<compile_context>
chip_gen: v5e
topology: v5e:2x2
jax: 0.10.0
libtpu: 0.0.40
codegen_flags: <defaults>
</compile_context>

<pallas_src>
import functools

import jax
import jax.numpy as jnp
from jax.experimental import pallas as pl
from jax.experimental.pallas import tpu as pltpu

HIDDEN = 128
FEAT = 16


def _sigmoid(x):
    # EUP-only sigmoid: 0.5*(tanh(0.5x)+1) avoids jax.nn.sigmoid's VALU divide.
    return 0.5 * jnp.tanh(0.5 * x) + 0.5


def lstm_kernel(
    x_ref,                        # (T*Bp, D)  time-major, flattened, batch-padded
    wih0_ref, whh0_ref, b0_ref,   # layer 0: (D,4H), (H,4H), (1,4H)  [i,f,o,g order]
    wih1_ref, whh1_ref, b1_ref,   # layer 1: (H,4H), (H,4H), (1,4H)  [i,f,o,g order]
    w1_ref, bl1_ref,              # linear1: (H,16), (1,16)
    whead_ref, bhead_ref,         # fused linear2|classify: (16,3), (1,3)
    head_ref,                     # output: (Bp, 3)  = [val | logits]
    xg0_ref,                      # VMEM scratch: (T*Bp, 4H)
    *, seq_len, batch,
):
    H = whh0_ref.shape[0]
    B = batch                     # padded batch (multiple of 8)
    T = seq_len

    # Hoisted layer-0 input projection (one wide MXU push instead of T thin
    # ones), layer-0 bias folded in; parked in VMEM scratch, read per step.
    xg0_ref[...] = (
        jnp.dot(x_ref[...], wih0_ref[...], preferred_element_type=jnp.float32)
        + b0_ref[...]
    )

    # Layer-1 bias broadcast hoisted once (4 vregs live; cheaper than a fresh
    # broadcast_in_dim every unrolled step).
    b1b = jnp.broadcast_to(b1_ref[...], (B, 4 * H))

    def gates_to_hc(gates, c):
        # Gate column order (i, f, o, g): one sigmoid over the first 3H lanes.
        sig = _sigmoid(gates[:, 0:3 * H])
        i = sig[:, 0 * H:1 * H]
        f = sig[:, 1 * H:2 * H]
        o = sig[:, 2 * H:3 * H]
        g = jnp.tanh(gates[:, 3 * H:4 * H])
        c_new = f * c + i * g
        h_new = o * jnp.tanh(c_new)
        return h_new, c_new

    h0 = jnp.zeros((B, H), jnp.float32)
    c0 = jnp.zeros((B, H), jnp.float32)
    h1 = jnp.zeros((B, H), jnp.float32)
    c1 = jnp.zeros((B, H), jnp.float32)

    # Fully unrolled recurrence (T is small/static); state lives in vregs,
    # recurrent weights are read from their VMEM refs at each use so they are
    # never held live across the loop.
    for t in range(T):
        xg0_t = xg0_ref[t * B:(t + 1) * B, :]              # 8-row aligned slice
        g0 = xg0_t + jnp.dot(h0, whh0_ref[...],
                             preferred_element_type=jnp.float32)
        h0, c0 = gates_to_hc(g0, c0)

        # Split layer-1 matmul: the h1-term is independent of this step's h0.
        g1 = (
            jnp.dot(h0, wih1_ref[...], preferred_element_type=jnp.float32)
            + jnp.dot(h1, whh1_ref[...], preferred_element_type=jnp.float32)
            + b1b
        )
        h1, c1 = gates_to_hc(g1, c1)

    # Head: last hidden of top layer -> linear1 -> fused (linear2 | classify).
    feat = jnp.dot(h1, w1_ref[...],
                   preferred_element_type=jnp.float32) + bl1_ref[...]     # (B,16)
    head_ref[...] = jnp.dot(feat, whead_ref[...],
                            preferred_element_type=jnp.float32) + bhead_ref[...]


def _reorder_gates(w):
    """Permute the 4H gate axis from PyTorch (i,f,g,o) to kernel (i,f,o,g)."""
    H = HIDDEN
    return jnp.concatenate(
        [w[..., 0:2 * H], w[..., 3 * H:4 * H], w[..., 2 * H:3 * H]], axis=-1)


@jax.jit
def lstm_forward(x, params):
    """x: (B, T, D) batch-first, float32. Returns (predict_val (B,1), predict_classify (B,2))."""
    B, T, D = x.shape
    H = HIDDEN
    Bp = ((B + 7) // 8) * 8            # pad batch to the f32 sublane granule

    # Zero-pad batch, go time-major, flatten so per-step gate slices are
    # contiguous, 8-row-aligned sublane blocks.
    x_p = jnp.zeros((Bp, T, D), x.dtype).at[:B].set(x)
    x_tm = jnp.transpose(x_p, (1, 0, 2)).reshape(T * Bp, D)

    # Offline weight prep (XLA, outside the kernel): gate-column reorder and
    # fused head weights.
    wih0 = _reorder_gates(params["wih0"])
    whh0 = _reorder_gates(params["whh0"])
    b0 = _reorder_gates(params["b0"])
    wih1 = _reorder_gates(params["wih1"])
    whh1 = _reorder_gates(params["whh1"])
    b1 = _reorder_gates(params["b1"])
    whead = jnp.concatenate([params["w2"], params["wc"]], axis=1)      # (16, 3)
    bhead = jnp.concatenate([params["bl2"], params["bc"]], axis=1)     # (1, 3)

    inputs = (
        x_tm,
        wih0, whh0, b0,
        wih1, whh1, b1,
        params["w1"], params["bl1"],
        whead, bhead,
    )

    vmem = pl.BlockSpec(memory_space=pltpu.MemorySpace.VMEM)
    head = pl.pallas_call(
        functools.partial(lstm_kernel, seq_len=T, batch=Bp),
        out_shape=jax.ShapeDtypeStruct((Bp, 3), jnp.float32),
        in_specs=[vmem] * len(inputs),
        out_specs=vmem,
        scratch_shapes=[pltpu.VMEM((T * Bp, 4 * H), jnp.float32)],
    )(*inputs)

    # Padded rows carry garbage h/c (biases make them nonzero): slice them off
    # and never reduce over them.
    head = head[:B]
    predict_val = head[:, 0:1]
    predict_classify = jax.nn.softmax(head[:, 1:3], axis=1)
    return predict_val, predict_classify


def init_params(key, dimension):
    """Deterministic parameter init mirroring the shapes of the PyTorch module.

    nn.LSTM stores weight_ih_l* as (4H, in); we keep them transposed (in, 4H)
    so the in-kernel matmul is x @ W. Gate order here is PyTorch's (i, f, g, o);
    the wrapper permutes columns to the kernel's (i, f, o, g) layout.
    bias_ih + bias_hh are pre-summed into a single (1, 4H) bias per layer.
    """
    H = HIDDEN
    stdv = 1.0 / jnp.sqrt(H)
    ks = jax.random.split(key, 16)
    u = lambda k, shape, s: jax.random.uniform(k, shape, jnp.float32, -s, s)

    params = {
        # LSTM layer 0
        "wih0": u(ks[0], (dimension, 4 * H), stdv),
        "whh0": u(ks[1], (H, 4 * H), stdv),
        "b0": u(ks[2], (1, 4 * H), stdv) + u(ks[3], (1, 4 * H), stdv),
        # LSTM layer 1
        "wih1": u(ks[4], (H, 4 * H), stdv),
        "whh1": u(ks[5], (H, 4 * H), stdv),
        "b1": u(ks[6], (1, 4 * H), stdv) + u(ks[7], (1, 4 * H), stdv),
        # linear1: 128 -> 16
        "w1": u(ks[8], (H, FEAT), 1.0 / jnp.sqrt(H)),
        "bl1": u(ks[9], (1, FEAT), 1.0 / jnp.sqrt(H)),
        # linear2: 16 -> 1
        "w2": u(ks[10], (FEAT, 1), 1.0 / jnp.sqrt(FEAT)),
        "bl2": u(ks[11], (1, 1), 1.0 / jnp.sqrt(FEAT)),
        # linear_classify: 16 -> 2
        "wc": u(ks[12], (FEAT, 2), 1.0 / jnp.sqrt(FEAT)),
        "bc": u(ks[13], (1, 2), 1.0 / jnp.sqrt(FEAT)),
    }
    return params


def _reference(x, p):
    """Pure-JAX reference of the same forward pass (PyTorch gate order)."""
    B, T, D = x.shape
    H = HIDDEN

    def cell(x_t, h, c, wih, whh, b):
        g = x_t @ wih + h @ whh + b
        i = jax.nn.sigmoid(g[:, :H])
        f = jax.nn.sigmoid(g[:, H:2 * H])
        gg = jnp.tanh(g[:, 2 * H:3 * H])
        o = jax.nn.sigmoid(g[:, 3 * H:])
        c = f * c + i * gg
        return o * jnp.tanh(c), c

    h0 = c0 = h1 = c1 = jnp.zeros((B, H), jnp.float32)
    for t in range(T):
        h0, c0 = cell(x[:, t, :], h0, c0, p["wih0"], p["whh0"], p["b0"])
        h1, c1 = cell(h0, h1, c1, p["wih1"], p["whh1"], p["b1"])
    feat = h1 @ p["w1"] + p["bl1"]
    val = feat @ p["w2"] + p["bl2"]
    logits = feat @ p["wc"] + p["bc"]
    return val, jax.nn.softmax(logits, axis=1)


if __name__ == "__main__":
    key = jax.random.PRNGKey(0)
    k_x, k_p = jax.random.split(key)

    B, T, D = 2, 8, 32  # batch=2, seq=8, input dimension=32
    x = jax.random.normal(k_x, (B, T, D), jnp.float32)
    params = init_params(k_p, D)

    predict_val, predict_classify = lstm_forward(x, params)
    jax.block_until_ready((predict_val, predict_classify))

    ref_val, ref_cls = _reference(x, params)
    assert predict_val.shape == (B, 1) and predict_classify.shape == (B, 2)
    assert jnp.allclose(predict_val, ref_val, atol=1e-4, rtol=1e-4)
    assert jnp.allclose(predict_classify, ref_cls, atol=1e-4, rtol=1e-4)

    print("KERNEL_OK")
</pallas_src>

<mosaic_0001>
module attributes {stable_mosaic.version = 11 : i64} {
  func.func @lstm_kernel(%arg0: memref<64x32xf32, #tpu.memory_space<vmem>>, %arg1: memref<32x512xf32, #tpu.memory_space<vmem>>, %arg2: memref<128x512xf32, #tpu.memory_space<vmem>>, %arg3: memref<1x512xf32, #tpu.memory_space<vmem>>, %arg4: memref<128x512xf32, #tpu.memory_space<vmem>>, %arg5: memref<128x512xf32, #tpu.memory_space<vmem>>, %arg6: memref<1x512xf32, #tpu.memory_space<vmem>>, %arg7: memref<128x16xf32, #tpu.memory_space<vmem>>, %arg8: memref<1x16xf32, #tpu.memory_space<vmem>>, %arg9: memref<16x3xf32, #tpu.memory_space<vmem>>, %arg10: memref<1x3xf32, #tpu.memory_space<vmem>>, %arg11: memref<8x3xf32, #tpu.memory_space<vmem>>, %arg12: memref<64x512xf32, #tpu.memory_space<vmem>>) attributes {dimension_semantics = [], scalar_prefetch = 0 : i64, scratch_operands = 1 : i64, tpu.core_type = #tpu.core_type<tc>} {
    %c0 = arith.constant 0 : index
    %c0_0 = arith.constant 0 : index
    %0 = vector.load %arg0[%c0, %c0_0] : memref<64x32xf32, #tpu.memory_space<vmem>>, vector<64x32xf32>
    %c0_1 = arith.constant 0 : index
    %c0_2 = arith.constant 0 : index
    %1 = vector.load %arg1[%c0_1, %c0_2] : memref<32x512xf32, #tpu.memory_space<vmem>>, vector<32x512xf32>
    %cst = arith.constant dense<0.000000e+00> : vector<64x512xf32>
    %2 = tpu.matmul %0, %1, %cst {dimension_numbers = #tpu.dot_dimension_numbers<[1], [0], [0], [1], [0, 0, 1, 1], [], []>} : vector<64x32xf32>, vector<32x512xf32>, vector<64x512xf32> -> vector<64x512xf32>
    %c0_3 = arith.constant 0 : index
    %c0_4 = arith.constant 0 : index
    %3 = vector.load %arg3[%c0_3, %c0_4] : memref<1x512xf32, #tpu.memory_space<vmem>>, vector<1x512xf32>
    %4 = vector.broadcast %3 : vector<1x512xf32> to vector<64x512xf32>
    %5 = arith.addf %2, %4 : vector<64x512xf32>
    %c0_5 = arith.constant 0 : index
    %c0_6 = arith.constant 0 : index
    %6 = vector.load %arg12[%c0_5, %c0_6] : memref<64x512xf32, #tpu.memory_space<vmem>>, vector<64x512xf32>
    tpu.vector_store %arg12[%c0_5, %c0_6], %5 {strides = array<i32>} : memref<64x512xf32, #tpu.memory_space<vmem>>, vector<64x512xf32>,
    %c0_7 = arith.constant 0 : index
    %c0_8 = arith.constant 0 : index
    %7 = vector.load %arg6[%c0_7, %c0_8] : memref<1x512xf32, #tpu.memory_space<vmem>>, vector<1x512xf32>
    %8 = vector.shape_cast %7 : vector<1x512xf32> to vector<1x512xf32>
    %9 = vector.broadcast %8 : vector<1x512xf32> to vector<8x512xf32>
    %cst_9 = arith.constant 0.000000e+00 : f32
    %10 = vector.broadcast %cst_9 : f32 to vector<8x128xf32>
    %cst_10 = arith.constant 0.000000e+00 : f32
    %11 = vector.broadcast %cst_10 : f32 to vector<8x128xf32>
    %cst_11 = arith.constant 0.000000e+00 : f32
    %12 = vector.broadcast %cst_11 : f32 to vector<8x128xf32>
    %cst_12 = arith.constant 0.000000e+00 : f32
    %13 = vector.broadcast %cst_12 : f32 to vector<8x128xf32>
    %c0_13 = arith.constant 0 : index
    %c0_14 = arith.constant 0 : index
    %14 = vector.load %arg12[%c0_13, %c0_14] : memref<64x512xf32, #tpu.memory_space<vmem>>, vector<8x512xf32>
    %c0_15 = arith.constant 0 : index
    %c0_16 = arith.constant 0 : index
    %15 = vector.load %arg2[%c0_15, %c0_16] : memref<128x512xf32, #tpu.memory_space<vmem>>, vector<128x512xf32>
    %cst_17 = arith.constant dense<0.000000e+00> : vector<8x512xf32>
    %16 = tpu.matmul %10, %15, %cst_17 {dimension_numbers = #tpu.dot_dimension_numbers<[1], [0], [0], [1], [0, 0, 1, 1], [], []>} : vector<8x128xf32>, vector<128x512xf32>, vector<8x512xf32> -> vector<8x512xf32>
    %17 = arith.addf %14, %16 : vector<8x512xf32>
    %18 = vector.extract_strided_slice %17 {offsets = [0, 0], sizes = [8, 384], strides = [1, 1]} : vector<8x512xf32> to vector<8x384xf32>
    %cst_18 = arith.constant 5.000000e-01 : f32
    %19 = vector.broadcast %cst_18 : f32 to vector<8x384xf32>
    %20 = arith.mulf %19, %18 : vector<8x384xf32>
    %21 = math.tanh %20 : vector<8x384xf32>
    %cst_19 = arith.constant 5.000000e-01 : f32
    %22 = vector.broadcast %cst_19 : f32 to vector<8x384xf32>
    %23 = arith.mulf %22, %21 : vector<8x384xf32>
    %cst_20 = arith.constant 5.000000e-01 : f32
    %24 = vector.broadcast %cst_20 : f32 to vector<8x384xf32>
    %25 = arith.addf %23, %24 : vector<8x384xf32>
    %26 = vector.extract_strided_slice %25 {offsets = [0, 0], sizes = [8, 128], strides = [1, 1]} : vector<8x384xf32> to vector<8x128xf32>
    %27 = vector.extract_strided_slice %25 {offsets = [0, 128], sizes = [8, 128], strides = [1, 1]} : vector<8x384xf32> to vector<8x128xf32>
    %28 = vector.extract_strided_slice %25 {offsets = [0, 256], sizes = [8, 128], strides = [1, 1]} : vector<8x384xf32> to vector<8x128xf32>
    %29 = vector.extract_strided_slice %17 {offsets = [0, 384], sizes = [8, 128], strides = [1, 1]} : vector<8x512xf32> to vector<8x128xf32>
    %30 = math.tanh %29 : vector<8x128xf32>
    %31 = arith.mulf %27, %11 : vector<8x128xf32>
    %32 = arith.mulf %26, %30 : vector<8x128xf32>
    %33 = arith.addf %31, %32 : vector<8x128xf32>
    %34 = math.tanh %33 : vector<8x128xf32>
    %35 = arith.mulf %28, %34 : vector<8x128xf32>
    %c0_21 = arith.constant 0 : index
    %c0_22 = arith.constant 0 : index
    %36 = vector.load %arg4[%c0_21, %c0_22] : memref<128x512xf32, #tpu.memory_space<vmem>>, vector<128x512xf32>
    %cst_23 = arith.constant dense<0.000000e+00> : vector<8x512xf32>
    %37 = tpu.matmul %35, %36, %cst_23 {dimension_numbers = #tpu.dot_dimension_numbers<[1], [0], [0], [1], [0, 0, 1, 1], [], []>} : vector<8x128xf32>, vector<128x512xf32>, vector<8x512xf32> -> vector<8x512xf32>
    %c0_24 = arith.constant 0 : index
    %c0_25 = arith.constant 0 : index
    %38 = vector.load %arg5[%c0_24, %c0_25] : memref<128x512xf32, #tpu.memory_space<vmem>>, vector<128x512xf32>
    %cst_26 = arith.constant dense<0.000000e+00> : vector<8x512xf32>
    %39 = tpu.matmul %12, %38, %cst_26 {dimension_numbers = #tpu.dot_dimension_numbers<[1], [0], [0], [1], [0, 0, 1, 1], [], []>} : vector<8x128xf32>, vector<128x512xf32>, vector<8x512xf32> -> vector<8x512xf32>
    %40 = arith.addf %37, %39 : vector<8x512xf32>
    %41 = arith.addf %40, %9 : vector<8x512xf32>
    %42 = vector.extract_strided_slice %41 {offsets = [0, 0], sizes = [8, 384], strides = [1, 1]} : vector<8x512xf32> to vector<8x384xf32>
    %cst_27 = arith.constant 5.000000e-01 : f32
    %43 = vector.broadcast %cst_27 : f32 to vector<8x384xf32>
    %44 = arith.mulf %43, %42 : vector<8x384xf32>
    %45 = math.tanh %44 : vector<8x384xf32>
    %cst_28 = arith.constant 5.000000e-01 : f32
    %46 = vector.broadcast %cst_28 : f32 to vector<8x384xf32>
    %47 = arith.mulf %46, %45 : vector<8x384xf32>
    %cst_29 = arith.constant 5.000000e-01 : f32
    %48 = vector.broadcast %cst_29 : f32 to vector<8x384xf32>
    %49 = arith.addf %47, %48 : vector<8x384xf32>
    %50 = vector.extract_strided_slice %49 {offsets = [0, 0], sizes = [8, 128], strides = [1, 1]} : vector<8x384xf32> to vector<8x128xf32>
    %51 = vector.extract_strided_slice %49 {offsets = [0, 128], sizes = [8, 128], strides = [1, 1]} : vector<8x384xf32> to vector<8x128xf32>
    %52 = vector.extract_strided_slice %49 {offsets = [0, 256], sizes = [8, 128], strides = [1, 1]} : vector<8x384xf32> to vector<8x128xf32>
    %53 = vector.extract_strided_slice %41 {offsets = [0, 384], sizes = [8, 128], strides = [1, 1]} : vector<8x512xf32> to vector<8x128xf32>
    %54 = math.tanh %53 : vector<8x128xf32>
    %55 = arith.mulf %51, %13 : vector<8x128xf32>
    %56 = arith.mulf %50, %54 : vector<8x128xf32>
    %57 = arith.addf %55, %56 : vector<8x128xf32>
    %58 = math.tanh %57 : vector<8x128xf32>
    %59 = arith.mulf %52, %58 : vector<8x128xf32>
    %c8 = arith.constant 8 : index
    %c0_30 = arith.constant 0 : index
    %60 = vector.load %arg12[%c8, %c0_30] : memref<64x512xf32, #tpu.memory_space<vmem>>, vector<8x512xf32>
    %c0_31 = arith.constant 0 : index
    %c0_32 = arith.constant 0 : index
    %61 = vector.load %arg2[%c0_31, %c0_32] : memref<128x512xf32, #tpu.memory_space<vmem>>, vector<128x512xf32>
    %cst_33 = arith.constant dense<0.000000e+00> : vector<8x512xf32>
    %62 = tpu.matmul %35, %61, %cst_33 {dimension_numbers = #tpu.dot_dimension_numbers<[1], [0], [0], [1], [0, 0, 1, 1], [], []>} : vector<8x128xf32>, vector<128x512xf32>, vector<8x512xf32> -> vector<8x512xf32>
    %63 = arith.addf %60, %62 : vector<8x512xf32>
    %64 = vector.extract_strided_slice %63 {offsets = [0, 0], sizes = [8, 384], strides = [1, 1]} : vector<8x512xf32> to vector<8x384xf32>
    %cst_34 = arith.constant 5.000000e-01 : f32
    %65 = vector.broadcast %cst_34 : f32 to vector<8x384xf32>
    %66 = arith.mulf %65, %64 : vector<8x384xf32>
    %67 = math.tanh %66 : vector<8x384xf32>
    %cst_35 = arith.constant 5.000000e-01 : f32
    %68 = vector.broadcast %cst_35 : f32 to vector<8x384xf32>
    %69 = arith.mulf %68, %67 : vector<8x384xf32>
    %cst_36 = arith.constant 5.000000e-01 : f32
    %70 = vector.broadcast %cst_36 : f32 to vector<8x384xf32>
    %71 = arith.addf %69, %70 : vector<8x384xf32>
    %72 = vector.extract_strided_slice %71 {offsets = [0, 0], sizes = [8, 128], strides = [1, 1]} : vector<8x384xf32> to vector<8x128xf32>
    %73 = vector.extract_strided_slice %71 {offsets = [0, 128], sizes = [8, 128], strides = [1, 1]} : vector<8x384xf32> to vector<8x128xf32>
    %74 = vector.extract_strided_slice %71 {offsets = [0, 256], sizes = [8, 128], strides = [1, 1]} : vector<8x384xf32> to vector<8x128xf32>
    %75 = vector.extract_strided_slice %63 {offsets = [0, 384], sizes = [8, 128], strides = [1, 1]} : vector<8x512xf32> to vector<8x128xf32>
    %76 = math.tanh %75 : vector<8x128xf32>
    %77 = arith.mulf %73, %33 : vector<8x128xf32>
    %78 = arith.mulf %72, %76 : vector<8x128xf32>
    %79 = arith.addf %77, %78 : vector<8x128xf32>
    %80 = math.tanh %79 : vector<8x128xf32>
    %81 = arith.mulf %74, %80 : vector<8x128xf32>
    %c0_37 = arith.constant 0 : index
    %c0_38 = arith.constant 0 : index
    %82 = vector.load %arg4[%c0_37, %c0_38] : memref<128x512xf32, #tpu.memory_space<vmem>>, vector<128x512xf32>
    %cst_39 = arith.constant dense<0.000000e+00> : vector<8x512xf32>
    %83 = tpu.matmul %81, %82, %cst_39 {dimension_numbers = #tpu.dot_dimension_numbers<[1], [0], [0], [1], [0, 0, 1, 1], [], []>} : vector<8x128xf32>, vector<128x512xf32>, vector<8x512xf32> -> vector<8x512xf32>
    %c0_40 = arith.constant 0 : index
    %c0_41 = arith.constant 0 : index
    %84 = vector.load %arg5[%c0_40, %c0_41] : memref<128x512xf32, #tpu.memory_space<vmem>>, vector<128x512xf32>
    %cst_42 = arith.constant dense<0.000000e+00> : vector<8x512xf32>
    %85 = tpu.matmul %59, %84, %cst_42 {dimension_numbers = #tpu.dot_dimension_numbers<[1], [0], [0], [1], [0, 0, 1, 1], [], []>} : vector<8x128xf32>, vector<128x512xf32>, vector<8x512xf32> -> vector<8x512xf32>
    %86 = arith.addf %83, %85 : vector<8x512xf32>
    %87 = arith.addf %86, %9 : vector<8x512xf32>
    %88 = vector.extract_strided_slice %87 {offsets = [0, 0], sizes = [8, 384], strides = [1, 1]} : vector<8x512xf32> to vector<8x384xf32>
    %cst_43 = arith.constant 5.000000e-01 : f32
    %89 = vector.broadcast %cst_43 : f32 to vector<8x384xf32>
    %90 = arith.mulf %89, %88 : vector<8x384xf32>
    %91 = math.tanh %90 : vector<8x384xf32>
    %cst_44 = arith.constant 5.000000e-01 : f32
    %92 = vector.broadcast %cst_44 : f32 to vector<8x384xf32>
    %93 = arith.mulf %92, %91 : vector<8x384xf32>
    %cst_45 = arith.constant 5.000000e-01 : f32
    %94 = vector.broadcast %cst_45 : f32 to vector<8x384xf32>
    %95 = arith.addf %93, %94 : vector<8x384xf32>
    %96 = vector.extract_strided_slice %95 {offsets = [0, 0], sizes = [8, 128], strides = [1, 1]} : vector<8x384xf32> to vector<8x128xf32>
    %97 = vector.extract_strided_slice %95 {offsets = [0, 128], sizes = [8, 128], strides = [1, 1]} : vector<8x384xf32> to vector<8x128xf32>
    %98 = vector.extract_strided_slice %95 {offsets = [0, 256], sizes = [8, 128], strides = [1, 1]} : vector<8x384xf32> to vector<8x128xf32>
    %99 = vector.extract_strided_slice %87 {offsets = [0, 384], sizes = [8, 128], strides = [1, 1]} : vector<8x512xf32> to vector<8x128xf32>
    %100 = math.tanh %99 : vector<8x128xf32>
    %101 = arith.mulf %97, %57 : vector<8x128xf32>
    %102 = arith.mulf %96, %100 : vector<8x128xf32>
    %103 = arith.addf %101, %102 : vector<8x128xf32>
    %104 = math.tanh %103 : vector<8x128xf32>
    %105 = arith.mulf %98, %104 : vector<8x128xf32>
    %c16 = arith.constant 16 : index
    %c0_46 = arith.constant 0 : index
    %106 = vector.load %arg12[%c16, %c0_46] : memref<64x512xf32, #tpu.memory_space<vmem>>, vector<8x512xf32>
    %c0_47 = arith.constant 0 : index
    %c0_48 = arith.constant 0 : index
    %107 = vector.load %arg2[%c0_47, %c0_48] : memref<128x512xf32, #tpu.memory_space<vmem>>, vector<128x512xf32>
    %cst_49 = arith.constant dense<0.000000e+00> : vector<8x512xf32>
    %108 = tpu.matmul %81, %107, %cst_49 {dimension_numbers = #tpu.dot_dimension_numbers<[1], [0], [0], [1], [0, 0, 1, 1], [], []>} : vector<8x128xf32>, vector<128x512xf32>, vector<8x512xf32> -> vector<8x512xf32>
    %109 = arith.addf %106, %108 : vector<8x512xf32>
    %110 = vector.extract_strided_slice %109 {offsets = [0, 0], sizes = [8, 384], strides = [1, 1]} : vector<8x512xf32> to vector<8x384xf32>
    %cst_50 = arith.constant 5.000000e-01 : f32
    %111 = vector.broadcast %cst_50 : f32 to vector<8x384xf32>
    %112 = arith.mulf %111, %110 : vector<8x384xf32>
    %113 = math.tanh %112 : vector<8x384xf32>
    %cst_51 = arith.constant 5.000000e-01 : f32
    %114 = vector.broadcast %cst_51 : f32 to vector<8x384xf32>
    %115 = arith.mulf %114, %113 : vector<8x384xf32>
    %cst_52 = arith.constant 5.000000e-01 : f32
    %116 = vector.broadcast %cst_52 : f32 to vector<8x384xf32>
    %117 = arith.addf %115, %116 : vector<8x384xf32>
    %118 = vector.extract_strided_slice %117 {offsets = [0, 0], sizes = [8, 128], strides = [1, 1]} : vector<8x384xf32> to vector<8x128xf32>
    %119 = vector.extract_strided_slice %117 {offsets = [0, 128], sizes = [8, 128], strides = [1, 1]} : vector<8x384xf32> to vector<8x128xf32>
    %120 = vector.extract_strided_slice %117 {offsets = [0, 256], sizes = [8, 128], strides = [1, 1]} : vector<8x384xf32> to vector<8x128xf32>
    %121 = vector.extract_strided_slice %109 {offsets = [0, 384], sizes = [8, 128], strides = [1, 1]} : vector<8x512xf32> to vector<8x128xf32>
    %122 = math.tanh %121 : vector<8x128xf32>
    %123 = arith.mulf %119, %79 : vector<8x128xf32>
    %124 = arith.mulf %118, %122 : vector<8x128xf32>
    %125 = arith.addf %123, %124 : vector<8x128xf32>
    %126 = math.tanh %125 : vector<8x128xf32>
    %127 = arith.mulf %120, %126 : vector<8x128xf32>
    %c0_53 = arith.constant 0 : index
    %c0_54 = arith.constant 0 : index
    %128 = vector.load %arg4[%c0_53, %c0_54] : memref<128x512xf32, #tpu.memory_space<vmem>>, vector<128x512xf32>
    %cst_55 = arith.constant dense<0.000000e+00> : vector<8x512xf32>
    %129 = tpu.matmul %127, %128, %cst_55 {dimension_numbers = #tpu.dot_dimension_numbers<[1], [0], [0], [1], [0, 0, 1, 1], [], []>} : vector<8x128xf32>, vector<128x512xf32>, vector<8x512xf32> -> vector<8x512xf32>
    %c0_56 = arith.constant 0 : index
    %c0_57 = arith.constant 0 : index
    %130 = vector.load %arg5[%c0_56, %c0_57] : memref<128x512xf32, #tpu.memory_space<vmem>>, vector<128x512xf32>
    %cst_58 = arith.constant dense<0.000000e+00> : vector<8x512xf32>
    %131 = tpu.matmul %105, %130, %cst_58 {dimension_numbers = #tpu.dot_dimension_numbers<[1], [0], [0], [1], [0, 0, 1, 1], [], []>} : vector<8x128xf32>, vector<128x512xf32>, vector<8x512xf32> -> vector<8x512xf32>
    %132 = arith.addf %129, %131 : vector<8x512xf32>
    %133 = arith.addf %132, %9 : vector<8x512xf32>
    %134 = vector.extract_strided_slice %133 {offsets = [0, 0], sizes = [8, 384], strides = [1, 1]} : vector<8x512xf32> to vector<8x384xf32>
    %cst_59 = arith.constant 5.000000e-01 : f32
    %135 = vector.broadcast %cst_59 : f32 to vector<8x384xf32>
    %136 = arith.mulf %135, %134 : vector<8x384xf32>
    %137 = math.tanh %136 : vector<8x384xf32>
    %cst_60 = arith.constant 5.000000e-01 : f32
    %138 = vector.broadcast %cst_60 : f32 to vector<8x384xf32>
    %139 = arith.mulf %138, %137 : vector<8x384xf32>
    %cst_61 = arith.constant 5.000000e-01 : f32
    %140 = vector.broadcast %cst_61 : f32 to vector<8x384xf32>
    %141 = arith.addf %139, %140 : vector<8x384xf32>
    %142 = vector.extract_strided_slice %141 {offsets = [0, 0], sizes = [8, 128], strides = [1, 1]} : vector<8x384xf32> to vector<8x128xf32>
    %143 = vector.extract_strided_slice %141 {offsets = [0, 128], sizes = [8, 128], strides = [1, 1]} : vector<8x384xf32> to vector<8x128xf32>
    %144 = vector.extract_strided_slice %141 {offsets = [0, 256], sizes = [8, 128], strides = [1, 1]} : vector<8x384xf32> to vector<8x128xf32>
    %145 = vector.extract_strided_slice %133 {offsets = [0, 384], sizes = [8, 128], strides = [1, 1]} : vector<8x512xf32> to vector<8x128xf32>
    %146 = math.tanh %145 : vector<8x128xf32>
    %147 = arith.mulf %143, %103 : vector<8x128xf32>
    %148 = arith.mulf %142, %146 : vector<8x128xf32>
    %149 = arith.addf %147, %148 : vector<8x128xf32>
    %150 = math.tanh %149 : vector<8x128xf32>
    %151 = arith.mulf %144, %150 : vector<8x128xf32>
    %c24 = arith.constant 24 : index
    %c0_62 = arith.constant 0 : index
    %152 = vector.load %arg12[%c24, %c0_62] : memref<64x512xf32, #tpu.memory_space<vmem>>, vector<8x512xf32>
    %c0_63 = arith.constant 0 : index
    %c0_64 = arith.constant 0 : index
    %153 = vector.load %arg2[%c0_63, %c0_64] : memref<128x512xf32, #tpu.memory_space<vmem>>, vector<128x512xf32>
    %cst_65 = arith.constant dense<0.000000e+00> : vector<8x512xf32>
    %154 = tpu.matmul %127, %153, %cst_65 {dimension_numbers = #tpu.dot_dimension_numbers<[1], [0], [0], [1], [0, 0, 1, 1], [], []>} : vector<8x128xf32>, vector<128x512xf32>, vector<8x512xf32> -> vector<8x512xf32>
    %155 = arith.addf %152, %154 : vector<8x512xf32>
    %156 = vector.extract_strided_slice %155 {offsets = [0, 0], sizes = [8, 384], strides = [1, 1]} : vector<8x512xf32> to vector<8x384xf32>
    %cst_66 = arith.constant 5.000000e-01 : f32
    %157 = vector.broadcast %cst_66 : f32 to vector<8x384xf32>
    %158 = arith.mulf %157, %156 : vector<8x384xf32>
    %159 = math.tanh %158 : vector<8x384xf32>
    %cst_67 = arith.constant 5.000000e-01 : f32
    %160 = vector.broadcast %cst_67 : f32 to vector<8x384xf32>
    %161 = arith.mulf %160, %159 : vector<8x384xf32>
    %cst_68 = arith.constant 5.000000e-01 : f32
    %162 = vector.broadcast %cst_68 : f32 to vector<8x384xf32>
    %163 = arith.addf %161, %162 : vector<8x384xf32>
    %164 = vector.extract_strided_slice %163 {offsets = [0, 0], sizes = [8, 128], strides = [1, 1]} : vector<8x384xf32> to vector<8x128xf32>
    %165 = vector.extract_strided_slice %163 {offsets = [0, 128], sizes = [8, 128], strides = [1, 1]} : vector<8x384xf32> to vector<8x128xf32>
    %166 = vector.extract_strided_slice %163 {offsets = [0, 256], sizes = [8, 128], strides = [1, 1]} : vector<8x384xf32> to vector<8x128xf32>
    %167 = vector.extract_strided_slice %155 {offsets = [0, 384], sizes = [8, 128], strides = [1, 1]} : vector<8x512xf32> to vector<8x128xf32>
    %168 = math.tanh %167 : vector<8x128xf32>
    %169 = arith.mulf %165, %125 : vector<8x128xf32>
    %170 = arith.mulf %164, %168 : vector<8x128xf32>
    %171 = arith.addf %169, %170 : vector<8x128xf32>
    %172 = math.tanh %171 : vector<8x128xf32>
    %173 = arith.mulf %166, %172 : vector<8x128xf32>
    %c0_69 = arith.constant 0 : index
    %c0_70 = arith.constant 0 : index
    %174 = vector.load %arg4[%c0_69, %c0_70] : memref<128x512xf32, #tpu.memory_space<vmem>>, vector<128x512xf32>
    %cst_71 = arith.constant dense<0.000000e+00> : vector<8x512xf32>
    %175 = tpu.matmul %173, %174, %cst_71 {dimension_numbers = #tpu.dot_dimension_numbers<[1], [0], [0], [1], [0, 0, 1, 1], [], []>} : vector<8x128xf32>, vector<128x512xf32>, vector<8x512xf32> -> vector<8x512xf32>
    %c0_72 = arith.constant 0 : index
    %c0_73 = arith.constant 0 : index
    %176 = vector.load %arg5[%c0_72, %c0_73] : memref<128x512xf32, #tpu.memory_space<vmem>>, vector<128x512xf32>
    %cst_74 = arith.constant dense<0.000000e+00> : vector<8x512xf32>
    %177 = tpu.matmul %151, %176, %cst_74 {dimension_numbers = #tpu.dot_dimension_numbers<[1], [0], [0], [1], [0, 0, 1, 1], [], []>} : vector<8x128xf32>, vector<128x512xf32>, vector<8x512xf32> -> vector<8x512xf32>
    %178 = arith.addf %175, %177 : vector<8x512xf32>
    %179 = arith.addf %178, %9 : vector<8x512xf32>
    %180 = vector.extract_strided_slice %179 {offsets = [0, 0], sizes = [8, 384], strides = [1, 1]} : vector<8x512xf32> to vector<8x384xf32>
    %cst_75 = arith.constant 5.000000e-01 : f32
    %181 = vector.broadcast %cst_75 : f32 to vector<8x384xf32>
    %182 = arith.mulf %181, %180 : vector<8x384xf32>
    %183 = math.tanh %182 : vector<8x384xf32>
    %cst_76 = arith.constant 5.000000e-01 : f32
    %184 = vector.broadcast %cst_76 : f32 to vector<8x384xf32>
    %185 = arith.mulf %184, %183 : vector<8x384xf32>
    %cst_77 = arith.constant 5.000000e-01 : f32
    %186 = vector.broadcast %cst_77 : f32 to vector<8x384xf32>
    %187 = arith.addf %185, %186 : vector<8x384xf32>
    %188 = vector.extract_strided_slice %187 {offsets = [0, 0], sizes = [8, 128], strides = [1, 1]} : vector<8x384xf32> to vector<8x128xf32>
    %189 = vector.extract_strided_slice %187 {offsets = [0, 128], sizes = [8, 128], strides = [1, 1]} : vector<8x384xf32> to vector<8x128xf32>
    %190 = vector.extract_strided_slice %187 {offsets = [0, 256], sizes = [8, 128], strides = [1, 1]} : vector<8x384xf32> to vector<8x128xf32>
    %191 = vector.extract_strided_slice %179 {offsets = [0, 384], sizes = [8, 128], strides = [1, 1]} : vector<8x512xf32> to vector<8x128xf32>
    %192 = math.tanh %191 : vector<8x128xf32>
    %193 = arith.mulf %189, %149 : vector<8x128xf32>
    %194 = arith.mulf %188, %192 : vector<8x128xf32>
    %195 = arith.addf %193, %194 : vector<8x128xf32>
    %196 = math.tanh %195 : vector<8x128xf32>
    %197 = arith.mulf %190, %196 : vector<8x128xf32>
    %c32 = arith.constant 32 : index
    %c0_78 = arith.constant 0 : index
    %198 = vector.load %arg12[%c32, %c0_78] : memref<64x512xf32, #tpu.memory_space<vmem>>, vector<8x512xf32>
    %c0_79 = arith.constant 0 : index
    %c0_80 = arith.constant 0 : index
    %199 = vector.load %arg2[%c0_79, %c0_80] : memref<128x512xf32, #tpu.memory_space<vmem>>, vector<128x512xf32>
    %cst_81 = arith.constant dense<0.000000e+00> : vector<8x512xf32>
    %200 = tpu.matmul %173, %199, %cst_81 {dimension_numbers = #tpu.dot_dimension_numbers<[1], [0], [0], [1], [0, 0, 1, 1], [], []>} : vector<8x128xf32>, vector<128x512xf32>, vector<8x512xf32> -> vector<8x512xf32>
    %201 = arith.addf %198, %200 : vector<8x512xf32>
    %202 = vector.extract_strided_slice %201 {offsets = [0, 0], sizes = [8, 384], strides = [1, 1]} : vector<8x512xf32> to vector<8x384xf32>
    %cst_82 = arith.constant 5.000000e-01 : f32
    %203 = vector.broadcast %cst_82 : f32 to vector<8x384xf32>
    %204 = arith.mulf %203, %202 : vector<8x384xf32>
    %205 = math.tanh %204 : vector<8x384xf32>
    %cst_83 = arith.constant 5.000000e-01 : f32
    %206 = vector.broadcast %cst_83 : f32 to vector<8x384xf32>
    %207 = arith.mulf %206, %205 : vector<8x384xf32>
    %cst_84 = arith.constant 5.000000e-01 : f32
    %208 = vector.broadcast %cst_84 : f32 to vector<8x384xf32>
    %209 = arith.addf %207, %208 : vector<8x384xf32>
    %210 = vector.extract_strided_slice %209 {offsets = [0, 0], sizes = [8, 128], strides = [1, 1]} : vector<8x384xf32> to vector<8x128xf32>
    %211 = vector.extract_strided_slice %209 {offsets = [0, 128], sizes = [8, 128], strides = [1, 1]} : vector<8x384xf32> to vector<8x128xf32>
    %212 = vector.extract_strided_slice %209 {offsets = [0, 256], sizes = [8, 128], strides = [1, 1]} : vector<8x384xf32> to vector<8x128xf32>
    %213 = vector.extract_strided_slice %201 {offsets = [0, 384], sizes = [8, 128], strides = [1, 1]} : vector<8x512xf32> to vector<8x128xf32>
    %214 = math.tanh %213 : vector<8x128xf32>
    %215 = arith.mulf %211, %171 : vector<8x128xf32>
    %216 = arith.mulf %210, %214 : vector<8x128xf32>
    %217 = arith.addf %215, %216 : vector<8x128xf32>
    %218 = math.tanh %217 : vector<8x128xf32>
    %219 = arith.mulf %212, %218 : vector<8x128xf32>
    %c0_85 = arith.constant 0 : index
    %c0_86 = arith.constant 0 : index
    %220 = vector.load %arg4[%c0_85, %c0_86] : memref<128x512xf32, #tpu.memory_space<vmem>>, vector<128x512xf32>
    %cst_87 = arith.constant dense<0.000000e+00> : vector<8x512xf32>
    %221 = tpu.matmul %219, %220, %cst_87 {dimension_numbers = #tpu.dot_dimension_numbers<[1], [0], [0], [1], [0, 0, 1, 1], [], []>} : vector<8x128xf32>, vector<128x512xf32>, vector<8x512xf32> -> vector<8x512xf32>
    %c0_88 = arith.constant 0 : index
    %c0_89 = arith.constant 0 : index
    %222 = vector.load %arg5[%c0_88, %c0_89] : memref<128x512xf32, #tpu.memory_space<vmem>>, vector<128x512xf32>
    %cst_90 = arith.constant dense<0.000000e+00> : vector<8x512xf32>
    %223 = tpu.matmul %197, %222, %cst_90 {dimension_numbers = #tpu.dot_dimension_numbers<[1], [0], [0], [1], [0, 0, 1, 1], [], []>} : vector<8x128xf32>, vector<128x512xf32>, vector<8x512xf32> -> vector<8x512xf32>
    %224 = arith.addf %221, %223 : vector<8x512xf32>
    %225 = arith.addf %224, %9 : vector<8x512xf32>
    %226 = vector.extract_strided_slice %225 {offsets = [0, 0], sizes = [8, 384], strides = [1, 1]} : vector<8x512xf32> to vector<8x384xf32>
    %cst_91 = arith.constant 5.000000e-01 : f32
    %227 = vector.broadcast %cst_91 : f32 to vector<8x384xf32>
    %228 = arith.mulf %227, %226 : vector<8x384xf32>
    %229 = math.tanh %228 : vector<8x384xf32>
    %cst_92 = arith.constant 5.000000e-01 : f32
    %230 = vector.broadcast %cst_92 : f32 to vector<8x384xf32>
    %231 = arith.mulf %230, %229 : vector<8x384xf32>
    %cst_93 = arith.constant 5.000000e-01 : f32
    %232 = vector.broadcast %cst_93 : f32 to vector<8x384xf32>
    %233 = arith.addf %231, %232 : vector<8x384xf32>
    %234 = vector.extract_strided_slice %233 {offsets = [0, 0], sizes = [8, 128], strides = [1, 1]} : vector<8x384xf32> to vector<8x128xf32>
    %235 = vector.extract_strided_slice %233 {offsets = [0, 128], sizes = [8, 128], strides = [1, 1]} : vector<8x384xf32> to vector<8x128xf32>
    %236 = vector.extract_strided_slice %233 {offsets = [0, 256], sizes = [8, 128], strides = [1, 1]} : vector<8x384xf32> to vector<8x128xf32>
    %237 = vector.extract_strided_slice %225 {offsets = [0, 384], sizes = [8, 128], strides = [1, 1]} : vector<8x512xf32> to vector<8x128xf32>
    %238 = math.tanh %237 : vector<8x128xf32>
    %239 = arith.mulf %235, %195 : vector<8x128xf32>
    %240 = arith.mulf %234, %238 : vector<8x128xf32>
    %241 = arith.addf %239, %240 : vector<8x128xf32>
    %242 = math.tanh %241 : vector<8x128xf32>
    %243 = arith.mulf %236, %242 : vector<8x128xf32>
    %c40 = arith.constant 40 : index
    %c0_94 = arith.constant 0 : index
    %244 = vector.load %arg12[%c40, %c0_94] : memref<64x512xf32, #tpu.memory_space<vmem>>, vector<8x512xf32>
    %c0_95 = arith.constant 0 : index
    %c0_96 = arith.constant 0 : index
    %245 = vector.load %arg2[%c0_95, %c0_96] : memref<128x512xf32, #tpu.memory_space<vmem>>, vector<128x512xf32>
    %cst_97 = arith.constant dense<0.000000e+00> : vector<8x512xf32>
    %246 = tpu.matmul %219, %245, %cst_97 {dimension_numbers = #tpu.dot_dimension_numbers<[1], [0], [0], [1], [0, 0, 1, 1], [], []>} : vector<8x128xf32>, vector<128x512xf32>, vector<8x512xf32> -> vector<8x512xf32>
    %247 = arith.addf %244, %246 : vector<8x512xf32>
    %248 = vector.extract_strided_slice %247 {offsets = [0, 0], sizes = [8, 384], strides = [1, 1]} : vector<8x512xf32> to vector<8x384xf32>
    %cst_98 = arith.constant 5.000000e-01 : f32
    %249 = vector.broadcast %cst_98 : f32 to vector<8x384xf32>
    %250 = arith.mulf %249, %248 : vector<8x384xf32>
    %251 = math.tanh %250 : vector<8x384xf32>
    %cst_99 = arith.constant 5.000000e-01 : f32
    %252 = vector.broadcast %cst_99 : f32 to vector<8x384xf32>
    %253 = arith.mulf %252, %251 : vector<8x384xf32>
    %cst_100 = arith.constant 5.000000e-01 : f32
    %254 = vector.broadcast %cst_100 : f32 to vector<8x384xf32>
    %255 = arith.addf %253, %254 : vector<8x384xf32>
    %256 = vector.extract_strided_slice %255 {offsets = [0, 0], sizes = [8, 128], strides = [1, 1]} : vector<8x384xf32> to vector<8x128xf32>
    %257 = vector.extract_strided_slice %255 {offsets = [0, 128], sizes = [8, 128], strides = [1, 1]} : vector<8x384xf32> to vector<8x128xf32>
    %258 = vector.extract_strided_slice %255 {offsets = [0, 256], sizes = [8, 128], strides = [1, 1]} : vector<8x384xf32> to vector<8x128xf32>
    %259 = vector.extract_strided_slice %247 {offsets = [0, 384], sizes = [8, 128], strides = [1, 1]} : vector<8x512xf32> to vector<8x128xf32>
    %260 = math.tanh %259 : vector<8x128xf32>
    %261 = arith.mulf %257, %217 : vector<8x128xf32>
    %262 = arith.mulf %256, %260 : vector<8x128xf32>
    %263 = arith.addf %261, %262 : vector<8x128xf32>
    %264 = math.tanh %263 : vector<8x128xf32>
    %265 = arith.mulf %258, %264 : vector<8x128xf32>
    %c0_101 = arith.constant 0 : index
    %c0_102 = arith.constant 0 : index
    %266 = vector.load %arg4[%c0_101, %c0_102] : memref<128x512xf32, #tpu.memory_space<vmem>>, vector<128x512xf32>
    %cst_103 = arith.constant dense<0.000000e+00> : vector<8x512xf32>
    %267 = tpu.matmul %265, %266, %cst_103 {dimension_numbers = #tpu.dot_dimension_numbers<[1], [0], [0], [1], [0, 0, 1, 1], [], []>} : vector<8x128xf32>, vector<128x512xf32>, vector<8x512xf32> -> vector<8x512xf32>
    %c0_104 = arith.constant 0 : index
    %c0_105 = arith.constant 0 : index
    %268 = vector.load %arg5[%c0_104, %c0_105] : memref<128x512xf32, #tpu.memory_space<vmem>>, vector<128x512xf32>
    %cst_106 = arith.constant dense<0.000000e+00> : vector<8x512xf32>
    %269 = tpu.matmul %243, %268, %cst_106 {dimension_numbers = #tpu.dot_dimension_numbers<[1], [0], [0], [1], [0, 0, 1, 1], [], []>} : vector<8x128xf32>, vector<128x512xf32>, vector<8x512xf32> -> vector<8x512xf32>
    %270 = arith.addf %267, %269 : vector<8x512xf32>
    %271 = arith.addf %270, %9 : vector<8x512xf32>
    %272 = vector.extract_strided_slice %271 {offsets = [0, 0], sizes = [8, 384], strides = [1, 1]} : vector<8x512xf32> to vector<8x384xf32>
    %cst_107 = arith.constant 5.000000e-01 : f32
    %273 = vector.broadcast %cst_107 : f32 to vector<8x384xf32>
    %274 = arith.mulf %273, %272 : vector<8x384xf32>
    %275 = math.tanh %274 : vector<8x384xf32>
    %cst_108 = arith.constant 5.000000e-01 : f32
    %276 = vector.broadcast %cst_108 : f32 to vector<8x384xf32>
    %277 = arith.mulf %276, %275 : vector<8x384xf32>
    %cst_109 = arith.constant 5.000000e-01 : f32
    %278 = vector.broadcast %cst_109 : f32 to vector<8x384xf32>
    %279 = arith.addf %277, %278 : vector<8x384xf32>
    %280 = vector.extract_strided_slice %279 {offsets = [0, 0], sizes = [8, 128], strides = [1, 1]} : vector<8x384xf32> to vector<8x128xf32>
    %281 = vector.extract_strided_slice %279 {offsets = [0, 128], sizes = [8, 128], strides = [1, 1]} : vector<8x384xf32> to vector<8x128xf32>
    %282 = vector.extract_strided_slice %279 {offsets = [0, 256], sizes = [8, 128], strides = [1, 1]} : vector<8x384xf32> to vector<8x128xf32>
    %283 = vector.extract_strided_slice %271 {offsets = [0, 384], sizes = [8, 128], strides = [1, 1]} : vector<8x512xf32> to vector<8x128xf32>
    %284 = math.tanh %283 : vector<8x128xf32>
    %285 = arith.mulf %281, %241 : vector<8x128xf32>
    %286 = arith.mulf %280, %284 : vector<8x128xf32>
    %287 = arith.addf %285, %286 : vector<8x128xf32>
    %288 = math.tanh %287 : vector<8x128xf32>
    %289 = arith.mulf %282, %288 : vector<8x128xf32>
    %c48 = arith.constant 48 : index
    %c0_110 = arith.constant 0 : index
    %290 = vector.load %arg12[%c48, %c0_110] : memref<64x512xf32, #tpu.memory_space<vmem>>, vector<8x512xf32>
    %c0_111 = arith.constant 0 : index
    %c0_112 = arith.constant 0 : index
    %291 = vector.load %arg2[%c0_111, %c0_112] : memref<128x512xf32, #tpu.memory_space<vmem>>, vector<128x512xf32>
    %cst_113 = arith.constant dense<0.000000e+00> : vector<8x512xf32>
    %292 = tpu.matmul %265, %291, %cst_113 {dimension_numbers = #tpu.dot_dimension_numbers<[1], [0], [0], [1], [0, 0, 1, 1], [], []>} : vector<8x128xf32>, vector<128x512xf32>, vector<8x512xf32> -> vector<8x512xf32>
    %293 = arith.addf %290, %292 : vector<8x512xf32>
    %294 = vector.extract_strided_slice %293 {offsets = [0, 0], sizes = [8, 384], strides = [1, 1]} : vector<8x512xf32> to vector<8x384xf32>
    %cst_114 = arith.constant 5.000000e-01 : f32
    %295 = vector.broadcast %cst_114 : f32 to vector<8x384xf32>
    %296 = arith.mulf %295, %294 : vector<8x384xf32>
    %297 = math.tanh %296 : vector<8x384xf32>
    %cst_115 = arith.constant 5.000000e-01 : f32
    %298 = vector.broadcast %cst_115 : f32 to vector<8x384xf32>
    %299 = arith.mulf %298, %297 : vector<8x384xf32>
    %cst_116 = arith.constant 5.000000e-01 : f32
    %300 = vector.broadcast %cst_116 : f32 to vector<8x384xf32>
    %301 = arith.addf %299, %300 : vector<8x384xf32>
    %302 = vector.extract_strided_slice %301 {offsets = [0, 0], sizes = [8, 128], strides = [1, 1]} : vector<8x384xf32> to vector<8x128xf32>
    %303 = vector.extract_strided_slice %301 {offsets = [0, 128], sizes = [8, 128], strides = [1, 1]} : vector<8x384xf32> to vector<8x128xf32>
    %304 = vector.extract_strided_slice %301 {offsets = [0, 256], sizes = [8, 128], strides = [1, 1]} : vector<8x384xf32> to vector<8x128xf32>
    %305 = vector.extract_strided_slice %293 {offsets = [0, 384], sizes = [8, 128], strides = [1, 1]} : vector<8x512xf32> to vector<8x128xf32>
    %306 = math.tanh %305 : vector<8x128xf32>
    %307 = arith.mulf %303, %263 : vector<8x128xf32>
    %308 = arith.mulf %302, %306 : vector<8x128xf32>
    %309 = arith.addf %307, %308 : vector<8x128xf32>
    %310 = math.tanh %309 : vector<8x128xf32>
    %311 = arith.mulf %304, %310 : vector<8x128xf32>
    %c0_117 = arith.constant 0 : index
    %c0_118 = arith.constant 0 : index
    %312 = vector.load %arg4[%c0_117, %c0_118] : memref<128x512xf32, #tpu.memory_space<vmem>>, vector<128x512xf32>
    %cst_119 = arith.constant dense<0.000000e+00> : vector<8x512xf32>
    %313 = tpu.matmul %311, %312, %cst_119 {dimension_numbers = #tpu.dot_dimension_numbers<[1], [0], [0], [1], [0, 0, 1, 1], [], []>} : vector<8x128xf32>, vector<128x512xf32>, vector<8x512xf32> -> vector<8x512xf32>
    %c0_120 = arith.constant 0 : index
    %c0_121 = arith.constant 0 : index
    %314 = vector.load %arg5[%c0_120, %c0_121] : memref<128x512xf32, #tpu.memory_space<vmem>>, vector<128x512xf32>
    %cst_122 = arith.constant dense<0.000000e+00> : vector<8x512xf32>
    %315 = tpu.matmul %289, %314, %cst_122 {dimension_numbers = #tpu.dot_dimension_numbers<[1], [0], [0], [1], [0, 0, 1, 1], [], []>} : vector<8x128xf32>, vector<128x512xf32>, vector<8x512xf32> -> vector<8x512xf32>
    %316 = arith.addf %313, %315 : vector<8x512xf32>
    %317 = arith.addf %316, %9 : vector<8x512xf32>
    %318 = vector.extract_strided_slice %317 {offsets = [0, 0], sizes = [8, 384], strides = [1, 1]} : vector<8x512xf32> to vector<8x384xf32>
    %cst_123 = arith.constant 5.000000e-01 : f32
    %319 = vector.broadcast %cst_123 : f32 to vector<8x384xf32>
    %320 = arith.mulf %319, %318 : vector<8x384xf32>
    %321 = math.tanh %320 : vector<8x384xf32>
    %cst_124 = arith.constant 5.000000e-01 : f32
    %322 = vector.broadcast %cst_124 : f32 to vector<8x384xf32>
    %323 = arith.mulf %322, %321 : vector<8x384xf32>
    %cst_125 = arith.constant 5.000000e-01 : f32
    %324 = vector.broadcast %cst_125 : f32 to vector<8x384xf32>
    %325 = arith.addf %323, %324 : vector<8x384xf32>
    %326 = vector.extract_strided_slice %325 {offsets = [0, 0], sizes = [8, 128], strides = [1, 1]} : vector<8x384xf32> to vector<8x128xf32>
    %327 = vector.extract_strided_slice %325 {offsets = [0, 128], sizes = [8, 128], strides = [1, 1]} : vector<8x384xf32> to vector<8x128xf32>
    %328 = vector.extract_strided_slice %325 {offsets = [0, 256], sizes = [8, 128], strides = [1, 1]} : vector<8x384xf32> to vector<8x128xf32>
    %329 = vector.extract_strided_slice %317 {offsets = [0, 384], sizes = [8, 128], strides = [1, 1]} : vector<8x512xf32> to vector<8x128xf32>
    %330 = math.tanh %329 : vector<8x128xf32>
    %331 = arith.mulf %327, %287 : vector<8x128xf32>
    %332 = arith.mulf %326, %330 : vector<8x128xf32>
    %333 = arith.addf %331, %332 : vector<8x128xf32>
    %334 = math.tanh %333 : vector<8x128xf32>
    %335 = arith.mulf %328, %334 : vector<8x128xf32>
    %c56 = arith.constant 56 : index
    %c0_126 = arith.constant 0 : index
    %336 = vector.load %arg12[%c56, %c0_126] : memref<64x512xf32, #tpu.memory_space<vmem>>, vector<8x512xf32>
    %c0_127 = arith.constant 0 : index
    %c0_128 = arith.constant 0 : index
    %337 = vector.load %arg2[%c0_127, %c0_128] : memref<128x512xf32, #tpu.memory_space<vmem>>, vector<128x512xf32>
    %cst_129 = arith.constant dense<0.000000e+00> : vector<8x512xf32>
    %338 = tpu.matmul %311, %337, %cst_129 {dimension_numbers = #tpu.dot_dimension_numbers<[1], [0], [0], [1], [0, 0, 1, 1], [], []>} : vector<8x128xf32>, vector<128x512xf32>, vector<8x512xf32> -> vector<8x512xf32>
    %339 = arith.addf %336, %338 : vector<8x512xf32>
    %340 = vector.extract_strided_slice %339 {offsets = [0, 0], sizes = [8, 384], strides = [1, 1]} : vector<8x512xf32> to vector<8x384xf32>
    %cst_130 = arith.constant 5.000000e-01 : f32
    %341 = vector.broadcast %cst_130 : f32 to vector<8x384xf32>
    %342 = arith.mulf %341, %340 : vector<8x384xf32>
    %343 = math.tanh %342 : vector<8x384xf32>
    %cst_131 = arith.constant 5.000000e-01 : f32
    %344 = vector.broadcast %cst_131 : f32 to vector<8x384xf32>
    %345 = arith.mulf %344, %343 : vector<8x384xf32>
    %cst_132 = arith.constant 5.000000e-01 : f32
    %346 = vector.broadcast %cst_132 : f32 to vector<8x384xf32>
    %347 = arith.addf %345, %346 : vector<8x384xf32>
    %348 = vector.extract_strided_slice %347 {offsets = [0, 0], sizes = [8, 128], strides = [1, 1]} : vector<8x384xf32> to vector<8x128xf32>
    %349 = vector.extract_strided_slice %347 {offsets = [0, 128], sizes = [8, 128], strides = [1, 1]} : vector<8x384xf32> to vector<8x128xf32>
    %350 = vector.extract_strided_slice %347 {offsets = [0, 256], sizes = [8, 128], strides = [1, 1]} : vector<8x384xf32> to vector<8x128xf32>
    %351 = vector.extract_strided_slice %339 {offsets = [0, 384], sizes = [8, 128], strides = [1, 1]} : vector<8x512xf32> to vector<8x128xf32>
    %352 = math.tanh %351 : vector<8x128xf32>
    %353 = arith.mulf %349, %309 : vector<8x128xf32>
    %354 = arith.mulf %348, %352 : vector<8x128xf32>
    %355 = arith.addf %353, %354 : vector<8x128xf32>
    %356 = math.tanh %355 : vector<8x128xf32>
    %357 = arith.mulf %350, %356 : vector<8x128xf32>
    %c0_133 = arith.constant 0 : index
    %c0_134 = arith.constant 0 : index
    %358 = vector.load %arg4[%c0_133, %c0_134] : memref<128x512xf32, #tpu.memory_space<vmem>>, vector<128x512xf32>
    %cst_135 = arith.constant dense<0.000000e+00> : vector<8x512xf32>
    %359 = tpu.matmul %357, %358, %cst_135 {dimension_numbers = #tpu.dot_dimension_numbers<[1], [0], [0], [1], [0, 0, 1, 1], [], []>} : vector<8x128xf32>, vector<128x512xf32>, vector<8x512xf32> -> vector<8x512xf32>
    %c0_136 = arith.constant 0 : index
    %c0_137 = arith.constant 0 : index
    %360 = vector.load %arg5[%c0_136, %c0_137] : memref<128x512xf32, #tpu.memory_space<vmem>>, vector<128x512xf32>
    %cst_138 = arith.constant dense<0.000000e+00> : vector<8x512xf32>
    %361 = tpu.matmul %335, %360, %cst_138 {dimension_numbers = #tpu.dot_dimension_numbers<[1], [0], [0], [1], [0, 0, 1, 1], [], []>} : vector<8x128xf32>, vector<128x512xf32>, vector<8x512xf32> -> vector<8x512xf32>
    %362 = arith.addf %359, %361 : vector<8x512xf32>
    %363 = arith.addf %362, %9 : vector<8x512xf32>
    %364 = vector.extract_strided_slice %363 {offsets = [0, 0], sizes = [8, 384], strides = [1, 1]} : vector<8x512xf32> to vector<8x384xf32>
    %cst_139 = arith.constant 5.000000e-01 : f32
    %365 = vector.broadcast %cst_139 : f32 to vector<8x384xf32>
    %366 = arith.mulf %365, %364 : vector<8x384xf32>
    %367 = math.tanh %366 : vector<8x384xf32>
    %cst_140 = arith.constant 5.000000e-01 : f32
    %368 = vector.broadcast %cst_140 : f32 to vector<8x384xf32>
    %369 = arith.mulf %368, %367 : vector<8x384xf32>
    %cst_141 = arith.constant 5.000000e-01 : f32
    %370 = vector.broadcast %cst_141 : f32 to vector<8x384xf32>
    %371 = arith.addf %369, %370 : vector<8x384xf32>
    %372 = vector.extract_strided_slice %371 {offsets = [0, 0], sizes = [8, 128], strides = [1, 1]} : vector<8x384xf32> to vector<8x128xf32>
    %373 = vector.extract_strided_slice %371 {offsets = [0, 128], sizes = [8, 128], strides = [1, 1]} : vector<8x384xf32> to vector<8x128xf32>
    %374 = vector.extract_strided_slice %371 {offsets = [0, 256], sizes = [8, 128], strides = [1, 1]} : vector<8x384xf32> to vector<8x128xf32>
    %375 = vector.extract_strided_slice %363 {offsets = [0, 384], sizes = [8, 128], strides = [1, 1]} : vector<8x512xf32> to vector<8x128xf32>
    %376 = math.tanh %375 : vector<8x128xf32>
    %377 = arith.mulf %373, %333 : vector<8x128xf32>
    %378 = arith.mulf %372, %376 : vector<8x128xf32>
    %379 = arith.addf %377, %378 : vector<8x128xf32>
    %380 = math.tanh %379 : vector<8x128xf32>
    %381 = arith.mulf %374, %380 : vector<8x128xf32>
    %c0_142 = arith.constant 0 : index
    %c0_143 = arith.constant 0 : index
    %382 = vector.load %arg7[%c0_142, %c0_143] : memref<128x16xf32, #tpu.memory_space<vmem>>, vector<128x16xf32>
    %cst_144 = arith.constant dense<0.000000e+00> : vector<8x16xf32>
    %383 = tpu.matmul %381, %382, %cst_144 {dimension_numbers = #tpu.dot_dimension_numbers<[1], [0], [0], [1], [0, 0, 1, 1], [], []>} : vector<8x128xf32>, vector<128x16xf32>, vector<8x16xf32> -> vector<8x16xf32>
    %c0_145 = arith.constant 0 : index
    %c0_146 = arith.constant 0 : index
    %384 = vector.load %arg8[%c0_145, %c0_146] : memref<1x16xf32, #tpu.memory_space<vmem>>, vector<1x16xf32>
    %385 = vector.broadcast %384 : vector<1x16xf32> to vector<8x16xf32>
    %386 = arith.addf %383, %385 : vector<8x16xf32>
    %c0_147 = arith.constant 0 : index
    %c0_148 = arith.constant 0 : index
    %387 = vector.load %arg9[%c0_147, %c0_148] : memref<16x3xf32, #tpu.memory_space<vmem>>, vector<16x3xf32>
    %cst_149 = arith.constant dense<0.000000e+00> : vector<8x3xf32>
    %388 = tpu.matmul %386, %387, %cst_149 {dimension_numbers = #tpu.dot_dimension_numbers<[1], [0], [0], [1], [0, 0, 1, 1], [], []>} : vector<8x16xf32>, vector<16x3xf32>, vector<8x3xf32> -> vector<8x3xf32>
    %c0_150 = arith.constant 0 : index
    %c0_151 = arith.constant 0 : index
    %389 = vector.load %arg10[%c0_150, %c0_151] : memref<1x3xf32, #tpu.memory_space<vmem>>, vector<1x3xf32>
    %390 = vector.broadcast %389 : vector<1x3xf32> to vector<8x3xf32>
    %391 = arith.addf %388, %390 : vector<8x3xf32>
    %c0_152 = arith.constant 0 : index
    %c0_153 = arith.constant 0 : index
    %392 = vector.load %arg11[%c0_152, %c0_153] : memref<8x3xf32, #tpu.memory_space<vmem>>, vector<8x3xf32>
    tpu.vector_store %arg11[%c0_152, %c0_153], %391 {strides = array<i32>} : memref<8x3xf32, #tpu.memory_space<vmem>>, vector<8x3xf32>,
    return
  }
}

</mosaic_0001>

<bundles_post_ra>
// kernel: lstm_forward.1
= control target key start
LH: loop header
LB: loop body
LE: loop exit
PB: predicated region body
PF: predicated region fallthrough
CT: control target
= control target key end

     0   :  { %vm72_vm0 = vcmask 261120   ;;  %vm2845_vm1 = vcmask 130048   ;;  %vm2869_vm2 = vcmask 23552   ;;  %s9573_s1 = inlined_call_operand.vmem [shape: f32[32,512], index: 1, kind: input, shape index: {}]   ;;  %s9574_s0 = inlined_call_operand.vmem [shape: f32[64,32], index: 0, kind: input, shape index: {}]   ;;  %s9575_s2 = inlined_call_operand.vmem [shape: f32[128,512], index: 2, kind: input, shape index: {}]   ;;  %s9576_s5 = inlined_call_operand.vmem [shape: f32[128,512], index: 5, kind: input, shape index: {}]   ;;  %s9577_s4 = inlined_call_operand.vmem [shape: f32[128,512], index: 4, kind: input, shape index: {}]   ;;  %s9578_s3 = inlined_call_operand.vmem [shape: f32[1,512], index: 3, kind: input, shape index: {}]   ;;  %s9579_s6 = inlined_call_operand.vmem [shape: f32[1,512], index: 6, kind: input, shape index: {}]   ;;  %s9580_s8 = inlined_call_operand.vmem [shape: f32[1,16], index: 8, kind: input, shape index: {}]   ;;  %s9581_s7 = inlined_call_operand.vmem [shape: f32[128,16], index: 7, kind: input, shape index: {}]   ;;  %s9582_s9 = inlined_call_operand.vmem [shape: f32[16,3], index: 9, kind: input, shape index: {}]   ;;  %s9583_s10 = inlined_call_operand.vmem [shape: f32[1,3], index: 10, kind: input, shape index: {}]   ;;  %s9584_s11 = inlined_call_operand.vmem [shape: f32[8,3], index: 11, kind: output, shape index: {}]  }
   0x1   :  { %v58_v0 = vld [vmem:[%s9573_s1 + $0x60] sm:$0xff]  ;;  %v59_v1 = vld [vmem:[%s9573_s1 + $0x68] sm:$0xff]  ;;  %v61_v2 = vld [vmem:[%s9573_s1 + $0x78] sm:$0xff] }
   0x2   :  { %109 = vmatpush.msra.mxu0 %v58_v0  ;;  %2908 = vmatpush.msra.mxu2 %v58_v0  ;;  %v54_v3 = vld [vmem:[%s9573_s1 + $0x40] sm:$0xff]  ;;  %v55_v4 = vld [vmem:[%s9573_s1 + $0x48] sm:$0xff]  ;;  %v57_v5 = vld [vmem:[%s9573_s1 + $0x58] sm:$0xff] }
   0x3   :  { %150 = vmatpush.msra.mxu1 %v59_v1  ;;  %232 = vmatpush.msra.mxu3 %v61_v2  ;;  %v50_v6 = vld [vmem:[%s9573_s1 + $0x20] sm:$0xff]  ;;  %v51_v7 = vld [vmem:[%s9573_s1 + $0x28] sm:$0xff]  ;;  %v53_v8 = vld [vmem:[%s9573_s1 + $0x38] sm:$0xff] }
   0x4   :  { %110 = vmatpush.msra.mxu0 %v54_v3  ;;  %2909 = vmatpush.msra.mxu2 %v54_v3  ;;  %v46_v9 = vld [vmem:[%s9573_s1] sm:$0xff]  ;;  %v47_v10 = vld [vmem:[%s9573_s1 + $0x8] sm:$0xff]  ;;  %v49_v11 = vld [vmem:[%s9573_s1 + $0x18] sm:$0xff] }
   0x5   :  { %151 = vmatpush.msra.mxu1 %v55_v4  ;;  %233 = vmatpush.msra.mxu3 %v57_v5  ;;  %v3751_v12 = vld [vmem:[%s9574_s0] sm:$0xff]  ;;  %v3756_v13 = vld [vmem:[%s9574_s0 + $0x30] sm:$0xff]  ;;  %v3764_v15 = vld [vmem:[%s9575_s2 + $0x1e8] sm:$0xff] }
   0x6   :  { %111 = vmatpush.msra.mxu0 %v50_v6  ;;  %2910 = vmatpush.msra.mxu2 %v50_v6  ;;  %v60_v14 = vld [vmem:[%s9573_s1 + $0x70] sm:$0xff]  ;;  %v3776_v17 = vld [vmem:[%s9575_s2 + $0x1f8] sm:$0xff]  ;;  %v3783_v18 = vld [vmem:[%s9575_s2 + $0x1c8] sm:$0xff] }
   0x7   :  { %152 = vmatpush.msra.mxu1 %v51_v7  ;;  %234 = vmatpush.msra.mxu3 %v53_v8  ;;  %v56_v16 = vld [vmem:[%s9573_s1 + $0x50] sm:$0xff]  ;;  %v3788_v19 = vld [vmem:[%s9575_s2 + $0x1e0] sm:$0xff]  ;;  %v3799_v21 = vld [vmem:[%s9575_s2 + $0x1d8] sm:$0xff] }
   0x8   :  { %112 = vmatpush.msra.mxu0 %v46_v9  ;;  %2911 = vmatpush.msra.mxu2 %v46_v9  ;;  %v52_v20 = vld [vmem:[%s9573_s1 + $0x30] sm:$0xff]  ;;  %v3805_v22 = vld [vmem:[%s9575_s2 + $0x1c0] sm:$0xff]  ;;  %v3810_v23 = vld [vmem:[%s9575_s2 + $0x1a8] sm:$0xff] }
   0x9   :  { %153 = vmatpush.msra.mxu1 %v47_v10  ;;  %235 = vmatpush.msra.mxu3 %v49_v11  ;;  %v48_v24 = vld [vmem:[%s9573_s1 + $0x10] sm:$0xff]  ;;  %v3820_v25 = vld [vmem:[%s9575_s2 + $0x1b8] sm:$0xff]  ;;  %v3825_v26 = vld [vmem:[%s9574_s0 + $0x8] sm:$0xff] }
   0xa   :  { %2875 = vmatmul.msk.f32.vlgmr.msra.gmra.mxu0 %vm72_vm0, %v3751_v12  ;;  %2881 = vmatmul.msk.f32.vlgmr.msra.gmra.mxu2 %vm72_vm0, %v3756_v13  ;;  %v3830_v27 = vld [vmem:[%s9574_s0 + $0x38] sm:$0xff]  ;;  %v3836_v28 = vld [vmem:[%s9575_s2 + $0x1f0] sm:$0xff]  ;;  %v3844_v29 = vld [vmem:[%s9575_s2 + $0x1a0] sm:$0xff] }
   0xb   :  { %2883 = vmatmul.msk.f32.vlgmr.msra.gmra.mxu1 %vm72_vm0, %v3751_v12  ;;  %191 = vmatpush.msrb.mxu2 %v60_v14  ;;  %v3853_v30 = vld [vmem:[%s9575_s2 + $0x1d0] sm:$0xff]  ;;  %v3858_v31 = vld [vmem:[%s9575_s2 + $0x188] sm:$0xff]  ;;  %v3866_v32 = vld [vmem:[%s9575_s2 + $0x180] sm:$0xff] }
   0xc   :  { %2899 = vmatmul.msk.f32.vlgmr.msra.gmra.mxu3 %vm72_vm0, %v3751_v12  ;;  %391 = vmatpush.msrb.mxu1 %v3764_v15  ;;  %v3871_v33 = vld [vmem:[%s9575_s2 + $0x198] sm:$0xff]  ;;  %v3879_v34 = vld [vmem:[%s9575_s2 + $0x1b0] sm:$0xff]  ;;  %v3884_v35 = vld [vmem:[%s9575_s2 + $0x168] sm:$0xff] }
   0xd   :  { %192 = vmatpush.msrb.mxu2 %v56_v16  ;;  %431 = vmatpush.msrb.mxu3 %v3776_v17  ;;  %v3891_v36 = vld [vmem:[%s9575_s2 + $0x160] sm:$0xff]  ;;  %v3896_v37 = vld [vmem:[%s9575_s2 + $0x178] sm:$0xff]  ;;  %v3903_v38 = vld [vmem:[%s9575_s2 + $0x190] sm:$0xff] }
   0xe   :  { %392 = vmatpush.msrb.mxu1 %v3783_v18  ;;  %371 = vmatpush.msrb.mxu0 %v3788_v19  ;;  %v3908_v39 = vld [vmem:[%s9575_s2 + $0x148] sm:$0xff]  ;;  %v3913_v40 = vld [vmem:[%s9574_s0 + $0x10] sm:$0xff]  ;;  %v3921_v41 = vld [vmem:[%s9575_s2 + $0x140] sm:$0xff] }
   0xf   :  { %193 = vmatpush.msrb.mxu2 %v52_v20  ;;  %432 = vmatpush.msrb.mxu3 %v3799_v21  ;;  %v3929_v42 = vld [vmem:[%s9575_s2 + $0x170] sm:$0xff]  ;;  %v3938_v43 = vld [vmem:[%s9575_s2 + $0x120] sm:$0xff]  ;;  %v3943_v44 = vld [vmem:[%s9575_s2 + $0x158] sm:$0xff] }
  0x10   :  { %372 = vmatpush.msrb.mxu0 %v3805_v22  ;;  %393 = vmatpush.msrb.mxu1 %v3810_v23  ;;  %v3951_v45 = vld [vmem:[%s9575_s2 + $0x128] sm:$0xff]  ;;  %v3956_v46 = vld [vmem:[%s9575_s2 + $0x150] sm:$0xff]  ;;  %v3963_v47 = vld [vmem:[%s9575_s2 + $0x100] sm:$0xff] }
  0x11   :  { %194 = vmatpush.msrb.mxu2 %v48_v24  ;;  %433 = vmatpush.msrb.mxu3 %v3820_v25  ;;  %v3969_v48 = vld [vmem:[%s9575_s2 + $0x138] sm:$0xff]  ;;  %v3976_v49 = vld [vmem:[%s9575_s2 + $0x108] sm:$0xff]  ;;  %v3981_v50 = vld [vmem:[%s9575_s2 + $0x130] sm:$0xff] }
  0x12   :  { %2876 = vmatmul.msk.f32.gmra.mxu0 %vm72_vm0, %v3825_v26  ;;  %2882 = vmatmul.msk.f32.gmra.mxu2 %vm72_vm0, %v3830_v27  ;;  %v3986_v51 = vld [vmem:[%s9575_s2 + $0xe0] sm:$0xff]  ;;  %v3993_v52 = vld [vmem:[%s9575_s2 + $0x118] sm:$0xff]  ;;  %v4014_v55 = vld [vmem:[%s9575_s2 + $0xe8] sm:$0xff] }
  0x13   :  { %2884 = vmatmul.msk.f32.gmra.mxu1 %vm72_vm0, %v3825_v26  ;;  %411 = vmatpush.msra.mxu2 %v3836_v28  ;;  %v3998_v53 = vld [vmem:[%s9574_s0 + $0x18] sm:$0xff]  ;;  %v4005_v54 = vld [vmem:[%s9575_s2 + $0xc0] sm:$0xff]  ;;  %v4036_v58 = vld [vmem:[%s9575_s2 + $0x110] sm:$0xff] }
  0x14   :  { %2900 = vmatmul.msk.f32.gmra.mxu3 %vm72_vm0, %v3825_v26  ;;  %373 = vmatpush.msrb.mxu0 %v3844_v29  ;;  %v4023_v56 = vld [vmem:[%s9575_s2 + $0xa0] sm:$0xff]  ;;  %v4028_v57 = vld [vmem:[%s9575_s2 + $0xf8] sm:$0xff]  ;;  %v4041_v59 = vld [vmem:[%s9575_s2 + $0xc8] sm:$0xff] }
  0x15   :  { %412 = vmatpush.msra.mxu2 %v3853_v30  ;;  %394 = vmatpush.msrb.mxu1 %v3858_v31  ;;  %v4048_v60 = vld [vmem:[%s9575_s2 + $0x80] sm:$0xff]  ;;  %v4054_v61 = vld [vmem:[%s9575_s2 + $0xd8] sm:$0xff]  ;;  %v4061_v62 = vld [vmem:[%s9575_s2 + $0xf0] sm:$0xff] }
  0x16   :  { %374 = vmatpush.msrb.mxu0 %v3866_v32  ;;  %434 = vmatpush.msrb.mxu3 %v3871_v33  ;;  %v4066_v63 = vld [vmem:[%s9575_s2 + $0xa8] sm:$0xff]  ;;  %v4071_v0 = vld [vmem:[%s9575_s2 + $0x60] sm:$0xff]  ;;  %v4078_v1 = vld [vmem:[%s9575_s2 + $0xb8] sm:$0xff] }
  0x17   :  { %413 = vmatpush.msra.mxu2 %v3879_v34  ;;  %395 = vmatpush.msrb.mxu1 %v3884_v35  ;;  %v42_v2 = vld [vmem:[%s9574_s0 + $0x20] sm:$0xff]  ;;  %v4097_v4 = vld [vmem:[%s9575_s2 + $0xd0] sm:$0xff]  ;;  %v4110_v6 = vld [vmem:[%s9575_s2 + $0x88] sm:$0xff] }
  0x18   :  { %375 = vmatpush.msrb.mxu0 %v3891_v36  ;;  %435 = vmatpush.msrb.mxu3 %v3896_v37  ;;  %v4088_v3 = vld [vmem:[%s9575_s2 + $0x40] sm:$0xff]  ;;  %v4117_v7 = vld [vmem:[%s9575_s2 + $0x98] sm:$0xff]  ;;  %v4122_v8 = vld [vmem:[%s9575_s2 + $0xb0] sm:$0xff] }
  0x19   :  { %414 = vmatpush.msra.mxu2 %v3903_v38  ;;  %396 = vmatpush.msrb.mxu1 %v3908_v39  ;;  %10193 = vst [vmem:[#allocation3_spill] sm:$0xff] %v4088_v3  ;;  %v4105_v5 = vld [vmem:[%s9575_s2 + $0x20] sm:$0xff]  ;;  %v4134_v10 = vld [vmem:[%s9575_s2 + $0x68] sm:$0xff]  ;;  %v4141_v11 = vld [vmem:[%s9575_s2 + $0x78] sm:$0xff] }
  0x1a   :  { %2877 = vmatmul.msk.f32.gmra.mxu0 %vm72_vm0, %v3913_v40  ;;  %2891 = vmatmul.msk.f32.vlgmr.msrb.gmra.mxu2 %vm72_vm0, %v3751_v12  ;;  %10194 = vst [vmem:[#allocation4_spill] sm:$0xff] %v4105_v5  ;;  %v4128_v9 = vld [vmem:[%s9575_s2] sm:$0xff]  ;;  %v4146_v12 = vld [vmem:[%s9575_s2 + $0x90] sm:$0xff]  ;;  %v4153_v14 = vld [vmem:[%s9575_s2 + $0x48] sm:$0xff] }
  0x1b   :  { %2885 = vmatmul.msk.f32.gmra.mxu1 %vm72_vm0, %v3913_v40  ;;  %376 = vmatpush.msrb.mxu0 %v3921_v41  ;;  %10195 = vst [vmem:[#allocation5_spill] sm:$0xff] %v4128_v9  ;;  %v43_v16 = vld [vmem:[%s9574_s0 + $0x28] sm:$0xff]  ;;  %v4164_v20 = vld [vmem:[%s9575_s2 + $0x58] sm:$0xff] }
  0x1c   :  { %2901 = vmatmul.msk.f32.gmra.mxu3 %vm72_vm0, %v3913_v40  ;;  %415 = vmatpush.msra.mxu2 %v3929_v42  ;;  %10196 = vst [vmem:[#allocation6_spill] sm:$0xff] %v4153_v14  ;;  %v4171_v24 = vld [vmem:[%s9575_s2 + $0x28] sm:$0xff] }
  0x1d   :  { %377 = vmatpush.msrb.mxu0 %v3938_v43  ;;  %436 = vmatpush.msrb.mxu3 %v3943_v44  ;;  %10197 = vst [vmem:[#allocation7_spill] sm:$0xff] %v4164_v20 }
  0x1e   :  { %397 = vmatpush.msrb.mxu1 %v3951_v45  ;;  %416 = vmatpush.msra.mxu2 %v3956_v46  ;;  %10198 = vst [vmem:[#allocation8_spill] sm:$0xff] %v4171_v24 }
  0x1f   :  { %378 = vmatpush.msrb.mxu0 %v3963_v47  ;;  %437 = vmatpush.msrb.mxu3 %v3969_v48 }
  0x20   :  { %398 = vmatpush.msrb.mxu1 %v3976_v49  ;;  %417 = vmatpush.msra.mxu2 %v3981_v50 }
  0x21   :  { %379 = vmatpush.msrb.mxu0 %v3986_v51  ;;  %438 = vmatpush.msrb.mxu3 %v3993_v52 }
  0x22   :  { %2878 = vmatmul.msk.f32.gmra.mxu0 %vm72_vm0, %v3998_v53  ;;  %2892 = vmatmul.msk.f32.gmra.mxu2 %vm72_vm0, %v3825_v26  ;;  %v4179_v26 = vld [vmem:[%s9575_s2 + $0x38] sm:$0xff] }
  0x23   :  { %2886 = vmatmul.msk.f32.gmra.mxu1 %vm72_vm0, %v3998_v53  ;;  %380 = vmatpush.msrb.mxu0 %v4005_v54  ;;  %10199 = vst [vmem:[#allocation9_spill] sm:$0xff] %v4179_v26 }
  0x24   :  { %2902 = vmatmul.msk.f32.gmra.mxu3 %vm72_vm0, %v3998_v53  ;;  %399 = vmatpush.msrb.mxu1 %v4014_v55 }
  0x25   :  { %381 = vmatpush.msrb.mxu0 %v4023_v56  ;;  %439 = vmatpush.msrb.mxu3 %v4028_v57 }
  0x26   :  { %418 = vmatpush.msra.mxu2 %v4036_v58  ;;  %400 = vmatpush.msrb.mxu1 %v4041_v59 }
  0x27   :  { %382 = vmatpush.msrb.mxu0 %v4048_v60  ;;  %440 = vmatpush.msrb.mxu3 %v4054_v61 }
  0x28   :  { %419 = vmatpush.msra.mxu2 %v4061_v62  ;;  %401 = vmatpush.msrb.mxu1 %v4066_v63 }
  0x29   :  { %383 = vmatpush.msrb.mxu0 %v4071_v0  ;;  %441 = vmatpush.msrb.mxu3 %v4078_v1 }
  0x2a   :  { %2879 = vmatmul.msk.f32.gmra.mxu0 %vm72_vm0, %v42_v2  ;;  %2893 = vmatmul.msk.f32.gmra.mxu2 %vm72_vm0, %v3913_v40  ;;  %v4184_v40 = vld [vmem:[%s9575_s2 + $0x70] sm:$0xff] }
  0x2b   :  { %2887 = vmatmul.msk.f32.gmra.mxu1 %vm72_vm0, %v42_v2  ;;  %384 = vmatpush.msrb.mxu0 %v4088_v3 }
  0x2c   :  { %2903 = vmatmul.msk.f32.gmra.mxu3 %vm72_vm0, %v42_v2  ;;  %420 = vmatpush.msra.mxu2 %v4097_v4 }
  0x2d   :  { %385 = vmatpush.msrb.mxu0 %v4105_v5  ;;  %402 = vmatpush.msrb.mxu1 %v4110_v6  ;;  %v4203_v5 = vld [vmem:[%s9575_s2 + $0x50] sm:$0xff] }
  0x2e   :  { %442 = vmatpush.msrb.mxu3 %v4117_v7  ;;  %421 = vmatpush.msra.mxu2 %v4122_v8  ;;  %10202 = vst [vmem:[#allocation12_spill] sm:$0xff] %v4203_v5 }
  0x2f   :  { %386 = vmatpush.msrb.mxu0 %v4128_v9  ;;  %403 = vmatpush.msrb.mxu1 %v4134_v10  ;;  %v4191_v9 = vld [vmem:[%s9575_s2 + $0x8] sm:$0xff] }
  0x30   :  { %443 = vmatpush.msrb.mxu3 %v4141_v11  ;;  %422 = vmatpush.msra.mxu2 %v4146_v12  ;;  %10200 = vst [vmem:[#allocation10_spill] sm:$0xff] %v4191_v9 }
  0x31   :  { %404 = vmatpush.msrb.mxu1 %v4153_v14 }
  0x32   :  { %2880 = vmatmul.msk.f32.gmra.mxu0 %vm72_vm0, %v43_v16  ;;  %2894 = vmatmul.msk.f32.gmra.mxu2 %vm72_vm0, %v3998_v53  ;;  %v4198_v53 = vld [vmem:[%s9575_s2 + $0x18] sm:$0xff] }
  0x33   :  { %2888 = vmatmul.msk.f32.gmra.mxu1 %vm72_vm0, %v43_v16  ;;  %444 = vmatpush.msrb.mxu3 %v4164_v20  ;;  %10201 = vst [vmem:[#allocation11_spill] sm:$0xff] %v4198_v53  ;;  %v4218_v20 = vld [vmem:[%s9575_s2 + $0x10] sm:$0xff] }
  0x34   :  { %2904 = vmatmul.msk.f32.gmra.mxu3 %vm72_vm0, %v43_v16  ;;  %405 = vmatpush.msrb.mxu1 %v4171_v24  ;;  %v4211_v24 = vld [vmem:[%s9575_s2 + $0x30] sm:$0xff]  ;;  %10204 = vst [vmem:[#allocation14_spill] sm:$0xff] %v4218_v20 }
  0x35   :  { %445 = vmatpush.msrb.mxu3 %v4179_v26  ;;  %423 = vmatpush.msra.mxu2 %v4184_v40  ;;  %10203 = vst [vmem:[#allocation13_spill] sm:$0xff] %v4211_v24  ;;  %v9590_v26 = vmov 0.0  }
  0x36   :  { %406 = vmatpush.msrb.mxu1 %v4191_v9  ;;  %v4376_v9 = vld [vmem:[%s9576_s5 + $0x158] sm:$0xff] }
  0x37   :  { %446 = vmatpush.msrb.mxu3 %v4198_v53  ;;  %424 = vmatpush.msra.mxu2 %v4203_v5  ;;  %v4270_v53 = vld [vmem:[%s9576_s5 + $0x1c8] sm:$0xff]  ;;  %10228 = vst [vmem:[#allocation38_spill] sm:$0xff] %v4376_v9  ;;  %v4476_v5 = vld [vmem:[%s9576_s5 + $0xd8] sm:$0xff] }
  0x38   :  { %10210 = vst [vmem:[#allocation20_spill] sm:$0xff] %v4270_v53 }
  0x39   :  { %425 = vmatpush.msra.mxu2 %v4211_v24  ;;  %v4459_v24 = vld [vmem:[%s9576_s5 + $0xc0] sm:$0xff]  ;;  %10244 = vst [vmem:[#allocation54_spill] sm:$0xff] %v4476_v5 }
  0x3a   :  { %2895 = vmatmul.msk.f32.gmra.mxu2 %vm72_vm0, %v42_v2  ;;  %387 = vmatmul.f32.vlgmr.msrb.gmra.mxu0 %v9590_v26  ;;  %v4243_v2 = vld [vmem:[%s9576_s5 + $0x1e0] sm:$0xff]  ;;  %10241 = vst [vmem:[#allocation51_spill] sm:$0xff] %v4459_v24 }
  0x3b   :  { %2889 = vmatmul.msk.f32.gmra.mxu1 %vm72_vm0, %v3756_v13  ;;  %426 = vmatpush.msra.mxu2 %v4218_v20  ;;  %10205 = vst [vmem:[#allocation15_spill] sm:$0xff] %v4243_v2  ;;  %v4359_v20 = vld [vmem:[%s9576_s5 + $0x140] sm:$0xff] }
  0x3c   :  { %2905 = vmatmul.msk.f32.gmra.mxu3 %vm72_vm0, %v3756_v13  ;;  %601 = vmatpush.msra.mxu0 %v4243_v2  ;;  %v4282_v2 = vld [vmem:[%s9576_s5 + $0x1d8] sm:$0xff]  ;;  %10225 = vst [vmem:[#allocation35_spill] sm:$0xff] %v4359_v20 }
  0x3d   :  { %10212 = vst [vmem:[#allocation22_spill] sm:$0xff] %v4282_v2 }
  0x42   :  { %2896 = vmatmul.msk.f32.gmra.mxu2 %vm72_vm0, %v43_v16  ;;  %v4248_v16 = vld [vmem:[%s9576_s5 + $0x1e8] sm:$0xff] }
  0x43   :  { %2890 = vmatmul.msk.f32.gmra.mxu1 %vm72_vm0, %v3830_v27  ;;  %10206 = vst [vmem:[#allocation16_spill] sm:$0xff] %v4248_v16 }
  0x44   :  { %2906 = vmatmul.msk.f32.gmra.mxu3 %vm72_vm0, %v3830_v27  ;;  %621 = vmatpush.msra.mxu1 %v4248_v16  ;;  %v4277_v16 = vld [vmem:[%s9576_s5 + $0x1d0] sm:$0xff] }
  0x45   :  { %10211 = vst [vmem:[#allocation21_spill] sm:$0xff] %v4277_v16 }
  0x46   :  { %622 = vmatpush.msra.mxu1 %v4270_v53  ;;  %v4342_v53 = vld [vmem:[%s9576_s5 + $0x168] sm:$0xff] }
  0x47   :  { %10222 = vst [vmem:[#allocation32_spill] sm:$0xff] %v4342_v53 }
  0x4a   :  { %2897 = vmatmul.msk.f32.gmra.mxu2 %vm72_vm0, %v3756_v13  ;;  %v4253_v13 = vld [vmem:[%s9576_s5 + $0x1f0] sm:$0xff] }
  0x4b   :  { %407 = vmatmul.f32.vlgmr.msrb.gmra.mxu1 %v9590_v26  ;;  %10207 = vst [vmem:[#allocation17_spill] sm:$0xff] %v4253_v13  ;;  %641 = vmatpush.msrb.mxu2 %v4253_v13  ;;  %v4296_v13 = vld [vmem:[%s9576_s5 + $0x1a8] sm:$0xff] }
  0x4c   :  { %447 = vmatmul.f32.vlgmr.msrb.gmra.mxu3 %v9590_v26  ;;  %10214 = vst [vmem:[#allocation24_spill] sm:$0xff] %v4296_v13  ;;  %623 = vmatpush.msra.mxu1 %v4296_v13  ;;  %v4325_v13 = vld [vmem:[%s9576_s5 + $0x190] sm:$0xff] }
  0x4d   :  { %642 = vmatpush.msrb.mxu2 %v4277_v16  ;;  %v4315_v16 = vld [vmem:[%s9576_s5 + $0x180] sm:$0xff]  ;;  %10219 = vst [vmem:[#allocation29_spill] sm:$0xff] %v4325_v13 }
  0x4e   :  { %10217 = vst [vmem:[#allocation27_spill] sm:$0xff] %v4315_v16 }
  0x52   :  { %2898 = vmatmul.msk.f32.gmra.mxu2 %vm72_vm0, %v3830_v27  ;;  %v4260_v27 = vld [vmem:[%s9576_s5 + $0x1f8] sm:$0xff] }
  0x53   :  { %10208 = vst [vmem:[#allocation18_spill] sm:$0xff] %v4260_v27  ;;  %661 = vmatpush.msra.mxu3 %v4260_v27  ;;  %v4291_v27 = vld [vmem:[%s9576_s5 + $0x1a0] sm:$0xff] }
  0x54   :  { %10213 = vst [vmem:[#allocation23_spill] sm:$0xff] %v4291_v27 }
  0x55   :  { %662 = vmatpush.msra.mxu3 %v4282_v2  ;;  %v4308_v2 = vld [vmem:[%s9576_s5 + $0x1b8] sm:$0xff] }
  0x56   :  { %10216 = vst [vmem:[#allocation26_spill] sm:$0xff] %v4308_v2 }
  0x57   :  { %663 = vmatpush.msra.mxu3 %v4308_v2  ;;  %v4332_v2 = vld [vmem:[%s9576_s5 + $0x198] sm:$0xff] }
  0x58   :  { %10220 = vst [vmem:[#allocation30_spill] sm:$0xff] %v4332_v2 }
  0x59   :  { %664 = vmatpush.msra.mxu3 %v4332_v2  ;;  %v4366_v2 = vld [vmem:[%s9576_s5 + $0x148] sm:$0xff] }
  0x5a   :  { %427 = vmatmul.f32.vlgmr.msra.gmra.mxu2 %v9590_v26  ;;  %v4265_v26 = vld [vmem:[%s9576_s5 + $0x1c0] sm:$0xff]  ;;  %10226 = vst [vmem:[#allocation36_spill] sm:$0xff] %v4366_v2 }
  0x5b   :  { %10209 = vst [vmem:[#allocation19_spill] sm:$0xff] %v4265_v26  ;;  %602 = vmatpush.msra.mxu0 %v4265_v26  ;;  %v4301_v26 = vld [vmem:[%s9576_s5 + $0x1b0] sm:$0xff] }
  0x5c   :  { %10215 = vst [vmem:[#allocation25_spill] sm:$0xff] %v4301_v26  ;;  %643 = vmatpush.msrb.mxu2 %v4301_v26  ;;  %v4337_v26 = vld [vmem:[%s9576_s5 + $0x160] sm:$0xff] }
  0x5d   :  { %603 = vmatpush.msra.mxu0 %v4291_v27  ;;  %v4320_v27 = vld [vmem:[%s9576_s5 + $0x188] sm:$0xff]  ;;  %10221 = vst [vmem:[#allocation31_spill] sm:$0xff] %v4337_v26 }
  0x5e   :  { %10218 = vst [vmem:[#allocation28_spill] sm:$0xff] %v4320_v27  ;;  %624 = vmatpush.msra.mxu1 %v4320_v27  ;;  %644 = vmatpush.msrb.mxu2 %v4325_v13  ;;  %v4349_v27 = vld [vmem:[%s9576_s5 + $0x170] sm:$0xff] }
  0x5f   :  { %604 = vmatpush.msra.mxu0 %v4315_v16  ;;  %10223 = vst [vmem:[#allocation33_spill] sm:$0xff] %v4349_v27  ;;  %v4354_v16 = vld [vmem:[%s9576_s5 + $0x178] sm:$0xff]  ;;  %v4371_v13 = vld [vmem:[%s9576_s5 + $0x150] sm:$0xff] }
  0x60   :  { %10224 = vst [vmem:[#allocation34_spill] sm:$0xff] %v4354_v16  ;;  %625 = vmatpush.msra.mxu1 %v4342_v53  ;;  %645 = vmatpush.msrb.mxu2 %v4349_v27  ;;  %v4387_v53 = vld [vmem:[%s9576_s5 + $0x120] sm:$0xff]  ;;  %v4442_v27 = vld [vmem:[%s9576_s5 + $0xe8] sm:$0xff] }
  0x61   :  { %605 = vmatpush.msra.mxu0 %v4337_v26  ;;  %10227 = vst [vmem:[#allocation37_spill] sm:$0xff] %v4371_v13  ;;  %665 = vmatpush.msra.mxu3 %v4354_v16  ;;  %v4392_v26 = vld [vmem:[%s9576_s5 + $0x128] sm:$0xff]  ;;  %v4415_v16 = vld [vmem:[%s9576_s5 + $0x100] sm:$0xff] }
  0x62   :  { %626 = vmatpush.msra.mxu1 %v4366_v2  ;;  %646 = vmatpush.msrb.mxu2 %v4371_v13  ;;  %10229 = vst [vmem:[#allocation39_spill] sm:$0xff] %v4387_v53 }
  0x63   :  { %606 = vmatpush.msra.mxu0 %v4359_v20  ;;  %666 = vmatpush.msra.mxu3 %v4376_v9  ;;  %10230 = vst [vmem:[#allocation40_spill] sm:$0xff] %v4392_v26  ;;  %v4397_v20 = vld [vmem:[%s9576_s5 + $0x130] sm:$0xff]  ;;  %v4408_v9 = vld [vmem:[%s9576_s5 + $0x138] sm:$0xff] }
  0x64   :  { %10231 = vst [vmem:[#allocation41_spill] sm:$0xff] %v4397_v20  ;;  %627 = vmatpush.msra.mxu1 %v4392_v26  ;;  %647 = vmatpush.msrb.mxu2 %v4397_v20  ;;  %v4425_v26 = vld [vmem:[%s9576_s5 + $0x110] sm:$0xff]  ;;  %v4437_v20 = vld [vmem:[%s9576_s5 + $0xe0] sm:$0xff] }
  0x65   :  { %607 = vmatpush.msra.mxu0 %v4387_v53  ;;  %10232 = vst [vmem:[#allocation42_spill] sm:$0xff] %v4408_v9  ;;  %667 = vmatpush.msra.mxu3 %v4408_v9  ;;  %v4420_v53 = vld [vmem:[%s9576_s5 + $0x108] sm:$0xff]  ;;  %v4432_v9 = vld [vmem:[%s9576_s5 + $0x118] sm:$0xff] }
  0x66   :  { %10233 = vst [vmem:[#allocation43_spill] sm:$0xff] %v4415_v16  ;;  %628 = vmatpush.msra.mxu1 %v4420_v53  ;;  %648 = vmatpush.msrb.mxu2 %v4425_v26 }
  0x67   :  { %10234 = vst [vmem:[#allocation44_spill] sm:$0xff] %v4420_v53  ;;  %608 = vmatpush.msra.mxu0 %v4415_v16  ;;  %668 = vmatpush.msra.mxu3 %v4432_v9  ;;  %v4449_v53 = vld [vmem:[%s9576_s5 + $0xf0] sm:$0xff]  ;;  %v4454_v16 = vld [vmem:[%s9576_s5 + $0xf8] sm:$0xff] }
  0x68   :  { %10235 = vst [vmem:[#allocation45_spill] sm:$0xff] %v4425_v26  ;;  %629 = vmatpush.msra.mxu1 %v4442_v27  ;;  %v4471_v26 = vld [vmem:[%s9576_s5 + $0xd0] sm:$0xff]  ;;  %649 = vmatpush.msrb.mxu2 %v4449_v53 }
  0x69   :  { %10236 = vst [vmem:[#allocation46_spill] sm:$0xff] %v4432_v9  ;;  %609 = vmatpush.msra.mxu0 %v4437_v20  ;;  %v4466_v9 = vld [vmem:[%s9576_s5 + $0xc8] sm:$0xff]  ;;  %669 = vmatpush.msra.mxu3 %v4454_v16 }
  0x6a   :  { %10237 = vst [vmem:[#allocation47_spill] sm:$0xff] %v4437_v20  ;;  %630 = vmatpush.msra.mxu1 %v4466_v9  ;;  %650 = vmatpush.msrb.mxu2 %v4471_v26  ;;  %v4491_v20 = vld [vmem:[%s9576_s5 + $0xa0] sm:$0xff] }
  0x6b   :  { %10238 = vst [vmem:[#allocation48_spill] sm:$0xff] %v4442_v27  ;;  %610 = vmatpush.msra.mxu0 %v4459_v24  ;;  %670 = vmatpush.msra.mxu3 %v4476_v5  ;;  %v4510_v5 = vld [vmem:[%s9576_s5 + $0xb8] sm:$0xff] }
  0x6c   :  { %10239 = vst [vmem:[#allocation49_spill] sm:$0xff] %v4449_v53  ;;  %v4580_v53 = vld [vmem:[%s9576_s5 + $0x58] sm:$0xff] }
  0x6d   :  { %10240 = vst [vmem:[#allocation50_spill] sm:$0xff] %v4454_v16  ;;  %611 = vmatpush.msra.mxu0 %v4491_v20  ;;  %671 = vmatpush.msra.mxu3 %v4510_v5  ;;  %v4546_v16 = vld [vmem:[%s9576_s5 + $0x68] sm:$0xff] }
  0x6e   :  { %10242 = vst [vmem:[#allocation52_spill] sm:$0xff] %v4466_v9  ;;  %v4501_v9 = vld [vmem:[%s9576_s5 + $0xb0] sm:$0xff] }
  0x6f   :  { %10243 = vst [vmem:[#allocation53_spill] sm:$0xff] %v4471_v26  ;;  %651 = vmatpush.msrb.mxu2 %v4501_v9  ;;  %v4517_v26 = vld [vmem:[%s9576_s5 + $0x80] sm:$0xff] }
  0x70   :  { %10246 = vst [vmem:[#allocation56_spill] sm:$0xff] %v4491_v20  ;;  %612 = vmatpush.msra.mxu0 %v4517_v26 }
  0x71   :  { %10248 = vst [vmem:[#allocation58_spill] sm:$0xff] %v4501_v9  ;;  %v4541_v9 = vld [vmem:[%s9576_s5 + $0x60] sm:$0xff] }
  0x72   :  { %10250 = vst [vmem:[#allocation60_spill] sm:$0xff] %v4510_v5  ;;  %v4536_v5 = vld [vmem:[%s9576_s5 + $0x98] sm:$0xff]  ;;  %613 = vmatpush.msra.mxu0 %v4541_v9 }
  0x73   :  { %10251 = vst [vmem:[#allocation61_spill] sm:$0xff] %v4517_v26  ;;  %672 = vmatpush.msra.mxu3 %v4536_v5  ;;  %v4563_v26 = vld [vmem:[%s9576_s5 + $0x40] sm:$0xff] }
  0x74   :  { %10255 = vst [vmem:[#allocation65_spill] sm:$0xff] %v4536_v5  ;;  %v4570_v5 = vld [vmem:[%s9576_s5 + $0x48] sm:$0xff]  ;;  %614 = vmatpush.msra.mxu0 %v4563_v26 }
  0x75   :  { %10256 = vst [vmem:[#allocation66_spill] sm:$0xff] %v4541_v9  ;;  %v4595_v9 = vld [vmem:[%s9576_s5 + $0x20] sm:$0xff] }
  0x76   :  { %10257 = vst [vmem:[#allocation67_spill] sm:$0xff] %v4546_v16  ;;  %615 = vmatpush.msra.mxu0 %v4595_v9 }
  0x77   :  { %10260 = vst [vmem:[#allocation70_spill] sm:$0xff] %v4563_v26 }
  0x78   :  { %10261 = vst [vmem:[#allocation71_spill] sm:$0xff] %v4570_v5 }
  0x79   :  { %10263 = vst [vmem:[#allocation73_spill] sm:$0xff] %v4580_v53 }
  0x7a   :  { %10266 = vst [vmem:[#allocation76_spill] sm:$0xff] %v4595_v9  ;;  %v4648_v9 = vld [vmem:[%s9577_s4 + $0x1e8] sm:$0xff] }
  0x7b   :  { %10276 = vst [vmem:[#allocation86_spill] sm:$0xff] %v4648_v9 }
  0x87   :  { %v4399_v2 = vpop.f32.mrf.mxu0 }
  0x88   :  { %v4401_v13 = vpop.f32.mrf.mxu1 }
  0x8d   :  { %v4478_v14 = vpop.f32.mrf.mxu2 }
  0x8e   :  { %10245 = vst [vmem:[#allocation55_spill] sm:$0xff] %v4478_v14  ;;  %v4496_v14 = vld [vmem:[%s9576_s5 + $0xa8] sm:$0xff] }
  0x8f   :  { %v4484_v27 = vpop.f32.mrf.mxu3  ;;  %10247 = vst [vmem:[#allocation57_spill] sm:$0xff] %v4496_v14  ;;  %631 = vmatpush.msra.mxu1 %v4496_v14  ;;  %v4527_v14 = vld [vmem:[%s9576_s5 + $0x90] sm:$0xff]  ;;  %v4529_v20 = vpop.f32.mrf.mxu0 }
  0x90   :  { %v4503_v24 = vpop.f32.mrf.mxu1  ;;  %10253 = vst [vmem:[#allocation63_spill] sm:$0xff] %v4527_v14  ;;  %652 = vmatpush.msrb.mxu2 %v4527_v14  ;;  %v4575_v14 = vld [vmem:[%s9576_s5 + $0x50] sm:$0xff] }
  0x91   :  { %10249 = vst [vmem:[#allocation59_spill] sm:$0xff] %v4503_v24  ;;  %v4522_v24 = vld [vmem:[%s9576_s5 + $0x88] sm:$0xff] }
  0x92   :  { %10252 = vst [vmem:[#allocation62_spill] sm:$0xff] %v4522_v24  ;;  %632 = vmatpush.msra.mxu1 %v4522_v24  ;;  %v4558_v24 = vld [vmem:[%s9576_s5 + $0x78] sm:$0xff] }
  0x93   :  { %10254 = vst [vmem:[#allocation64_spill] sm:$0xff] %v4529_v20  ;;  %v4553_v20 = vld [vmem:[%s9576_s5 + $0x70] sm:$0xff]  ;;  %673 = vmatpush.msra.mxu3 %v4558_v24 }
  0x94   :  { %10258 = vst [vmem:[#allocation68_spill] sm:$0xff] %v4553_v20  ;;  %633 = vmatpush.msra.mxu1 %v4546_v16  ;;  %653 = vmatpush.msrb.mxu2 %v4553_v20 }
  0x95   :  { %10259 = vst [vmem:[#allocation69_spill] sm:$0xff] %v4558_v24  ;;  %v4582_v3 = vpop.f32.mrf.mxu2  ;;  %674 = vmatpush.msra.mxu3 %v4580_v53  ;;  %v4614_v53 = vld [vmem:[%s9576_s5 + $0x38] sm:$0xff]  ;;  %v4679_v24 = vld [vmem:[%s9577_s4 + $0x1d0] sm:$0xff] }
  0x96   :  { %10262 = vst [vmem:[#allocation72_spill] sm:$0xff] %v4575_v14  ;;  %634 = vmatpush.msra.mxu1 %v4570_v5  ;;  %654 = vmatpush.msrb.mxu2 %v4575_v14  ;;  %v4605_v5 = vld [vmem:[%s9576_s5 + $0x30] sm:$0xff]  ;;  %v4621_v14 = vld [vmem:[%s9576_s5] sm:$0xff] }
  0x97   :  { %10264 = vst [vmem:[#allocation74_spill] sm:$0xff] %v4582_v3  ;;  %v4588_v16 = vpop.f32.mrf.mxu3  ;;  %v4600_v3 = vld [vmem:[%s9576_s5 + $0x28] sm:$0xff]  ;;  %675 = vmatpush.msra.mxu3 %v4614_v53  ;;  %616 = vmatpush.msra.mxu0 %v4621_v14  ;;  %v4662_v26 = vpop.f32.mrf.mxu0 }
  0x98   :  { %10265 = vst [vmem:[#allocation75_spill] sm:$0xff] %v4588_v16  ;;  %v4607_v16 = vpop.f32.mrf.mxu1  ;;  %635 = vmatpush.msra.mxu1 %v4600_v3  ;;  %655 = vmatpush.msrb.mxu2 %v4605_v5 }
  0x99   :  { %10267 = vst [vmem:[#allocation77_spill] sm:$0xff] %v4600_v3  ;;  %v4631_v3 = vld [vmem:[%s9576_s5 + $0x10] sm:$0xff] }
  0x9a   :  { %10268 = vst [vmem:[#allocation78_spill] sm:$0xff] %v4605_v5  ;;  %v4643_v5 = vld [vmem:[%s9577_s4 + $0x1e0] sm:$0xff]  ;;  %656 = vmatpush.msrb.mxu2 %v4631_v3 }
  0x9b   :  { %10269 = vst [vmem:[#allocation79_spill] sm:$0xff] %v4607_v16  ;;  %v4626_v16 = vld [vmem:[%s9576_s5 + $0x8] sm:$0xff]  ;;  %681 = vmatpush.msrb.mxu0 %v4643_v5 }
  0x9c   :  { %10270 = vst [vmem:[#allocation80_spill] sm:$0xff] %v4614_v53  ;;  %636 = vmatpush.msra.mxu1 %v4626_v16  ;;  %v4638_v53 = vld [vmem:[%s9576_s5 + $0x18] sm:$0xff] }
  0x9d   :  { %10271 = vst [vmem:[#allocation81_spill] sm:$0xff] %v4621_v14  ;;  %676 = vmatpush.msra.mxu3 %v4638_v53  ;;  %v4660_v14 = vld [vmem:[%s9577_s4 + $0x1f8] sm:$0xff] }
  0x9e   :  { %10272 = vst [vmem:[#allocation82_spill] sm:$0xff] %v4626_v16  ;;  %v4655_v16 = vld [vmem:[%s9577_s4 + $0x1f0] sm:$0xff]  ;;  %701 = vmatpush.msrb.mxu1 %v4648_v9  ;;  %v4688_v9 = vld [vmem:[%s9577_s4 + $0x1d8] sm:$0xff] }
  0x9f   :  { %10273 = vst [vmem:[#allocation83_spill] sm:$0xff] %v4631_v3  ;;  %v4674_v3 = vld [vmem:[%s9577_s4 + $0x1c8] sm:$0xff]  ;;  %721 = vmatpush.msra.mxu2 %v4655_v16  ;;  %741 = vmatpush.msrb.mxu3 %v4660_v14  ;;  %v4707_v20 = vpop.f32.mrf.mxu3 }
  0xa0   :  { %10274 = vst [vmem:[#allocation84_spill] sm:$0xff] %v4638_v53  ;;  %v4669_v53 = vld [vmem:[%s9577_s4 + $0x1c0] sm:$0xff]  ;;  %702 = vmatpush.msrb.mxu1 %v4674_v3 }
  0xa1   :  { %10275 = vst [vmem:[#allocation85_spill] sm:$0xff] %v4643_v5  ;;  %682 = vmatpush.msrb.mxu0 %v4669_v53  ;;  %v4695_v5 = vld [vmem:[%s9577_s4 + $0x1a0] sm:$0xff]  ;;  %722 = vmatpush.msra.mxu2 %v4679_v24 }
  0xa2   :  { %10277 = vst [vmem:[#allocation87_spill] sm:$0xff] %v4655_v16  ;;  %v4700_v16 = vld [vmem:[%s9577_s4 + $0x1a8] sm:$0xff]  ;;  %742 = vmatpush.msrb.mxu3 %v4688_v9 }
  0xa3   :  { %10278 = vst [vmem:[#allocation88_spill] sm:$0xff] %v4660_v14  ;;  %v4705_v14 = vld [vmem:[%s9577_s4 + $0x1b0] sm:$0xff]  ;;  %683 = vmatpush.msrb.mxu0 %v4695_v5  ;;  %703 = vmatpush.msrb.mxu1 %v4700_v16 }
  0xa4   :  { %10279 = vst [vmem:[#allocation89_spill] sm:$0xff] %v4662_v26  ;;  %v4681_v26 = vpop.f32.mrf.mxu2  ;;  %723 = vmatpush.msra.mxu2 %v4705_v14 }
  0xa5   :  { %10280 = vst [vmem:[#allocation90_spill] sm:$0xff] %v4669_v53  ;;  %v4716_v53 = vpop.f32.mrf.mxu1 }
  0xa6   :  { %10281 = vst [vmem:[#allocation91_spill] sm:$0xff] %v4674_v3  ;;  %v4714_v3 = vld [vmem:[%s9577_s4 + $0x1b8] sm:$0xff] }
  0xa7   :  { %10282 = vst [vmem:[#allocation92_spill] sm:$0xff] %v4679_v24  ;;  %743 = vmatpush.msrb.mxu3 %v4714_v3  ;;  %v4799_v24 = vld [vmem:[%s9577_s4 + $0x120] sm:$0xff] }
  0xa8   :  { %10283 = vst [vmem:[#allocation93_spill] sm:$0xff] %v4681_v26  ;;  %v4723_v26 = vld [vmem:[%s9577_s4 + $0x180] sm:$0xff] }
  0xa9   :  { %10284 = vst [vmem:[#allocation94_spill] sm:$0xff] %v4688_v9  ;;  %v4733_v9 = vld [vmem:[%s9577_s4 + $0x190] sm:$0xff]  ;;  %684 = vmatpush.msrb.mxu0 %v4723_v26 }
  0xaa   :  { %10285 = vst [vmem:[#allocation95_spill] sm:$0xff] %v4695_v5  ;;  %724 = vmatpush.msra.mxu2 %v4733_v9 }
  0xab   :  { %10286 = vst [vmem:[#allocation96_spill] sm:$0xff] %v4700_v16  ;;  %v4747_v16 = vld [vmem:[%s9577_s4 + $0x160] sm:$0xff] }
  0xac   :  { %10287 = vst [vmem:[#allocation97_spill] sm:$0xff] %v4705_v14  ;;  %v4752_v14 = vld [vmem:[%s9577_s4 + $0x168] sm:$0xff]  ;;  %685 = vmatpush.msrb.mxu0 %v4747_v16  ;;  %v4783_v5 = vpop.f32.mrf.mxu2 }
  0xad   :  { %10288 = vst [vmem:[#allocation98_spill] sm:$0xff] %v4707_v20  ;;  %v4728_v20 = vld [vmem:[%s9577_s4 + $0x188] sm:$0xff] }
  0xae   :  { %10289 = vst [vmem:[#allocation99_spill] sm:$0xff] %v4714_v3  ;;  %704 = vmatpush.msrb.mxu1 %v4728_v20  ;;  %v4757_v3 = vld [vmem:[%s9577_s4 + $0x170] sm:$0xff] }
  0xaf   :  { %10290 = vst [vmem:[#allocation100_spill] sm:$0xff] %v4716_v53  ;;  %v4740_v53 = vld [vmem:[%s9577_s4 + $0x198] sm:$0xff]  ;;  %725 = vmatpush.msra.mxu2 %v4757_v3 }
  0xb0   :  { %10291 = vst [vmem:[#allocation101_spill] sm:$0xff] %v4723_v26  ;;  %744 = vmatpush.msrb.mxu3 %v4740_v53  ;;  %705 = vmatpush.msrb.mxu1 %v4752_v14  ;;  %v4771_v26 = vld [vmem:[%s9577_s4 + $0x140] sm:$0xff] }
  0xb1   :  { %10292 = vst [vmem:[#allocation102_spill] sm:$0xff] %v4728_v20  ;;  %v4764_v20 = vld [vmem:[%s9577_s4 + $0x178] sm:$0xff]  ;;  %686 = vmatpush.msrb.mxu0 %v4771_v26 }
  0xb2   :  { %10293 = vst [vmem:[#allocation103_spill] sm:$0xff] %v4733_v9  ;;  %v4776_v9 = vld [vmem:[%s9577_s4 + $0x148] sm:$0xff]  ;;  %745 = vmatpush.msrb.mxu3 %v4764_v20 }
  0xb3   :  { %10294 = vst [vmem:[#allocation104_spill] sm:$0xff] %v4740_v53  ;;  %v4781_v53 = vld [vmem:[%s9577_s4 + $0x150] sm:$0xff]  ;;  %706 = vmatpush.msrb.mxu1 %v4776_v9  ;;  %687 = vmatpush.msrb.mxu0 %v4799_v24 }
  0xb4   :  { %10295 = vst [vmem:[#allocation105_spill] sm:$0xff] %v4747_v16  ;;  %v4792_v16 = vpop.f32.mrf.mxu0  ;;  %726 = vmatpush.msra.mxu2 %v4781_v53 }
  0xb5   :  { %10296 = vst [vmem:[#allocation106_spill] sm:$0xff] %v4752_v14  ;;  %v4790_v14 = vld [vmem:[%s9577_s4 + $0x158] sm:$0xff] }
  0xb6   :  { %10297 = vst [vmem:[#allocation107_spill] sm:$0xff] %v4757_v3  ;;  %746 = vmatpush.msrb.mxu3 %v4790_v14  ;;  %v4827_v3 = vld [vmem:[%s9577_s4 + $0x100] sm:$0xff] }
  0xb7   :  { %10298 = vst [vmem:[#allocation108_spill] sm:$0xff] %v4764_v20  ;;  %v4809_v20 = vld [vmem:[%s9577_s4 + $0x130] sm:$0xff]  ;;  %688 = vmatpush.msrb.mxu0 %v4827_v3 }
  0xb8   :  { %10299 = vst [vmem:[#allocation109_spill] sm:$0xff] %v4771_v26  ;;  %v4820_v26 = vpop.f32.mrf.mxu1  ;;  %727 = vmatpush.msra.mxu2 %v4809_v20 }
  0xb9   :  { %10300 = vst [vmem:[#allocation110_spill] sm:$0xff] %v4776_v9  ;;  %v4818_v9 = vld [vmem:[%s9577_s4 + $0x138] sm:$0xff] }
  0xba   :  { %10301 = vst [vmem:[#allocation111_spill] sm:$0xff] %v4781_v53  ;;  %747 = vmatpush.msrb.mxu3 %v4818_v9 }
  0xbb   :  { %10302 = vst [vmem:[#allocation112_spill] sm:$0xff] %v4783_v5  ;;  %v4804_v5 = vld [vmem:[%s9577_s4 + $0x128] sm:$0xff] }
  0xbc   :  { %10303 = vst [vmem:[#allocation113_spill] sm:$0xff] %v4790_v14  ;;  %707 = vmatpush.msrb.mxu1 %v4804_v5  ;;  %v4837_v14 = vld [vmem:[%s9577_s4 + $0x110] sm:$0xff] }
  0xbd   :  { %10304 = vst [vmem:[#allocation114_spill] sm:$0xff] %v4792_v16  ;;  %v4811_v16 = vpop.f32.mrf.mxu3  ;;  %728 = vmatpush.msra.mxu2 %v4837_v14 }
  0xbe   :  { %10305 = vst [vmem:[#allocation115_spill] sm:$0xff] %v4799_v24  ;;  %v4887_v24 = vpop.f32.mrf.mxu2 }
  0xbf   :  { %10306 = vst [vmem:[#allocation116_spill] sm:$0xff] %v4804_v5  ;;  %v4851_v5 = vld [vmem:[%s9577_s4 + $0xe0] sm:$0xff] }
  0xc0   :  { %10307 = vst [vmem:[#allocation117_spill] sm:$0xff] %v4809_v20  ;;  %v4856_v20 = vld [vmem:[%s9577_s4 + $0xe8] sm:$0xff]  ;;  %689 = vmatpush.msrb.mxu0 %v4851_v5  ;;  %v4924_v53 = vpop.f32.mrf.mxu1 }
  0xc1   :  { %10308 = vst [vmem:[#allocation118_spill] sm:$0xff] %v4811_v16  ;;  %v4832_v16 = vld [vmem:[%s9577_s4 + $0x108] sm:$0xff] }
  0xc2   :  { %10309 = vst [vmem:[#allocation119_spill] sm:$0xff] %v4818_v9  ;;  %708 = vmatpush.msrb.mxu1 %v4832_v16  ;;  %v4861_v9 = vld [vmem:[%s9577_s4 + $0xf0] sm:$0xff] }
  0xc3   :  { %10310 = vst [vmem:[#allocation120_spill] sm:$0xff] %v4820_v26  ;;  %v4844_v26 = vld [vmem:[%s9577_s4 + $0x118] sm:$0xff]  ;;  %729 = vmatpush.msra.mxu2 %v4861_v9 }
  0xc4   :  { %10311 = vst [vmem:[#allocation121_spill] sm:$0xff] %v4827_v3  ;;  %748 = vmatpush.msrb.mxu3 %v4844_v26  ;;  %709 = vmatpush.msrb.mxu1 %v4856_v20  ;;  %v4875_v3 = vld [vmem:[%s9577_s4 + $0xc0] sm:$0xff] }
  0xc5   :  { %10312 = vst [vmem:[#allocation122_spill] sm:$0xff] %v4832_v16  ;;  %v4868_v16 = vld [vmem:[%s9577_s4 + $0xf8] sm:$0xff]  ;;  %690 = vmatpush.msrb.mxu0 %v4875_v3 }
  0xc6   :  { %10313 = vst [vmem:[#allocation123_spill] sm:$0xff] %v4837_v14  ;;  %v4880_v14 = vld [vmem:[%s9577_s4 + $0xc8] sm:$0xff]  ;;  %749 = vmatpush.msrb.mxu3 %v4868_v16 }
  0xc7   :  { %10314 = vst [vmem:[#allocation124_spill] sm:$0xff] %v4844_v26  ;;  %v4885_v26 = vld [vmem:[%s9577_s4 + $0xd0] sm:$0xff]  ;;  %710 = vmatpush.msrb.mxu1 %v4880_v14 }
  0xc8   :  { %10315 = vst [vmem:[#allocation125_spill] sm:$0xff] %v4851_v5  ;;  %v4901_v5 = vld [vmem:[%s9577_s4 + $0xa0] sm:$0xff]  ;;  %730 = vmatpush.msra.mxu2 %v4885_v26 }
  0xc9   :  { %10316 = vst [vmem:[#allocation126_spill] sm:$0xff] %v4856_v20  ;;  %v4894_v20 = vld [vmem:[%s9577_s4 + $0xd8] sm:$0xff]  ;;  %691 = vmatpush.msrb.mxu0 %v4901_v5 }
  0xca   :  { %10317 = vst [vmem:[#allocation127_spill] sm:$0xff] %v4861_v9  ;;  %v4913_v9 = vpop.f32.mrf.mxu3  ;;  %750 = vmatpush.msrb.mxu3 %v4894_v20 }
  0xcb   :  { %10318 = vst [vmem:[#allocation128_spill] sm:$0xff] %v4868_v16  ;;  %v4911_v16 = vld [vmem:[%s9577_s4 + $0xb0] sm:$0xff] }
  0xcc   :  { %10319 = vst [vmem:[#allocation129_spill] sm:$0xff] %v4875_v3  ;;  %v4922_v3 = vpop.f32.mrf.mxu0  ;;  %731 = vmatpush.msra.mxu2 %v4911_v16 }
  0xcd   :  { %10320 = vst [vmem:[#allocation130_spill] sm:$0xff] %v4880_v14  ;;  %v4920_v14 = vld [vmem:[%s9577_s4 + $0xb8] sm:$0xff] }
  0xce   :  { %10321 = vst [vmem:[#allocation131_spill] sm:$0xff] %v4885_v26  ;;  %751 = vmatpush.msrb.mxu3 %v4920_v14  ;;  %v5033_v26 = vld [vmem:[%s9577_s4] sm:$0xff] }
  0xcf   :  { %10322 = vst [vmem:[#allocation132_spill] sm:$0xff] %v4887_v24  ;;  %v4906_v24 = vld [vmem:[%s9577_s4 + $0xa8] sm:$0xff] }
  0xd0   :  { %10323 = vst [vmem:[#allocation133_spill] sm:$0xff] %v4894_v20  ;;  %711 = vmatpush.msrb.mxu1 %v4906_v24  ;;  %v4936_v20 = vld [vmem:[%s9577_s4 + $0x88] sm:$0xff] }
  0xd1   :  { %10324 = vst [vmem:[#allocation134_spill] sm:$0xff] %v4901_v5  ;;  %v4991_v5 = vpop.f32.mrf.mxu2 }
  0xd2   :  { %10325 = vst [vmem:[#allocation135_spill] sm:$0xff] %v4906_v24  ;;  %712 = vmatpush.msrb.mxu1 %v4936_v20  ;;  %v4955_v24 = vld [vmem:[%s9577_s4 + $0x60] sm:$0xff] }
  0xd3   :  { %10326 = vst [vmem:[#allocation136_spill] sm:$0xff] %v4911_v16  ;;  %v4960_v16 = vld [vmem:[%s9577_s4 + $0x68] sm:$0xff] }
  0xd4   :  { %10327 = vst [vmem:[#allocation137_spill] sm:$0xff] %v4913_v9  ;;  %v4931_v9 = vld [vmem:[%s9577_s4 + $0x80] sm:$0xff]  ;;  %713 = vmatpush.msrb.mxu1 %v4960_v16 }
  0xd5   :  { %10328 = vst [vmem:[#allocation138_spill] sm:$0xff] %v4920_v14  ;;  %692 = vmatpush.msrb.mxu0 %v4931_v9  ;;  %v4965_v14 = vld [vmem:[%s9577_s4 + $0x70] sm:$0xff] }
  0xd6   :  { %10329 = vst [vmem:[#allocation139_spill] sm:$0xff] %v4922_v3  ;;  %v4941_v3 = vld [vmem:[%s9577_s4 + $0x90] sm:$0xff] }
  0xd7   :  { %10330 = vst [vmem:[#allocation140_spill] sm:$0xff] %v4924_v53  ;;  %v4948_v53 = vld [vmem:[%s9577_s4 + $0x98] sm:$0xff]  ;;  %732 = vmatpush.msra.mxu2 %v4941_v3  ;;  %693 = vmatpush.msrb.mxu0 %v4955_v24 }
  0xd8   :  { %10331 = vst [vmem:[#allocation141_spill] sm:$0xff] %v4931_v9  ;;  %752 = vmatpush.msrb.mxu3 %v4948_v53  ;;  %v4979_v9 = vld [vmem:[%s9577_s4 + $0x40] sm:$0xff] }
  0xd9   :  { %10332 = vst [vmem:[#allocation142_spill] sm:$0xff] %v4936_v20  ;;  %v4972_v20 = vld [vmem:[%s9577_s4 + $0x78] sm:$0xff]  ;;  %733 = vmatpush.msra.mxu2 %v4965_v14  ;;  %694 = vmatpush.msrb.mxu0 %v4979_v9 }
  0xda   :  { %10333 = vst [vmem:[#allocation143_spill] sm:$0xff] %v4941_v3  ;;  %v4984_v3 = vld [vmem:[%s9577_s4 + $0x48] sm:$0xff]  ;;  %753 = vmatpush.msrb.mxu3 %v4972_v20 }
  0xdb   :  { %10334 = vst [vmem:[#allocation144_spill] sm:$0xff] %v4948_v53  ;;  %v4989_v53 = vld [vmem:[%s9577_s4 + $0x50] sm:$0xff]  ;;  %714 = vmatpush.msrb.mxu1 %v4984_v3 }
  0xdc   :  { %10335 = vst [vmem:[#allocation145_spill] sm:$0xff] %v4955_v24  ;;  %v5005_v24 = vld [vmem:[%s9577_s4 + $0x20] sm:$0xff]  ;;  %734 = vmatpush.msra.mxu2 %v4989_v53 }
  0xdd   :  { %10336 = vst [vmem:[#allocation146_spill] sm:$0xff] %v4960_v16  ;;  %v4998_v16 = vld [vmem:[%s9577_s4 + $0x58] sm:$0xff]  ;;  %695 = vmatpush.msrb.mxu0 %v5005_v24 }
  0xde   :  { %10337 = vst [vmem:[#allocation147_spill] sm:$0xff] %v4965_v14  ;;  %v5017_v14 = vpop.f32.mrf.mxu3  ;;  %754 = vmatpush.msrb.mxu3 %v4998_v16 }
  0xdf   :  { %10338 = vst [vmem:[#allocation148_spill] sm:$0xff] %v4972_v20  ;;  %v5015_v20 = vld [vmem:[%s9577_s4 + $0x30] sm:$0xff]  ;;  %696 = vmatpush.msrb.mxu0 %v5033_v26 }
  0xe0   :  { %10339 = vst [vmem:[#allocation149_spill] sm:$0xff] %v4979_v9  ;;  %v5026_v9 = vpop.f32.mrf.mxu1  ;;  %735 = vmatpush.msra.mxu2 %v5015_v20 }
  0xe1   :  { %10340 = vst [vmem:[#allocation150_spill] sm:$0xff] %v4984_v3  ;;  %v5024_v3 = vld [vmem:[%s9577_s4 + $0x38] sm:$0xff] }
  0xe2   :  { %10341 = vst [vmem:[#allocation151_spill] sm:$0xff] %v4991_v5  ;;  %v5010_v5 = vld [vmem:[%s9577_s4 + $0x28] sm:$0xff]  ;;  %755 = vmatpush.msrb.mxu3 %v5024_v3 }
  0xe3   :  { %10342 = vst [vmem:[#allocation152_spill] sm:$0xff] %v4998_v16  ;;  %715 = vmatpush.msrb.mxu1 %v5010_v5  ;;  %v5043_v16 = vld [vmem:[%s9577_s4 + $0x10] sm:$0xff] }
  0xe4   :  { %10343 = vst [vmem:[#allocation153_spill] sm:$0xff] %v5005_v24  ;;  %736 = vmatpush.msra.mxu2 %v5043_v16  ;;  %v10350_v24 = vmov 0.0  }
  0xe5   :  { %10344 = vst [vmem:[#allocation154_spill] sm:$0xff] %v5010_v5  ;;  %v5052_v5 = vpop.f32.mrf.mxu0  ;;  %617 = vmatmul.f32.vlgmr.msra.gmra.mxu0 %v10350_v24  ;;  %637 = vmatmul.f32.vlgmr.msra.gmra.mxu1 %v10350_v24 }
  0xe6   :  { %10345 = vst [vmem:[#allocation155_spill] sm:$0xff] %v5017_v14  ;;  %v5038_v14 = vld [vmem:[%s9577_s4 + $0x8] sm:$0xff]  ;;  %657 = vmatmul.f32.vlgmr.msrb.gmra.mxu2 %v10350_v24  ;;  %677 = vmatmul.f32.vlgmr.msra.gmra.mxu3 %v10350_v24 }
  0xe7   :  { %10346 = vst [vmem:[#allocation156_spill] sm:$0xff] %v5024_v3  ;;  %716 = vmatpush.msrb.mxu1 %v5038_v14  ;;  %v5060_v3 = vpop.f32.mrf.mxu2  ;;  %787 = vmatpush.msra.mxu0 %v3788_v19  ;;  %v10372_v24 = vld [vmem:[#allocation16_spill] sm:$0xff] }
  0xe8   :  { %10347 = vst [vmem:[#allocation157_spill] sm:$0xff] %v5026_v9  ;;  %v5050_v9 = vld [vmem:[%s9577_s4 + $0x18] sm:$0xff]  ;;  %827 = vmatpush.msrb.mxu2 %v3836_v28 }
  0xe9   :  { %10348 = vst [vmem:[#allocation158_spill] sm:$0xff] %v5050_v9  ;;  %756 = vmatpush.msrb.mxu3 %v5050_v9  ;;  %807 = vmatpush.msra.mxu1 %v3764_v15  ;;  %v5073_v9 = vld [vmem:[%s9578_s3] sm:$0xf] }
  0xea   :  { %10349 = vst [vmem:[#allocation159_spill] sm:$0xff] %v5052_v5  ;;  %v5066_v5 = vpop.f32.mrf.mxu3  ;;  %788 = vmatpush.msra.mxu0 %v3805_v22  ;;  %828 = vmatpush.msrb.mxu2 %v3853_v30  ;;  %v5084_v15 = vperm.slane %v5073_v9, 0  ;;  %v5114_v30 = vperm.slane %v5073_v9, 3 }
  0xeb   :  { %10351 = vst [vmem:[#allocation160_spill] sm:$0xff] %v5060_v3  ;;  %847 = vmatpush.msra.mxu3 %v3776_v17  ;;  %v5075_v3 = vpop.f32.mrf.mxu1  ;;  %808 = vmatpush.msra.mxu1 %v3783_v18  ;;  %v5087_v17 = vperm.slane %v5073_v9, 1 }
  0xec   :  { %10352 = vst [vmem:[#allocation161_spill] sm:$0xff] %v5066_v5  ;;  %789 = vmatpush.msra.mxu0 %v3844_v29  ;;  %829 = vmatpush.msrb.mxu2 %v3879_v34  ;;  %v115_v18 = vadd.f32 %v4399_v2, %v5084_v15  ;;  %v238_v34 = vadd.f32 %v4484_v27, %v5114_v30  ;;  %v10374_v2 = vld [vmem:[#allocation18_spill] sm:$0xff]  ;;  %v10376_v27 = vld [vmem:[#allocation20_spill] sm:$0xff] }
  0xed   :  { %10353 = vst [vmem:[#allocation162_spill] sm:$0xff] %v5075_v3  ;;  %848 = vmatpush.msra.mxu3 %v3799_v21  ;;  %809 = vmatpush.msra.mxu1 %v3810_v23  ;;  %v388_v19 = vpop.f32.mrf.mxu0  ;;  %v156_v22 = vadd.f32 %v4401_v13, %v5087_v17  ;;  %v10375_v13 = vld [vmem:[#allocation19_spill] sm:$0xff]  ;;  %v5629_v3 = vld [vmem:[%s9575_s2 + $0x68] sm:$0xff]  ;;  %v5641_v5 = vld [vmem:[%s9575_s2 + $0x78] sm:$0xff] }
  0xee   :  { %790 = vmatpush.msra.mxu0 %v3866_v32  ;;  %830 = vmatpush.msrb.mxu2 %v3903_v38  ;;  %v451_v23 = vadd.f32 %v388_v19, %v115_v18  ;;  %v10377_v19 = vld [vmem:[#allocation21_spill] sm:$0xff]  ;;  %v10378_v18 = vld [vmem:[#allocation22_spill] sm:$0xff]  ;;  %10512 = vst [vmem:[#allocation16_spill] sm:$0xff] %v5629_v3 }
  0xef   :  { %849 = vmatpush.msra.mxu3 %v3820_v25  ;;  %810 = vmatpush.msra.mxu1 %v3858_v31  ;;  %v5095_v21 = vpop.f32.mrf.mxu2  ;;  %10514 = vst [vmem:[#allocation18_spill] sm:$0xff] %v5641_v5 }
  0xf0   :  { %10354 = vst [vmem:[#allocation163_spill] sm:$0xff] %v5095_v21  ;;  %791 = vmatpush.msra.mxu0 %v3891_v36  ;;  %831 = vmatpush.msrb.mxu2 %v3929_v42  ;;  %v455_v31 = vmul.f32 0.5, %v451_v23  ;;  %v5149_v42 = vperm.slane %v5073_v9, 2  ;;  %v10380_v23 = vld [vmem:[#allocation24_spill] sm:$0xff]  ;;  %v5647_v21 = vld [vmem:[%s9575_s2 + $0x40] sm:$0xff] }
  0xf1   :  { %850 = vmatpush.msra.mxu3 %v3871_v33  ;;  %811 = vmatpush.msra.mxu1 %v3884_v35  ;;  %10515 = vst [vmem:[#allocation19_spill] sm:$0xff] %v5647_v21 }
  0xf2   :  { %v5103_v25 = vpop.f32.mrf.mxu3  ;;  %792 = vmatpush.msra.mxu0 %v3921_v41  ;;  %832 = vmatpush.msrb.mxu2 %v3956_v46  ;;  %v10360_v46 = vld [vmem:[#allocation12_spill] sm:$0xff] }
  0xf3   :  { %10355 = vst [vmem:[#allocation164_spill] sm:$0xff] %v5103_v25  ;;  %851 = vmatpush.msra.mxu3 %v3896_v37  ;;  %v408_v28 = vpop.f32.mrf.mxu1  ;;  %812 = vmatpush.msra.mxu1 %v3908_v39  ;;  %v5623_v25 = vld [vmem:[%s9575_s2 + $0x60] sm:$0xff] }
  0xf4   :  { %v452_v29 = vadd.f32 %v408_v28, %v156_v22  ;;  %793 = vmatpush.msra.mxu0 %v3938_v43  ;;  %833 = vmatpush.msrb.mxu2 %v3981_v50  ;;  %v10363_v50 = vld [vmem:[#allocation8_spill] sm:$0xff]  ;;  %v10379_v22 = vld [vmem:[#allocation23_spill] sm:$0xff]  ;;  %v10381_v28 = vld [vmem:[#allocation25_spill] sm:$0xff] }
  0xf5   :  { %852 = vmatpush.msra.mxu3 %v3943_v44  ;;  %813 = vmatpush.msra.mxu1 %v3951_v45  ;;  %v10358_v44 = vld [vmem:[#allocation3_spill] sm:$0xff]  ;;  %v10359_v45 = vld [vmem:[#allocation6_spill] sm:$0xff] }
  0xf6   :  { %v456_v32 = vmul.f32 0.5, %v452_v29  ;;  %794 = vmatpush.msra.mxu0 %v3963_v47  ;;  %834 = vmatpush.msrb.mxu2 %v4036_v58  ;;  %v10361_v47 = vld [vmem:[#allocation7_spill] sm:$0xff]  ;;  %v10367_v58 = vld [vmem:[#allocation5_spill] sm:$0xff]  ;;  %v10382_v29 = vld [vmem:[#allocation26_spill] sm:$0xff] }
  0xf7   :  { %853 = vmatpush.msra.mxu3 %v3969_v48  ;;  %814 = vmatpush.msra.mxu1 %v3976_v49  ;;  %v5120_v33 = vpop.f32.mrf.mxu2  ;;  %v10362_v49 = vld [vmem:[#allocation4_spill] sm:$0xff] }
  0xf8   :  { %2915 = vtanh.f32 %v456_v32  ;;  %10356 = vst [vmem:[#allocation165_spill] sm:$0xff] %v5120_v33  ;;  %795 = vmatpush.msra.mxu0 %v3986_v51  ;;  %835 = vmatpush.msrb.mxu2 %v4061_v62  ;;  %v10370_v62 = vld [vmem:[#allocation11_spill] sm:$0xff]  ;;  %v10384_v32 = vld [vmem:[#allocation28_spill] sm:$0xff]  ;;  %v5635_v33 = vld [vmem:[%s9575_s2 + $0x70] sm:$0xff] }
  0xf9   :  { %854 = vmatpush.msra.mxu3 %v3993_v52  ;;  %815 = vmatpush.msra.mxu1 %v4014_v55  ;;  %2917 = vtanh.f32 %v455_v31  ;;  %v10364_v52 = vld [vmem:[#allocation13_spill] sm:$0xff]  ;;  %v10383_v31 = vld [vmem:[#allocation27_spill] sm:$0xff] }
  0xfa   :  { %v448_v35 = vpop.f32.mrf.mxu3  ;;  %796 = vmatpush.msra.mxu0 %v4005_v54  ;;  %836 = vmatpush.msrb.mxu2 %v4097_v4  ;;  %v10365_v54 = vld [vmem:[#allocation9_spill] sm:$0xff] }
  0xfb   :  { %855 = vmatpush.msra.mxu3 %v4028_v57  ;;  %816 = vmatpush.msra.mxu1 %v4041_v59  ;;  %v454_v36 = vadd.f32 %v448_v35, %v238_v34  ;;  %v10366_v55 = vld [vmem:[#allocation93_spill] sm:$0xff]  ;;  %v10368_v59 = vld [vmem:[#allocation10_spill] sm:$0xff] }
  0xfc   :  { %797 = vmatpush.msra.mxu0 %v4023_v56  ;;  %837 = vmatpush.msrb.mxu2 %v4122_v8  ;;  %v197_v56 = vadd.f32 %v10366_v55, %v5149_v42  ;;  %v10385_v34 = vld [vmem:[#allocation29_spill] sm:$0xff]  ;;  %v10386_v35 = vld [vmem:[#allocation30_spill] sm:$0xff] }
  0xfd   :  { %856 = vmatpush.msra.mxu3 %v4054_v61  ;;  %817 = vmatpush.msra.mxu1 %v4066_v63  ;;  %2919 = vtanh.f32 %v454_v36  ;;  %v10369_v61 = vld [vmem:[#allocation14_spill] sm:$0xff]  ;;  %v10387_v36 = vld [vmem:[#allocation31_spill] sm:$0xff] }
  0xfe   :  { %v2916_v37 = vpop.eup %2915  ;;  %798 = vmatpush.msra.mxu0 %v4048_v60  ;;  %838 = vmatpush.msrb.mxu2 %v4146_v12  ;;  %v10371_v12 = vld [vmem:[#allocation15_spill] sm:$0xff]  ;;  %v10402_v55 = vld [vmem:[#allocation46_spill] sm:$0xff] }
  0xff   :  { %857 = vmatpush.msra.mxu3 %v4078_v1  ;;  %818 = vmatpush.msra.mxu1 %v4110_v6  ;;  %v2918_v38 = vpop.eup %2917  ;;  %v5140_v39 = vpop.f32.mrf.mxu2  ;;  %v462_v41 = vmul.f32 0.5, %v2916_v37  ;;  %v10388_v37 = vld [vmem:[#allocation32_spill] sm:$0xff]  ;;  %10511 = vst [vmem:[#allocation15_spill] sm:$0xff] %v5623_v25 }
 0x100   :  { %10357 = vst [vmem:[#allocation166_spill] sm:$0xff] %v5140_v39  ;;  %799 = vmatpush.msra.mxu0 %v4071_v0  ;;  %839 = vmatpush.msrb.mxu2 %v4184_v40  ;;  %v461_v43 = vmul.f32 0.5, %v2918_v38  ;;  %v10373_v40 = vld [vmem:[#allocation17_spill] sm:$0xff]  ;;  %v5617_v39 = vld [vmem:[%s9575_s2 + $0x98] sm:$0xff] }
 0x101   :  { %858 = vmatpush.msra.mxu3 %v4117_v7  ;;  %819 = vmatpush.msra.mxu1 %v4134_v10  ;;  %v465_v48 = vadd.f32 0.5, %v462_v41  ;;  %v10389_v38 = vld [vmem:[#allocation33_spill] sm:$0xff]  ;;  %v10390_v41 = vld [vmem:[#allocation34_spill] sm:$0xff]  ;;  %10510 = vst [vmem:[#allocation11_spill] sm:$0xff] %v5617_v39 }
 0x102   :  { %800 = vmatpush.msra.mxu0 %v10358_v44  ;;  %840 = vmatpush.msrb.mxu2 %v10360_v46  ;;  %v464_v57 = vadd.f32 0.5, %v461_v43  ;;  %v10391_v43 = vld [vmem:[#allocation35_spill] sm:$0xff]  ;;  %v10392_v44 = vld [vmem:[#allocation36_spill] sm:$0xff]  ;;  %v10394_v46 = vld [vmem:[#allocation38_spill] sm:$0xff]  ;;  %10513 = vst [vmem:[#allocation17_spill] sm:$0xff] %v5635_v33 }
 0x103   :  { %859 = vmatpush.msra.mxu3 %v4141_v11  ;;  %820 = vmatpush.msra.mxu1 %v10359_v45  ;;  %v2920_v51 = vpop.eup %2919  ;;  %v468_v63 = vmul.f32 0.0, %v465_v48  ;;  %v10393_v45 = vld [vmem:[#allocation37_spill] sm:$0xff]  ;;  %v10396_v48 = vld [vmem:[#allocation40_spill] sm:$0xff] }
 0x104   :  { %801 = vmatpush.msra.mxu0 %v10362_v49  ;;  %841 = vmatpush.msrb.mxu2 %v10364_v52  ;;  %v469_v0 = vmul.f32 %v2920_v51, %v464_v57  ;;  %v10397_v49 = vld [vmem:[#allocation41_spill] sm:$0xff]  ;;  %v10399_v51 = vld [vmem:[#allocation43_spill] sm:$0xff]  ;;  %v10400_v52 = vld [vmem:[#allocation44_spill] sm:$0xff] }
 0x105   :  { %860 = vmatpush.msra.mxu3 %v10361_v47  ;;  %821 = vmatpush.msra.mxu1 %v10363_v50  ;;  %v10395_v47 = vld [vmem:[#allocation39_spill] sm:$0xff]  ;;  %v10398_v50 = vld [vmem:[#allocation42_spill] sm:$0xff]  ;;  %v10404_v57 = vld [vmem:[#allocation48_spill] sm:$0xff] }
 0x106   :  { %802 = vmatpush.msra.mxu0 %v10367_v58  ;;  %842 = vmatpush.msrb.mxu2 %v10369_v61  ;;  %v5165_v6 = vadd.f32 %v469_v0, %v468_v63  ;;  %v10405_v58 = vld [vmem:[#allocation49_spill] sm:$0xff]  ;;  %v10408_v61 = vld [vmem:[#allocation52_spill] sm:$0xff]  ;;  %v10410_v63 = vld [vmem:[#allocation54_spill] sm:$0xff] }
 0x107   :  { %861 = vmatpush.msra.mxu3 %v10365_v54  ;;  %822 = vmatpush.msra.mxu1 %v10368_v59  ;;  %v428_v60 = vpop.f32.mrf.mxu2  ;;  %v10401_v54 = vld [vmem:[#allocation45_spill] sm:$0xff]  ;;  %v10406_v59 = vld [vmem:[#allocation50_spill] sm:$0xff]  ;;  %v10411_v0 = vld [vmem:[#allocation56_spill] sm:$0xff] }
 0x108   :  { %v453_v1 = vadd.f32 %v428_v60, %v197_v56  ;;  %v10403_v56 = vld [vmem:[#allocation47_spill] sm:$0xff] }
 0x109   :  { %862 = vmatpush.msra.mxu3 %v10370_v62  ;;  %v10407_v60 = vld [vmem:[#allocation51_spill] sm:$0xff]  ;;  %v10409_v62 = vld [vmem:[#allocation53_spill] sm:$0xff] }
 0x10a   :  { %v457_v4 = vmul.f32 0.5, %v453_v1  ;;  %v10412_v1 = vld [vmem:[#allocation57_spill] sm:$0xff] }
 0x10c   :  { %2921 = vtanh.f32 %v457_v4  ;;  %v10413_v4 = vld [vmem:[#allocation58_spill] sm:$0xff] }
 0x10d   :  { %2923 = vtanh.f32 %v5165_v6 }
 0x112   :  { %v2922_v7 = vpop.eup %2921 }
 0x113   :  { %v463_v8 = vmul.f32 0.5, %v2922_v7  ;;  %v2924_v10 = vpop.eup %2923  ;;  %v10414_v7 = vld [vmem:[#allocation60_spill] sm:$0xff] }
 0x115   :  { %v466_v9 = vadd.f32 0.5, %v463_v8  ;;  %v10415_v8 = vld [vmem:[#allocation61_spill] sm:$0xff] }
 0x117   :  { %v472_v11 = vmul.f32 %v2924_v10, %v466_v9  ;;  %v10416_v9 = vld [vmem:[#allocation62_spill] sm:$0xff]  ;;  %v10417_v10 = vld [vmem:[#allocation63_spill] sm:$0xff] }
 0x119   :  { %697 = vmatmul.f32.vlgmr.msrb.gmra.mxu0 %v472_v11  ;;  %717 = vmatmul.f32.vlgmr.msrb.gmra.mxu1 %v472_v11 }
 0x11a   :  { %737 = vmatmul.f32.vlgmr.msra.gmra.mxu2 %v472_v11  ;;  %757 = vmatmul.f32.vlgmr.msrb.gmra.mxu3 %v472_v11 }
 0x11b   :  { %889 = vmatpush.msrb.mxu0 %v10371_v12  ;;  %909 = vmatpush.msrb.mxu1 %v10372_v24  ;;  %v10419_v12 = vld [vmem:[#allocation66_spill] sm:$0xff]  ;;  %v10420_v24 = vld [vmem:[#allocation67_spill] sm:$0xff] }
 0x11c   :  { %929 = vmatpush.msra.mxu2 %v10373_v40  ;;  %949 = vmatpush.msrb.mxu3 %v10374_v2  ;;  %v10421_v40 = vld [vmem:[#allocation68_spill] sm:$0xff]  ;;  %v10422_v2 = vld [vmem:[#allocation69_spill] sm:$0xff] }
 0x11d   :  { %890 = vmatpush.msrb.mxu0 %v10375_v13  ;;  %910 = vmatpush.msrb.mxu1 %v10376_v27  ;;  %v10423_v13 = vld [vmem:[#allocation70_spill] sm:$0xff]  ;;  %v10424_v27 = vld [vmem:[#allocation71_spill] sm:$0xff] }
 0x11e   :  { %930 = vmatpush.msra.mxu2 %v10377_v19  ;;  %950 = vmatpush.msrb.mxu3 %v10378_v18  ;;  %v10425_v19 = vld [vmem:[#allocation72_spill] sm:$0xff]  ;;  %v10426_v18 = vld [vmem:[#allocation73_spill] sm:$0xff] }
 0x11f   :  { %891 = vmatpush.msrb.mxu0 %v10379_v22  ;;  %911 = vmatpush.msrb.mxu1 %v10380_v23  ;;  %v10427_v22 = vld [vmem:[#allocation76_spill] sm:$0xff]  ;;  %v10428_v23 = vld [vmem:[#allocation77_spill] sm:$0xff] }
 0x120   :  { %931 = vmatpush.msra.mxu2 %v10381_v28  ;;  %951 = vmatpush.msrb.mxu3 %v10382_v29  ;;  %v10429_v28 = vld [vmem:[#allocation78_spill] sm:$0xff]  ;;  %v10430_v29 = vld [vmem:[#allocation80_spill] sm:$0xff] }
 0x121   :  { %803 = vmatmul.f32.vlgmr.msra.gmra.mxu0 %v472_v11  ;;  %823 = vmatmul.f32.vlgmr.msra.gmra.mxu1 %v472_v11 }
 0x122   :  { %843 = vmatmul.f32.vlgmr.msrb.gmra.mxu2 %v472_v11  ;;  %863 = vmatmul.f32.vlgmr.msra.gmra.mxu3 %v472_v11  ;;  %v10418_v11 = vld [vmem:[#allocation65_spill] sm:$0xff] }
 0x123   :  { %892 = vmatpush.msrb.mxu0 %v10383_v31  ;;  %912 = vmatpush.msrb.mxu1 %v10384_v32  ;;  %v10431_v31 = vld [vmem:[#allocation81_spill] sm:$0xff]  ;;  %v10432_v32 = vld [vmem:[#allocation82_spill] sm:$0xff] }
 0x124   :  { %932 = vmatpush.msra.mxu2 %v10385_v34  ;;  %952 = vmatpush.msrb.mxu3 %v10386_v35  ;;  %v10433_v34 = vld [vmem:[#allocation83_spill] sm:$0xff]  ;;  %v10434_v35 = vld [vmem:[#allocation84_spill] sm:$0xff] }
 0x125   :  { %893 = vmatpush.msrb.mxu0 %v10387_v36  ;;  %913 = vmatpush.msrb.mxu1 %v10388_v37  ;;  %v10435_v36 = vld [vmem:[#allocation85_spill] sm:$0xff]  ;;  %v10436_v37 = vld [vmem:[#allocation86_spill] sm:$0xff] }
 0x126   :  { %933 = vmatpush.msra.mxu2 %v10389_v38  ;;  %953 = vmatpush.msrb.mxu3 %v10390_v41  ;;  %v10437_v38 = vld [vmem:[#allocation87_spill] sm:$0xff]  ;;  %v10438_v41 = vld [vmem:[#allocation88_spill] sm:$0xff] }
 0x127   :  { %894 = vmatpush.msrb.mxu0 %v10391_v43  ;;  %914 = vmatpush.msrb.mxu1 %v10392_v44  ;;  %v10439_v43 = vld [vmem:[#allocation90_spill] sm:$0xff]  ;;  %v10440_v44 = vld [vmem:[#allocation91_spill] sm:$0xff] }
 0x128   :  { %934 = vmatpush.msra.mxu2 %v10393_v45  ;;  %954 = vmatpush.msrb.mxu3 %v10394_v46  ;;  %v10441_v45 = vld [vmem:[#allocation92_spill] sm:$0xff]  ;;  %v10442_v46 = vld [vmem:[#allocation94_spill] sm:$0xff] }
 0x129   :  { %895 = vmatpush.msrb.mxu0 %v10395_v47  ;;  %915 = vmatpush.msrb.mxu1 %v10396_v48  ;;  %v10443_v47 = vld [vmem:[#allocation95_spill] sm:$0xff]  ;;  %v10444_v48 = vld [vmem:[#allocation96_spill] sm:$0xff] }
 0x12a   :  { %935 = vmatpush.msra.mxu2 %v10397_v49  ;;  %955 = vmatpush.msrb.mxu3 %v10398_v50  ;;  %v10445_v49 = vld [vmem:[#allocation97_spill] sm:$0xff]  ;;  %v10446_v50 = vld [vmem:[#allocation99_spill] sm:$0xff] }
 0x12b   :  { %896 = vmatpush.msrb.mxu0 %v10399_v51  ;;  %916 = vmatpush.msrb.mxu1 %v10400_v52  ;;  %v10447_v51 = vld [vmem:[#allocation101_spill] sm:$0xff]  ;;  %v10448_v52 = vld [vmem:[#allocation102_spill] sm:$0xff] }
 0x12c   :  { %936 = vmatpush.msra.mxu2 %v10401_v54  ;;  %956 = vmatpush.msrb.mxu3 %v10402_v55  ;;  %v10449_v54 = vld [vmem:[#allocation103_spill] sm:$0xff]  ;;  %v10450_v55 = vld [vmem:[#allocation104_spill] sm:$0xff] }
 0x12d   :  { %897 = vmatpush.msrb.mxu0 %v10403_v56  ;;  %917 = vmatpush.msrb.mxu1 %v10404_v57  ;;  %v10451_v56 = vld [vmem:[#allocation105_spill] sm:$0xff]  ;;  %v10452_v57 = vld [vmem:[#allocation106_spill] sm:$0xff] }
 0x12e   :  { %937 = vmatpush.msra.mxu2 %v10405_v58  ;;  %957 = vmatpush.msrb.mxu3 %v10406_v59  ;;  %v10453_v58 = vld [vmem:[#allocation107_spill] sm:$0xff]  ;;  %v10454_v59 = vld [vmem:[#allocation108_spill] sm:$0xff] }
 0x12f   :  { %898 = vmatpush.msrb.mxu0 %v10407_v60  ;;  %918 = vmatpush.msrb.mxu1 %v10408_v61  ;;  %v10455_v60 = vld [vmem:[#allocation109_spill] sm:$0xff]  ;;  %v10456_v61 = vld [vmem:[#allocation110_spill] sm:$0xff] }
 0x130   :  { %938 = vmatpush.msra.mxu2 %v10409_v62  ;;  %958 = vmatpush.msrb.mxu3 %v10410_v63  ;;  %v10457_v62 = vld [vmem:[#allocation111_spill] sm:$0xff]  ;;  %v10458_v63 = vld [vmem:[#allocation113_spill] sm:$0xff] }
 0x131   :  { %899 = vmatpush.msrb.mxu0 %v10411_v0  ;;  %919 = vmatpush.msrb.mxu1 %v10412_v1  ;;  %v10459_v0 = vld [vmem:[#allocation115_spill] sm:$0xff]  ;;  %v10460_v1 = vld [vmem:[#allocation116_spill] sm:$0xff] }
 0x132   :  { %939 = vmatpush.msra.mxu2 %v10413_v4  ;;  %959 = vmatpush.msrb.mxu3 %v10414_v7  ;;  %v10461_v4 = vld [vmem:[#allocation117_spill] sm:$0xff]  ;;  %v10462_v7 = vld [vmem:[#allocation119_spill] sm:$0xff] }
 0x133   :  { %900 = vmatpush.msrb.mxu0 %v10415_v8  ;;  %920 = vmatpush.msrb.mxu1 %v10416_v9  ;;  %v10463_v8 = vld [vmem:[#allocation121_spill] sm:$0xff]  ;;  %v10464_v9 = vld [vmem:[#allocation122_spill] sm:$0xff] }
 0x134   :  { %940 = vmatpush.msra.mxu2 %v10417_v10  ;;  %960 = vmatpush.msrb.mxu3 %v10418_v11  ;;  %v10465_v10 = vld [vmem:[#allocation123_spill] sm:$0xff]  ;;  %v10466_v11 = vld [vmem:[#allocation124_spill] sm:$0xff] }
 0x135   :  { %901 = vmatpush.msrb.mxu0 %v10419_v12  ;;  %921 = vmatpush.msrb.mxu1 %v10420_v24  ;;  %v10467_v12 = vld [vmem:[#allocation125_spill] sm:$0xff]  ;;  %v10468_v24 = vld [vmem:[#allocation126_spill] sm:$0xff] }
 0x136   :  { %941 = vmatpush.msra.mxu2 %v10421_v40  ;;  %961 = vmatpush.msrb.mxu3 %v10422_v2  ;;  %v10469_v40 = vld [vmem:[#allocation127_spill] sm:$0xff]  ;;  %v10470_v2 = vld [vmem:[#allocation128_spill] sm:$0xff] }
 0x137   :  { %902 = vmatpush.msrb.mxu0 %v10423_v13  ;;  %922 = vmatpush.msrb.mxu1 %v10424_v27  ;;  %v10471_v13 = vld [vmem:[#allocation129_spill] sm:$0xff]  ;;  %v10472_v27 = vld [vmem:[#allocation130_spill] sm:$0xff] }
 0x138   :  { %942 = vmatpush.msra.mxu2 %v10425_v19  ;;  %962 = vmatpush.msrb.mxu3 %v10426_v18  ;;  %v10473_v19 = vld [vmem:[#allocation131_spill] sm:$0xff]  ;;  %v10474_v18 = vld [vmem:[#allocation133_spill] sm:$0xff] }
 0x139   :  { %903 = vmatpush.msrb.mxu0 %v10427_v22  ;;  %923 = vmatpush.msrb.mxu1 %v10428_v23  ;;  %v10475_v22 = vld [vmem:[#allocation134_spill] sm:$0xff]  ;;  %v10476_v23 = vld [vmem:[#allocation135_spill] sm:$0xff] }
 0x13a   :  { %943 = vmatpush.msra.mxu2 %v10429_v28  ;;  %963 = vmatpush.msrb.mxu3 %v10430_v29  ;;  %v10477_v28 = vld [vmem:[#allocation136_spill] sm:$0xff]  ;;  %v10478_v29 = vld [vmem:[#allocation138_spill] sm:$0xff] }
 0x13b   :  { %904 = vmatpush.msrb.mxu0 %v10431_v31  ;;  %924 = vmatpush.msrb.mxu1 %v10432_v32  ;;  %v10479_v31 = vld [vmem:[#allocation141_spill] sm:$0xff]  ;;  %v10480_v32 = vld [vmem:[#allocation142_spill] sm:$0xff] }
 0x13c   :  { %944 = vmatpush.msra.mxu2 %v10433_v34  ;;  %964 = vmatpush.msrb.mxu3 %v10434_v35  ;;  %v10481_v34 = vld [vmem:[#allocation143_spill] sm:$0xff]  ;;  %v10482_v35 = vld [vmem:[#allocation144_spill] sm:$0xff] }
 0x13d   :  { %969 = vmatpush.msra.mxu0 %v10435_v36  ;;  %989 = vmatpush.msra.mxu1 %v10436_v37  ;;  %v10483_v36 = vld [vmem:[#allocation145_spill] sm:$0xff]  ;;  %v10484_v37 = vld [vmem:[#allocation146_spill] sm:$0xff] }
 0x13e   :  { %1009 = vmatpush.msrb.mxu2 %v10437_v38  ;;  %1029 = vmatpush.msra.mxu3 %v10438_v41  ;;  %v10485_v38 = vld [vmem:[#allocation147_spill] sm:$0xff]  ;;  %v10486_v41 = vld [vmem:[#allocation148_spill] sm:$0xff] }
 0x13f   :  { %970 = vmatpush.msra.mxu0 %v10439_v43  ;;  %990 = vmatpush.msra.mxu1 %v10440_v44  ;;  %v10487_v43 = vld [vmem:[#allocation149_spill] sm:$0xff]  ;;  %v10488_v44 = vld [vmem:[#allocation150_spill] sm:$0xff] }
 0x140   :  { %1010 = vmatpush.msrb.mxu2 %v10441_v45  ;;  %1030 = vmatpush.msra.mxu3 %v10442_v46  ;;  %v10489_v45 = vld [vmem:[#allocation152_spill] sm:$0xff]  ;;  %v10490_v46 = vld [vmem:[#allocation153_spill] sm:$0xff] }
 0x141   :  { %971 = vmatpush.msra.mxu0 %v10443_v47  ;;  %991 = vmatpush.msra.mxu1 %v10444_v48  ;;  %v10491_v47 = vld [vmem:[#allocation154_spill] sm:$0xff]  ;;  %v10492_v48 = vld [vmem:[#allocation156_spill] sm:$0xff] }
 0x142   :  { %1011 = vmatpush.msrb.mxu2 %v10445_v49  ;;  %1031 = vmatpush.msra.mxu3 %v10446_v50  ;;  %v10493_v49 = vld [vmem:[#allocation158_spill] sm:$0xff] }
 0x143   :  { %972 = vmatpush.msra.mxu0 %v10447_v51  ;;  %992 = vmatpush.msra.mxu1 %v10448_v52  ;;  %v293_v51 = vld [vmem:[%s9579_s6] sm:$0xf] }
 0x144   :  { %1012 = vmatpush.msrb.mxu2 %v10449_v54  ;;  %1032 = vmatpush.msra.mxu3 %v10450_v55  ;;  %v5299_v55 = vperm.slane %v293_v51, 0 }
 0x145   :  { %973 = vmatpush.msra.mxu0 %v10451_v56  ;;  %993 = vmatpush.msra.mxu1 %v10452_v57 }
 0x146   :  { %1013 = vmatpush.msrb.mxu2 %v10453_v58  ;;  %1033 = vmatpush.msra.mxu3 %v10454_v59 }
 0x147   :  { %974 = vmatpush.msra.mxu0 %v10455_v60  ;;  %994 = vmatpush.msra.mxu1 %v10456_v61  ;;  %v5305_v61 = vperm.slane %v293_v51, 2 }
 0x148   :  { %1014 = vmatpush.msrb.mxu2 %v10457_v62  ;;  %1034 = vmatpush.msra.mxu3 %v10458_v63  ;;  %v5307_v62 = vperm.slane %v293_v51, 3  ;;  %v10494_v63 = vld [vmem:[#allocation64_spill] sm:$0xff] }
 0x149   :  { %975 = vmatpush.msra.mxu0 %v10459_v0  ;;  %995 = vmatpush.msra.mxu1 %v10460_v1  ;;  %v118_v0 = vadd.f32 %v10494_v63, %v5084_v15  ;;  %v10495_v1 = vld [vmem:[#allocation59_spill] sm:$0xff] }
 0x14a   :  { %1015 = vmatpush.msrb.mxu2 %v10461_v4  ;;  %1035 = vmatpush.msra.mxu3 %v10462_v7  ;;  %v159_v4 = vadd.f32 %v10495_v1, %v5087_v17 }
 0x14b   :  { %976 = vmatpush.msra.mxu0 %v10463_v8  ;;  %996 = vmatpush.msra.mxu1 %v10464_v9 }
 0x14c   :  { %1016 = vmatpush.msrb.mxu2 %v10465_v10  ;;  %1036 = vmatpush.msra.mxu3 %v10466_v11 }
 0x14d   :  { %977 = vmatpush.msra.mxu0 %v10467_v12  ;;  %997 = vmatpush.msra.mxu1 %v10468_v24 }
 0x14e   :  { %1017 = vmatpush.msrb.mxu2 %v10469_v40  ;;  %1037 = vmatpush.msra.mxu3 %v10470_v2 }
 0x14f   :  { %978 = vmatpush.msra.mxu0 %v10471_v13  ;;  %998 = vmatpush.msra.mxu1 %v10472_v27 }
 0x150   :  { %1018 = vmatpush.msrb.mxu2 %v10473_v19  ;;  %1038 = vmatpush.msra.mxu3 %v10474_v18 }
 0x151   :  { %979 = vmatpush.msra.mxu0 %v10475_v22  ;;  %999 = vmatpush.msra.mxu1 %v10476_v23 }
 0x152   :  { %1019 = vmatpush.msrb.mxu2 %v10477_v28  ;;  %1039 = vmatpush.msra.mxu3 %v10478_v29  ;;  %v10496_v28 = vld [vmem:[#allocation75_spill] sm:$0xff] }
 0x153   :  { %980 = vmatpush.msra.mxu0 %v10479_v31  ;;  %1000 = vmatpush.msra.mxu1 %v10480_v32  ;;  %v241_v29 = vadd.f32 %v10496_v28, %v5114_v30  ;;  %v10497_v32 = vld [vmem:[#allocation112_spill] sm:$0xff] }
 0x154   :  { %1020 = vmatpush.msrb.mxu2 %v10481_v34  ;;  %1040 = vmatpush.msra.mxu3 %v10482_v35  ;;  %v200_v34 = vadd.f32 %v10497_v32, %v5149_v42  ;;  %v5409_v28 = vld [vmem:[%s9575_s2 + $0x188] sm:$0xff]  ;;  %v5431_v32 = vld [vmem:[%s9575_s2 + $0x160] sm:$0xff] }
 0x155   :  { %981 = vmatpush.msra.mxu0 %v10483_v36  ;;  %1001 = vmatpush.msra.mxu1 %v10484_v37 }
 0x156   :  { %1021 = vmatpush.msrb.mxu2 %v10485_v38  ;;  %1041 = vmatpush.msra.mxu3 %v10486_v41 }
 0x157   :  { %982 = vmatpush.msra.mxu0 %v10487_v43  ;;  %1002 = vmatpush.msra.mxu1 %v10488_v44 }
 0x158   :  { %1022 = vmatpush.msrb.mxu2 %v4989_v53  ;;  %1042 = vmatpush.msra.mxu3 %v10489_v45 }
 0x159   :  { %983 = vmatpush.msra.mxu0 %v10490_v46  ;;  %1003 = vmatpush.msra.mxu1 %v10491_v47 }
 0x15a   :  { %1023 = vmatpush.msrb.mxu2 %v5015_v20  ;;  %1043 = vmatpush.msra.mxu3 %v10492_v48  ;;  %v5301_v20 = vperm.slane %v293_v51, 1 }
 0x15b   :  { %984 = vmatpush.msra.mxu0 %v5033_v26  ;;  %1004 = vmatpush.msra.mxu1 %v5038_v14 }
 0x15c   :  { %1024 = vmatpush.msrb.mxu2 %v5043_v16  ;;  %1044 = vmatpush.msra.mxu3 %v10493_v49 }
 0x162   :  { %v618_v50 = vpop.f32.mrf.mxu0  ;;  %v638_v53 = vpop.f32.mrf.mxu1 }
 0x169   :  { %v678_v52 = vpop.f32.mrf.mxu3  ;;  %v658_v54 = vpop.f32.mrf.mxu2 }
 0x196   :  { %v698_v56 = vpop.f32.mrf.mxu0  ;;  %v718_v26 = vpop.f32.mrf.mxu1 }
 0x197   :  { %v699_v57 = vadd.f32 %v698_v56, %v618_v50  ;;  %v719_v14 = vadd.f32 %v718_v26, %v638_v53 }
 0x199   :  { %v761_v16 = vadd.f32 %v699_v57, %v5299_v55  ;;  %v762_v58 = vadd.f32 %v719_v14, %v5301_v20 }
 0x19b   :  { %v765_v59 = vmul.f32 0.5, %v761_v16  ;;  %v766_v60 = vmul.f32 0.5, %v762_v58 }
 0x19d   :  { %2925 = vtanh.f32 %v765_v59  ;;  %v738_v7 = vpop.f32.mrf.mxu2  ;;  %v758_v8 = vpop.f32.mrf.mxu3 }
 0x19e   :  { %2927 = vtanh.f32 %v766_v60  ;;  %v739_v9 = vadd.f32 %v738_v7, %v658_v54  ;;  %v759_v10 = vadd.f32 %v758_v8, %v678_v52  ;;  %v804_v11 = vpop.f32.mrf.mxu0  ;;  %v824_v12 = vpop.f32.mrf.mxu1  ;;  %v5329_v7 = vld [vmem:[%s9575_s2 + $0x1e0] sm:$0xff]  ;;  %v5341_v8 = vld [vmem:[%s9575_s2 + $0x1f0] sm:$0xff] }
 0x19f   :  { %v867_v24 = vadd.f32 %v804_v11, %v118_v0  ;;  %v868_v40 = vadd.f32 %v824_v12, %v159_v4  ;;  %v5359_v11 = vld [vmem:[%s9575_s2 + $0x1c8] sm:$0xff] }
 0x1a0   :  { %v763_v2 = vadd.f32 %v739_v9, %v5305_v61  ;;  %v764_v13 = vadd.f32 %v759_v10, %v5307_v62  ;;  %v5347_v9 = vld [vmem:[%s9575_s2 + $0x1f8] sm:$0xff]  ;;  %v5353_v10 = vld [vmem:[%s9575_s2 + $0x1c0] sm:$0xff] }
 0x1a1   :  { %v871_v27 = vmul.f32 0.5, %v867_v24  ;;  %v872_v19 = vmul.f32 0.5, %v868_v40  ;;  %v5365_v24 = vld [vmem:[%s9575_s2 + $0x1d0] sm:$0xff]  ;;  %v5371_v40 = vld [vmem:[%s9575_s2 + $0x1d8] sm:$0xff] }
 0x1a2   :  { %v767_v18 = vmul.f32 0.5, %v763_v2  ;;  %2929 = vtanh.f32 %v764_v13  ;;  %v5377_v13 = vld [vmem:[%s9575_s2 + $0x1a0] sm:$0xff] }
 0x1a3   :  { %v2926_v22 = vpop.eup %2925  ;;  %2931 = vtanh.f32 %v871_v27  ;;  %v5383_v27 = vld [vmem:[%s9575_s2 + $0x1a8] sm:$0xff] }
 0x1a4   :  { %v2928_v23 = vpop.eup %2927  ;;  %v771_v31 = vmul.f32 0.5, %v2926_v22  ;;  %2933 = vtanh.f32 %v767_v18  ;;  %v5395_v18 = vld [vmem:[%s9575_s2 + $0x1b8] sm:$0xff] }
 0x1a5   :  { %v772_v35 = vmul.f32 0.5, %v2928_v23  ;;  %2935 = vtanh.f32 %v872_v19  ;;  %v844_v36 = vpop.f32.mrf.mxu2  ;;  %v864_v37 = vpop.f32.mrf.mxu3  ;;  %v5389_v19 = vld [vmem:[%s9575_s2 + $0x1b0] sm:$0xff]  ;;  %v5403_v23 = vld [vmem:[%s9575_s2 + $0x180] sm:$0xff] }
 0x1a6   :  { %v774_v38 = vadd.f32 0.5, %v771_v31  ;;  %v870_v41 = vadd.f32 %v864_v37, %v241_v29  ;;  %v869_v44 = vadd.f32 %v844_v36, %v200_v34  ;;  %v5415_v29 = vld [vmem:[%s9575_s2 + $0x190] sm:$0xff]  ;;  %v5421_v31 = vld [vmem:[%s9575_s2 + $0x198] sm:$0xff]  ;;  %v5437_v34 = vld [vmem:[%s9575_s2 + $0x168] sm:$0xff] }
 0x1a7   :  { %v775_v43 = vadd.f32 0.5, %v772_v35  ;;  %v5443_v35 = vld [vmem:[%s9575_s2 + $0x170] sm:$0xff]  ;;  %v5449_v36 = vld [vmem:[%s9575_s2 + $0x178] sm:$0xff]  ;;  %v5455_v37 = vld [vmem:[%s9575_s2 + $0x140] sm:$0xff] }
 0x1a8   :  { %v2930_v45 = vpop.eup %2929  ;;  %2937 = vtanh.f32 %v870_v41  ;;  %v873_v52 = vmul.f32 0.5, %v869_v44  ;;  %v5467_v41 = vld [vmem:[%s9575_s2 + $0x150] sm:$0xff]  ;;  %v5479_v44 = vld [vmem:[%s9575_s2 + $0x120] sm:$0xff] }
 0x1a9   :  { %v2932_v46 = vpop.eup %2931  ;;  %v778_v47 = vmul.f32 0.0, %v775_v43  ;;  %v779_v48 = vmul.f32 %v2930_v45, %v774_v38  ;;  %v5461_v38 = vld [vmem:[%s9575_s2 + $0x148] sm:$0xff]  ;;  %v5473_v43 = vld [vmem:[%s9575_s2 + $0x158] sm:$0xff] }
 0x1aa   :  { %v2934_v49 = vpop.eup %2933  ;;  %v877_v50 = vmul.f32 0.5, %v2932_v46  ;;  %v5485_v45 = vld [vmem:[%s9575_s2 + $0x128] sm:$0xff]  ;;  %v5491_v46 = vld [vmem:[%s9575_s2 + $0x130] sm:$0xff] }
 0x1ab   :  { %v2936_v53 = vpop.eup %2935  ;;  %v5319_v51 = vadd.f32 %v779_v48, %v778_v47  ;;  %v773_v57 = vmul.f32 0.5, %v2934_v49  ;;  %v5497_v47 = vld [vmem:[%s9575_s2 + $0x138] sm:$0xff]  ;;  %v5503_v48 = vld [vmem:[%s9575_s2 + $0x100] sm:$0xff]  ;;  %v5509_v49 = vld [vmem:[%s9575_s2 + $0x108] sm:$0xff] }
 0x1ac   :  { %v880_v54 = vadd.f32 0.5, %v877_v50  ;;  %v878_v56 = vmul.f32 0.5, %v2936_v53  ;;  %v5515_v50 = vld [vmem:[%s9575_s2 + $0x110] sm:$0xff]  ;;  %v5521_v53 = vld [vmem:[%s9575_s2 + $0x118] sm:$0xff] }
 0x1ad   :  { %2939 = vtanh.f32 %v5319_v51  ;;  %v776_v59 = vadd.f32 0.5, %v773_v57  ;;  %v5551_v57 = vld [vmem:[%s9575_s2 + $0xc0] sm:$0xff] }
 0x1ae   :  { %v2938_v26 = vpop.eup %2937  ;;  %v881_v14 = vadd.f32 0.5, %v878_v56  ;;  %2941 = vtanh.f32 %v873_v52  ;;  %v5527_v52 = vld [vmem:[%s9575_s2 + $0xe0] sm:$0xff]  ;;  %v5539_v56 = vld [vmem:[%s9575_s2 + $0xf0] sm:$0xff]  ;;  %10499 = vst [vmem:[#allocation6_spill] sm:$0xff] %v5551_v57 }
 0x1af   :  { %v885_v16 = vmul.f32 %v2938_v26, %v880_v54  ;;  %v5533_v54 = vld [vmem:[%s9575_s2 + $0xe8] sm:$0xff]  ;;  %v5545_v26 = vld [vmem:[%s9575_s2 + $0xf8] sm:$0xff] }
 0x1b0   :  { %v884_v58 = vmul.f32 %v881_v14, %v5165_v6  ;;  %v5335_v6 = vld [vmem:[%s9575_s2 + $0x1e8] sm:$0xff]  ;;  %10498 = vst [vmem:[#allocation3_spill] sm:$0xff] %v5545_v26 }
 0x1b1   :  { %v5557_v14 = vld [vmem:[%s9575_s2 + $0xc8] sm:$0xff] }
 0x1b2   :  { %v5323_v60 = vadd.f32 %v885_v16, %v884_v58  ;;  %10500 = vst [vmem:[#allocation12_spill] sm:$0xff] %v5557_v14  ;;  %v5563_v16 = vld [vmem:[%s9575_s2 + $0xd0] sm:$0xff]  ;;  %v5569_v58 = vld [vmem:[%s9575_s2 + $0xd8] sm:$0xff] }
 0x1b3   :  { %v2940_v63 = vpop.eup %2939  ;;  %10501 = vst [vmem:[#allocation7_spill] sm:$0xff] %v5563_v16 }
 0x1b4   :  { %v782_v0 = vmul.f32 %v2940_v63, %v776_v59  ;;  %v2942_v1 = vpop.eup %2941  ;;  %2943 = vtanh.f32 %v5323_v60  ;;  %10502 = vst [vmem:[#allocation4_spill] sm:$0xff] %v5569_v58  ;;  %v5575_v59 = vld [vmem:[%s9575_s2 + $0xa0] sm:$0xff]  ;;  %v5581_v63 = vld [vmem:[%s9575_s2 + $0xa8] sm:$0xff] }
 0x1b5   :  { %v879_v4 = vmul.f32 0.5, %v2942_v1  ;;  %10503 = vst [vmem:[#allocation8_spill] sm:$0xff] %v5575_v59  ;;  %v5593_v1 = vld [vmem:[%s9575_s2 + $0xb8] sm:$0xff] }
 0x1b6   :  { %905 = vmatmul.f32.vlgmr.msrb.gmra.mxu0 %v782_v0  ;;  %925 = vmatmul.f32.vlgmr.msrb.gmra.mxu1 %v782_v0  ;;  %10504 = vst [vmem:[#allocation13_spill] sm:$0xff] %v5581_v63 }
 0x1b7   :  { %945 = vmatmul.f32.vlgmr.msra.gmra.mxu2 %v782_v0  ;;  %965 = vmatmul.f32.vlgmr.msrb.gmra.mxu3 %v782_v0  ;;  %v882_v2 = vadd.f32 0.5, %v879_v4  ;;  %v5587_v0 = vld [vmem:[%s9575_s2 + $0xb0] sm:$0xff]  ;;  %10506 = vst [vmem:[#allocation93_spill] sm:$0xff] %v5593_v1  ;;  %v5599_v4 = vld [vmem:[%s9575_s2 + $0x80] sm:$0xff] }
 0x1b8   :  { %1075 = vmatpush.msrb.mxu0 %v5329_v7  ;;  %1095 = vmatpush.msrb.mxu1 %v5335_v6  ;;  %10505 = vst [vmem:[#allocation9_spill] sm:$0xff] %v5587_v0 }
 0x1b9   :  { %1115 = vmatpush.msra.mxu2 %v5341_v8  ;;  %1135 = vmatpush.msrb.mxu3 %v5347_v9  ;;  %10507 = vst [vmem:[#allocation5_spill] sm:$0xff] %v5599_v4 }
 0x1ba   :  { %1076 = vmatpush.msrb.mxu0 %v5353_v10  ;;  %1096 = vmatpush.msrb.mxu1 %v5359_v11  ;;  %v2944_v12 = vpop.eup %2943 }
 0x1bb   :  { %1116 = vmatpush.msra.mxu2 %v5365_v24  ;;  %1136 = vmatpush.msrb.mxu3 %v5371_v40  ;;  %v5398_v22 = vmul.f32 %v2944_v12, %v882_v2  ;;  %v5605_v12 = vld [vmem:[%s9575_s2 + $0x88] sm:$0xff]  ;;  %v5611_v2 = vld [vmem:[%s9575_s2 + $0x90] sm:$0xff] }
 0x1bc   :  { %1077 = vmatpush.msrb.mxu0 %v5377_v13  ;;  %1097 = vmatpush.msrb.mxu1 %v5383_v27  ;;  %10508 = vst [vmem:[#allocation10_spill] sm:$0xff] %v5605_v12 }
 0x1bd   :  { %1117 = vmatpush.msra.mxu2 %v5389_v19  ;;  %1137 = vmatpush.msrb.mxu3 %v5395_v18  ;;  %10509 = vst [vmem:[#allocation14_spill] sm:$0xff] %v5611_v2 }
 0x1be   :  { %1078 = vmatpush.msrb.mxu0 %v5403_v23  ;;  %1098 = vmatpush.msrb.mxu1 %v5409_v28 }
 0x1bf   :  { %1118 = vmatpush.msra.mxu2 %v5415_v29  ;;  %1138 = vmatpush.msrb.mxu3 %v5421_v31 }
 0x1c0   :  { %985 = vmatmul.f32.vlgmr.msra.gmra.mxu0 %v5398_v22  ;;  %1005 = vmatmul.f32.vlgmr.msra.gmra.mxu1 %v5398_v22 }
 0x1c1   :  { %1025 = vmatmul.f32.vlgmr.msrb.gmra.mxu2 %v5398_v22  ;;  %1045 = vmatmul.f32.vlgmr.msra.gmra.mxu3 %v5398_v22 }
 0x1c2   :  { %1079 = vmatpush.msrb.mxu0 %v5431_v32  ;;  %1099 = vmatpush.msrb.mxu1 %v5437_v34 }
 0x1c3   :  { %1119 = vmatpush.msra.mxu2 %v5443_v35  ;;  %1139 = vmatpush.msrb.mxu3 %v5449_v36 }
 0x1c4   :  { %1080 = vmatpush.msrb.mxu0 %v5455_v37  ;;  %1100 = vmatpush.msrb.mxu1 %v5461_v38 }
 0x1c5   :  { %1120 = vmatpush.msra.mxu2 %v5467_v41  ;;  %1140 = vmatpush.msrb.mxu3 %v5473_v43 }
 0x1c6   :  { %1081 = vmatpush.msrb.mxu0 %v5479_v44  ;;  %1101 = vmatpush.msrb.mxu1 %v5485_v45 }
 0x1c7   :  { %1121 = vmatpush.msra.mxu2 %v5491_v46  ;;  %1141 = vmatpush.msrb.mxu3 %v5497_v47 }
 0x1c8   :  { %1082 = vmatpush.msrb.mxu0 %v5503_v48  ;;  %1102 = vmatpush.msrb.mxu1 %v5509_v49 }
 0x1c9   :  { %1122 = vmatpush.msra.mxu2 %v5515_v50  ;;  %1142 = vmatpush.msrb.mxu3 %v5521_v53 }
 0x1ca   :  { %1083 = vmatpush.msrb.mxu0 %v5527_v52  ;;  %1103 = vmatpush.msrb.mxu1 %v5533_v54 }
 0x1cb   :  { %1123 = vmatpush.msra.mxu2 %v5539_v56  ;;  %1143 = vmatpush.msrb.mxu3 %v5545_v26 }
 0x1cc   :  { %1084 = vmatpush.msrb.mxu0 %v5551_v57  ;;  %1104 = vmatpush.msrb.mxu1 %v5557_v14 }
 0x1cd   :  { %1124 = vmatpush.msra.mxu2 %v5563_v16  ;;  %1144 = vmatpush.msrb.mxu3 %v5569_v58 }
 0x1ce   :  { %1085 = vmatpush.msrb.mxu0 %v5575_v59  ;;  %1105 = vmatpush.msrb.mxu1 %v5581_v63 }
 0x1cf   :  { %1125 = vmatpush.msra.mxu2 %v5587_v0  ;;  %1145 = vmatpush.msrb.mxu3 %v5593_v1 }
 0x1d0   :  { %1086 = vmatpush.msrb.mxu0 %v5599_v4  ;;  %1106 = vmatpush.msrb.mxu1 %v5605_v12 }
 0x1d1   :  { %1126 = vmatpush.msra.mxu2 %v5611_v2  ;;  %1146 = vmatpush.msrb.mxu3 %v5617_v39 }
 0x1d2   :  { %1087 = vmatpush.msrb.mxu0 %v5623_v25  ;;  %1107 = vmatpush.msrb.mxu1 %v5629_v3  ;;  %v5653_v3 = vld [vmem:[%s9575_s2 + $0x48] sm:$0xff] }
 0x1d3   :  { %1127 = vmatpush.msra.mxu2 %v5635_v33  ;;  %1147 = vmatpush.msrb.mxu3 %v5641_v5  ;;  %10516 = vst [vmem:[#allocation20_spill] sm:$0xff] %v5653_v3  ;;  %v5659_v33 = vld [vmem:[%s9575_s2 + $0x50] sm:$0xff]  ;;  %v5665_v5 = vld [vmem:[%s9575_s2 + $0x58] sm:$0xff] }
 0x1d4   :  { %1088 = vmatpush.msrb.mxu0 %v5647_v21  ;;  %1108 = vmatpush.msrb.mxu1 %v5653_v3  ;;  %10517 = vst [vmem:[#allocation21_spill] sm:$0xff] %v5659_v33  ;;  %v5671_v21 = vld [vmem:[%s9575_s2 + $0x20] sm:$0xff]  ;;  %v5677_v3 = vld [vmem:[%s9575_s2 + $0x28] sm:$0xff] }
 0x1d5   :  { %1128 = vmatpush.msra.mxu2 %v5659_v33  ;;  %10518 = vst [vmem:[#allocation22_spill] sm:$0xff] %v5665_v5  ;;  %1148 = vmatpush.msrb.mxu3 %v5665_v5  ;;  %v5683_v33 = vld [vmem:[%s9575_s2 + $0x30] sm:$0xff]  ;;  %v5689_v5 = vld [vmem:[%s9575_s2 + $0x38] sm:$0xff] }
 0x1d6   :  { %10519 = vst [vmem:[#allocation23_spill] sm:$0xff] %v5671_v21  ;;  %1089 = vmatpush.msrb.mxu0 %v5671_v21  ;;  %1109 = vmatpush.msrb.mxu1 %v5677_v3  ;;  %v5695_v21 = vld [vmem:[%s9575_s2] sm:$0xff] }
 0x1d7   :  { %10520 = vst [vmem:[#allocation24_spill] sm:$0xff] %v5677_v3  ;;  %1129 = vmatpush.msra.mxu2 %v5683_v33  ;;  %1149 = vmatpush.msrb.mxu3 %v5689_v5  ;;  %v5701_v3 = vld [vmem:[%s9575_s2 + $0x8] sm:$0xff] }
 0x1d8   :  { %10521 = vst [vmem:[#allocation25_spill] sm:$0xff] %v5683_v33  ;;  %1090 = vmatpush.msrb.mxu0 %v5695_v21  ;;  %1110 = vmatpush.msrb.mxu1 %v5701_v3  ;;  %v5707_v33 = vld [vmem:[%s9575_s2 + $0x10] sm:$0xff] }
 0x1d9   :  { %10522 = vst [vmem:[#allocation26_spill] sm:$0xff] %v5689_v5  ;;  %1130 = vmatpush.msra.mxu2 %v5707_v33  ;;  %v5713_v5 = vld [vmem:[%s9575_s2 + $0x18] sm:$0xff]  ;;  %1091 = vmatmul.f32.vlgmr.msrb.gmra.mxu0 %v5398_v22 }
 0x1da   :  { %10523 = vst [vmem:[#allocation27_spill] sm:$0xff] %v5695_v21  ;;  %1150 = vmatpush.msrb.mxu3 %v5713_v5  ;;  %1111 = vmatmul.f32.vlgmr.msrb.gmra.mxu1 %v5398_v22 }
 0x1db   :  { %10524 = vst [vmem:[#allocation28_spill] sm:$0xff] %v5701_v3  ;;  %1131 = vmatmul.f32.vlgmr.msra.gmra.mxu2 %v5398_v22  ;;  %1151 = vmatmul.f32.vlgmr.msrb.gmra.mxu3 %v5398_v22  ;;  %v5723_v3 = vld [vmem:[%s9576_s5 + $0x1e0] sm:$0xff]  ;;  %v5741_v22 = vld [vmem:[%s9576_s5 + $0x1f8] sm:$0xff] }
 0x1dc   :  { %10525 = vst [vmem:[#allocation29_spill] sm:$0xff] %v5707_v33  ;;  %1177 = vmatpush.msra.mxu0 %v5723_v3  ;;  %v5729_v33 = vld [vmem:[%s9576_s5 + $0x1e8] sm:$0xff]  ;;  %1237 = vmatpush.msra.mxu3 %v5741_v22 }
 0x1dd   :  { %10526 = vst [vmem:[#allocation30_spill] sm:$0xff] %v5713_v5  ;;  %1197 = vmatpush.msra.mxu1 %v5729_v33  ;;  %v5735_v5 = vld [vmem:[%s9576_s5 + $0x1f0] sm:$0xff] }
 0x1de   :  { %10527 = vst [vmem:[#allocation31_spill] sm:$0xff] %v5723_v3  ;;  %1217 = vmatpush.msrb.mxu2 %v5735_v5  ;;  %v5747_v3 = vld [vmem:[%s9576_s5 + $0x1c0] sm:$0xff] }
 0x1df   :  { %10528 = vst [vmem:[#allocation32_spill] sm:$0xff] %v5729_v33  ;;  %1178 = vmatpush.msra.mxu0 %v5747_v3  ;;  %v5753_v33 = vld [vmem:[%s9576_s5 + $0x1c8] sm:$0xff] }
 0x1e0   :  { %10529 = vst [vmem:[#allocation33_spill] sm:$0xff] %v5735_v5  ;;  %1198 = vmatpush.msra.mxu1 %v5753_v33  ;;  %v5759_v5 = vld [vmem:[%s9576_s5 + $0x1d0] sm:$0xff] }
 0x1e1   :  { %10530 = vst [vmem:[#allocation34_spill] sm:$0xff] %v5741_v22  ;;  %1218 = vmatpush.msrb.mxu2 %v5759_v5  ;;  %v5765_v22 = vld [vmem:[%s9576_s5 + $0x1d8] sm:$0xff] }
 0x1e2   :  { %10531 = vst [vmem:[#allocation35_spill] sm:$0xff] %v5747_v3  ;;  %1238 = vmatpush.msra.mxu3 %v5765_v22  ;;  %v5771_v3 = vld [vmem:[%s9576_s5 + $0x1a0] sm:$0xff] }
 0x1e3   :  { %10532 = vst [vmem:[#allocation36_spill] sm:$0xff] %v5753_v33  ;;  %1179 = vmatpush.msra.mxu0 %v5771_v3  ;;  %v5777_v33 = vld [vmem:[%s9576_s5 + $0x1a8] sm:$0xff] }
 0x1e4   :  { %10533 = vst [vmem:[#allocation37_spill] sm:$0xff] %v5759_v5  ;;  %1199 = vmatpush.msra.mxu1 %v5777_v33  ;;  %v5783_v5 = vld [vmem:[%s9576_s5 + $0x1b0] sm:$0xff] }
 0x1e5   :  { %10534 = vst [vmem:[#allocation38_spill] sm:$0xff] %v5765_v22  ;;  %1219 = vmatpush.msrb.mxu2 %v5783_v5  ;;  %v5789_v22 = vld [vmem:[%s9576_s5 + $0x1b8] sm:$0xff] }
 0x1e6   :  { %10535 = vst [vmem:[#allocation39_spill] sm:$0xff] %v5771_v3  ;;  %1239 = vmatpush.msra.mxu3 %v5789_v22  ;;  %v5795_v3 = vld [vmem:[%s9576_s5 + $0x180] sm:$0xff] }
 0x1e7   :  { %10536 = vst [vmem:[#allocation40_spill] sm:$0xff] %v5777_v33  ;;  %1180 = vmatpush.msra.mxu0 %v5795_v3  ;;  %v5801_v33 = vld [vmem:[%s9576_s5 + $0x188] sm:$0xff] }
 0x1e8   :  { %10537 = vst [vmem:[#allocation41_spill] sm:$0xff] %v5783_v5  ;;  %1200 = vmatpush.msra.mxu1 %v5801_v33  ;;  %v5807_v5 = vld [vmem:[%s9576_s5 + $0x190] sm:$0xff] }
 0x1e9   :  { %10538 = vst [vmem:[#allocation42_spill] sm:$0xff] %v5789_v22  ;;  %1220 = vmatpush.msrb.mxu2 %v5807_v5  ;;  %v5813_v22 = vld [vmem:[%s9576_s5 + $0x198] sm:$0xff] }
 0x1ea   :  { %10539 = vst [vmem:[#allocation43_spill] sm:$0xff] %v5795_v3  ;;  %1240 = vmatpush.msra.mxu3 %v5813_v22  ;;  %v5819_v3 = vld [vmem:[%s9576_s5 + $0x160] sm:$0xff] }
 0x1eb   :  { %10540 = vst [vmem:[#allocation44_spill] sm:$0xff] %v5801_v33  ;;  %1181 = vmatpush.msra.mxu0 %v5819_v3  ;;  %v5825_v33 = vld [vmem:[%s9576_s5 + $0x168] sm:$0xff] }
 0x1ec   :  { %10541 = vst [vmem:[#allocation45_spill] sm:$0xff] %v5807_v5  ;;  %1201 = vmatpush.msra.mxu1 %v5825_v33  ;;  %v5831_v5 = vld [vmem:[%s9576_s5 + $0x170] sm:$0xff] }
 0x1ed   :  { %10542 = vst [vmem:[#allocation46_spill] sm:$0xff] %v5813_v22  ;;  %1221 = vmatpush.msrb.mxu2 %v5831_v5  ;;  %v5837_v22 = vld [vmem:[%s9576_s5 + $0x178] sm:$0xff] }
 0x1ee   :  { %10543 = vst [vmem:[#allocation47_spill] sm:$0xff] %v5819_v3  ;;  %1241 = vmatpush.msra.mxu3 %v5837_v22  ;;  %v5843_v3 = vld [vmem:[%s9576_s5 + $0x140] sm:$0xff] }
 0x1ef   :  { %10544 = vst [vmem:[#allocation48_spill] sm:$0xff] %v5825_v33  ;;  %1182 = vmatpush.msra.mxu0 %v5843_v3  ;;  %v5849_v33 = vld [vmem:[%s9576_s5 + $0x148] sm:$0xff] }
 0x1f0   :  { %10545 = vst [vmem:[#allocation49_spill] sm:$0xff] %v5831_v5  ;;  %1202 = vmatpush.msra.mxu1 %v5849_v33  ;;  %v5855_v5 = vld [vmem:[%s9576_s5 + $0x150] sm:$0xff] }
 0x1f1   :  { %10546 = vst [vmem:[#allocation50_spill] sm:$0xff] %v5837_v22  ;;  %1222 = vmatpush.msrb.mxu2 %v5855_v5  ;;  %v5861_v22 = vld [vmem:[%s9576_s5 + $0x158] sm:$0xff] }
 0x1f2   :  { %10547 = vst [vmem:[#allocation51_spill] sm:$0xff] %v5843_v3  ;;  %1242 = vmatpush.msra.mxu3 %v5861_v22  ;;  %v5867_v3 = vld [vmem:[%s9576_s5 + $0x120] sm:$0xff] }
 0x1f3   :  { %10548 = vst [vmem:[#allocation52_spill] sm:$0xff] %v5849_v33  ;;  %1183 = vmatpush.msra.mxu0 %v5867_v3  ;;  %v5873_v33 = vld [vmem:[%s9576_s5 + $0x128] sm:$0xff] }
 0x1f4   :  { %10549 = vst [vmem:[#allocation53_spill] sm:$0xff] %v5855_v5  ;;  %1203 = vmatpush.msra.mxu1 %v5873_v33  ;;  %v5879_v5 = vld [vmem:[%s9576_s5 + $0x130] sm:$0xff] }
 0x1f5   :  { %10550 = vst [vmem:[#allocation54_spill] sm:$0xff] %v5861_v22  ;;  %1223 = vmatpush.msrb.mxu2 %v5879_v5  ;;  %v5885_v22 = vld [vmem:[%s9576_s5 + $0x138] sm:$0xff] }
 0x1f6   :  { %10551 = vst [vmem:[#allocation56_spill] sm:$0xff] %v5867_v3  ;;  %1243 = vmatpush.msra.mxu3 %v5885_v22  ;;  %v5891_v3 = vld [vmem:[%s9576_s5 + $0x100] sm:$0xff] }
 0x1f7   :  { %10552 = vst [vmem:[#allocation57_spill] sm:$0xff] %v5873_v33  ;;  %1184 = vmatpush.msra.mxu0 %v5891_v3  ;;  %v5897_v33 = vld [vmem:[%s9576_s5 + $0x108] sm:$0xff] }
 0x1f8   :  { %10553 = vst [vmem:[#allocation58_spill] sm:$0xff] %v5879_v5  ;;  %1204 = vmatpush.msra.mxu1 %v5897_v33  ;;  %v5903_v5 = vld [vmem:[%s9576_s5 + $0x110] sm:$0xff] }
 0x1f9   :  { %10554 = vst [vmem:[#allocation60_spill] sm:$0xff] %v5885_v22  ;;  %1224 = vmatpush.msrb.mxu2 %v5903_v5  ;;  %v5909_v22 = vld [vmem:[%s9576_s5 + $0x118] sm:$0xff] }
 0x1fa   :  { %10555 = vst [vmem:[#allocation61_spill] sm:$0xff] %v5891_v3  ;;  %1244 = vmatpush.msra.mxu3 %v5909_v22  ;;  %v5915_v3 = vld [vmem:[%s9576_s5 + $0xe0] sm:$0xff] }
 0x1fb   :  { %10556 = vst [vmem:[#allocation62_spill] sm:$0xff] %v5897_v33  ;;  %1185 = vmatpush.msra.mxu0 %v5915_v3  ;;  %v5921_v33 = vld [vmem:[%s9576_s5 + $0xe8] sm:$0xff] }
 0x1fc   :  { %10557 = vst [vmem:[#allocation63_spill] sm:$0xff] %v5903_v5  ;;  %1205 = vmatpush.msra.mxu1 %v5921_v33  ;;  %v5927_v5 = vld [vmem:[%s9576_s5 + $0xf0] sm:$0xff] }
 0x1fd   :  { %10558 = vst [vmem:[#allocation65_spill] sm:$0xff] %v5909_v22  ;;  %1225 = vmatpush.msrb.mxu2 %v5927_v5  ;;  %v5933_v22 = vld [vmem:[%s9576_s5 + $0xf8] sm:$0xff] }
 0x1fe   :  { %10559 = vst [vmem:[#allocation66_spill] sm:$0xff] %v5915_v3  ;;  %1245 = vmatpush.msra.mxu3 %v5933_v22  ;;  %v5939_v3 = vld [vmem:[%s9576_s5 + $0xc0] sm:$0xff] }
 0x1ff   :  { %10560 = vst [vmem:[#allocation67_spill] sm:$0xff] %v5921_v33  ;;  %1186 = vmatpush.msra.mxu0 %v5939_v3  ;;  %v5945_v33 = vld [vmem:[%s9576_s5 + $0xc8] sm:$0xff] }
 0x200   :  { %10561 = vst [vmem:[#allocation68_spill] sm:$0xff] %v5927_v5  ;;  %1206 = vmatpush.msra.mxu1 %v5945_v33  ;;  %v5951_v5 = vld [vmem:[%s9576_s5 + $0xd0] sm:$0xff] }
 0x201   :  { %10562 = vst [vmem:[#allocation69_spill] sm:$0xff] %v5933_v22  ;;  %1226 = vmatpush.msrb.mxu2 %v5951_v5  ;;  %v5957_v22 = vld [vmem:[%s9576_s5 + $0xd8] sm:$0xff] }
 0x202   :  { %10563 = vst [vmem:[#allocation70_spill] sm:$0xff] %v5939_v3  ;;  %1246 = vmatpush.msra.mxu3 %v5957_v22  ;;  %v5963_v3 = vld [vmem:[%s9576_s5 + $0xa0] sm:$0xff] }
 0x203   :  { %10564 = vst [vmem:[#allocation71_spill] sm:$0xff] %v5945_v33  ;;  %1187 = vmatpush.msra.mxu0 %v5963_v3  ;;  %v5969_v33 = vld [vmem:[%s9576_s5 + $0xa8] sm:$0xff] }
 0x204   :  { %10565 = vst [vmem:[#allocation72_spill] sm:$0xff] %v5951_v5  ;;  %1207 = vmatpush.msra.mxu1 %v5969_v33  ;;  %v5975_v5 = vld [vmem:[%s9576_s5 + $0xb0] sm:$0xff] }
 0x205   :  { %10566 = vst [vmem:[#allocation73_spill] sm:$0xff] %v5957_v22  ;;  %1227 = vmatpush.msrb.mxu2 %v5975_v5  ;;  %v5981_v22 = vld [vmem:[%s9576_s5 + $0xb8] sm:$0xff] }
 0x206   :  { %10567 = vst [vmem:[#allocation76_spill] sm:$0xff] %v5963_v3  ;;  %1247 = vmatpush.msra.mxu3 %v5981_v22  ;;  %v5987_v3 = vld [vmem:[%s9576_s5 + $0x80] sm:$0xff] }
 0x207   :  { %10568 = vst [vmem:[#allocation77_spill] sm:$0xff] %v5969_v33  ;;  %1188 = vmatpush.msra.mxu0 %v5987_v3  ;;  %v5993_v33 = vld [vmem:[%s9576_s5 + $0x88] sm:$0xff] }
 0x208   :  { %10569 = vst [vmem:[#allocation78_spill] sm:$0xff] %v5975_v5  ;;  %1208 = vmatpush.msra.mxu1 %v5993_v33  ;;  %v5999_v5 = vld [vmem:[%s9576_s5 + $0x90] sm:$0xff] }
 0x209   :  { %10570 = vst [vmem:[#allocation80_spill] sm:$0xff] %v5981_v22  ;;  %1228 = vmatpush.msrb.mxu2 %v5999_v5  ;;  %v6005_v22 = vld [vmem:[%s9576_s5 + $0x98] sm:$0xff] }
 0x20a   :  { %10571 = vst [vmem:[#allocation81_spill] sm:$0xff] %v5987_v3  ;;  %1248 = vmatpush.msra.mxu3 %v6005_v22  ;;  %v6011_v3 = vld [vmem:[%s9576_s5 + $0x60] sm:$0xff] }
 0x20b   :  { %10572 = vst [vmem:[#allocation82_spill] sm:$0xff] %v5993_v33  ;;  %1189 = vmatpush.msra.mxu0 %v6011_v3  ;;  %v6017_v33 = vld [vmem:[%s9576_s5 + $0x68] sm:$0xff] }
 0x20c   :  { %10573 = vst [vmem:[#allocation83_spill] sm:$0xff] %v5999_v5  ;;  %1209 = vmatpush.msra.mxu1 %v6017_v33  ;;  %v6023_v5 = vld [vmem:[%s9576_s5 + $0x70] sm:$0xff] }
 0x20d   :  { %10574 = vst [vmem:[#allocation84_spill] sm:$0xff] %v6005_v22  ;;  %1229 = vmatpush.msrb.mxu2 %v6023_v5  ;;  %v6029_v22 = vld [vmem:[%s9576_s5 + $0x78] sm:$0xff] }
 0x20e   :  { %10575 = vst [vmem:[#allocation85_spill] sm:$0xff] %v6011_v3  ;;  %1249 = vmatpush.msra.mxu3 %v6029_v22  ;;  %v6035_v3 = vld [vmem:[%s9576_s5 + $0x40] sm:$0xff] }
 0x20f   :  { %10576 = vst [vmem:[#allocation86_spill] sm:$0xff] %v6017_v33  ;;  %1190 = vmatpush.msra.mxu0 %v6035_v3  ;;  %v6041_v33 = vld [vmem:[%s9576_s5 + $0x48] sm:$0xff] }
 0x210   :  { %10577 = vst [vmem:[#allocation87_spill] sm:$0xff] %v6023_v5  ;;  %1210 = vmatpush.msra.mxu1 %v6041_v33  ;;  %v6047_v5 = vld [vmem:[%s9576_s5 + $0x50] sm:$0xff] }
 0x211   :  { %10578 = vst [vmem:[#allocation88_spill] sm:$0xff] %v6029_v22  ;;  %1230 = vmatpush.msrb.mxu2 %v6047_v5  ;;  %v6053_v22 = vld [vmem:[%s9576_s5 + $0x58] sm:$0xff] }
 0x212   :  { %10579 = vst [vmem:[#allocation90_spill] sm:$0xff] %v6035_v3  ;;  %1250 = vmatpush.msra.mxu3 %v6053_v22  ;;  %v6059_v3 = vld [vmem:[%s9576_s5 + $0x20] sm:$0xff] }
 0x213   :  { %10580 = vst [vmem:[#allocation91_spill] sm:$0xff] %v6041_v33  ;;  %1191 = vmatpush.msra.mxu0 %v6059_v3  ;;  %v6065_v33 = vld [vmem:[%s9576_s5 + $0x28] sm:$0xff] }
 0x214   :  { %10581 = vst [vmem:[#allocation92_spill] sm:$0xff] %v6047_v5  ;;  %1211 = vmatpush.msra.mxu1 %v6065_v33  ;;  %v6071_v5 = vld [vmem:[%s9576_s5 + $0x30] sm:$0xff] }
 0x215   :  { %10582 = vst [vmem:[#allocation94_spill] sm:$0xff] %v6053_v22  ;;  %1231 = vmatpush.msrb.mxu2 %v6071_v5  ;;  %v6077_v22 = vld [vmem:[%s9576_s5 + $0x38] sm:$0xff] }
 0x216   :  { %10583 = vst [vmem:[#allocation95_spill] sm:$0xff] %v6059_v3  ;;  %1251 = vmatpush.msra.mxu3 %v6077_v22  ;;  %v6083_v3 = vld [vmem:[%s9576_s5] sm:$0xff] }
 0x217   :  { %10584 = vst [vmem:[#allocation96_spill] sm:$0xff] %v6065_v33  ;;  %1192 = vmatpush.msra.mxu0 %v6083_v3  ;;  %v6089_v33 = vld [vmem:[%s9576_s5 + $0x8] sm:$0xff] }
 0x218   :  { %10585 = vst [vmem:[#allocation97_spill] sm:$0xff] %v6071_v5  ;;  %1212 = vmatpush.msra.mxu1 %v6089_v33  ;;  %v6095_v5 = vld [vmem:[%s9576_s5 + $0x10] sm:$0xff] }
 0x219   :  { %10586 = vst [vmem:[#allocation99_spill] sm:$0xff] %v6077_v22  ;;  %1232 = vmatpush.msrb.mxu2 %v6095_v5  ;;  %v6101_v22 = vld [vmem:[%s9576_s5 + $0x18] sm:$0xff] }
 0x21a   :  { %10587 = vst [vmem:[#allocation101_spill] sm:$0xff] %v6083_v3  ;;  %1252 = vmatpush.msra.mxu3 %v6101_v22  ;;  %v6107_v3 = vld [vmem:[%s9577_s4 + $0x1e0] sm:$0xff] }
 0x21b   :  { %10588 = vst [vmem:[#allocation102_spill] sm:$0xff] %v6089_v33  ;;  %1257 = vmatpush.msrb.mxu0 %v6107_v3  ;;  %v6113_v33 = vld [vmem:[%s9577_s4 + $0x1e8] sm:$0xff] }
 0x21c   :  { %10589 = vst [vmem:[#allocation103_spill] sm:$0xff] %v6095_v5  ;;  %1277 = vmatpush.msrb.mxu1 %v6113_v33  ;;  %v6119_v5 = vld [vmem:[%s9577_s4 + $0x1f0] sm:$0xff] }
 0x21d   :  { %10590 = vst [vmem:[#allocation104_spill] sm:$0xff] %v6101_v22  ;;  %1297 = vmatpush.msra.mxu2 %v6119_v5  ;;  %v6125_v22 = vld [vmem:[%s9577_s4 + $0x1f8] sm:$0xff] }
 0x21e   :  { %10591 = vst [vmem:[#allocation105_spill] sm:$0xff] %v6107_v3  ;;  %1317 = vmatpush.msrb.mxu3 %v6125_v22  ;;  %v6131_v3 = vld [vmem:[%s9577_s4 + $0x1c0] sm:$0xff] }
 0x21f   :  { %10592 = vst [vmem:[#allocation106_spill] sm:$0xff] %v6113_v33  ;;  %1258 = vmatpush.msrb.mxu0 %v6131_v3  ;;  %v6137_v33 = vld [vmem:[%s9577_s4 + $0x1c8] sm:$0xff] }
 0x220   :  { %10593 = vst [vmem:[#allocation107_spill] sm:$0xff] %v6119_v5  ;;  %1278 = vmatpush.msrb.mxu1 %v6137_v33  ;;  %v6143_v5 = vld [vmem:[%s9577_s4 + $0x1d0] sm:$0xff] }
 0x221   :  { %10594 = vst [vmem:[#allocation108_spill] sm:$0xff] %v6125_v22  ;;  %1298 = vmatpush.msra.mxu2 %v6143_v5  ;;  %v6149_v22 = vld [vmem:[%s9577_s4 + $0x1d8] sm:$0xff] }
 0x222   :  { %10595 = vst [vmem:[#allocation109_spill] sm:$0xff] %v6131_v3  ;;  %1318 = vmatpush.msrb.mxu3 %v6149_v22  ;;  %v6155_v3 = vld [vmem:[%s9577_s4 + $0x1a0] sm:$0xff] }
 0x223   :  { %10596 = vst [vmem:[#allocation110_spill] sm:$0xff] %v6137_v33  ;;  %1259 = vmatpush.msrb.mxu0 %v6155_v3  ;;  %v6161_v33 = vld [vmem:[%s9577_s4 + $0x1a8] sm:$0xff] }
 0x224   :  { %10597 = vst [vmem:[#allocation111_spill] sm:$0xff] %v6143_v5  ;;  %1279 = vmatpush.msrb.mxu1 %v6161_v33  ;;  %v6167_v5 = vld [vmem:[%s9577_s4 + $0x1b0] sm:$0xff] }
 0x225   :  { %10598 = vst [vmem:[#allocation113_spill] sm:$0xff] %v6149_v22  ;;  %1299 = vmatpush.msra.mxu2 %v6167_v5  ;;  %v6173_v22 = vld [vmem:[%s9577_s4 + $0x1b8] sm:$0xff] }
 0x226   :  { %10599 = vst [vmem:[#allocation115_spill] sm:$0xff] %v6155_v3  ;;  %1319 = vmatpush.msrb.mxu3 %v6173_v22  ;;  %v6179_v3 = vld [vmem:[%s9577_s4 + $0x180] sm:$0xff] }
 0x227   :  { %10600 = vst [vmem:[#allocation116_spill] sm:$0xff] %v6161_v33  ;;  %1260 = vmatpush.msrb.mxu0 %v6179_v3  ;;  %v6185_v33 = vld [vmem:[%s9577_s4 + $0x188] sm:$0xff] }
 0x228   :  { %10601 = vst [vmem:[#allocation117_spill] sm:$0xff] %v6167_v5  ;;  %1280 = vmatpush.msrb.mxu1 %v6185_v33  ;;  %v6191_v5 = vld [vmem:[%s9577_s4 + $0x190] sm:$0xff] }
 0x229   :  { %10602 = vst [vmem:[#allocation119_spill] sm:$0xff] %v6173_v22  ;;  %1300 = vmatpush.msra.mxu2 %v6191_v5  ;;  %v6197_v22 = vld [vmem:[%s9577_s4 + $0x198] sm:$0xff] }
 0x22a   :  { %10603 = vst [vmem:[#allocation121_spill] sm:$0xff] %v6179_v3  ;;  %1320 = vmatpush.msrb.mxu3 %v6197_v22  ;;  %v6203_v3 = vld [vmem:[%s9577_s4 + $0x160] sm:$0xff] }
 0x22b   :  { %10604 = vst [vmem:[#allocation122_spill] sm:$0xff] %v6185_v33  ;;  %1261 = vmatpush.msrb.mxu0 %v6203_v3  ;;  %v6209_v33 = vld [vmem:[%s9577_s4 + $0x168] sm:$0xff] }
 0x22c   :  { %10605 = vst [vmem:[#allocation123_spill] sm:$0xff] %v6191_v5  ;;  %1281 = vmatpush.msrb.mxu1 %v6209_v33  ;;  %v6215_v5 = vld [vmem:[%s9577_s4 + $0x170] sm:$0xff] }
 0x22d   :  { %10606 = vst [vmem:[#allocation124_spill] sm:$0xff] %v6197_v22  ;;  %1301 = vmatpush.msra.mxu2 %v6215_v5  ;;  %v6221_v22 = vld [vmem:[%s9577_s4 + $0x178] sm:$0xff] }
 0x22e   :  { %10607 = vst [vmem:[#allocation125_spill] sm:$0xff] %v6203_v3  ;;  %1321 = vmatpush.msrb.mxu3 %v6221_v22  ;;  %v6227_v3 = vld [vmem:[%s9577_s4 + $0x140] sm:$0xff] }
 0x22f   :  { %10608 = vst [vmem:[#allocation126_spill] sm:$0xff] %v6209_v33  ;;  %1262 = vmatpush.msrb.mxu0 %v6227_v3  ;;  %v6233_v33 = vld [vmem:[%s9577_s4 + $0x148] sm:$0xff] }
 0x230   :  { %10609 = vst [vmem:[#allocation127_spill] sm:$0xff] %v6215_v5  ;;  %1282 = vmatpush.msrb.mxu1 %v6233_v33  ;;  %v6239_v5 = vld [vmem:[%s9577_s4 + $0x150] sm:$0xff] }
 0x231   :  { %10610 = vst [vmem:[#allocation128_spill] sm:$0xff] %v6221_v22  ;;  %1302 = vmatpush.msra.mxu2 %v6239_v5  ;;  %v6245_v22 = vld [vmem:[%s9577_s4 + $0x158] sm:$0xff] }
 0x232   :  { %10611 = vst [vmem:[#allocation129_spill] sm:$0xff] %v6227_v3  ;;  %1322 = vmatpush.msrb.mxu3 %v6245_v22  ;;  %v6251_v3 = vld [vmem:[%s9577_s4 + $0x120] sm:$0xff] }
 0x233   :  { %10612 = vst [vmem:[#allocation130_spill] sm:$0xff] %v6233_v33  ;;  %1263 = vmatpush.msrb.mxu0 %v6251_v3  ;;  %v6257_v33 = vld [vmem:[%s9577_s4 + $0x128] sm:$0xff]  ;;  %v926_v21 = vpop.f32.mrf.mxu1 }
 0x234   :  { %10613 = vst [vmem:[#allocation131_spill] sm:$0xff] %v6239_v5  ;;  %1283 = vmatpush.msrb.mxu1 %v6257_v33  ;;  %v6263_v5 = vld [vmem:[%s9577_s4 + $0x130] sm:$0xff] }
 0x235   :  { %10614 = vst [vmem:[#allocation133_spill] sm:$0xff] %v6245_v22  ;;  %1303 = vmatpush.msra.mxu2 %v6263_v5  ;;  %v6269_v22 = vld [vmem:[%s9577_s4 + $0x138] sm:$0xff] }
 0x236   :  { %10615 = vst [vmem:[#allocation134_spill] sm:$0xff] %v6251_v3  ;;  %1323 = vmatpush.msrb.mxu3 %v6269_v22  ;;  %v6275_v3 = vld [vmem:[%s9577_s4 + $0x100] sm:$0xff] }
 0x237   :  { %10616 = vst [vmem:[#allocation135_spill] sm:$0xff] %v6257_v33  ;;  %1264 = vmatpush.msrb.mxu0 %v6275_v3  ;;  %v6281_v33 = vld [vmem:[%s9577_s4 + $0x108] sm:$0xff] }
 0x238   :  { %10617 = vst [vmem:[#allocation136_spill] sm:$0xff] %v6263_v5  ;;  %1284 = vmatpush.msrb.mxu1 %v6281_v33  ;;  %v6287_v5 = vld [vmem:[%s9577_s4 + $0x110] sm:$0xff] }
 0x239   :  { %10618 = vst [vmem:[#allocation138_spill] sm:$0xff] %v6269_v22  ;;  %1304 = vmatpush.msra.mxu2 %v6287_v5  ;;  %v6293_v22 = vld [vmem:[%s9577_s4 + $0x118] sm:$0xff] }
 0x23a   :  { %10619 = vst [vmem:[#allocation141_spill] sm:$0xff] %v6275_v3  ;;  %1324 = vmatpush.msrb.mxu3 %v6293_v22  ;;  %v6299_v3 = vld [vmem:[%s9577_s4 + $0xe0] sm:$0xff]  ;;  %v946_v25 = vpop.f32.mrf.mxu2  ;;  %v966_v39 = vpop.f32.mrf.mxu3 }
 0x23b   :  { %10620 = vst [vmem:[#allocation142_spill] sm:$0xff] %v6281_v33  ;;  %1265 = vmatpush.msrb.mxu0 %v6299_v3  ;;  %v6305_v33 = vld [vmem:[%s9577_s4 + $0xe8] sm:$0xff] }
 0x23c   :  { %10621 = vst [vmem:[#allocation143_spill] sm:$0xff] %v6287_v5  ;;  %1285 = vmatpush.msrb.mxu1 %v6305_v33  ;;  %v6311_v5 = vld [vmem:[%s9577_s4 + $0xf0] sm:$0xff] }
 0x23d   :  { %10622 = vst [vmem:[#allocation144_spill] sm:$0xff] %v6293_v22  ;;  %1305 = vmatpush.msra.mxu2 %v6311_v5  ;;  %v6317_v22 = vld [vmem:[%s9577_s4 + $0xf8] sm:$0xff] }
 0x23e   :  { %10623 = vst [vmem:[#allocation145_spill] sm:$0xff] %v6299_v3  ;;  %1325 = vmatpush.msrb.mxu3 %v6317_v22  ;;  %v6323_v3 = vld [vmem:[%s9577_s4 + $0xc0] sm:$0xff] }
 0x23f   :  { %10624 = vst [vmem:[#allocation146_spill] sm:$0xff] %v6305_v33  ;;  %1266 = vmatpush.msrb.mxu0 %v6323_v3  ;;  %v6329_v33 = vld [vmem:[%s9577_s4 + $0xc8] sm:$0xff] }
 0x240   :  { %10625 = vst [vmem:[#allocation147_spill] sm:$0xff] %v6311_v5  ;;  %1286 = vmatpush.msrb.mxu1 %v6329_v33  ;;  %v6335_v5 = vld [vmem:[%s9577_s4 + $0xd0] sm:$0xff] }
 0x241   :  { %10626 = vst [vmem:[#allocation148_spill] sm:$0xff] %v6317_v22  ;;  %1306 = vmatpush.msra.mxu2 %v6335_v5  ;;  %v6341_v22 = vld [vmem:[%s9577_s4 + $0xd8] sm:$0xff] }
 0x242   :  { %10627 = vst [vmem:[#allocation149_spill] sm:$0xff] %v6323_v3  ;;  %1326 = vmatpush.msrb.mxu3 %v6341_v22  ;;  %v6347_v3 = vld [vmem:[%s9577_s4 + $0xa0] sm:$0xff] }
 0x243   :  { %10628 = vst [vmem:[#allocation150_spill] sm:$0xff] %v6329_v33  ;;  %1267 = vmatpush.msrb.mxu0 %v6347_v3  ;;  %v6353_v33 = vld [vmem:[%s9577_s4 + $0xa8] sm:$0xff] }
 0x244   :  { %10629 = vst [vmem:[#allocation152_spill] sm:$0xff] %v6335_v5  ;;  %1287 = vmatpush.msrb.mxu1 %v6353_v33  ;;  %v6359_v5 = vld [vmem:[%s9577_s4 + $0xb0] sm:$0xff]  ;;  %v1026_v59 = vpop.f32.mrf.mxu2  ;;  %v1046_v58 = vpop.f32.mrf.mxu3 }
 0x245   :  { %10630 = vst [vmem:[#allocation153_spill] sm:$0xff] %v6341_v22  ;;  %1307 = vmatpush.msra.mxu2 %v6359_v5  ;;  %v6365_v22 = vld [vmem:[%s9577_s4 + $0xb8] sm:$0xff]  ;;  %v1027_v16 = vadd.f32 %v1026_v59, %v946_v25 }
 0x246   :  { %10631 = vst [vmem:[#allocation154_spill] sm:$0xff] %v6347_v3  ;;  %1327 = vmatpush.msrb.mxu3 %v6365_v22  ;;  %v6371_v3 = vld [vmem:[%s9577_s4 + $0x80] sm:$0xff] }
 0x247   :  { %10632 = vst [vmem:[#allocation156_spill] sm:$0xff] %v6353_v33  ;;  %1268 = vmatpush.msrb.mxu0 %v6371_v3  ;;  %v6377_v33 = vld [vmem:[%s9577_s4 + $0x88] sm:$0xff]  ;;  %v1051_v14 = vadd.f32 %v1027_v16, %v5305_v61  ;;  %v10656_v16 = vld [vmem:[#allocation79_spill] sm:$0xff] }
 0x248   :  { %10633 = vst [vmem:[#allocation158_spill] sm:$0xff] %v6359_v5  ;;  %1288 = vmatpush.msrb.mxu1 %v6377_v33  ;;  %v6383_v5 = vld [vmem:[%s9577_s4 + $0x90] sm:$0xff] }
 0x249   :  { %10634 = vst [vmem:[#allocation64_spill] sm:$0xff] %v6365_v22  ;;  %1308 = vmatpush.msra.mxu2 %v6383_v5  ;;  %v6389_v22 = vld [vmem:[%s9577_s4 + $0x98] sm:$0xff]  ;;  %v1055_v26 = vmul.f32 0.5, %v1051_v14  ;;  %v10655_v14 = vld [vmem:[#allocation89_spill] sm:$0xff] }
 0x24a   :  { %10635 = vst [vmem:[#allocation59_spill] sm:$0xff] %v6371_v3  ;;  %1328 = vmatpush.msrb.mxu3 %v6389_v22  ;;  %v6395_v3 = vld [vmem:[%s9577_s4 + $0x60] sm:$0xff] }
 0x24b   :  { %10636 = vst [vmem:[#allocation75_spill] sm:$0xff] %v6377_v33  ;;  %1269 = vmatpush.msrb.mxu0 %v6395_v3  ;;  %v6401_v33 = vld [vmem:[%s9577_s4 + $0x68] sm:$0xff] }
 0x24c   :  { %10637 = vst [vmem:[#allocation112_spill] sm:$0xff] %v6383_v5  ;;  %1289 = vmatpush.msrb.mxu1 %v6401_v33  ;;  %v6407_v5 = vld [vmem:[%s9577_s4 + $0x70] sm:$0xff] }
 0x24d   :  { %10638 = vst [vmem:[#allocation167_spill] sm:$0xff] %v6389_v22  ;;  %1309 = vmatpush.msra.mxu2 %v6407_v5  ;;  %v6413_v22 = vld [vmem:[%s9577_s4 + $0x78] sm:$0xff] }
 0x24e   :  { %10639 = vst [vmem:[#allocation168_spill] sm:$0xff] %v6395_v3  ;;  %1329 = vmatpush.msrb.mxu3 %v6413_v22  ;;  %v6419_v3 = vld [vmem:[%s9577_s4 + $0x40] sm:$0xff] }
 0x24f   :  { %10640 = vst [vmem:[#allocation169_spill] sm:$0xff] %v6401_v33  ;;  %1270 = vmatpush.msrb.mxu0 %v6419_v3  ;;  %v6425_v33 = vld [vmem:[%s9577_s4 + $0x48] sm:$0xff] }
 0x250   :  { %10641 = vst [vmem:[#allocation170_spill] sm:$0xff] %v6407_v5  ;;  %1290 = vmatpush.msrb.mxu1 %v6425_v33  ;;  %v6431_v5 = vld [vmem:[%s9577_s4 + $0x50] sm:$0xff] }
 0x251   :  { %10642 = vst [vmem:[#allocation171_spill] sm:$0xff] %v6413_v22  ;;  %1310 = vmatpush.msra.mxu2 %v6431_v5  ;;  %v6437_v22 = vld [vmem:[%s9577_s4 + $0x58] sm:$0xff] }
 0x252   :  { %10643 = vst [vmem:[#allocation172_spill] sm:$0xff] %v6419_v3  ;;  %1330 = vmatpush.msrb.mxu3 %v6437_v22  ;;  %v6443_v3 = vld [vmem:[%s9577_s4 + $0x20] sm:$0xff] }
 0x253   :  { %10644 = vst [vmem:[#allocation173_spill] sm:$0xff] %v6425_v33  ;;  %1271 = vmatpush.msrb.mxu0 %v6443_v3  ;;  %v6449_v33 = vld [vmem:[%s9577_s4 + $0x28] sm:$0xff] }
 0x254   :  { %10645 = vst [vmem:[#allocation174_spill] sm:$0xff] %v6431_v5  ;;  %1291 = vmatpush.msrb.mxu1 %v6449_v33  ;;  %v6455_v5 = vld [vmem:[%s9577_s4 + $0x30] sm:$0xff] }
 0x255   :  { %10646 = vst [vmem:[#allocation175_spill] sm:$0xff] %v6437_v22  ;;  %1311 = vmatpush.msra.mxu2 %v6455_v5  ;;  %v6461_v22 = vld [vmem:[%s9577_s4 + $0x38] sm:$0xff] }
 0x256   :  { %10647 = vst [vmem:[#allocation176_spill] sm:$0xff] %v6443_v3  ;;  %1331 = vmatpush.msrb.mxu3 %v6461_v22  ;;  %v6467_v3 = vld [vmem:[%s9577_s4] sm:$0xff] }
 0x257   :  { %10648 = vst [vmem:[#allocation177_spill] sm:$0xff] %v6449_v33  ;;  %1272 = vmatpush.msrb.mxu0 %v6467_v3  ;;  %v6473_v33 = vld [vmem:[%s9577_s4 + $0x8] sm:$0xff] }
 0x258   :  { %10649 = vst [vmem:[#allocation178_spill] sm:$0xff] %v6455_v5  ;;  %1292 = vmatpush.msrb.mxu1 %v6473_v33  ;;  %v6479_v5 = vld [vmem:[%s9577_s4 + $0x10] sm:$0xff] }
 0x259   :  { %10650 = vst [vmem:[#allocation179_spill] sm:$0xff] %v6461_v22  ;;  %1312 = vmatpush.msra.mxu2 %v6479_v5  ;;  %v6485_v22 = vld [vmem:[%s9577_s4 + $0x18] sm:$0xff] }
 0x25a   :  { %10651 = vst [vmem:[#allocation180_spill] sm:$0xff] %v6467_v3  ;;  %1332 = vmatpush.msrb.mxu3 %v6485_v22  ;;  %v906_v3 = vpop.f32.mrf.mxu0 }
 0x25b   :  { %10652 = vst [vmem:[#allocation181_spill] sm:$0xff] %v6473_v33  ;;  %v1006_v33 = vpop.f32.mrf.mxu1 }
 0x25c   :  { %10653 = vst [vmem:[#allocation182_spill] sm:$0xff] %v6479_v5  ;;  %v1007_v4 = vadd.f32 %v1006_v33, %v926_v21 }
 0x25d   :  { %10654 = vst [vmem:[#allocation183_spill] sm:$0xff] %v6485_v22  ;;  %v1047_v22 = vadd.f32 %v1046_v58, %v966_v39  ;;  %v162_v58 = vadd.f32 %v10656_v16, %v5087_v17 }
 0x25e   :  { %v1050_v0 = vadd.f32 %v1007_v4, %v5301_v20 }
 0x25f   :  { %v1052_v57 = vadd.f32 %v1047_v22, %v5307_v62 }
 0x260   :  { %v1054_v63 = vmul.f32 0.5, %v1050_v0 }
 0x262   :  { %v986_v2 = vpop.f32.mrf.mxu0 }
 0x263   :  { %v987_v12 = vadd.f32 %v986_v2, %v906_v3 }
 0x265   :  { %v1049_v1 = vadd.f32 %v987_v12, %v5299_v55 }
 0x267   :  { %v1053_v5 = vmul.f32 0.5, %v1049_v1 }
 0x269   :  { %2945 = vtanh.f32 %v1053_v5 }
 0x26a   :  { %2947 = vtanh.f32 %v1054_v63  ;;  %v1092_v59 = vpop.f32.mrf.mxu0 }
 0x26b   :  { %2949 = vtanh.f32 %v1052_v57  ;;  %v121_v57 = vadd.f32 %v10655_v14, %v5084_v15  ;;  %v1152_v14 = vpop.f32.mrf.mxu3 }
 0x26c   :  { %2951 = vtanh.f32 %v1055_v26  ;;  %v1112_v26 = vpop.f32.mrf.mxu1 }
 0x26d   :  { %v1155_v22 = vadd.f32 %v1092_v59, %v121_v57 }
 0x26f   :  { %v2946_v3 = vpop.eup %2945 }
 0x270   :  { %v2948_v21 = vpop.eup %2947  ;;  %v1059_v33 = vmul.f32 0.5, %v2946_v3  ;;  %v1156_v3 = vadd.f32 %v1112_v26, %v162_v58 }
 0x271   :  { %v1060_v12 = vmul.f32 0.5, %v2948_v21  ;;  %v2950_v0 = vpop.eup %2949 }
 0x272   :  { %v1062_v4 = vadd.f32 0.5, %v1059_v33  ;;  %v2952_v63 = vpop.eup %2951 }
 0x273   :  { %v1063_v1 = vadd.f32 0.5, %v1060_v12  ;;  %v1061_v39 = vmul.f32 0.5, %v2952_v63  ;;  %v1160_v12 = vmul.f32 0.5, %v1156_v3  ;;  %v1132_v63 = vpop.f32.mrf.mxu2  ;;  %v10684_v3 = vld [vmem:[#allocation27_spill] sm:$0xff] }
 0x274   :  { %v1067_v2 = vmul.f32 %v2950_v0, %v1062_v4 }
 0x275   :  { %v1066_v5 = vmul.f32 %v1063_v1, %v5319_v51  ;;  %v1064_v21 = vadd.f32 0.5, %v1061_v39  ;;  %v1159_v51 = vmul.f32 0.5, %v1155_v22  ;;  %v10657_v1 = vld [vmem:[#allocation98_spill] sm:$0xff] }
 0x276   :  { %v244_v0 = vadd.f32 %v10657_v1, %v5114_v30  ;;  %v10683_v22 = vld [vmem:[#allocation26_spill] sm:$0xff]  ;;  %v10690_v1 = vld [vmem:[#allocation33_spill] sm:$0xff] }
 0x277   :  { %v6493_v25 = vadd.f32 %v1067_v2, %v1066_v5  ;;  %v10658_v5 = vld [vmem:[#allocation132_spill] sm:$0xff] }
 0x278   :  { %v203_v2 = vadd.f32 %v10658_v5, %v5149_v42  ;;  %v1158_v39 = vadd.f32 %v1152_v14, %v244_v0  ;;  %v10691_v0 = vld [vmem:[#allocation34_spill] sm:$0xff]  ;;  %v10692_v5 = vld [vmem:[#allocation35_spill] sm:$0xff] }
 0x279   :  { %2953 = vtanh.f32 %v6493_v25  ;;  %v10695_v14 = vld [vmem:[#allocation38_spill] sm:$0xff] }
 0x27a   :  { %2955 = vtanh.f32 %v1159_v51  ;;  %v1157_v57 = vadd.f32 %v1132_v63, %v203_v2  ;;  %v10687_v51 = vld [vmem:[#allocation30_spill] sm:$0xff]  ;;  %v10693_v2 = vld [vmem:[#allocation36_spill] sm:$0xff]  ;;  %v10694_v63 = vld [vmem:[#allocation37_spill] sm:$0xff] }
 0x27b   :  { %2957 = vtanh.f32 %v1160_v12  ;;  %v10688_v12 = vld [vmem:[#allocation31_spill] sm:$0xff] }
 0x27c   :  { %v1161_v16 = vmul.f32 0.5, %v1157_v57  ;;  %2959 = vtanh.f32 %v1158_v39  ;;  %v10696_v57 = vld [vmem:[#allocation39_spill] sm:$0xff]  ;;  %v10697_v39 = vld [vmem:[#allocation40_spill] sm:$0xff] }
 0x27e   :  { %2961 = vtanh.f32 %v1161_v16  ;;  %v10698_v16 = vld [vmem:[#allocation41_spill] sm:$0xff] }
 0x27f   :  { %v2954_v33 = vpop.eup %2953 }
 0x280   :  { %v1070_v4 = vmul.f32 %v2954_v33, %v1064_v21  ;;  %v2956_v58 = vpop.eup %2955  ;;  %v10685_v21 = vld [vmem:[#allocation28_spill] sm:$0xff]  ;;  %v10686_v33 = vld [vmem:[#allocation29_spill] sm:$0xff] }
 0x281   :  { %v2958_v59 = vpop.eup %2957  ;;  %v1165_v26 = vmul.f32 0.5, %v2956_v58  ;;  %v10699_v58 = vld [vmem:[#allocation42_spill] sm:$0xff] }
 0x282   :  { %1193 = vmatmul.f32.vlgmr.msra.gmra.mxu0 %v1070_v4  ;;  %1213 = vmatmul.f32.vlgmr.msra.gmra.mxu1 %v1070_v4 }
 0x283   :  { %1233 = vmatmul.f32.vlgmr.msrb.gmra.mxu2 %v1070_v4  ;;  %1253 = vmatmul.f32.vlgmr.msra.gmra.mxu3 %v1070_v4  ;;  %v10689_v4 = vld [vmem:[#allocation32_spill] sm:$0xff] }
 0x284   :  { %1363 = vmatpush.msra.mxu0 %v5329_v7  ;;  %1383 = vmatpush.msra.mxu1 %v5335_v6  ;;  %v1166_v7 = vmul.f32 0.5, %v2958_v59  ;;  %v1168_v6 = vadd.f32 0.5, %v1165_v26  ;;  %v10700_v59 = vld [vmem:[#allocation43_spill] sm:$0xff]  ;;  %v10701_v26 = vld [vmem:[#allocation44_spill] sm:$0xff] }
 0x285   :  { %1403 = vmatpush.msrb.mxu2 %v5341_v8  ;;  %1423 = vmatpush.msra.mxu3 %v5347_v9  ;;  %v2960_v9 = vpop.eup %2959 }
 0x286   :  { %1364 = vmatpush.msra.mxu0 %v5353_v10  ;;  %1384 = vmatpush.msra.mxu1 %v5359_v11  ;;  %v1169_v8 = vadd.f32 0.5, %v1166_v7  ;;  %v1173_v11 = vmul.f32 %v2960_v9, %v1168_v6  ;;  %v10702_v7 = vld [vmem:[#allocation45_spill] sm:$0xff]  ;;  %v10703_v6 = vld [vmem:[#allocation46_spill] sm:$0xff]  ;;  %v10705_v9 = vld [vmem:[#allocation48_spill] sm:$0xff] }
 0x287   :  { %1404 = vmatpush.msrb.mxu2 %v5365_v24  ;;  %1424 = vmatpush.msra.mxu3 %v5371_v40  ;;  %v2962_v24 = vpop.eup %2961 }
 0x288   :  { %1365 = vmatpush.msra.mxu0 %v5377_v13  ;;  %1385 = vmatpush.msra.mxu1 %v5383_v27  ;;  %v1172_v10 = vmul.f32 %v1169_v8, %v5323_v60  ;;  %v1167_v60 = vmul.f32 0.5, %v2962_v24  ;;  %v10659_v13 = vld [vmem:[#allocation3_spill] sm:$0xff] }
 0x289   :  { %1405 = vmatpush.msrb.mxu2 %v5389_v19  ;;  %1425 = vmatpush.msra.mxu3 %v5395_v18  ;;  %v10660_v19 = vld [vmem:[#allocation6_spill] sm:$0xff]  ;;  %v10661_v18 = vld [vmem:[#allocation12_spill] sm:$0xff]  ;;  %v10704_v8 = vld [vmem:[#allocation47_spill] sm:$0xff] }
 0x28a   :  { %1366 = vmatpush.msra.mxu0 %v5403_v23  ;;  %1386 = vmatpush.msra.mxu1 %v5409_v28  ;;  %v6527_v40 = vadd.f32 %v1173_v11, %v1172_v10  ;;  %v1170_v27 = vadd.f32 0.5, %v1167_v60  ;;  %v10662_v28 = vld [vmem:[#allocation7_spill] sm:$0xff]  ;;  %v10706_v10 = vld [vmem:[#allocation49_spill] sm:$0xff]  ;;  %v10707_v11 = vld [vmem:[#allocation50_spill] sm:$0xff] }
 0x28b   :  { %1406 = vmatpush.msrb.mxu2 %v5415_v29  ;;  %1426 = vmatpush.msra.mxu3 %v5421_v31  ;;  %v10663_v29 = vld [vmem:[#allocation4_spill] sm:$0xff]  ;;  %v10708_v24 = vld [vmem:[#allocation51_spill] sm:$0xff] }
 0x28c   :  { %1367 = vmatpush.msra.mxu0 %v5431_v32  ;;  %1387 = vmatpush.msra.mxu1 %v5437_v34  ;;  %2963 = vtanh.f32 %v6527_v40  ;;  %v10664_v32 = vld [vmem:[#allocation8_spill] sm:$0xff]  ;;  %v10665_v34 = vld [vmem:[#allocation13_spill] sm:$0xff] }
 0x28d   :  { %1407 = vmatpush.msrb.mxu2 %v5443_v35  ;;  %1427 = vmatpush.msra.mxu3 %v5449_v36  ;;  %v10666_v35 = vld [vmem:[#allocation9_spill] sm:$0xff]  ;;  %v10709_v60 = vld [vmem:[#allocation52_spill] sm:$0xff] }
 0x28e   :  { %1368 = vmatpush.msra.mxu0 %v5455_v37  ;;  %1388 = vmatpush.msra.mxu1 %v5461_v38  ;;  %v10667_v36 = vld [vmem:[#allocation93_spill] sm:$0xff]  ;;  %v10669_v38 = vld [vmem:[#allocation10_spill] sm:$0xff] }
 0x28f   :  { %1408 = vmatpush.msrb.mxu2 %v5467_v41  ;;  %1428 = vmatpush.msra.mxu3 %v5473_v43  ;;  %v10668_v37 = vld [vmem:[#allocation5_spill] sm:$0xff]  ;;  %v10670_v41 = vld [vmem:[#allocation14_spill] sm:$0xff]  ;;  %v10671_v43 = vld [vmem:[#allocation11_spill] sm:$0xff] }
 0x290   :  { %1369 = vmatpush.msra.mxu0 %v5479_v44  ;;  %1389 = vmatpush.msra.mxu1 %v5485_v45  ;;  %v10672_v44 = vld [vmem:[#allocation15_spill] sm:$0xff]  ;;  %v10673_v45 = vld [vmem:[#allocation16_spill] sm:$0xff] }
 0x291   :  { %1409 = vmatpush.msrb.mxu2 %v5491_v46  ;;  %1429 = vmatpush.msra.mxu3 %v5497_v47  ;;  %v10674_v46 = vld [vmem:[#allocation17_spill] sm:$0xff]  ;;  %v10675_v47 = vld [vmem:[#allocation18_spill] sm:$0xff] }
 0x292   :  { %1370 = vmatpush.msra.mxu0 %v5503_v48  ;;  %1390 = vmatpush.msra.mxu1 %v5509_v49  ;;  %v2964_v23 = vpop.eup %2963  ;;  %v10676_v48 = vld [vmem:[#allocation19_spill] sm:$0xff]  ;;  %v10677_v49 = vld [vmem:[#allocation20_spill] sm:$0xff] }
 0x293   :  { %1410 = vmatpush.msrb.mxu2 %v5515_v50  ;;  %1430 = vmatpush.msra.mxu3 %v5521_v53  ;;  %v1176_v31 = vmul.f32 %v2964_v23, %v1170_v27  ;;  %v10678_v50 = vld [vmem:[#allocation21_spill] sm:$0xff]  ;;  %v10679_v53 = vld [vmem:[#allocation22_spill] sm:$0xff] }
 0x294   :  { %1371 = vmatpush.msra.mxu0 %v5527_v52  ;;  %1391 = vmatpush.msra.mxu1 %v5533_v54  ;;  %v10680_v52 = vld [vmem:[#allocation23_spill] sm:$0xff]  ;;  %v10681_v54 = vld [vmem:[#allocation24_spill] sm:$0xff]  ;;  %v10711_v27 = vld [vmem:[#allocation54_spill] sm:$0xff] }
 0x295   :  { %1411 = vmatpush.msrb.mxu2 %v5539_v56  ;;  %1431 = vmatpush.msra.mxu3 %v10659_v13  ;;  %v10682_v56 = vld [vmem:[#allocation25_spill] sm:$0xff]  ;;  %v10714_v23 = vld [vmem:[#allocation58_spill] sm:$0xff] }
 0x296   :  { %1372 = vmatpush.msra.mxu0 %v10660_v19  ;;  %1392 = vmatpush.msra.mxu1 %v10661_v18  ;;  %v10710_v13 = vld [vmem:[#allocation53_spill] sm:$0xff]  ;;  %v10712_v19 = vld [vmem:[#allocation56_spill] sm:$0xff] }
 0x297   :  { %1412 = vmatpush.msrb.mxu2 %v10662_v28  ;;  %1432 = vmatpush.msra.mxu3 %v10663_v29  ;;  %v10713_v18 = vld [vmem:[#allocation57_spill] sm:$0xff]  ;;  %v10715_v28 = vld [vmem:[#allocation60_spill] sm:$0xff] }
 0x298   :  { %1373 = vmatpush.msra.mxu0 %v10664_v32  ;;  %1393 = vmatpush.msra.mxu1 %v10665_v34  ;;  %v10716_v29 = vld [vmem:[#allocation61_spill] sm:$0xff]  ;;  %v10718_v32 = vld [vmem:[#allocation63_spill] sm:$0xff] }
 0x299   :  { %1413 = vmatpush.msrb.mxu2 %v10666_v35  ;;  %1433 = vmatpush.msra.mxu3 %v10667_v36  ;;  %v10719_v34 = vld [vmem:[#allocation65_spill] sm:$0xff]  ;;  %v10720_v35 = vld [vmem:[#allocation66_spill] sm:$0xff]  ;;  %v10721_v36 = vld [vmem:[#allocation67_spill] sm:$0xff] }
 0x29a   :  { %1273 = vmatmul.f32.vlgmr.msrb.gmra.mxu0 %v1176_v31  ;;  %1293 = vmatmul.f32.vlgmr.msrb.gmra.mxu1 %v1176_v31 }
 0x29b   :  { %1313 = vmatmul.f32.vlgmr.msra.gmra.mxu2 %v1176_v31  ;;  %1333 = vmatmul.f32.vlgmr.msrb.gmra.mxu3 %v1176_v31 }
 0x29c   :  { %1374 = vmatpush.msra.mxu0 %v10668_v37  ;;  %1394 = vmatpush.msra.mxu1 %v10669_v38  ;;  %v10722_v37 = vld [vmem:[#allocation68_spill] sm:$0xff]  ;;  %v10723_v38 = vld [vmem:[#allocation69_spill] sm:$0xff] }
 0x29d   :  { %1414 = vmatpush.msrb.mxu2 %v10670_v41  ;;  %1434 = vmatpush.msra.mxu3 %v10671_v43  ;;  %v10724_v41 = vld [vmem:[#allocation70_spill] sm:$0xff]  ;;  %v10725_v43 = vld [vmem:[#allocation71_spill] sm:$0xff] }
 0x29e   :  { %1375 = vmatpush.msra.mxu0 %v10672_v44  ;;  %1395 = vmatpush.msra.mxu1 %v10673_v45  ;;  %v10726_v44 = vld [vmem:[#allocation72_spill] sm:$0xff]  ;;  %v10727_v45 = vld [vmem:[#allocation73_spill] sm:$0xff] }
 0x29f   :  { %1415 = vmatpush.msrb.mxu2 %v10674_v46  ;;  %1435 = vmatpush.msra.mxu3 %v10675_v47  ;;  %v10728_v46 = vld [vmem:[#allocation76_spill] sm:$0xff]  ;;  %v10729_v47 = vld [vmem:[#allocation77_spill] sm:$0xff] }
 0x2a0   :  { %1376 = vmatpush.msra.mxu0 %v10676_v48  ;;  %1396 = vmatpush.msra.mxu1 %v10677_v49  ;;  %v10730_v48 = vld [vmem:[#allocation78_spill] sm:$0xff]  ;;  %v10731_v49 = vld [vmem:[#allocation80_spill] sm:$0xff] }
 0x2a1   :  { %1416 = vmatpush.msrb.mxu2 %v10678_v50  ;;  %1436 = vmatpush.msra.mxu3 %v10679_v53  ;;  %v10732_v50 = vld [vmem:[#allocation81_spill] sm:$0xff]  ;;  %v10733_v53 = vld [vmem:[#allocation82_spill] sm:$0xff] }
 0x2a2   :  { %1377 = vmatpush.msra.mxu0 %v10680_v52  ;;  %1397 = vmatpush.msra.mxu1 %v10681_v54  ;;  %v10734_v52 = vld [vmem:[#allocation83_spill] sm:$0xff]  ;;  %v10735_v54 = vld [vmem:[#allocation84_spill] sm:$0xff] }
 0x2a3   :  { %1417 = vmatpush.msrb.mxu2 %v10682_v56  ;;  %1437 = vmatpush.msra.mxu3 %v10683_v22  ;;  %v10736_v56 = vld [vmem:[#allocation85_spill] sm:$0xff]  ;;  %v10737_v22 = vld [vmem:[#allocation86_spill] sm:$0xff] }
 0x2a4   :  { %1378 = vmatpush.msra.mxu0 %v10684_v3  ;;  %1398 = vmatpush.msra.mxu1 %v10685_v21  ;;  %v10738_v3 = vld [vmem:[#allocation87_spill] sm:$0xff]  ;;  %v10739_v21 = vld [vmem:[#allocation88_spill] sm:$0xff] }
 0x2a5   :  { %1418 = vmatpush.msrb.mxu2 %v10686_v33  ;;  %1438 = vmatpush.msra.mxu3 %v10687_v51  ;;  %v10740_v33 = vld [vmem:[#allocation90_spill] sm:$0xff]  ;;  %v10741_v51 = vld [vmem:[#allocation91_spill] sm:$0xff] }
 0x2a6   :  { %1379 = vmatmul.f32.vlgmr.msra.gmra.mxu0 %v1176_v31  ;;  %1399 = vmatmul.f32.vlgmr.msra.gmra.mxu1 %v1176_v31 }
 0x2a7   :  { %1419 = vmatmul.f32.vlgmr.msrb.gmra.mxu2 %v1176_v31  ;;  %1439 = vmatmul.f32.vlgmr.msra.gmra.mxu3 %v1176_v31  ;;  %v10717_v31 = vld [vmem:[#allocation62_spill] sm:$0xff] }
 0x2a8   :  { %1465 = vmatpush.msrb.mxu0 %v10688_v12  ;;  %1485 = vmatpush.msrb.mxu1 %v10689_v4  ;;  %v10742_v12 = vld [vmem:[#allocation92_spill] sm:$0xff]  ;;  %v10743_v4 = vld [vmem:[#allocation94_spill] sm:$0xff] }
 0x2a9   :  { %1505 = vmatpush.msra.mxu2 %v10690_v1  ;;  %1525 = vmatpush.msrb.mxu3 %v10691_v0  ;;  %v10744_v1 = vld [vmem:[#allocation95_spill] sm:$0xff]  ;;  %v10745_v0 = vld [vmem:[#allocation96_spill] sm:$0xff] }
 0x2aa   :  { %1466 = vmatpush.msrb.mxu0 %v10692_v5  ;;  %1486 = vmatpush.msrb.mxu1 %v10693_v2  ;;  %v10746_v5 = vld [vmem:[#allocation97_spill] sm:$0xff]  ;;  %v10747_v2 = vld [vmem:[#allocation99_spill] sm:$0xff] }
 0x2ab   :  { %1506 = vmatpush.msra.mxu2 %v10694_v63  ;;  %1526 = vmatpush.msrb.mxu3 %v10695_v14  ;;  %v10748_v63 = vld [vmem:[#allocation101_spill] sm:$0xff]  ;;  %v10749_v14 = vld [vmem:[#allocation102_spill] sm:$0xff] }
 0x2ac   :  { %1467 = vmatpush.msrb.mxu0 %v10696_v57  ;;  %1487 = vmatpush.msrb.mxu1 %v10697_v39  ;;  %v10750_v57 = vld [vmem:[#allocation103_spill] sm:$0xff]  ;;  %v10751_v39 = vld [vmem:[#allocation104_spill] sm:$0xff] }
 0x2ad   :  { %1507 = vmatpush.msra.mxu2 %v10698_v16  ;;  %1527 = vmatpush.msrb.mxu3 %v10699_v58  ;;  %v10752_v16 = vld [vmem:[#allocation105_spill] sm:$0xff]  ;;  %v10753_v58 = vld [vmem:[#allocation106_spill] sm:$0xff] }
 0x2ae   :  { %1468 = vmatpush.msrb.mxu0 %v10700_v59  ;;  %1488 = vmatpush.msrb.mxu1 %v10701_v26  ;;  %v10754_v59 = vld [vmem:[#allocation107_spill] sm:$0xff]  ;;  %v10755_v26 = vld [vmem:[#allocation108_spill] sm:$0xff] }
 0x2af   :  { %1508 = vmatpush.msra.mxu2 %v10702_v7  ;;  %1528 = vmatpush.msrb.mxu3 %v10703_v6  ;;  %v10756_v7 = vld [vmem:[#allocation109_spill] sm:$0xff]  ;;  %v10757_v6 = vld [vmem:[#allocation110_spill] sm:$0xff] }
 0x2b0   :  { %1469 = vmatpush.msrb.mxu0 %v10704_v8  ;;  %1489 = vmatpush.msrb.mxu1 %v10705_v9  ;;  %v10758_v8 = vld [vmem:[#allocation111_spill] sm:$0xff]  ;;  %v10759_v9 = vld [vmem:[#allocation113_spill] sm:$0xff] }
 0x2b1   :  { %1509 = vmatpush.msra.mxu2 %v10706_v10  ;;  %1529 = vmatpush.msrb.mxu3 %v10707_v11  ;;  %v10760_v10 = vld [vmem:[#allocation115_spill] sm:$0xff]  ;;  %v10761_v11 = vld [vmem:[#allocation116_spill] sm:$0xff] }
 0x2b2   :  { %1470 = vmatpush.msrb.mxu0 %v10708_v24  ;;  %1490 = vmatpush.msrb.mxu1 %v10709_v60  ;;  %v10762_v24 = vld [vmem:[#allocation117_spill] sm:$0xff]  ;;  %v10763_v60 = vld [vmem:[#allocation119_spill] sm:$0xff] }
 0x2b3   :  { %1510 = vmatpush.msra.mxu2 %v10710_v13  ;;  %1530 = vmatpush.msrb.mxu3 %v10711_v27  ;;  %v10764_v13 = vld [vmem:[#allocation121_spill] sm:$0xff]  ;;  %v10765_v27 = vld [vmem:[#allocation122_spill] sm:$0xff] }
 0x2b4   :  { %1471 = vmatpush.msrb.mxu0 %v10712_v19  ;;  %1491 = vmatpush.msrb.mxu1 %v10713_v18  ;;  %v10766_v19 = vld [vmem:[#allocation123_spill] sm:$0xff]  ;;  %v10767_v18 = vld [vmem:[#allocation124_spill] sm:$0xff] }
 0x2b5   :  { %1511 = vmatpush.msra.mxu2 %v10714_v23  ;;  %1531 = vmatpush.msrb.mxu3 %v10715_v28  ;;  %v10768_v23 = vld [vmem:[#allocation125_spill] sm:$0xff]  ;;  %v10769_v28 = vld [vmem:[#allocation126_spill] sm:$0xff] }
 0x2b6   :  { %1472 = vmatpush.msrb.mxu0 %v10716_v29  ;;  %1492 = vmatpush.msrb.mxu1 %v10717_v31  ;;  %v10770_v29 = vld [vmem:[#allocation127_spill] sm:$0xff]  ;;  %v10771_v31 = vld [vmem:[#allocation128_spill] sm:$0xff] }
 0x2b7   :  { %1512 = vmatpush.msra.mxu2 %v10718_v32  ;;  %1532 = vmatpush.msrb.mxu3 %v10719_v34  ;;  %v10772_v32 = vld [vmem:[#allocation129_spill] sm:$0xff]  ;;  %v10773_v34 = vld [vmem:[#allocation130_spill] sm:$0xff] }
 0x2b8   :  { %1473 = vmatpush.msrb.mxu0 %v10720_v35  ;;  %1493 = vmatpush.msrb.mxu1 %v10721_v36  ;;  %v10774_v35 = vld [vmem:[#allocation131_spill] sm:$0xff]  ;;  %v10775_v36 = vld [vmem:[#allocation133_spill] sm:$0xff] }
 0x2b9   :  { %1513 = vmatpush.msra.mxu2 %v10722_v37  ;;  %1533 = vmatpush.msrb.mxu3 %v10723_v38  ;;  %v10776_v37 = vld [vmem:[#allocation134_spill] sm:$0xff]  ;;  %v10777_v38 = vld [vmem:[#allocation135_spill] sm:$0xff] }
 0x2ba   :  { %1474 = vmatpush.msrb.mxu0 %v10724_v41  ;;  %1494 = vmatpush.msrb.mxu1 %v10725_v43  ;;  %v10778_v41 = vld [vmem:[#allocation136_spill] sm:$0xff]  ;;  %v10779_v43 = vld [vmem:[#allocation138_spill] sm:$0xff] }
 0x2bb   :  { %1514 = vmatpush.msra.mxu2 %v10726_v44  ;;  %1534 = vmatpush.msrb.mxu3 %v10727_v45  ;;  %v10780_v44 = vld [vmem:[#allocation141_spill] sm:$0xff]  ;;  %v10781_v45 = vld [vmem:[#allocation142_spill] sm:$0xff] }
 0x2bc   :  { %1475 = vmatpush.msrb.mxu0 %v10728_v46  ;;  %1495 = vmatpush.msrb.mxu1 %v10729_v47  ;;  %v10782_v46 = vld [vmem:[#allocation143_spill] sm:$0xff]  ;;  %v10783_v47 = vld [vmem:[#allocation144_spill] sm:$0xff] }
 0x2bd   :  { %1515 = vmatpush.msra.mxu2 %v10730_v48  ;;  %1535 = vmatpush.msrb.mxu3 %v10731_v49  ;;  %v10784_v48 = vld [vmem:[#allocation145_spill] sm:$0xff]  ;;  %v10785_v49 = vld [vmem:[#allocation146_spill] sm:$0xff] }
 0x2be   :  { %1476 = vmatpush.msrb.mxu0 %v10732_v50  ;;  %1496 = vmatpush.msrb.mxu1 %v10733_v53  ;;  %v10786_v50 = vld [vmem:[#allocation147_spill] sm:$0xff]  ;;  %v10787_v53 = vld [vmem:[#allocation148_spill] sm:$0xff] }
 0x2bf   :  { %1516 = vmatpush.msra.mxu2 %v10734_v52  ;;  %1536 = vmatpush.msrb.mxu3 %v10735_v54  ;;  %v10788_v52 = vld [vmem:[#allocation149_spill] sm:$0xff]  ;;  %v10789_v54 = vld [vmem:[#allocation150_spill] sm:$0xff] }
 0x2c0   :  { %1477 = vmatpush.msrb.mxu0 %v10736_v56  ;;  %1497 = vmatpush.msrb.mxu1 %v10737_v22  ;;  %v10790_v56 = vld [vmem:[#allocation152_spill] sm:$0xff]  ;;  %v10791_v22 = vld [vmem:[#allocation153_spill] sm:$0xff] }
 0x2c1   :  { %1517 = vmatpush.msra.mxu2 %v10738_v3  ;;  %1537 = vmatpush.msrb.mxu3 %v10739_v21  ;;  %v10792_v3 = vld [vmem:[#allocation154_spill] sm:$0xff]  ;;  %v10793_v21 = vld [vmem:[#allocation156_spill] sm:$0xff] }
 0x2c2   :  { %1478 = vmatpush.msrb.mxu0 %v10740_v33  ;;  %1498 = vmatpush.msrb.mxu1 %v10741_v51  ;;  %v10794_v33 = vld [vmem:[#allocation158_spill] sm:$0xff]  ;;  %v10795_v51 = vld [vmem:[#allocation64_spill] sm:$0xff] }
 0x2c3   :  { %1518 = vmatpush.msra.mxu2 %v10742_v12  ;;  %1538 = vmatpush.msrb.mxu3 %v10743_v4  ;;  %v10796_v12 = vld [vmem:[#allocation59_spill] sm:$0xff] }
 0x2c4   :  { %1479 = vmatpush.msrb.mxu0 %v10744_v1  ;;  %1499 = vmatpush.msrb.mxu1 %v10745_v0  ;;  %v10797_v4 = vld [vmem:[#allocation75_spill] sm:$0xff]  ;;  %v10798_v1 = vld [vmem:[#allocation112_spill] sm:$0xff] }
 0x2c5   :  { %1519 = vmatpush.msra.mxu2 %v10746_v5  ;;  %1539 = vmatpush.msrb.mxu3 %v10747_v2  ;;  %v10799_v0 = vld [vmem:[#allocation167_spill] sm:$0xff]  ;;  %v10800_v5 = vld [vmem:[#allocation168_spill] sm:$0xff]  ;;  %v10801_v2 = vld [vmem:[#allocation169_spill] sm:$0xff] }
 0x2c6   :  { %1480 = vmatpush.msrb.mxu0 %v10748_v63  ;;  %1500 = vmatpush.msrb.mxu1 %v10749_v14  ;;  %v10802_v63 = vld [vmem:[#allocation170_spill] sm:$0xff]  ;;  %v10803_v14 = vld [vmem:[#allocation171_spill] sm:$0xff] }
 0x2c7   :  { %1520 = vmatpush.msra.mxu2 %v10750_v57  ;;  %1540 = vmatpush.msrb.mxu3 %v10751_v39  ;;  %v10804_v57 = vld [vmem:[#allocation172_spill] sm:$0xff]  ;;  %v10805_v39 = vld [vmem:[#allocation173_spill] sm:$0xff] }
 0x2c8   :  { %1545 = vmatpush.msra.mxu0 %v10752_v16  ;;  %1565 = vmatpush.msra.mxu1 %v10753_v58  ;;  %v10806_v16 = vld [vmem:[#allocation174_spill] sm:$0xff]  ;;  %v10807_v58 = vld [vmem:[#allocation175_spill] sm:$0xff] }
 0x2c9   :  { %1585 = vmatpush.msrb.mxu2 %v10754_v59  ;;  %1605 = vmatpush.msra.mxu3 %v10755_v26  ;;  %v10808_v59 = vld [vmem:[#allocation176_spill] sm:$0xff]  ;;  %v10809_v26 = vld [vmem:[#allocation177_spill] sm:$0xff] }
 0x2ca   :  { %1546 = vmatpush.msra.mxu0 %v10756_v7  ;;  %1566 = vmatpush.msra.mxu1 %v10757_v6  ;;  %v10810_v7 = vld [vmem:[#allocation178_spill] sm:$0xff]  ;;  %v10811_v6 = vld [vmem:[#allocation179_spill] sm:$0xff] }
 0x2cb   :  { %1586 = vmatpush.msrb.mxu2 %v10758_v8  ;;  %1606 = vmatpush.msra.mxu3 %v10759_v9  ;;  %v10812_v8 = vld [vmem:[#allocation180_spill] sm:$0xff]  ;;  %v10813_v9 = vld [vmem:[#allocation181_spill] sm:$0xff] }
 0x2cc   :  { %1547 = vmatpush.msra.mxu0 %v10760_v10  ;;  %1567 = vmatpush.msra.mxu1 %v10761_v11  ;;  %v10814_v10 = vld [vmem:[#allocation182_spill] sm:$0xff]  ;;  %v10815_v11 = vld [vmem:[#allocation183_spill] sm:$0xff] }
 0x2cd   :  { %1587 = vmatpush.msrb.mxu2 %v10762_v24  ;;  %1607 = vmatpush.msra.mxu3 %v10763_v60 }
 0x2ce   :  { %1548 = vmatpush.msra.mxu0 %v10764_v13  ;;  %1568 = vmatpush.msra.mxu1 %v10765_v27 }
 0x2cf   :  { %1588 = vmatpush.msrb.mxu2 %v10766_v19  ;;  %1608 = vmatpush.msra.mxu3 %v10767_v18 }
 0x2d0   :  { %1549 = vmatpush.msra.mxu0 %v10768_v23  ;;  %1569 = vmatpush.msra.mxu1 %v10769_v28 }
 0x2d1   :  { %1589 = vmatpush.msrb.mxu2 %v10770_v29  ;;  %1609 = vmatpush.msra.mxu3 %v10771_v31 }
 0x2d2   :  { %1550 = vmatpush.msra.mxu0 %v10772_v32  ;;  %1570 = vmatpush.msra.mxu1 %v10773_v34 }
 0x2d3   :  { %1590 = vmatpush.msrb.mxu2 %v10774_v35  ;;  %1610 = vmatpush.msra.mxu3 %v10775_v36 }
 0x2d4   :  { %1551 = vmatpush.msra.mxu0 %v10776_v37  ;;  %1571 = vmatpush.msra.mxu1 %v10777_v38 }
 0x2d5   :  { %1591 = vmatpush.msrb.mxu2 %v10778_v41  ;;  %1611 = vmatpush.msra.mxu3 %v10779_v43 }
 0x2d6   :  { %1552 = vmatpush.msra.mxu0 %v10780_v44  ;;  %1572 = vmatpush.msra.mxu1 %v10781_v45  ;;  %v10816_v44 = vld [vmem:[#allocation114_spill] sm:$0xff] }
 0x2d7   :  { %1592 = vmatpush.msrb.mxu2 %v10782_v46  ;;  %1612 = vmatpush.msra.mxu3 %v10783_v47  ;;  %v124_v45 = vadd.f32 %v10816_v44, %v5084_v15  ;;  %v10817_v46 = vld [vmem:[#allocation100_spill] sm:$0xff]  ;;  %v6771_v44 = vld [vmem:[%s9575_s2 + $0x1a0] sm:$0xff] }
 0x2d8   :  { %1553 = vmatpush.msra.mxu0 %v10784_v48  ;;  %1573 = vmatpush.msra.mxu1 %v10785_v49  ;;  %v165_v47 = vadd.f32 %v10817_v46, %v5087_v17 }
 0x2d9   :  { %1593 = vmatpush.msrb.mxu2 %v10786_v50  ;;  %1613 = vmatpush.msra.mxu3 %v10787_v53 }
 0x2da   :  { %1554 = vmatpush.msra.mxu0 %v10788_v52  ;;  %1574 = vmatpush.msra.mxu1 %v10789_v54 }
 0x2db   :  { %1594 = vmatpush.msrb.mxu2 %v10790_v56  ;;  %1614 = vmatpush.msra.mxu3 %v10791_v22 }
 0x2dc   :  { %1555 = vmatpush.msra.mxu0 %v10792_v3  ;;  %1575 = vmatpush.msra.mxu1 %v10793_v21 }
 0x2dd   :  { %1595 = vmatpush.msrb.mxu2 %v10794_v33  ;;  %1615 = vmatpush.msra.mxu3 %v10795_v51 }
 0x2de   :  { %1556 = vmatpush.msra.mxu0 %v10796_v12  ;;  %1576 = vmatpush.msra.mxu1 %v10797_v4 }
 0x2df   :  { %1596 = vmatpush.msrb.mxu2 %v10798_v1  ;;  %1616 = vmatpush.msra.mxu3 %v10799_v0  ;;  %v10818_v1 = vld [vmem:[#allocation118_spill] sm:$0xff] }
 0x2e0   :  { %1557 = vmatpush.msra.mxu0 %v10800_v5  ;;  %1577 = vmatpush.msra.mxu1 %v10801_v2  ;;  %v247_v0 = vadd.f32 %v10818_v1, %v5114_v30  ;;  %v10819_v5 = vld [vmem:[#allocation151_spill] sm:$0xff] }
 0x2e1   :  { %1597 = vmatpush.msrb.mxu2 %v10802_v63  ;;  %1617 = vmatpush.msra.mxu3 %v10803_v14  ;;  %v206_v2 = vadd.f32 %v10819_v5, %v5149_v42  ;;  %v6873_v1 = vld [vmem:[%s9575_s2 + $0x120] sm:$0xff]  ;;  %v6885_v5 = vld [vmem:[%s9575_s2 + $0x130] sm:$0xff] }
 0x2e2   :  { %1558 = vmatpush.msra.mxu0 %v10804_v57  ;;  %1578 = vmatpush.msra.mxu1 %v10805_v39 }
 0x2e3   :  { %1598 = vmatpush.msrb.mxu2 %v10806_v16  ;;  %1618 = vmatpush.msra.mxu3 %v10807_v58 }
 0x2e4   :  { %1559 = vmatpush.msra.mxu0 %v10808_v59  ;;  %1579 = vmatpush.msra.mxu1 %v10809_v26 }
 0x2e5   :  { %1599 = vmatpush.msrb.mxu2 %v10810_v7  ;;  %1619 = vmatpush.msra.mxu3 %v10811_v6 }
 0x2e6   :  { %1560 = vmatpush.msra.mxu0 %v10812_v8  ;;  %1580 = vmatpush.msra.mxu1 %v10813_v9 }
 0x2e7   :  { %1600 = vmatpush.msrb.mxu2 %v10814_v10  ;;  %1620 = vmatpush.msra.mxu3 %v10815_v11 }
 0x2ff   :  { %v1194_v24 = vpop.f32.mrf.mxu0  ;;  %v1214_v60 = vpop.f32.mrf.mxu1 }
 0x306   :  { %v1234_v13 = vpop.f32.mrf.mxu2  ;;  %v1254_v27 = vpop.f32.mrf.mxu3 }
 0x317   :  { %v1274_v19 = vpop.f32.mrf.mxu0  ;;  %v1294_v18 = vpop.f32.mrf.mxu1 }
 0x318   :  { %v1275_v23 = vadd.f32 %v1274_v19, %v1194_v24  ;;  %v1295_v28 = vadd.f32 %v1294_v18, %v1214_v60 }
 0x31a   :  { %v1337_v29 = vadd.f32 %v1275_v23, %v5299_v55  ;;  %v1338_v31 = vadd.f32 %v1295_v28, %v5301_v20 }
 0x31c   :  { %v1341_v32 = vmul.f32 0.5, %v1337_v29  ;;  %v1342_v34 = vmul.f32 0.5, %v1338_v31 }
 0x31e   :  { %2965 = vtanh.f32 %v1341_v32  ;;  %v1314_v35 = vpop.f32.mrf.mxu2  ;;  %v1334_v36 = vpop.f32.mrf.mxu3  ;;  %v6723_v32 = vld [vmem:[%s9575_s2 + $0x1e0] sm:$0xff] }
 0x31f   :  { %2967 = vtanh.f32 %v1342_v34  ;;  %v1315_v37 = vadd.f32 %v1314_v35, %v1234_v13  ;;  %v1335_v38 = vadd.f32 %v1334_v36, %v1254_v27  ;;  %v6735_v34 = vld [vmem:[%s9575_s2 + $0x1f0] sm:$0xff]  ;;  %v6741_v35 = vld [vmem:[%s9575_s2 + $0x1f8] sm:$0xff]  ;;  %v6747_v36 = vld [vmem:[%s9575_s2 + $0x1c0] sm:$0xff] }
 0x321   :  { %v1339_v41 = vadd.f32 %v1315_v37, %v5305_v61  ;;  %v1340_v43 = vadd.f32 %v1335_v38, %v5307_v62  ;;  %v6753_v37 = vld [vmem:[%s9575_s2 + $0x1c8] sm:$0xff]  ;;  %v6759_v38 = vld [vmem:[%s9575_s2 + $0x1d0] sm:$0xff] }
 0x323   :  { %v1343_v48 = vmul.f32 0.5, %v1339_v41  ;;  %2969 = vtanh.f32 %v1340_v43  ;;  %v1380_v49 = vpop.f32.mrf.mxu0  ;;  %v1400_v50 = vpop.f32.mrf.mxu1  ;;  %v6765_v41 = vld [vmem:[%s9575_s2 + $0x1d8] sm:$0xff] }
 0x324   :  { %v2966_v53 = vpop.eup %2965  ;;  %v1443_v52 = vadd.f32 %v1380_v49, %v124_v45  ;;  %v1444_v54 = vadd.f32 %v1400_v50, %v165_v47  ;;  %v6777_v45 = vld [vmem:[%s9575_s2 + $0x1a8] sm:$0xff]  ;;  %v6783_v47 = vld [vmem:[%s9575_s2 + $0x1b0] sm:$0xff]  ;;  %v6797_v50 = vld [vmem:[%s9575_s2 + $0x180] sm:$0xff] }
 0x325   :  { %v2968_v56 = vpop.eup %2967  ;;  %v1347_v22 = vmul.f32 0.5, %v2966_v53  ;;  %2971 = vtanh.f32 %v1343_v48  ;;  %v6789_v48 = vld [vmem:[%s9575_s2 + $0x1b8] sm:$0xff]  ;;  %v6803_v53 = vld [vmem:[%s9575_s2 + $0x188] sm:$0xff] }
 0x326   :  { %v1348_v3 = vmul.f32 0.5, %v2968_v56  ;;  %v1447_v21 = vmul.f32 0.5, %v1443_v52  ;;  %v1448_v33 = vmul.f32 0.5, %v1444_v54  ;;  %v6809_v52 = vld [vmem:[%s9575_s2 + $0x190] sm:$0xff]  ;;  %v6815_v54 = vld [vmem:[%s9575_s2 + $0x198] sm:$0xff]  ;;  %v6825_v56 = vld [vmem:[%s9575_s2 + $0x160] sm:$0xff] }
 0x327   :  { %v1350_v51 = vadd.f32 0.5, %v1347_v22  ;;  %v6831_v22 = vld [vmem:[%s9575_s2 + $0x168] sm:$0xff] }
 0x328   :  { %v1351_v12 = vadd.f32 0.5, %v1348_v3  ;;  %2973 = vtanh.f32 %v1447_v21  ;;  %v6837_v3 = vld [vmem:[%s9575_s2 + $0x170] sm:$0xff]  ;;  %v6843_v21 = vld [vmem:[%s9575_s2 + $0x178] sm:$0xff] }
 0x329   :  { %v2970_v4 = vpop.eup %2969  ;;  %2975 = vtanh.f32 %v1448_v33  ;;  %v6849_v33 = vld [vmem:[%s9575_s2 + $0x140] sm:$0xff] }
 0x32a   :  { %v1354_v63 = vmul.f32 %v1351_v12, %v6493_v25  ;;  %v1355_v14 = vmul.f32 %v2970_v4, %v1350_v51  ;;  %v1420_v57 = vpop.f32.mrf.mxu2  ;;  %v1440_v39 = vpop.f32.mrf.mxu3  ;;  %v6855_v51 = vld [vmem:[%s9575_s2 + $0x148] sm:$0xff]  ;;  %v6861_v12 = vld [vmem:[%s9575_s2 + $0x150] sm:$0xff]  ;;  %v6867_v4 = vld [vmem:[%s9575_s2 + $0x158] sm:$0xff] }
 0x32b   :  { %v1445_v16 = vadd.f32 %v1420_v57, %v206_v2  ;;  %v1446_v58 = vadd.f32 %v1440_v39, %v247_v0  ;;  %v2972_v59 = vpop.eup %2971  ;;  %v6879_v0 = vld [vmem:[%s9575_s2 + $0x128] sm:$0xff]  ;;  %v6891_v2 = vld [vmem:[%s9575_s2 + $0x138] sm:$0xff]  ;;  %v6909_v57 = vld [vmem:[%s9575_s2 + $0x110] sm:$0xff] }
 0x32c   :  { %v6713_v26 = vadd.f32 %v1355_v14, %v1354_v63  ;;  %v1349_v9 = vmul.f32 0.5, %v2972_v59  ;;  %v6897_v63 = vld [vmem:[%s9575_s2 + $0x100] sm:$0xff]  ;;  %v6903_v14 = vld [vmem:[%s9575_s2 + $0x108] sm:$0xff]  ;;  %v6915_v39 = vld [vmem:[%s9575_s2 + $0x118] sm:$0xff] }
 0x32d   :  { %v1449_v7 = vmul.f32 0.5, %v1445_v16  ;;  %2977 = vtanh.f32 %v1446_v58  ;;  %v6921_v16 = vld [vmem:[%s9575_s2 + $0xe0] sm:$0xff]  ;;  %v6927_v58 = vld [vmem:[%s9575_s2 + $0xe8] sm:$0xff]  ;;  %v6933_v59 = vld [vmem:[%s9575_s2 + $0xf0] sm:$0xff] }
 0x32e   :  { %v2974_v6 = vpop.eup %2973  ;;  %2979 = vtanh.f32 %v6713_v26  ;;  %v1352_v13 = vadd.f32 0.5, %v1349_v9  ;;  %v6957_v9 = vld [vmem:[%s9575_s2 + $0xd0] sm:$0xff] }
 0x32f   :  { %v2976_v8 = vpop.eup %2975  ;;  %v1453_v10 = vmul.f32 0.5, %v2974_v6  ;;  %2981 = vtanh.f32 %v1449_v7  ;;  %v6939_v7 = vld [vmem:[%s9575_s2 + $0xf8] sm:$0xff]  ;;  %v6945_v6 = vld [vmem:[%s9575_s2 + $0xc0] sm:$0xff]  ;;  %10823 = vst [vmem:[#allocation132_spill] sm:$0xff] %v6957_v9 }
 0x330   :  { %v1454_v11 = vmul.f32 0.5, %v2976_v8  ;;  %10820 = vst [vmem:[#allocation89_spill] sm:$0xff] %v6939_v7  ;;  %v6951_v8 = vld [vmem:[%s9575_s2 + $0xc8] sm:$0xff] }
 0x331   :  { %v1456_v24 = vadd.f32 0.5, %v1453_v10  ;;  %10821 = vst [vmem:[#allocation79_spill] sm:$0xff] %v6945_v6  ;;  %v6963_v10 = vld [vmem:[%s9575_s2 + $0xd8] sm:$0xff] }
 0x332   :  { %v1457_v25 = vadd.f32 0.5, %v1454_v11  ;;  %10822 = vst [vmem:[#allocation98_spill] sm:$0xff] %v6951_v8  ;;  %v6969_v11 = vld [vmem:[%s9575_s2 + $0xa0] sm:$0xff] }
 0x333   :  { %v2978_v60 = vpop.eup %2977  ;;  %10824 = vst [vmem:[#allocation3_spill] sm:$0xff] %v6963_v10 }
 0x334   :  { %v2980_v27 = vpop.eup %2979  ;;  %v1460_v19 = vmul.f32 %v1457_v25, %v6527_v40  ;;  %v1461_v18 = vmul.f32 %v2978_v60, %v1456_v24  ;;  %v6729_v40 = vld [vmem:[%s9575_s2 + $0x1e8] sm:$0xff]  ;;  %10825 = vst [vmem:[#allocation6_spill] sm:$0xff] %v6969_v11  ;;  %v6981_v25 = vld [vmem:[%s9575_s2 + $0xb0] sm:$0xff]  ;;  %v6987_v60 = vld [vmem:[%s9575_s2 + $0xb8] sm:$0xff] }
 0x335   :  { %v1358_v23 = vmul.f32 %v2980_v27, %v1352_v13  ;;  %v2982_v28 = vpop.eup %2981  ;;  %v6975_v24 = vld [vmem:[%s9575_s2 + $0xa8] sm:$0xff]  ;;  %10827 = vst [vmem:[#allocation7_spill] sm:$0xff] %v6981_v25  ;;  %v6993_v13 = vld [vmem:[%s9575_s2 + $0x80] sm:$0xff] }
 0x336   :  { %v6717_v29 = vadd.f32 %v1461_v18, %v1460_v19  ;;  %v1455_v31 = vmul.f32 0.5, %v2982_v28  ;;  %10826 = vst [vmem:[#allocation12_spill] sm:$0xff] %v6975_v24  ;;  %v6999_v27 = vld [vmem:[%s9575_s2 + $0x88] sm:$0xff]  ;;  %v7005_v19 = vld [vmem:[%s9575_s2 + $0x90] sm:$0xff]  ;;  %v7011_v18 = vld [vmem:[%s9575_s2 + $0x98] sm:$0xff] }
 0x337   :  { %1481 = vmatmul.f32.vlgmr.msrb.gmra.mxu0 %v1358_v23  ;;  %1501 = vmatmul.f32.vlgmr.msrb.gmra.mxu1 %v1358_v23  ;;  %10828 = vst [vmem:[#allocation4_spill] sm:$0xff] %v6987_v60  ;;  %v7023_v28 = vld [vmem:[%s9575_s2 + $0x68] sm:$0xff] }
 0x338   :  { %2983 = vtanh.f32 %v6717_v29  ;;  %1521 = vmatmul.f32.vlgmr.msra.gmra.mxu2 %v1358_v23  ;;  %1541 = vmatmul.f32.vlgmr.msrb.gmra.mxu3 %v1358_v23  ;;  %v1458_v43 = vadd.f32 0.5, %v1455_v31  ;;  %10829 = vst [vmem:[#allocation8_spill] sm:$0xff] %v6993_v13  ;;  %v7017_v23 = vld [vmem:[%s9575_s2 + $0x60] sm:$0xff]  ;;  %v7029_v31 = vld [vmem:[%s9575_s2 + $0x70] sm:$0xff] }
 0x339   :  { %1651 = vmatpush.msrb.mxu0 %v6723_v32  ;;  %1671 = vmatpush.msrb.mxu1 %v6729_v40  ;;  %10830 = vst [vmem:[#allocation13_spill] sm:$0xff] %v6999_v27 }
 0x33a   :  { %1691 = vmatpush.msra.mxu2 %v6735_v34  ;;  %1711 = vmatpush.msrb.mxu3 %v6741_v35  ;;  %10831 = vst [vmem:[#allocation9_spill] sm:$0xff] %v7005_v19 }
 0x33b   :  { %1652 = vmatpush.msrb.mxu0 %v6747_v36  ;;  %1672 = vmatpush.msrb.mxu1 %v6753_v37  ;;  %10832 = vst [vmem:[#allocation93_spill] sm:$0xff] %v7011_v18 }
 0x33c   :  { %1692 = vmatpush.msra.mxu2 %v6759_v38  ;;  %1712 = vmatpush.msrb.mxu3 %v6765_v41  ;;  %10833 = vst [vmem:[#allocation5_spill] sm:$0xff] %v7017_v23 }
 0x33d   :  { %1653 = vmatpush.msrb.mxu0 %v6771_v44  ;;  %1673 = vmatpush.msrb.mxu1 %v6777_v45  ;;  %10834 = vst [vmem:[#allocation10_spill] sm:$0xff] %v7023_v28 }
 0x33e   :  { %v2984_v46 = vpop.eup %2983  ;;  %1693 = vmatpush.msra.mxu2 %v6783_v47  ;;  %1713 = vmatpush.msrb.mxu3 %v6789_v48  ;;  %10835 = vst [vmem:[#allocation14_spill] sm:$0xff] %v7029_v31 }
 0x33f   :  { %v6792_v49 = vmul.f32 %v2984_v46, %v1458_v43  ;;  %1654 = vmatpush.msrb.mxu0 %v6797_v50  ;;  %1674 = vmatpush.msrb.mxu1 %v6803_v53  ;;  %v7035_v43 = vld [vmem:[%s9575_s2 + $0x78] sm:$0xff]  ;;  %v7041_v46 = vld [vmem:[%s9575_s2 + $0x40] sm:$0xff] }
 0x340   :  { %1694 = vmatpush.msra.mxu2 %v6809_v52  ;;  %1714 = vmatpush.msrb.mxu3 %v6815_v54  ;;  %10836 = vst [vmem:[#allocation11_spill] sm:$0xff] %v7035_v43 }
 0x341   :  { %1561 = vmatmul.f32.vlgmr.msra.gmra.mxu0 %v6792_v49  ;;  %1581 = vmatmul.f32.vlgmr.msra.gmra.mxu1 %v6792_v49  ;;  %10837 = vst [vmem:[#allocation15_spill] sm:$0xff] %v7041_v46 }
 0x342   :  { %1601 = vmatmul.f32.vlgmr.msrb.gmra.mxu2 %v6792_v49  ;;  %1621 = vmatmul.f32.vlgmr.msra.gmra.mxu3 %v6792_v49 }
 0x343   :  { %1655 = vmatpush.msrb.mxu0 %v6825_v56  ;;  %1675 = vmatpush.msrb.mxu1 %v6831_v22 }
 0x344   :  { %1695 = vmatpush.msra.mxu2 %v6837_v3  ;;  %1715 = vmatpush.msrb.mxu3 %v6843_v21 }
 0x345   :  { %1656 = vmatpush.msrb.mxu0 %v6849_v33  ;;  %1676 = vmatpush.msrb.mxu1 %v6855_v51 }
 0x346   :  { %1696 = vmatpush.msra.mxu2 %v6861_v12  ;;  %1716 = vmatpush.msrb.mxu3 %v6867_v4 }
 0x347   :  { %1657 = vmatpush.msrb.mxu0 %v6873_v1  ;;  %1677 = vmatpush.msrb.mxu1 %v6879_v0 }
 0x348   :  { %1697 = vmatpush.msra.mxu2 %v6885_v5  ;;  %1717 = vmatpush.msrb.mxu3 %v6891_v2 }
 0x349   :  { %1658 = vmatpush.msrb.mxu0 %v6897_v63  ;;  %1678 = vmatpush.msrb.mxu1 %v6903_v14 }
 0x34a   :  { %1698 = vmatpush.msra.mxu2 %v6909_v57  ;;  %1718 = vmatpush.msrb.mxu3 %v6915_v39 }
 0x34b   :  { %1659 = vmatpush.msrb.mxu0 %v6921_v16  ;;  %1679 = vmatpush.msrb.mxu1 %v6927_v58 }
 0x34c   :  { %1699 = vmatpush.msra.mxu2 %v6933_v59  ;;  %1719 = vmatpush.msrb.mxu3 %v6939_v7 }
 0x34d   :  { %1660 = vmatpush.msrb.mxu0 %v6945_v6  ;;  %1680 = vmatpush.msrb.mxu1 %v6951_v8 }
 0x34e   :  { %1700 = vmatpush.msra.mxu2 %v6957_v9  ;;  %1720 = vmatpush.msrb.mxu3 %v6963_v10 }
 0x34f   :  { %1661 = vmatpush.msrb.mxu0 %v6969_v11  ;;  %1681 = vmatpush.msrb.mxu1 %v6975_v24 }
 0x350   :  { %1701 = vmatpush.msra.mxu2 %v6981_v25  ;;  %1721 = vmatpush.msrb.mxu3 %v6987_v60 }
 0x351   :  { %1662 = vmatpush.msrb.mxu0 %v6993_v13  ;;  %1682 = vmatpush.msrb.mxu1 %v6999_v27 }
 0x352   :  { %1702 = vmatpush.msra.mxu2 %v7005_v19  ;;  %1722 = vmatpush.msrb.mxu3 %v7011_v18 }
 0x353   :  { %1663 = vmatpush.msrb.mxu0 %v7017_v23  ;;  %1683 = vmatpush.msrb.mxu1 %v7023_v28  ;;  %v7047_v28 = vld [vmem:[%s9575_s2 + $0x48] sm:$0xff] }
 0x354   :  { %1703 = vmatpush.msra.mxu2 %v7029_v31  ;;  %1723 = vmatpush.msrb.mxu3 %v7035_v43  ;;  %10838 = vst [vmem:[#allocation16_spill] sm:$0xff] %v7047_v28  ;;  %v7053_v31 = vld [vmem:[%s9575_s2 + $0x50] sm:$0xff]  ;;  %v7059_v43 = vld [vmem:[%s9575_s2 + $0x58] sm:$0xff] }
 0x355   :  { %1664 = vmatpush.msrb.mxu0 %v7041_v46  ;;  %1684 = vmatpush.msrb.mxu1 %v7047_v28  ;;  %10839 = vst [vmem:[#allocation17_spill] sm:$0xff] %v7053_v31  ;;  %v7065_v46 = vld [vmem:[%s9575_s2 + $0x20] sm:$0xff]  ;;  %v7071_v28 = vld [vmem:[%s9575_s2 + $0x28] sm:$0xff] }
 0x356   :  { %1704 = vmatpush.msra.mxu2 %v7053_v31  ;;  %10840 = vst [vmem:[#allocation18_spill] sm:$0xff] %v7059_v43  ;;  %1724 = vmatpush.msrb.mxu3 %v7059_v43  ;;  %v7077_v31 = vld [vmem:[%s9575_s2 + $0x30] sm:$0xff]  ;;  %v7083_v43 = vld [vmem:[%s9575_s2 + $0x38] sm:$0xff] }
 0x357   :  { %10841 = vst [vmem:[#allocation19_spill] sm:$0xff] %v7065_v46  ;;  %1665 = vmatpush.msrb.mxu0 %v7065_v46  ;;  %1685 = vmatpush.msrb.mxu1 %v7071_v28  ;;  %v7089_v46 = vld [vmem:[%s9575_s2] sm:$0xff] }
 0x358   :  { %10842 = vst [vmem:[#allocation20_spill] sm:$0xff] %v7071_v28  ;;  %1705 = vmatpush.msra.mxu2 %v7077_v31  ;;  %1725 = vmatpush.msrb.mxu3 %v7083_v43  ;;  %v7095_v28 = vld [vmem:[%s9575_s2 + $0x8] sm:$0xff] }
 0x359   :  { %10843 = vst [vmem:[#allocation21_spill] sm:$0xff] %v7077_v31  ;;  %1666 = vmatpush.msrb.mxu0 %v7089_v46  ;;  %1686 = vmatpush.msrb.mxu1 %v7095_v28  ;;  %v7101_v31 = vld [vmem:[%s9575_s2 + $0x10] sm:$0xff] }
 0x35a   :  { %10844 = vst [vmem:[#allocation22_spill] sm:$0xff] %v7083_v43  ;;  %1706 = vmatpush.msra.mxu2 %v7101_v31  ;;  %v7107_v43 = vld [vmem:[%s9575_s2 + $0x18] sm:$0xff]  ;;  %1667 = vmatmul.f32.vlgmr.msrb.gmra.mxu0 %v6792_v49 }
 0x35b   :  { %10845 = vst [vmem:[#allocation23_spill] sm:$0xff] %v7089_v46  ;;  %1726 = vmatpush.msrb.mxu3 %v7107_v43  ;;  %1687 = vmatmul.f32.vlgmr.msrb.gmra.mxu1 %v6792_v49 }
 0x35c   :  { %10846 = vst [vmem:[#allocation24_spill] sm:$0xff] %v7095_v28  ;;  %1707 = vmatmul.f32.vlgmr.msra.gmra.mxu2 %v6792_v49  ;;  %1727 = vmatmul.f32.vlgmr.msrb.gmra.mxu3 %v6792_v49  ;;  %v7117_v28 = vld [vmem:[%s9576_s5 + $0x1e0] sm:$0xff]  ;;  %v7135_v49 = vld [vmem:[%s9576_s5 + $0x1f8] sm:$0xff] }
 0x35d   :  { %10847 = vst [vmem:[#allocation25_spill] sm:$0xff] %v7101_v31  ;;  %1753 = vmatpush.msra.mxu0 %v7117_v28  ;;  %v7123_v31 = vld [vmem:[%s9576_s5 + $0x1e8] sm:$0xff]  ;;  %1813 = vmatpush.msra.mxu3 %v7135_v49 }
 0x35e   :  { %10848 = vst [vmem:[#allocation26_spill] sm:$0xff] %v7107_v43  ;;  %1773 = vmatpush.msra.mxu1 %v7123_v31  ;;  %v7129_v43 = vld [vmem:[%s9576_s5 + $0x1f0] sm:$0xff] }
 0x35f   :  { %10849 = vst [vmem:[#allocation27_spill] sm:$0xff] %v7117_v28  ;;  %1793 = vmatpush.msrb.mxu2 %v7129_v43  ;;  %v7141_v28 = vld [vmem:[%s9576_s5 + $0x1c0] sm:$0xff] }
 0x360   :  { %10850 = vst [vmem:[#allocation28_spill] sm:$0xff] %v7123_v31  ;;  %1754 = vmatpush.msra.mxu0 %v7141_v28  ;;  %v7147_v31 = vld [vmem:[%s9576_s5 + $0x1c8] sm:$0xff] }
 0x361   :  { %10851 = vst [vmem:[#allocation29_spill] sm:$0xff] %v7129_v43  ;;  %1774 = vmatpush.msra.mxu1 %v7147_v31  ;;  %v7153_v43 = vld [vmem:[%s9576_s5 + $0x1d0] sm:$0xff] }
 0x362   :  { %10852 = vst [vmem:[#allocation30_spill] sm:$0xff] %v7135_v49  ;;  %1794 = vmatpush.msrb.mxu2 %v7153_v43  ;;  %v7159_v49 = vld [vmem:[%s9576_s5 + $0x1d8] sm:$0xff] }
 0x363   :  { %10853 = vst [vmem:[#allocation31_spill] sm:$0xff] %v7141_v28  ;;  %1814 = vmatpush.msra.mxu3 %v7159_v49  ;;  %v7165_v28 = vld [vmem:[%s9576_s5 + $0x1a0] sm:$0xff] }
 0x364   :  { %10854 = vst [vmem:[#allocation32_spill] sm:$0xff] %v7147_v31  ;;  %1755 = vmatpush.msra.mxu0 %v7165_v28  ;;  %v7171_v31 = vld [vmem:[%s9576_s5 + $0x1a8] sm:$0xff] }
 0x365   :  { %10855 = vst [vmem:[#allocation33_spill] sm:$0xff] %v7153_v43  ;;  %1775 = vmatpush.msra.mxu1 %v7171_v31  ;;  %v7177_v43 = vld [vmem:[%s9576_s5 + $0x1b0] sm:$0xff] }
 0x366   :  { %10856 = vst [vmem:[#allocation34_spill] sm:$0xff] %v7159_v49  ;;  %1795 = vmatpush.msrb.mxu2 %v7177_v43  ;;  %v7183_v49 = vld [vmem:[%s9576_s5 + $0x1b8] sm:$0xff] }
 0x367   :  { %10857 = vst [vmem:[#allocation35_spill] sm:$0xff] %v7165_v28  ;;  %1815 = vmatpush.msra.mxu3 %v7183_v49  ;;  %v7189_v28 = vld [vmem:[%s9576_s5 + $0x180] sm:$0xff] }
 0x368   :  { %10858 = vst [vmem:[#allocation36_spill] sm:$0xff] %v7171_v31  ;;  %1756 = vmatpush.msra.mxu0 %v7189_v28  ;;  %v7195_v31 = vld [vmem:[%s9576_s5 + $0x188] sm:$0xff] }
 0x369   :  { %10859 = vst [vmem:[#allocation37_spill] sm:$0xff] %v7177_v43  ;;  %1776 = vmatpush.msra.mxu1 %v7195_v31  ;;  %v7201_v43 = vld [vmem:[%s9576_s5 + $0x190] sm:$0xff] }
 0x36a   :  { %10860 = vst [vmem:[#allocation38_spill] sm:$0xff] %v7183_v49  ;;  %1796 = vmatpush.msrb.mxu2 %v7201_v43  ;;  %v7207_v49 = vld [vmem:[%s9576_s5 + $0x198] sm:$0xff] }
 0x36b   :  { %10861 = vst [vmem:[#allocation39_spill] sm:$0xff] %v7189_v28  ;;  %1816 = vmatpush.msra.mxu3 %v7207_v49  ;;  %v7213_v28 = vld [vmem:[%s9576_s5 + $0x160] sm:$0xff] }
 0x36c   :  { %10862 = vst [vmem:[#allocation40_spill] sm:$0xff] %v7195_v31  ;;  %1757 = vmatpush.msra.mxu0 %v7213_v28  ;;  %v7219_v31 = vld [vmem:[%s9576_s5 + $0x168] sm:$0xff] }
 0x36d   :  { %10863 = vst [vmem:[#allocation41_spill] sm:$0xff] %v7201_v43  ;;  %1777 = vmatpush.msra.mxu1 %v7219_v31  ;;  %v7225_v43 = vld [vmem:[%s9576_s5 + $0x170] sm:$0xff] }
 0x36e   :  { %10864 = vst [vmem:[#allocation42_spill] sm:$0xff] %v7207_v49  ;;  %1797 = vmatpush.msrb.mxu2 %v7225_v43  ;;  %v7231_v49 = vld [vmem:[%s9576_s5 + $0x178] sm:$0xff] }
 0x36f   :  { %10865 = vst [vmem:[#allocation43_spill] sm:$0xff] %v7213_v28  ;;  %1817 = vmatpush.msra.mxu3 %v7231_v49  ;;  %v7237_v28 = vld [vmem:[%s9576_s5 + $0x140] sm:$0xff] }
 0x370   :  { %10866 = vst [vmem:[#allocation44_spill] sm:$0xff] %v7219_v31  ;;  %1758 = vmatpush.msra.mxu0 %v7237_v28  ;;  %v7243_v31 = vld [vmem:[%s9576_s5 + $0x148] sm:$0xff] }
 0x371   :  { %10867 = vst [vmem:[#allocation45_spill] sm:$0xff] %v7225_v43  ;;  %1778 = vmatpush.msra.mxu1 %v7243_v31  ;;  %v7249_v43 = vld [vmem:[%s9576_s5 + $0x150] sm:$0xff] }
 0x372   :  { %10868 = vst [vmem:[#allocation46_spill] sm:$0xff] %v7231_v49  ;;  %1798 = vmatpush.msrb.mxu2 %v7249_v43  ;;  %v7255_v49 = vld [vmem:[%s9576_s5 + $0x158] sm:$0xff] }
 0x373   :  { %10869 = vst [vmem:[#allocation47_spill] sm:$0xff] %v7237_v28  ;;  %1818 = vmatpush.msra.mxu3 %v7255_v49  ;;  %v7261_v28 = vld [vmem:[%s9576_s5 + $0x120] sm:$0xff] }
 0x374   :  { %10870 = vst [vmem:[#allocation48_spill] sm:$0xff] %v7243_v31  ;;  %1759 = vmatpush.msra.mxu0 %v7261_v28  ;;  %v7267_v31 = vld [vmem:[%s9576_s5 + $0x128] sm:$0xff] }
 0x375   :  { %10871 = vst [vmem:[#allocation49_spill] sm:$0xff] %v7249_v43  ;;  %1779 = vmatpush.msra.mxu1 %v7267_v31  ;;  %v7273_v43 = vld [vmem:[%s9576_s5 + $0x130] sm:$0xff] }
 0x376   :  { %10872 = vst [vmem:[#allocation50_spill] sm:$0xff] %v7255_v49  ;;  %1799 = vmatpush.msrb.mxu2 %v7273_v43  ;;  %v7279_v49 = vld [vmem:[%s9576_s5 + $0x138] sm:$0xff] }
 0x377   :  { %10873 = vst [vmem:[#allocation51_spill] sm:$0xff] %v7261_v28  ;;  %1819 = vmatpush.msra.mxu3 %v7279_v49  ;;  %v7285_v28 = vld [vmem:[%s9576_s5 + $0x100] sm:$0xff] }
 0x378   :  { %10874 = vst [vmem:[#allocation52_spill] sm:$0xff] %v7267_v31  ;;  %1760 = vmatpush.msra.mxu0 %v7285_v28  ;;  %v7291_v31 = vld [vmem:[%s9576_s5 + $0x108] sm:$0xff] }
 0x379   :  { %10875 = vst [vmem:[#allocation53_spill] sm:$0xff] %v7273_v43  ;;  %1780 = vmatpush.msra.mxu1 %v7291_v31  ;;  %v7297_v43 = vld [vmem:[%s9576_s5 + $0x110] sm:$0xff] }
 0x37a   :  { %10876 = vst [vmem:[#allocation54_spill] sm:$0xff] %v7279_v49  ;;  %1800 = vmatpush.msrb.mxu2 %v7297_v43  ;;  %v7303_v49 = vld [vmem:[%s9576_s5 + $0x118] sm:$0xff] }
 0x37b   :  { %10877 = vst [vmem:[#allocation56_spill] sm:$0xff] %v7285_v28  ;;  %1820 = vmatpush.msra.mxu3 %v7303_v49  ;;  %v7309_v28 = vld [vmem:[%s9576_s5 + $0xe0] sm:$0xff] }
 0x37c   :  { %10878 = vst [vmem:[#allocation57_spill] sm:$0xff] %v7291_v31  ;;  %1761 = vmatpush.msra.mxu0 %v7309_v28  ;;  %v7315_v31 = vld [vmem:[%s9576_s5 + $0xe8] sm:$0xff] }
 0x37d   :  { %10879 = vst [vmem:[#allocation58_spill] sm:$0xff] %v7297_v43  ;;  %1781 = vmatpush.msra.mxu1 %v7315_v31  ;;  %v7321_v43 = vld [vmem:[%s9576_s5 + $0xf0] sm:$0xff] }
 0x37e   :  { %10880 = vst [vmem:[#allocation60_spill] sm:$0xff] %v7303_v49  ;;  %1801 = vmatpush.msrb.mxu2 %v7321_v43  ;;  %v7327_v49 = vld [vmem:[%s9576_s5 + $0xf8] sm:$0xff] }
 0x37f   :  { %10881 = vst [vmem:[#allocation61_spill] sm:$0xff] %v7309_v28  ;;  %1821 = vmatpush.msra.mxu3 %v7327_v49  ;;  %v7333_v28 = vld [vmem:[%s9576_s5 + $0xc0] sm:$0xff] }
 0x380   :  { %10882 = vst [vmem:[#allocation62_spill] sm:$0xff] %v7315_v31  ;;  %1762 = vmatpush.msra.mxu0 %v7333_v28  ;;  %v7339_v31 = vld [vmem:[%s9576_s5 + $0xc8] sm:$0xff] }
 0x381   :  { %10883 = vst [vmem:[#allocation63_spill] sm:$0xff] %v7321_v43  ;;  %1782 = vmatpush.msra.mxu1 %v7339_v31  ;;  %v7345_v43 = vld [vmem:[%s9576_s5 + $0xd0] sm:$0xff] }
 0x382   :  { %10884 = vst [vmem:[#allocation65_spill] sm:$0xff] %v7327_v49  ;;  %1802 = vmatpush.msrb.mxu2 %v7345_v43  ;;  %v7351_v49 = vld [vmem:[%s9576_s5 + $0xd8] sm:$0xff] }
 0x383   :  { %10885 = vst [vmem:[#allocation66_spill] sm:$0xff] %v7333_v28  ;;  %1822 = vmatpush.msra.mxu3 %v7351_v49  ;;  %v7357_v28 = vld [vmem:[%s9576_s5 + $0xa0] sm:$0xff] }
 0x384   :  { %10886 = vst [vmem:[#allocation67_spill] sm:$0xff] %v7339_v31  ;;  %1763 = vmatpush.msra.mxu0 %v7357_v28  ;;  %v7363_v31 = vld [vmem:[%s9576_s5 + $0xa8] sm:$0xff] }
 0x385   :  { %10887 = vst [vmem:[#allocation68_spill] sm:$0xff] %v7345_v43  ;;  %1783 = vmatpush.msra.mxu1 %v7363_v31  ;;  %v7369_v43 = vld [vmem:[%s9576_s5 + $0xb0] sm:$0xff] }
 0x386   :  { %10888 = vst [vmem:[#allocation69_spill] sm:$0xff] %v7351_v49  ;;  %1803 = vmatpush.msrb.mxu2 %v7369_v43  ;;  %v7375_v49 = vld [vmem:[%s9576_s5 + $0xb8] sm:$0xff] }
 0x387   :  { %10889 = vst [vmem:[#allocation70_spill] sm:$0xff] %v7357_v28  ;;  %1823 = vmatpush.msra.mxu3 %v7375_v49  ;;  %v7381_v28 = vld [vmem:[%s9576_s5 + $0x80] sm:$0xff] }
 0x388   :  { %10890 = vst [vmem:[#allocation71_spill] sm:$0xff] %v7363_v31  ;;  %1764 = vmatpush.msra.mxu0 %v7381_v28  ;;  %v7387_v31 = vld [vmem:[%s9576_s5 + $0x88] sm:$0xff] }
 0x389   :  { %10891 = vst [vmem:[#allocation72_spill] sm:$0xff] %v7369_v43  ;;  %1784 = vmatpush.msra.mxu1 %v7387_v31  ;;  %v7393_v43 = vld [vmem:[%s9576_s5 + $0x90] sm:$0xff] }
 0x38a   :  { %10892 = vst [vmem:[#allocation73_spill] sm:$0xff] %v7375_v49  ;;  %1804 = vmatpush.msrb.mxu2 %v7393_v43  ;;  %v7399_v49 = vld [vmem:[%s9576_s5 + $0x98] sm:$0xff] }
 0x38b   :  { %10893 = vst [vmem:[#allocation76_spill] sm:$0xff] %v7381_v28  ;;  %1824 = vmatpush.msra.mxu3 %v7399_v49  ;;  %v7405_v28 = vld [vmem:[%s9576_s5 + $0x60] sm:$0xff] }
 0x38c   :  { %10894 = vst [vmem:[#allocation77_spill] sm:$0xff] %v7387_v31  ;;  %1765 = vmatpush.msra.mxu0 %v7405_v28  ;;  %v7411_v31 = vld [vmem:[%s9576_s5 + $0x68] sm:$0xff] }
 0x38d   :  { %10895 = vst [vmem:[#allocation78_spill] sm:$0xff] %v7393_v43  ;;  %1785 = vmatpush.msra.mxu1 %v7411_v31  ;;  %v7417_v43 = vld [vmem:[%s9576_s5 + $0x70] sm:$0xff] }
 0x38e   :  { %10896 = vst [vmem:[#allocation80_spill] sm:$0xff] %v7399_v49  ;;  %1805 = vmatpush.msrb.mxu2 %v7417_v43  ;;  %v7423_v49 = vld [vmem:[%s9576_s5 + $0x78] sm:$0xff] }
 0x38f   :  { %10897 = vst [vmem:[#allocation81_spill] sm:$0xff] %v7405_v28  ;;  %1825 = vmatpush.msra.mxu3 %v7423_v49  ;;  %v7429_v28 = vld [vmem:[%s9576_s5 + $0x40] sm:$0xff] }
 0x390   :  { %10898 = vst [vmem:[#allocation82_spill] sm:$0xff] %v7411_v31  ;;  %1766 = vmatpush.msra.mxu0 %v7429_v28  ;;  %v7435_v31 = vld [vmem:[%s9576_s5 + $0x48] sm:$0xff] }
 0x391   :  { %10899 = vst [vmem:[#allocation83_spill] sm:$0xff] %v7417_v43  ;;  %1786 = vmatpush.msra.mxu1 %v7435_v31  ;;  %v7441_v43 = vld [vmem:[%s9576_s5 + $0x50] sm:$0xff] }
 0x392   :  { %10900 = vst [vmem:[#allocation84_spill] sm:$0xff] %v7423_v49  ;;  %1806 = vmatpush.msrb.mxu2 %v7441_v43  ;;  %v7447_v49 = vld [vmem:[%s9576_s5 + $0x58] sm:$0xff] }
 0x393   :  { %10901 = vst [vmem:[#allocation85_spill] sm:$0xff] %v7429_v28  ;;  %1826 = vmatpush.msra.mxu3 %v7447_v49  ;;  %v7453_v28 = vld [vmem:[%s9576_s5 + $0x20] sm:$0xff] }
 0x394   :  { %10902 = vst [vmem:[#allocation86_spill] sm:$0xff] %v7435_v31  ;;  %1767 = vmatpush.msra.mxu0 %v7453_v28  ;;  %v7459_v31 = vld [vmem:[%s9576_s5 + $0x28] sm:$0xff] }
 0x395   :  { %10903 = vst [vmem:[#allocation87_spill] sm:$0xff] %v7441_v43  ;;  %1787 = vmatpush.msra.mxu1 %v7459_v31  ;;  %v7465_v43 = vld [vmem:[%s9576_s5 + $0x30] sm:$0xff] }
 0x396   :  { %10904 = vst [vmem:[#allocation88_spill] sm:$0xff] %v7447_v49  ;;  %1807 = vmatpush.msrb.mxu2 %v7465_v43  ;;  %v7471_v49 = vld [vmem:[%s9576_s5 + $0x38] sm:$0xff] }
 0x397   :  { %10905 = vst [vmem:[#allocation90_spill] sm:$0xff] %v7453_v28  ;;  %1827 = vmatpush.msra.mxu3 %v7471_v49  ;;  %v7477_v28 = vld [vmem:[%s9576_s5] sm:$0xff] }
 0x398   :  { %10906 = vst [vmem:[#allocation91_spill] sm:$0xff] %v7459_v31  ;;  %1768 = vmatpush.msra.mxu0 %v7477_v28  ;;  %v7483_v31 = vld [vmem:[%s9576_s5 + $0x8] sm:$0xff] }
 0x399   :  { %10907 = vst [vmem:[#allocation92_spill] sm:$0xff] %v7465_v43  ;;  %1788 = vmatpush.msra.mxu1 %v7483_v31  ;;  %v7489_v43 = vld [vmem:[%s9576_s5 + $0x10] sm:$0xff] }
 0x39a   :  { %10908 = vst [vmem:[#allocation94_spill] sm:$0xff] %v7471_v49  ;;  %1808 = vmatpush.msrb.mxu2 %v7489_v43  ;;  %v7495_v49 = vld [vmem:[%s9576_s5 + $0x18] sm:$0xff] }
 0x39b   :  { %10909 = vst [vmem:[#allocation95_spill] sm:$0xff] %v7477_v28  ;;  %1828 = vmatpush.msra.mxu3 %v7495_v49  ;;  %v7501_v28 = vld [vmem:[%s9577_s4 + $0x1e0] sm:$0xff] }
 0x39c   :  { %10910 = vst [vmem:[#allocation96_spill] sm:$0xff] %v7483_v31  ;;  %1833 = vmatpush.msrb.mxu0 %v7501_v28  ;;  %v7507_v31 = vld [vmem:[%s9577_s4 + $0x1e8] sm:$0xff] }
 0x39d   :  { %10911 = vst [vmem:[#allocation97_spill] sm:$0xff] %v7489_v43  ;;  %1853 = vmatpush.msrb.mxu1 %v7507_v31  ;;  %v7513_v43 = vld [vmem:[%s9577_s4 + $0x1f0] sm:$0xff] }
 0x39e   :  { %10912 = vst [vmem:[#allocation99_spill] sm:$0xff] %v7495_v49  ;;  %1873 = vmatpush.msra.mxu2 %v7513_v43  ;;  %v7519_v49 = vld [vmem:[%s9577_s4 + $0x1f8] sm:$0xff] }
 0x39f   :  { %10913 = vst [vmem:[#allocation101_spill] sm:$0xff] %v7501_v28  ;;  %1893 = vmatpush.msrb.mxu3 %v7519_v49  ;;  %v7525_v28 = vld [vmem:[%s9577_s4 + $0x1c0] sm:$0xff] }
 0x3a0   :  { %10914 = vst [vmem:[#allocation102_spill] sm:$0xff] %v7507_v31  ;;  %1834 = vmatpush.msrb.mxu0 %v7525_v28  ;;  %v7531_v31 = vld [vmem:[%s9577_s4 + $0x1c8] sm:$0xff] }
 0x3a1   :  { %10915 = vst [vmem:[#allocation103_spill] sm:$0xff] %v7513_v43  ;;  %1854 = vmatpush.msrb.mxu1 %v7531_v31  ;;  %v7537_v43 = vld [vmem:[%s9577_s4 + $0x1d0] sm:$0xff] }
 0x3a2   :  { %10916 = vst [vmem:[#allocation104_spill] sm:$0xff] %v7519_v49  ;;  %1874 = vmatpush.msra.mxu2 %v7537_v43  ;;  %v7543_v49 = vld [vmem:[%s9577_s4 + $0x1d8] sm:$0xff] }
 0x3a3   :  { %10917 = vst [vmem:[#allocation105_spill] sm:$0xff] %v7525_v28  ;;  %1894 = vmatpush.msrb.mxu3 %v7543_v49  ;;  %v7549_v28 = vld [vmem:[%s9577_s4 + $0x1a0] sm:$0xff] }
 0x3a4   :  { %10918 = vst [vmem:[#allocation106_spill] sm:$0xff] %v7531_v31  ;;  %1835 = vmatpush.msrb.mxu0 %v7549_v28  ;;  %v7555_v31 = vld [vmem:[%s9577_s4 + $0x1a8] sm:$0xff] }
 0x3a5   :  { %10919 = vst [vmem:[#allocation107_spill] sm:$0xff] %v7537_v43  ;;  %1855 = vmatpush.msrb.mxu1 %v7555_v31  ;;  %v7561_v43 = vld [vmem:[%s9577_s4 + $0x1b0] sm:$0xff] }
 0x3a6   :  { %10920 = vst [vmem:[#allocation108_spill] sm:$0xff] %v7543_v49  ;;  %1875 = vmatpush.msra.mxu2 %v7561_v43  ;;  %v7567_v49 = vld [vmem:[%s9577_s4 + $0x1b8] sm:$0xff] }
 0x3a7   :  { %10921 = vst [vmem:[#allocation109_spill] sm:$0xff] %v7549_v28  ;;  %1895 = vmatpush.msrb.mxu3 %v7567_v49  ;;  %v7573_v28 = vld [vmem:[%s9577_s4 + $0x180] sm:$0xff] }
 0x3a8   :  { %10922 = vst [vmem:[#allocation110_spill] sm:$0xff] %v7555_v31  ;;  %1836 = vmatpush.msrb.mxu0 %v7573_v28  ;;  %v7579_v31 = vld [vmem:[%s9577_s4 + $0x188] sm:$0xff] }
 0x3a9   :  { %10923 = vst [vmem:[#allocation111_spill] sm:$0xff] %v7561_v43  ;;  %1856 = vmatpush.msrb.mxu1 %v7579_v31  ;;  %v7585_v43 = vld [vmem:[%s9577_s4 + $0x190] sm:$0xff] }
 0x3aa   :  { %10924 = vst [vmem:[#allocation113_spill] sm:$0xff] %v7567_v49  ;;  %1876 = vmatpush.msra.mxu2 %v7585_v43  ;;  %v7591_v49 = vld [vmem:[%s9577_s4 + $0x198] sm:$0xff] }
 0x3ab   :  { %10925 = vst [vmem:[#allocation115_spill] sm:$0xff] %v7573_v28  ;;  %1896 = vmatpush.msrb.mxu3 %v7591_v49  ;;  %v7597_v28 = vld [vmem:[%s9577_s4 + $0x160] sm:$0xff] }
 0x3ac   :  { %10926 = vst [vmem:[#allocation116_spill] sm:$0xff] %v7579_v31  ;;  %1837 = vmatpush.msrb.mxu0 %v7597_v28  ;;  %v7603_v31 = vld [vmem:[%s9577_s4 + $0x168] sm:$0xff] }
 0x3ad   :  { %10927 = vst [vmem:[#allocation117_spill] sm:$0xff] %v7585_v43  ;;  %1857 = vmatpush.msrb.mxu1 %v7603_v31  ;;  %v7609_v43 = vld [vmem:[%s9577_s4 + $0x170] sm:$0xff] }
 0x3ae   :  { %10928 = vst [vmem:[#allocation119_spill] sm:$0xff] %v7591_v49  ;;  %1877 = vmatpush.msra.mxu2 %v7609_v43  ;;  %v7615_v49 = vld [vmem:[%s9577_s4 + $0x178] sm:$0xff] }
 0x3af   :  { %10929 = vst [vmem:[#allocation121_spill] sm:$0xff] %v7597_v28  ;;  %1897 = vmatpush.msrb.mxu3 %v7615_v49  ;;  %v7621_v28 = vld [vmem:[%s9577_s4 + $0x140] sm:$0xff] }
 0x3b0   :  { %10930 = vst [vmem:[#allocation122_spill] sm:$0xff] %v7603_v31  ;;  %1838 = vmatpush.msrb.mxu0 %v7621_v28  ;;  %v7627_v31 = vld [vmem:[%s9577_s4 + $0x148] sm:$0xff] }
 0x3b1   :  { %10931 = vst [vmem:[#allocation123_spill] sm:$0xff] %v7609_v43  ;;  %1858 = vmatpush.msrb.mxu1 %v7627_v31  ;;  %v7633_v43 = vld [vmem:[%s9577_s4 + $0x150] sm:$0xff] }
 0x3b2   :  { %10932 = vst [vmem:[#allocation124_spill] sm:$0xff] %v7615_v49  ;;  %1878 = vmatpush.msra.mxu2 %v7633_v43  ;;  %v7639_v49 = vld [vmem:[%s9577_s4 + $0x158] sm:$0xff] }
 0x3b3   :  { %10933 = vst [vmem:[#allocation125_spill] sm:$0xff] %v7621_v28  ;;  %1898 = vmatpush.msrb.mxu3 %v7639_v49  ;;  %v7645_v28 = vld [vmem:[%s9577_s4 + $0x120] sm:$0xff] }
 0x3b4   :  { %10934 = vst [vmem:[#allocation126_spill] sm:$0xff] %v7627_v31  ;;  %1839 = vmatpush.msrb.mxu0 %v7645_v28  ;;  %v7651_v31 = vld [vmem:[%s9577_s4 + $0x128] sm:$0xff]  ;;  %v1502_v46 = vpop.f32.mrf.mxu1 }
 0x3b5   :  { %10935 = vst [vmem:[#allocation127_spill] sm:$0xff] %v7633_v43  ;;  %1859 = vmatpush.msrb.mxu1 %v7651_v31  ;;  %v7657_v43 = vld [vmem:[%s9577_s4 + $0x130] sm:$0xff] }
 0x3b6   :  { %10936 = vst [vmem:[#allocation128_spill] sm:$0xff] %v7639_v49  ;;  %1879 = vmatpush.msra.mxu2 %v7657_v43  ;;  %v7663_v49 = vld [vmem:[%s9577_s4 + $0x138] sm:$0xff] }
 0x3b7   :  { %10937 = vst [vmem:[#allocation129_spill] sm:$0xff] %v7645_v28  ;;  %1899 = vmatpush.msrb.mxu3 %v7663_v49  ;;  %v7669_v28 = vld [vmem:[%s9577_s4 + $0x100] sm:$0xff] }
 0x3b8   :  { %10938 = vst [vmem:[#allocation130_spill] sm:$0xff] %v7651_v31  ;;  %1840 = vmatpush.msrb.mxu0 %v7669_v28  ;;  %v7675_v31 = vld [vmem:[%s9577_s4 + $0x108] sm:$0xff] }
 0x3b9   :  { %10939 = vst [vmem:[#allocation131_spill] sm:$0xff] %v7657_v43  ;;  %1860 = vmatpush.msrb.mxu1 %v7675_v31  ;;  %v7681_v43 = vld [vmem:[%s9577_s4 + $0x110] sm:$0xff] }
 0x3ba   :  { %10940 = vst [vmem:[#allocation133_spill] sm:$0xff] %v7663_v49  ;;  %1880 = vmatpush.msra.mxu2 %v7681_v43  ;;  %v7687_v49 = vld [vmem:[%s9577_s4 + $0x118] sm:$0xff] }
 0x3bb   :  { %10941 = vst [vmem:[#allocation134_spill] sm:$0xff] %v7669_v28  ;;  %1900 = vmatpush.msrb.mxu3 %v7687_v49  ;;  %v7693_v28 = vld [vmem:[%s9577_s4 + $0xe0] sm:$0xff]  ;;  %v1522_v23 = vpop.f32.mrf.mxu2  ;;  %v1542_v18 = vpop.f32.mrf.mxu3 }
 0x3bc   :  { %10942 = vst [vmem:[#allocation135_spill] sm:$0xff] %v7675_v31  ;;  %1841 = vmatpush.msrb.mxu0 %v7693_v28  ;;  %v7699_v31 = vld [vmem:[%s9577_s4 + $0xe8] sm:$0xff] }
 0x3bd   :  { %10943 = vst [vmem:[#allocation136_spill] sm:$0xff] %v7681_v43  ;;  %1861 = vmatpush.msrb.mxu1 %v7699_v31  ;;  %v7705_v43 = vld [vmem:[%s9577_s4 + $0xf0] sm:$0xff] }
 0x3be   :  { %10944 = vst [vmem:[#allocation138_spill] sm:$0xff] %v7687_v49  ;;  %1881 = vmatpush.msra.mxu2 %v7705_v43  ;;  %v7711_v49 = vld [vmem:[%s9577_s4 + $0xf8] sm:$0xff] }
 0x3bf   :  { %10945 = vst [vmem:[#allocation141_spill] sm:$0xff] %v7693_v28  ;;  %1901 = vmatpush.msrb.mxu3 %v7711_v49  ;;  %v7717_v28 = vld [vmem:[%s9577_s4 + $0xc0] sm:$0xff] }
 0x3c0   :  { %10946 = vst [vmem:[#allocation142_spill] sm:$0xff] %v7699_v31  ;;  %1842 = vmatpush.msrb.mxu0 %v7717_v28  ;;  %v7723_v31 = vld [vmem:[%s9577_s4 + $0xc8] sm:$0xff] }
 0x3c1   :  { %10947 = vst [vmem:[#allocation143_spill] sm:$0xff] %v7705_v43  ;;  %1862 = vmatpush.msrb.mxu1 %v7723_v31  ;;  %v7729_v43 = vld [vmem:[%s9577_s4 + $0xd0] sm:$0xff] }
 0x3c2   :  { %10948 = vst [vmem:[#allocation144_spill] sm:$0xff] %v7711_v49  ;;  %1882 = vmatpush.msra.mxu2 %v7729_v43  ;;  %v7735_v49 = vld [vmem:[%s9577_s4 + $0xd8] sm:$0xff] }
 0x3c3   :  { %10949 = vst [vmem:[#allocation145_spill] sm:$0xff] %v7717_v28  ;;  %1902 = vmatpush.msrb.mxu3 %v7735_v49  ;;  %v7741_v28 = vld [vmem:[%s9577_s4 + $0xa0] sm:$0xff] }
 0x3c4   :  { %10950 = vst [vmem:[#allocation146_spill] sm:$0xff] %v7723_v31  ;;  %1843 = vmatpush.msrb.mxu0 %v7741_v28  ;;  %v7747_v31 = vld [vmem:[%s9577_s4 + $0xa8] sm:$0xff] }
 0x3c5   :  { %10951 = vst [vmem:[#allocation147_spill] sm:$0xff] %v7729_v43  ;;  %1863 = vmatpush.msrb.mxu1 %v7747_v31  ;;  %v7753_v43 = vld [vmem:[%s9577_s4 + $0xb0] sm:$0xff]  ;;  %v1602_v11 = vpop.f32.mrf.mxu2  ;;  %v1622_v10 = vpop.f32.mrf.mxu3 }
 0x3c6   :  { %10952 = vst [vmem:[#allocation148_spill] sm:$0xff] %v7735_v49  ;;  %1883 = vmatpush.msra.mxu2 %v7753_v43  ;;  %v7759_v49 = vld [vmem:[%s9577_s4 + $0xb8] sm:$0xff]  ;;  %v1603_v9 = vadd.f32 %v1602_v11, %v1522_v23 }
 0x3c7   :  { %10953 = vst [vmem:[#allocation149_spill] sm:$0xff] %v7741_v28  ;;  %1903 = vmatpush.msrb.mxu3 %v7759_v49  ;;  %v7765_v28 = vld [vmem:[%s9577_s4 + $0x80] sm:$0xff] }
 0x3c8   :  { %10954 = vst [vmem:[#allocation150_spill] sm:$0xff] %v7747_v31  ;;  %1844 = vmatpush.msrb.mxu0 %v7765_v28  ;;  %v7771_v31 = vld [vmem:[%s9577_s4 + $0x88] sm:$0xff]  ;;  %v1627_v8 = vadd.f32 %v1603_v9, %v5305_v61 }
 0x3c9   :  { %10955 = vst [vmem:[#allocation152_spill] sm:$0xff] %v7753_v43  ;;  %1864 = vmatpush.msrb.mxu1 %v7771_v31  ;;  %v7777_v43 = vld [vmem:[%s9577_s4 + $0x90] sm:$0xff] }
 0x3ca   :  { %10956 = vst [vmem:[#allocation153_spill] sm:$0xff] %v7759_v49  ;;  %1884 = vmatpush.msra.mxu2 %v7777_v43  ;;  %v7783_v49 = vld [vmem:[%s9577_s4 + $0x98] sm:$0xff]  ;;  %v1631_v7 = vmul.f32 0.5, %v1627_v8  ;;  %v10977_v8 = vld [vmem:[#allocation139_spill] sm:$0xff] }
 0x3cb   :  { %10957 = vst [vmem:[#allocation154_spill] sm:$0xff] %v7765_v28  ;;  %1904 = vmatpush.msrb.mxu3 %v7783_v49  ;;  %v7789_v28 = vld [vmem:[%s9577_s4 + $0x60] sm:$0xff] }
 0x3cc   :  { %10958 = vst [vmem:[#allocation156_spill] sm:$0xff] %v7771_v31  ;;  %1845 = vmatpush.msrb.mxu0 %v7789_v28  ;;  %v7795_v31 = vld [vmem:[%s9577_s4 + $0x68] sm:$0xff] }
 0x3cd   :  { %10959 = vst [vmem:[#allocation158_spill] sm:$0xff] %v7777_v43  ;;  %1865 = vmatpush.msrb.mxu1 %v7795_v31  ;;  %v7801_v43 = vld [vmem:[%s9577_s4 + $0x70] sm:$0xff] }
 0x3ce   :  { %10960 = vst [vmem:[#allocation64_spill] sm:$0xff] %v7783_v49  ;;  %1885 = vmatpush.msra.mxu2 %v7801_v43  ;;  %v7807_v49 = vld [vmem:[%s9577_s4 + $0x78] sm:$0xff] }
 0x3cf   :  { %10961 = vst [vmem:[#allocation59_spill] sm:$0xff] %v7789_v28  ;;  %1905 = vmatpush.msrb.mxu3 %v7807_v49  ;;  %v7813_v28 = vld [vmem:[%s9577_s4 + $0x40] sm:$0xff] }
 0x3d0   :  { %10962 = vst [vmem:[#allocation75_spill] sm:$0xff] %v7795_v31  ;;  %1846 = vmatpush.msrb.mxu0 %v7813_v28  ;;  %v7819_v31 = vld [vmem:[%s9577_s4 + $0x48] sm:$0xff] }
 0x3d1   :  { %10963 = vst [vmem:[#allocation112_spill] sm:$0xff] %v7801_v43  ;;  %1866 = vmatpush.msrb.mxu1 %v7819_v31  ;;  %v7825_v43 = vld [vmem:[%s9577_s4 + $0x50] sm:$0xff] }
 0x3d2   :  { %10964 = vst [vmem:[#allocation167_spill] sm:$0xff] %v7807_v49  ;;  %1886 = vmatpush.msra.mxu2 %v7825_v43  ;;  %v7831_v49 = vld [vmem:[%s9577_s4 + $0x58] sm:$0xff] }
 0x3d3   :  { %10965 = vst [vmem:[#allocation168_spill] sm:$0xff] %v7813_v28  ;;  %1906 = vmatpush.msrb.mxu3 %v7831_v49  ;;  %v7837_v28 = vld [vmem:[%s9577_s4 + $0x20] sm:$0xff] }
 0x3d4   :  { %10966 = vst [vmem:[#allocation169_spill] sm:$0xff] %v7819_v31  ;;  %1847 = vmatpush.msrb.mxu0 %v7837_v28  ;;  %v7843_v31 = vld [vmem:[%s9577_s4 + $0x28] sm:$0xff] }
 0x3d5   :  { %10967 = vst [vmem:[#allocation170_spill] sm:$0xff] %v7825_v43  ;;  %1867 = vmatpush.msrb.mxu1 %v7843_v31  ;;  %v7849_v43 = vld [vmem:[%s9577_s4 + $0x30] sm:$0xff] }
 0x3d6   :  { %10968 = vst [vmem:[#allocation171_spill] sm:$0xff] %v7831_v49  ;;  %1887 = vmatpush.msra.mxu2 %v7849_v43  ;;  %v7855_v49 = vld [vmem:[%s9577_s4 + $0x38] sm:$0xff] }
 0x3d7   :  { %10969 = vst [vmem:[#allocation172_spill] sm:$0xff] %v7837_v28  ;;  %1907 = vmatpush.msrb.mxu3 %v7855_v49  ;;  %v7861_v28 = vld [vmem:[%s9577_s4] sm:$0xff] }
 0x3d8   :  { %10970 = vst [vmem:[#allocation173_spill] sm:$0xff] %v7843_v31  ;;  %1848 = vmatpush.msrb.mxu0 %v7861_v28  ;;  %v7867_v31 = vld [vmem:[%s9577_s4 + $0x8] sm:$0xff] }
 0x3d9   :  { %10971 = vst [vmem:[#allocation174_spill] sm:$0xff] %v7849_v43  ;;  %1868 = vmatpush.msrb.mxu1 %v7867_v31  ;;  %v7873_v43 = vld [vmem:[%s9577_s4 + $0x10] sm:$0xff] }
 0x3da   :  { %10972 = vst [vmem:[#allocation175_spill] sm:$0xff] %v7855_v49  ;;  %1888 = vmatpush.msra.mxu2 %v7873_v43  ;;  %v7879_v49 = vld [vmem:[%s9577_s4 + $0x18] sm:$0xff] }
 0x3db   :  { %10973 = vst [vmem:[#allocation176_spill] sm:$0xff] %v7861_v28  ;;  %1908 = vmatpush.msrb.mxu3 %v7879_v49  ;;  %v1482_v28 = vpop.f32.mrf.mxu0 }
 0x3dc   :  { %10974 = vst [vmem:[#allocation177_spill] sm:$0xff] %v7867_v31  ;;  %v1582_v31 = vpop.f32.mrf.mxu1 }
 0x3dd   :  { %10975 = vst [vmem:[#allocation178_spill] sm:$0xff] %v7873_v43  ;;  %v1583_v13 = vadd.f32 %v1582_v31, %v1502_v46 }
 0x3de   :  { %10976 = vst [vmem:[#allocation179_spill] sm:$0xff] %v7879_v49  ;;  %v1623_v49 = vadd.f32 %v1622_v10, %v1542_v18  ;;  %v10978_v10 = vld [vmem:[#allocation120_spill] sm:$0xff] }
 0x3df   :  { %v1626_v25 = vadd.f32 %v1583_v13, %v5301_v20  ;;  %v168_v18 = vadd.f32 %v10978_v10, %v5087_v17 }
 0x3e0   :  { %v1628_v6 = vadd.f32 %v1623_v49, %v5307_v62 }
 0x3e1   :  { %v1630_v24 = vmul.f32 0.5, %v1626_v25 }
 0x3e3   :  { %v1562_v19 = vpop.f32.mrf.mxu0 }
 0x3e4   :  { %v1563_v27 = vadd.f32 %v1562_v19, %v1482_v28 }
 0x3e6   :  { %v1625_v60 = vadd.f32 %v1563_v27, %v5299_v55 }
 0x3e8   :  { %v1629_v43 = vmul.f32 0.5, %v1625_v60 }
 0x3ea   :  { %2985 = vtanh.f32 %v1629_v43 }
 0x3eb   :  { %2987 = vtanh.f32 %v1630_v24  ;;  %v1668_v23 = vpop.f32.mrf.mxu0 }
 0x3ec   :  { %2989 = vtanh.f32 %v1628_v6  ;;  %v127_v6 = vadd.f32 %v10977_v8, %v5084_v15  ;;  %v1728_v8 = vpop.f32.mrf.mxu3 }
 0x3ed   :  { %2991 = vtanh.f32 %v1631_v7  ;;  %v1688_v7 = vpop.f32.mrf.mxu1 }
 0x3ee   :  { %v1731_v49 = vadd.f32 %v1668_v23, %v127_v6 }
 0x3f0   :  { %v2986_v19 = vpop.eup %2985 }
 0x3f1   :  { %v2988_v28 = vpop.eup %2987  ;;  %v1635_v31 = vmul.f32 0.5, %v2986_v19  ;;  %v1732_v19 = vadd.f32 %v1688_v7, %v168_v18 }
 0x3f2   :  { %v1636_v27 = vmul.f32 0.5, %v2988_v28  ;;  %v2990_v25 = vpop.eup %2989 }
 0x3f3   :  { %v1638_v13 = vadd.f32 0.5, %v1635_v31  ;;  %v2992_v24 = vpop.eup %2991 }
 0x3f4   :  { %v1639_v60 = vadd.f32 0.5, %v1636_v27  ;;  %v1637_v9 = vmul.f32 0.5, %v2992_v24  ;;  %v1736_v27 = vmul.f32 0.5, %v1732_v19  ;;  %v1708_v24 = vpop.f32.mrf.mxu2  ;;  %v11006_v19 = vld [vmem:[#allocation23_spill] sm:$0xff] }
 0x3f5   :  { %v1643_v46 = vmul.f32 %v2990_v25, %v1638_v13 }
 0x3f6   :  { %v1642_v43 = vmul.f32 %v1639_v60, %v6713_v26  ;;  %v1640_v28 = vadd.f32 0.5, %v1637_v9  ;;  %v1735_v26 = vmul.f32 0.5, %v1731_v49  ;;  %v10979_v60 = vld [vmem:[#allocation137_spill] sm:$0xff]  ;;  %v11005_v49 = vld [vmem:[#allocation22_spill] sm:$0xff] }
 0x3f7   :  { %v250_v25 = vadd.f32 %v10979_v60, %v5114_v30  ;;  %v11012_v60 = vld [vmem:[#allocation29_spill] sm:$0xff] }
 0x3f8   :  { %v7887_v11 = vadd.f32 %v1643_v46, %v1642_v43  ;;  %v10980_v43 = vld [vmem:[#allocation160_spill] sm:$0xff] }
 0x3f9   :  { %v209_v46 = vadd.f32 %v10980_v43, %v5149_v42  ;;  %v1734_v9 = vadd.f32 %v1728_v8, %v250_v25  ;;  %v11013_v25 = vld [vmem:[#allocation30_spill] sm:$0xff]  ;;  %v11014_v43 = vld [vmem:[#allocation31_spill] sm:$0xff] }
 0x3fa   :  { %2993 = vtanh.f32 %v7887_v11  ;;  %v11017_v8 = vld [vmem:[#allocation34_spill] sm:$0xff] }
 0x3fb   :  { %2995 = vtanh.f32 %v1735_v26  ;;  %v1733_v6 = vadd.f32 %v1708_v24, %v209_v46  ;;  %v11009_v26 = vld [vmem:[#allocation26_spill] sm:$0xff]  ;;  %v11015_v46 = vld [vmem:[#allocation32_spill] sm:$0xff]  ;;  %v11016_v24 = vld [vmem:[#allocation33_spill] sm:$0xff] }
 0x3fc   :  { %2997 = vtanh.f32 %v1736_v27  ;;  %v11010_v27 = vld [vmem:[#allocation27_spill] sm:$0xff] }
 0x3fd   :  { %v1737_v10 = vmul.f32 0.5, %v1733_v6  ;;  %2999 = vtanh.f32 %v1734_v9  ;;  %v11018_v6 = vld [vmem:[#allocation35_spill] sm:$0xff]  ;;  %v11019_v9 = vld [vmem:[#allocation36_spill] sm:$0xff] }
 0x3ff   :  { %3001 = vtanh.f32 %v1737_v10  ;;  %v11020_v10 = vld [vmem:[#allocation37_spill] sm:$0xff] }
 0x400   :  { %v2994_v31 = vpop.eup %2993 }
 0x401   :  { %v1646_v13 = vmul.f32 %v2994_v31, %v1640_v28  ;;  %v2996_v18 = vpop.eup %2995  ;;  %v11007_v28 = vld [vmem:[#allocation24_spill] sm:$0xff]  ;;  %v11008_v31 = vld [vmem:[#allocation25_spill] sm:$0xff] }
 0x402   :  { %v2998_v23 = vpop.eup %2997  ;;  %v1741_v7 = vmul.f32 0.5, %v2996_v18  ;;  %v11021_v18 = vld [vmem:[#allocation38_spill] sm:$0xff] }
 0x403   :  { %1769 = vmatmul.f32.vlgmr.msra.gmra.mxu0 %v1646_v13  ;;  %1789 = vmatmul.f32.vlgmr.msra.gmra.mxu1 %v1646_v13 }
 0x404   :  { %1809 = vmatmul.f32.vlgmr.msrb.gmra.mxu2 %v1646_v13  ;;  %1829 = vmatmul.f32.vlgmr.msra.gmra.mxu3 %v1646_v13  ;;  %v11011_v13 = vld [vmem:[#allocation28_spill] sm:$0xff] }
 0x405   :  { %1939 = vmatpush.msra.mxu0 %v6723_v32  ;;  %1959 = vmatpush.msra.mxu1 %v6729_v40  ;;  %v1742_v32 = vmul.f32 0.5, %v2998_v23  ;;  %v1744_v40 = vadd.f32 0.5, %v1741_v7  ;;  %v11022_v23 = vld [vmem:[#allocation39_spill] sm:$0xff]  ;;  %v11023_v7 = vld [vmem:[#allocation40_spill] sm:$0xff] }
 0x406   :  { %1979 = vmatpush.msrb.mxu2 %v6735_v34  ;;  %1999 = vmatpush.msra.mxu3 %v6741_v35  ;;  %v3000_v35 = vpop.eup %2999 }
 0x407   :  { %1940 = vmatpush.msra.mxu0 %v6747_v36  ;;  %1960 = vmatpush.msra.mxu1 %v6753_v37  ;;  %v1745_v34 = vadd.f32 0.5, %v1742_v32  ;;  %v1749_v37 = vmul.f32 %v3000_v35, %v1744_v40  ;;  %v11024_v32 = vld [vmem:[#allocation41_spill] sm:$0xff]  ;;  %v11025_v40 = vld [vmem:[#allocation42_spill] sm:$0xff]  ;;  %v11027_v35 = vld [vmem:[#allocation44_spill] sm:$0xff] }
 0x408   :  { %1980 = vmatpush.msrb.mxu2 %v6759_v38  ;;  %2000 = vmatpush.msra.mxu3 %v6765_v41  ;;  %v3002_v38 = vpop.eup %3001 }
 0x409   :  { %1941 = vmatpush.msra.mxu0 %v6771_v44  ;;  %1961 = vmatpush.msra.mxu1 %v6777_v45  ;;  %v1748_v36 = vmul.f32 %v1745_v34, %v6717_v29  ;;  %v1743_v29 = vmul.f32 0.5, %v3002_v38  ;;  %v10981_v44 = vld [vmem:[#allocation89_spill] sm:$0xff]  ;;  %v11026_v34 = vld [vmem:[#allocation43_spill] sm:$0xff] }
 0x40a   :  { %1981 = vmatpush.msrb.mxu2 %v6783_v47  ;;  %2001 = vmatpush.msra.mxu3 %v6789_v48  ;;  %v10982_v47 = vld [vmem:[#allocation79_spill] sm:$0xff]  ;;  %v10983_v48 = vld [vmem:[#allocation98_spill] sm:$0xff] }
 0x40b   :  { %1942 = vmatpush.msra.mxu0 %v6797_v50  ;;  %1962 = vmatpush.msra.mxu1 %v6803_v53  ;;  %v7921_v41 = vadd.f32 %v1749_v37, %v1748_v36  ;;  %v1746_v45 = vadd.f32 0.5, %v1743_v29  ;;  %v10984_v53 = vld [vmem:[#allocation132_spill] sm:$0xff]  ;;  %v11028_v36 = vld [vmem:[#allocation45_spill] sm:$0xff]  ;;  %v11029_v37 = vld [vmem:[#allocation46_spill] sm:$0xff] }
 0x40c   :  { %1982 = vmatpush.msrb.mxu2 %v6809_v52  ;;  %2002 = vmatpush.msra.mxu3 %v6815_v54  ;;  %v10985_v52 = vld [vmem:[#allocation3_spill] sm:$0xff]  ;;  %v11031_v29 = vld [vmem:[#allocation48_spill] sm:$0xff] }
 0x40d   :  { %1943 = vmatpush.msra.mxu0 %v6825_v56  ;;  %1963 = vmatpush.msra.mxu1 %v6831_v22  ;;  %3003 = vtanh.f32 %v7921_v41  ;;  %v10986_v56 = vld [vmem:[#allocation6_spill] sm:$0xff]  ;;  %v10987_v22 = vld [vmem:[#allocation12_spill] sm:$0xff]  ;;  %v11030_v38 = vld [vmem:[#allocation47_spill] sm:$0xff] }
 0x40e   :  { %1983 = vmatpush.msrb.mxu2 %v6837_v3  ;;  %2003 = vmatpush.msra.mxu3 %v6843_v21  ;;  %v10988_v3 = vld [vmem:[#allocation7_spill] sm:$0xff]  ;;  %v10989_v21 = vld [vmem:[#allocation4_spill] sm:$0xff] }
 0x40f   :  { %1944 = vmatpush.msra.mxu0 %v6849_v33  ;;  %1964 = vmatpush.msra.mxu1 %v6855_v51  ;;  %v10990_v33 = vld [vmem:[#allocation8_spill] sm:$0xff]  ;;  %v10991_v51 = vld [vmem:[#allocation13_spill] sm:$0xff] }
 0x410   :  { %1984 = vmatpush.msrb.mxu2 %v6861_v12  ;;  %2004 = vmatpush.msra.mxu3 %v6867_v4  ;;  %v10992_v12 = vld [vmem:[#allocation9_spill] sm:$0xff] }
 0x411   :  { %1945 = vmatpush.msra.mxu0 %v6873_v1  ;;  %1965 = vmatpush.msra.mxu1 %v6879_v0  ;;  %v10993_v4 = vld [vmem:[#allocation93_spill] sm:$0xff]  ;;  %v10995_v0 = vld [vmem:[#allocation10_spill] sm:$0xff] }
 0x412   :  { %1985 = vmatpush.msrb.mxu2 %v6885_v5  ;;  %2005 = vmatpush.msra.mxu3 %v6891_v2  ;;  %v10994_v1 = vld [vmem:[#allocation5_spill] sm:$0xff]  ;;  %v10996_v5 = vld [vmem:[#allocation14_spill] sm:$0xff]  ;;  %v10997_v2 = vld [vmem:[#allocation11_spill] sm:$0xff] }
 0x413   :  { %1946 = vmatpush.msra.mxu0 %v6897_v63  ;;  %1966 = vmatpush.msra.mxu1 %v6903_v14  ;;  %v3004_v50 = vpop.eup %3003  ;;  %v10998_v63 = vld [vmem:[#allocation15_spill] sm:$0xff]  ;;  %v10999_v14 = vld [vmem:[#allocation16_spill] sm:$0xff] }
 0x414   :  { %1986 = vmatpush.msrb.mxu2 %v6909_v57  ;;  %2006 = vmatpush.msra.mxu3 %v6915_v39  ;;  %v1752_v54 = vmul.f32 %v3004_v50, %v1746_v45  ;;  %v11000_v57 = vld [vmem:[#allocation17_spill] sm:$0xff]  ;;  %v11001_v39 = vld [vmem:[#allocation18_spill] sm:$0xff] }
 0x415   :  { %1947 = vmatpush.msra.mxu0 %v6921_v16  ;;  %1967 = vmatpush.msra.mxu1 %v6927_v58  ;;  %v11002_v16 = vld [vmem:[#allocation19_spill] sm:$0xff]  ;;  %v11003_v58 = vld [vmem:[#allocation20_spill] sm:$0xff]  ;;  %v11033_v45 = vld [vmem:[#allocation50_spill] sm:$0xff] }
 0x416   :  { %1987 = vmatpush.msrb.mxu2 %v6933_v59  ;;  %2007 = vmatpush.msra.mxu3 %v10981_v44  ;;  %v11004_v59 = vld [vmem:[#allocation21_spill] sm:$0xff] }
 0x417   :  { %1948 = vmatpush.msra.mxu0 %v10982_v47  ;;  %1968 = vmatpush.msra.mxu1 %v10983_v48  ;;  %v11032_v44 = vld [vmem:[#allocation49_spill] sm:$0xff]  ;;  %v11034_v47 = vld [vmem:[#allocation51_spill] sm:$0xff]  ;;  %v11035_v48 = vld [vmem:[#allocation52_spill] sm:$0xff] }
 0x418   :  { %1988 = vmatpush.msrb.mxu2 %v10984_v53  ;;  %2008 = vmatpush.msra.mxu3 %v10985_v52  ;;  %v11036_v50 = vld [vmem:[#allocation53_spill] sm:$0xff]  ;;  %v11037_v53 = vld [vmem:[#allocation54_spill] sm:$0xff]  ;;  %v11038_v52 = vld [vmem:[#allocation56_spill] sm:$0xff] }
 0x419   :  { %1949 = vmatpush.msra.mxu0 %v10986_v56  ;;  %1969 = vmatpush.msra.mxu1 %v10987_v22  ;;  %v11040_v56 = vld [vmem:[#allocation58_spill] sm:$0xff]  ;;  %v11041_v22 = vld [vmem:[#allocation60_spill] sm:$0xff] }
 0x41a   :  { %1989 = vmatpush.msrb.mxu2 %v10988_v3  ;;  %2009 = vmatpush.msra.mxu3 %v10989_v21  ;;  %v11042_v3 = vld [vmem:[#allocation61_spill] sm:$0xff]  ;;  %v11043_v21 = vld [vmem:[#allocation62_spill] sm:$0xff] }
 0x41b   :  { %1849 = vmatmul.f32.vlgmr.msrb.gmra.mxu0 %v1752_v54  ;;  %1869 = vmatmul.f32.vlgmr.msrb.gmra.mxu1 %v1752_v54 }
 0x41c   :  { %1889 = vmatmul.f32.vlgmr.msra.gmra.mxu2 %v1752_v54  ;;  %1909 = vmatmul.f32.vlgmr.msrb.gmra.mxu3 %v1752_v54 }
 0x41d   :  { %1950 = vmatpush.msra.mxu0 %v10990_v33  ;;  %1970 = vmatpush.msra.mxu1 %v10991_v51  ;;  %v11044_v33 = vld [vmem:[#allocation63_spill] sm:$0xff]  ;;  %v11045_v51 = vld [vmem:[#allocation65_spill] sm:$0xff] }
 0x41e   :  { %1990 = vmatpush.msrb.mxu2 %v10992_v12  ;;  %2010 = vmatpush.msra.mxu3 %v10993_v4  ;;  %v11046_v12 = vld [vmem:[#allocation66_spill] sm:$0xff]  ;;  %v11047_v4 = vld [vmem:[#allocation67_spill] sm:$0xff] }
 0x41f   :  { %1951 = vmatpush.msra.mxu0 %v10994_v1  ;;  %1971 = vmatpush.msra.mxu1 %v10995_v0  ;;  %v11048_v1 = vld [vmem:[#allocation68_spill] sm:$0xff]  ;;  %v11049_v0 = vld [vmem:[#allocation69_spill] sm:$0xff] }
 0x420   :  { %1991 = vmatpush.msrb.mxu2 %v10996_v5  ;;  %2011 = vmatpush.msra.mxu3 %v10997_v2  ;;  %v11050_v5 = vld [vmem:[#allocation70_spill] sm:$0xff]  ;;  %v11051_v2 = vld [vmem:[#allocation71_spill] sm:$0xff] }
 0x421   :  { %1952 = vmatpush.msra.mxu0 %v10998_v63  ;;  %1972 = vmatpush.msra.mxu1 %v10999_v14  ;;  %v11052_v63 = vld [vmem:[#allocation72_spill] sm:$0xff]  ;;  %v11053_v14 = vld [vmem:[#allocation73_spill] sm:$0xff] }
 0x422   :  { %1992 = vmatpush.msrb.mxu2 %v11000_v57  ;;  %2012 = vmatpush.msra.mxu3 %v11001_v39  ;;  %v11054_v57 = vld [vmem:[#allocation76_spill] sm:$0xff]  ;;  %v11055_v39 = vld [vmem:[#allocation77_spill] sm:$0xff] }
 0x423   :  { %1953 = vmatpush.msra.mxu0 %v11002_v16  ;;  %1973 = vmatpush.msra.mxu1 %v11003_v58  ;;  %v11056_v16 = vld [vmem:[#allocation78_spill] sm:$0xff]  ;;  %v11057_v58 = vld [vmem:[#allocation80_spill] sm:$0xff] }
 0x424   :  { %1993 = vmatpush.msrb.mxu2 %v11004_v59  ;;  %2013 = vmatpush.msra.mxu3 %v11005_v49  ;;  %v11058_v59 = vld [vmem:[#allocation81_spill] sm:$0xff]  ;;  %v11059_v49 = vld [vmem:[#allocation82_spill] sm:$0xff] }
 0x425   :  { %1954 = vmatpush.msra.mxu0 %v11006_v19  ;;  %1974 = vmatpush.msra.mxu1 %v11007_v28  ;;  %v11060_v19 = vld [vmem:[#allocation83_spill] sm:$0xff]  ;;  %v11061_v28 = vld [vmem:[#allocation84_spill] sm:$0xff] }
 0x426   :  { %1994 = vmatpush.msrb.mxu2 %v11008_v31  ;;  %2014 = vmatpush.msra.mxu3 %v11009_v26  ;;  %v11062_v31 = vld [vmem:[#allocation85_spill] sm:$0xff]  ;;  %v11063_v26 = vld [vmem:[#allocation86_spill] sm:$0xff] }
 0x427   :  { %1955 = vmatmul.f32.vlgmr.msra.gmra.mxu0 %v1752_v54  ;;  %1975 = vmatmul.f32.vlgmr.msra.gmra.mxu1 %v1752_v54 }
 0x428   :  { %1995 = vmatmul.f32.vlgmr.msrb.gmra.mxu2 %v1752_v54  ;;  %2015 = vmatmul.f32.vlgmr.msra.gmra.mxu3 %v1752_v54  ;;  %v11039_v54 = vld [vmem:[#allocation57_spill] sm:$0xff] }
 0x429   :  { %2041 = vmatpush.msrb.mxu0 %v11010_v27  ;;  %2061 = vmatpush.msrb.mxu1 %v11011_v13  ;;  %v11064_v27 = vld [vmem:[#allocation87_spill] sm:$0xff]  ;;  %v11065_v13 = vld [vmem:[#allocation88_spill] sm:$0xff] }
 0x42a   :  { %2081 = vmatpush.msra.mxu2 %v11012_v60  ;;  %2101 = vmatpush.msrb.mxu3 %v11013_v25  ;;  %v11066_v60 = vld [vmem:[#allocation90_spill] sm:$0xff]  ;;  %v11067_v25 = vld [vmem:[#allocation91_spill] sm:$0xff] }
 0x42b   :  { %2042 = vmatpush.msrb.mxu0 %v11014_v43  ;;  %2062 = vmatpush.msrb.mxu1 %v11015_v46  ;;  %v11068_v43 = vld [vmem:[#allocation92_spill] sm:$0xff]  ;;  %v11069_v46 = vld [vmem:[#allocation94_spill] sm:$0xff] }
 0x42c   :  { %2082 = vmatpush.msra.mxu2 %v11016_v24  ;;  %2102 = vmatpush.msrb.mxu3 %v11017_v8  ;;  %v11070_v24 = vld [vmem:[#allocation95_spill] sm:$0xff]  ;;  %v11071_v8 = vld [vmem:[#allocation96_spill] sm:$0xff] }
 0x42d   :  { %2043 = vmatpush.msrb.mxu0 %v11018_v6  ;;  %2063 = vmatpush.msrb.mxu1 %v11019_v9  ;;  %v11072_v6 = vld [vmem:[#allocation97_spill] sm:$0xff]  ;;  %v11073_v9 = vld [vmem:[#allocation99_spill] sm:$0xff] }
 0x42e   :  { %2083 = vmatpush.msra.mxu2 %v11020_v10  ;;  %2103 = vmatpush.msrb.mxu3 %v11021_v18  ;;  %v11074_v10 = vld [vmem:[#allocation101_spill] sm:$0xff]  ;;  %v11075_v18 = vld [vmem:[#allocation102_spill] sm:$0xff] }
 0x42f   :  { %2044 = vmatpush.msrb.mxu0 %v11022_v23  ;;  %2064 = vmatpush.msrb.mxu1 %v11023_v7  ;;  %v11076_v23 = vld [vmem:[#allocation103_spill] sm:$0xff]  ;;  %v11077_v7 = vld [vmem:[#allocation104_spill] sm:$0xff] }
 0x430   :  { %2084 = vmatpush.msra.mxu2 %v11024_v32  ;;  %2104 = vmatpush.msrb.mxu3 %v11025_v40  ;;  %v11078_v32 = vld [vmem:[#allocation105_spill] sm:$0xff]  ;;  %v11079_v40 = vld [vmem:[#allocation106_spill] sm:$0xff] }
 0x431   :  { %2045 = vmatpush.msrb.mxu0 %v11026_v34  ;;  %2065 = vmatpush.msrb.mxu1 %v11027_v35  ;;  %v11080_v34 = vld [vmem:[#allocation107_spill] sm:$0xff]  ;;  %v11081_v35 = vld [vmem:[#allocation108_spill] sm:$0xff] }
 0x432   :  { %2085 = vmatpush.msra.mxu2 %v11028_v36  ;;  %2105 = vmatpush.msrb.mxu3 %v11029_v37  ;;  %v11082_v36 = vld [vmem:[#allocation109_spill] sm:$0xff]  ;;  %v11083_v37 = vld [vmem:[#allocation110_spill] sm:$0xff] }
 0x433   :  { %2046 = vmatpush.msrb.mxu0 %v11030_v38  ;;  %2066 = vmatpush.msrb.mxu1 %v11031_v29  ;;  %v11084_v38 = vld [vmem:[#allocation111_spill] sm:$0xff]  ;;  %v11085_v29 = vld [vmem:[#allocation113_spill] sm:$0xff] }
 0x434   :  { %2086 = vmatpush.msra.mxu2 %v11032_v44  ;;  %2106 = vmatpush.msrb.mxu3 %v11033_v45  ;;  %v11086_v44 = vld [vmem:[#allocation115_spill] sm:$0xff]  ;;  %v11087_v45 = vld [vmem:[#allocation116_spill] sm:$0xff] }
 0x435   :  { %2047 = vmatpush.msrb.mxu0 %v11034_v47  ;;  %2067 = vmatpush.msrb.mxu1 %v11035_v48  ;;  %v11088_v47 = vld [vmem:[#allocation117_spill] sm:$0xff]  ;;  %v11089_v48 = vld [vmem:[#allocation119_spill] sm:$0xff] }
 0x436   :  { %2087 = vmatpush.msra.mxu2 %v11036_v50  ;;  %2107 = vmatpush.msrb.mxu3 %v11037_v53  ;;  %v11090_v50 = vld [vmem:[#allocation121_spill] sm:$0xff]  ;;  %v11091_v53 = vld [vmem:[#allocation122_spill] sm:$0xff] }
 0x437   :  { %2048 = vmatpush.msrb.mxu0 %v11038_v52  ;;  %2068 = vmatpush.msrb.mxu1 %v11039_v54  ;;  %v11092_v52 = vld [vmem:[#allocation123_spill] sm:$0xff]  ;;  %v11093_v54 = vld [vmem:[#allocation124_spill] sm:$0xff] }
 0x438   :  { %2088 = vmatpush.msra.mxu2 %v11040_v56  ;;  %2108 = vmatpush.msrb.mxu3 %v11041_v22  ;;  %v11094_v56 = vld [vmem:[#allocation125_spill] sm:$0xff]  ;;  %v11095_v22 = vld [vmem:[#allocation126_spill] sm:$0xff] }
 0x439   :  { %2049 = vmatpush.msrb.mxu0 %v11042_v3  ;;  %2069 = vmatpush.msrb.mxu1 %v11043_v21  ;;  %v11096_v3 = vld [vmem:[#allocation127_spill] sm:$0xff]  ;;  %v11097_v21 = vld [vmem:[#allocation128_spill] sm:$0xff] }
 0x43a   :  { %2089 = vmatpush.msra.mxu2 %v11044_v33  ;;  %2109 = vmatpush.msrb.mxu3 %v11045_v51  ;;  %v11098_v33 = vld [vmem:[#allocation129_spill] sm:$0xff]  ;;  %v11099_v51 = vld [vmem:[#allocation130_spill] sm:$0xff] }
 0x43b   :  { %2050 = vmatpush.msrb.mxu0 %v11046_v12  ;;  %2070 = vmatpush.msrb.mxu1 %v11047_v4  ;;  %v11100_v12 = vld [vmem:[#allocation131_spill] sm:$0xff]  ;;  %v11101_v4 = vld [vmem:[#allocation133_spill] sm:$0xff] }
 0x43c   :  { %2090 = vmatpush.msra.mxu2 %v11048_v1  ;;  %2110 = vmatpush.msrb.mxu3 %v11049_v0  ;;  %v11102_v1 = vld [vmem:[#allocation134_spill] sm:$0xff]  ;;  %v11103_v0 = vld [vmem:[#allocation135_spill] sm:$0xff] }
 0x43d   :  { %2051 = vmatpush.msrb.mxu0 %v11050_v5  ;;  %2071 = vmatpush.msrb.mxu1 %v11051_v2  ;;  %v11104_v5 = vld [vmem:[#allocation136_spill] sm:$0xff]  ;;  %v11105_v2 = vld [vmem:[#allocation138_spill] sm:$0xff] }
 0x43e   :  { %2091 = vmatpush.msra.mxu2 %v11052_v63  ;;  %2111 = vmatpush.msrb.mxu3 %v11053_v14  ;;  %v11106_v63 = vld [vmem:[#allocation141_spill] sm:$0xff]  ;;  %v11107_v14 = vld [vmem:[#allocation142_spill] sm:$0xff] }
 0x43f   :  { %2052 = vmatpush.msrb.mxu0 %v11054_v57  ;;  %2072 = vmatpush.msrb.mxu1 %v11055_v39  ;;  %v11108_v57 = vld [vmem:[#allocation143_spill] sm:$0xff]  ;;  %v11109_v39 = vld [vmem:[#allocation144_spill] sm:$0xff] }
 0x440   :  { %2092 = vmatpush.msra.mxu2 %v11056_v16  ;;  %2112 = vmatpush.msrb.mxu3 %v11057_v58  ;;  %v11110_v16 = vld [vmem:[#allocation145_spill] sm:$0xff]  ;;  %v11111_v58 = vld [vmem:[#allocation146_spill] sm:$0xff] }
 0x441   :  { %2053 = vmatpush.msrb.mxu0 %v11058_v59  ;;  %2073 = vmatpush.msrb.mxu1 %v11059_v49  ;;  %v11112_v59 = vld [vmem:[#allocation147_spill] sm:$0xff]  ;;  %v11113_v49 = vld [vmem:[#allocation148_spill] sm:$0xff] }
 0x442   :  { %2093 = vmatpush.msra.mxu2 %v11060_v19  ;;  %2113 = vmatpush.msrb.mxu3 %v11061_v28  ;;  %v11114_v19 = vld [vmem:[#allocation149_spill] sm:$0xff]  ;;  %v11115_v28 = vld [vmem:[#allocation150_spill] sm:$0xff] }
 0x443   :  { %2054 = vmatpush.msrb.mxu0 %v11062_v31  ;;  %2074 = vmatpush.msrb.mxu1 %v11063_v26  ;;  %v11116_v31 = vld [vmem:[#allocation152_spill] sm:$0xff]  ;;  %v11117_v26 = vld [vmem:[#allocation153_spill] sm:$0xff] }
 0x444   :  { %2094 = vmatpush.msra.mxu2 %v11064_v27  ;;  %2114 = vmatpush.msrb.mxu3 %v11065_v13  ;;  %v11118_v27 = vld [vmem:[#allocation154_spill] sm:$0xff]  ;;  %v11119_v13 = vld [vmem:[#allocation156_spill] sm:$0xff] }
 0x445   :  { %2055 = vmatpush.msrb.mxu0 %v11066_v60  ;;  %2075 = vmatpush.msrb.mxu1 %v11067_v25  ;;  %v11120_v60 = vld [vmem:[#allocation158_spill] sm:$0xff]  ;;  %v11121_v25 = vld [vmem:[#allocation64_spill] sm:$0xff] }
 0x446   :  { %2095 = vmatpush.msra.mxu2 %v11068_v43  ;;  %2115 = vmatpush.msrb.mxu3 %v11069_v46  ;;  %v11122_v43 = vld [vmem:[#allocation59_spill] sm:$0xff] }
 0x447   :  { %2056 = vmatpush.msrb.mxu0 %v11070_v24  ;;  %2076 = vmatpush.msrb.mxu1 %v11071_v8  ;;  %v11123_v46 = vld [vmem:[#allocation75_spill] sm:$0xff]  ;;  %v11124_v24 = vld [vmem:[#allocation112_spill] sm:$0xff] }
 0x448   :  { %2096 = vmatpush.msra.mxu2 %v11072_v6  ;;  %2116 = vmatpush.msrb.mxu3 %v11073_v9  ;;  %v11125_v8 = vld [vmem:[#allocation167_spill] sm:$0xff]  ;;  %v11126_v6 = vld [vmem:[#allocation168_spill] sm:$0xff]  ;;  %v11127_v9 = vld [vmem:[#allocation169_spill] sm:$0xff] }
 0x449   :  { %2121 = vmatpush.msra.mxu0 %v11074_v10  ;;  %2141 = vmatpush.msra.mxu1 %v11075_v18  ;;  %v11128_v10 = vld [vmem:[#allocation170_spill] sm:$0xff]  ;;  %v11129_v18 = vld [vmem:[#allocation171_spill] sm:$0xff] }
 0x44a   :  { %2161 = vmatpush.msrb.mxu2 %v11076_v23  ;;  %2181 = vmatpush.msra.mxu3 %v11077_v7  ;;  %v11130_v23 = vld [vmem:[#allocation172_spill] sm:$0xff]  ;;  %v11131_v7 = vld [vmem:[#allocation173_spill] sm:$0xff] }
 0x44b   :  { %2122 = vmatpush.msra.mxu0 %v11078_v32  ;;  %2142 = vmatpush.msra.mxu1 %v11079_v40  ;;  %v11132_v32 = vld [vmem:[#allocation174_spill] sm:$0xff]  ;;  %v11133_v40 = vld [vmem:[#allocation175_spill] sm:$0xff] }
 0x44c   :  { %2162 = vmatpush.msrb.mxu2 %v11080_v34  ;;  %2182 = vmatpush.msra.mxu3 %v11081_v35  ;;  %v11134_v34 = vld [vmem:[#allocation176_spill] sm:$0xff]  ;;  %v11135_v35 = vld [vmem:[#allocation177_spill] sm:$0xff] }
 0x44d   :  { %2123 = vmatpush.msra.mxu0 %v11082_v36  ;;  %2143 = vmatpush.msra.mxu1 %v11083_v37  ;;  %v11136_v36 = vld [vmem:[#allocation178_spill] sm:$0xff]  ;;  %v11137_v37 = vld [vmem:[#allocation179_spill] sm:$0xff] }
 0x44e   :  { %2163 = vmatpush.msrb.mxu2 %v11084_v38  ;;  %2183 = vmatpush.msra.mxu3 %v11085_v29 }
 0x44f   :  { %2124 = vmatpush.msra.mxu0 %v11086_v44  ;;  %2144 = vmatpush.msra.mxu1 %v11087_v45 }
 0x450   :  { %2164 = vmatpush.msrb.mxu2 %v11088_v47  ;;  %2184 = vmatpush.msra.mxu3 %v11089_v48 }
 0x451   :  { %2125 = vmatpush.msra.mxu0 %v11090_v50  ;;  %2145 = vmatpush.msra.mxu1 %v11091_v53 }
 0x452   :  { %2165 = vmatpush.msrb.mxu2 %v11092_v52  ;;  %2185 = vmatpush.msra.mxu3 %v11093_v54 }
 0x453   :  { %2126 = vmatpush.msra.mxu0 %v11094_v56  ;;  %2146 = vmatpush.msra.mxu1 %v11095_v22 }
 0x454   :  { %2166 = vmatpush.msrb.mxu2 %v11096_v3  ;;  %2186 = vmatpush.msra.mxu3 %v11097_v21 }
 0x455   :  { %2127 = vmatpush.msra.mxu0 %v11098_v33  ;;  %2147 = vmatpush.msra.mxu1 %v11099_v51 }
 0x456   :  { %2167 = vmatpush.msrb.mxu2 %v11100_v12  ;;  %2187 = vmatpush.msra.mxu3 %v11101_v4 }
 0x457   :  { %2128 = vmatpush.msra.mxu0 %v11102_v1  ;;  %2148 = vmatpush.msra.mxu1 %v11103_v0  ;;  %v11138_v1 = vld [vmem:[#allocation159_spill] sm:$0xff] }
 0x458   :  { %2168 = vmatpush.msrb.mxu2 %v11104_v5  ;;  %2188 = vmatpush.msra.mxu3 %v11105_v2  ;;  %v130_v0 = vadd.f32 %v11138_v1, %v5084_v15  ;;  %v11139_v5 = vld [vmem:[#allocation140_spill] sm:$0xff]  ;;  %v8165_v1 = vld [vmem:[%s9575_s2 + $0x1a0] sm:$0xff] }
 0x459   :  { %2129 = vmatpush.msra.mxu0 %v11106_v63  ;;  %2149 = vmatpush.msra.mxu1 %v11107_v14  ;;  %v171_v2 = vadd.f32 %v11139_v5, %v5087_v17 }
 0x45a   :  { %2169 = vmatpush.msrb.mxu2 %v11108_v57  ;;  %2189 = vmatpush.msra.mxu3 %v11109_v39 }
 0x45b   :  { %2130 = vmatpush.msra.mxu0 %v11110_v16  ;;  %2150 = vmatpush.msra.mxu1 %v11111_v58 }
 0x45c   :  { %2170 = vmatpush.msrb.mxu2 %v11112_v59  ;;  %2190 = vmatpush.msra.mxu3 %v11113_v49 }
 0x45d   :  { %2131 = vmatpush.msra.mxu0 %v11114_v19  ;;  %2151 = vmatpush.msra.mxu1 %v11115_v28 }
 0x45e   :  { %2171 = vmatpush.msrb.mxu2 %v11116_v31  ;;  %2191 = vmatpush.msra.mxu3 %v11117_v26 }
 0x45f   :  { %2132 = vmatpush.msra.mxu0 %v11118_v27  ;;  %2152 = vmatpush.msra.mxu1 %v11119_v13 }
 0x460   :  { %2172 = vmatpush.msrb.mxu2 %v11120_v60  ;;  %2192 = vmatpush.msra.mxu3 %v11121_v25  ;;  %v11140_v60 = vld [vmem:[#allocation155_spill] sm:$0xff] }
 0x461   :  { %2133 = vmatpush.msra.mxu0 %v11122_v43  ;;  %2153 = vmatpush.msra.mxu1 %v11123_v46  ;;  %v253_v25 = vadd.f32 %v11140_v60, %v5114_v30  ;;  %v11141_v43 = vld [vmem:[#allocation163_spill] sm:$0xff] }
 0x462   :  { %2173 = vmatpush.msrb.mxu2 %v11124_v24  ;;  %2193 = vmatpush.msra.mxu3 %v11125_v8  ;;  %v212_v46 = vadd.f32 %v11141_v43, %v5149_v42  ;;  %v8267_v60 = vld [vmem:[%s9575_s2 + $0x120] sm:$0xff]  ;;  %v8279_v43 = vld [vmem:[%s9575_s2 + $0x130] sm:$0xff] }
 0x463   :  { %2134 = vmatpush.msra.mxu0 %v11126_v6  ;;  %2154 = vmatpush.msra.mxu1 %v11127_v9 }
 0x464   :  { %2174 = vmatpush.msrb.mxu2 %v11128_v10  ;;  %2194 = vmatpush.msra.mxu3 %v11129_v18 }
 0x465   :  { %2135 = vmatpush.msra.mxu0 %v11130_v23  ;;  %2155 = vmatpush.msra.mxu1 %v11131_v7 }
 0x466   :  { %2175 = vmatpush.msrb.mxu2 %v11132_v32  ;;  %2195 = vmatpush.msra.mxu3 %v11133_v40 }
 0x467   :  { %2136 = vmatpush.msra.mxu0 %v11134_v34  ;;  %2156 = vmatpush.msra.mxu1 %v11135_v35 }
 0x468   :  { %2176 = vmatpush.msrb.mxu2 %v11136_v36  ;;  %2196 = vmatpush.msra.mxu3 %v11137_v37 }
 0x480   :  { %v1770_v38 = vpop.f32.mrf.mxu0  ;;  %v1790_v29 = vpop.f32.mrf.mxu1 }
 0x487   :  { %v1810_v44 = vpop.f32.mrf.mxu2  ;;  %v1830_v45 = vpop.f32.mrf.mxu3 }
 0x498   :  { %v1850_v47 = vpop.f32.mrf.mxu0  ;;  %v1870_v48 = vpop.f32.mrf.mxu1 }
 0x499   :  { %v1851_v50 = vadd.f32 %v1850_v47, %v1770_v38  ;;  %v1871_v53 = vadd.f32 %v1870_v48, %v1790_v29 }
 0x49b   :  { %v1913_v52 = vadd.f32 %v1851_v50, %v5299_v55  ;;  %v1914_v54 = vadd.f32 %v1871_v53, %v5301_v20 }
 0x49d   :  { %v1917_v56 = vmul.f32 0.5, %v1913_v52  ;;  %v1918_v22 = vmul.f32 0.5, %v1914_v54 }
 0x49f   :  { %3005 = vtanh.f32 %v1917_v56  ;;  %v1890_v3 = vpop.f32.mrf.mxu2  ;;  %v1910_v21 = vpop.f32.mrf.mxu3  ;;  %v8117_v56 = vld [vmem:[%s9575_s2 + $0x1e0] sm:$0xff] }
 0x4a0   :  { %3007 = vtanh.f32 %v1918_v22  ;;  %v1891_v33 = vadd.f32 %v1890_v3, %v1810_v44  ;;  %v1911_v51 = vadd.f32 %v1910_v21, %v1830_v45  ;;  %v8129_v22 = vld [vmem:[%s9575_s2 + $0x1f0] sm:$0xff]  ;;  %v8135_v3 = vld [vmem:[%s9575_s2 + $0x1f8] sm:$0xff]  ;;  %v8141_v21 = vld [vmem:[%s9575_s2 + $0x1c0] sm:$0xff] }
 0x4a2   :  { %v1915_v12 = vadd.f32 %v1891_v33, %v5305_v61  ;;  %v1916_v4 = vadd.f32 %v1911_v51, %v5307_v62  ;;  %v8147_v33 = vld [vmem:[%s9575_s2 + $0x1c8] sm:$0xff]  ;;  %v8153_v51 = vld [vmem:[%s9575_s2 + $0x1d0] sm:$0xff] }
 0x4a4   :  { %v1919_v63 = vmul.f32 0.5, %v1915_v12  ;;  %3009 = vtanh.f32 %v1916_v4  ;;  %v1956_v14 = vpop.f32.mrf.mxu0  ;;  %v1976_v57 = vpop.f32.mrf.mxu1  ;;  %v8159_v12 = vld [vmem:[%s9575_s2 + $0x1d8] sm:$0xff] }
 0x4a5   :  { %v3006_v39 = vpop.eup %3005  ;;  %v2019_v16 = vadd.f32 %v1956_v14, %v130_v0  ;;  %v2020_v58 = vadd.f32 %v1976_v57, %v171_v2  ;;  %v8171_v0 = vld [vmem:[%s9575_s2 + $0x1a8] sm:$0xff]  ;;  %v8177_v2 = vld [vmem:[%s9575_s2 + $0x1b0] sm:$0xff]  ;;  %v8191_v57 = vld [vmem:[%s9575_s2 + $0x180] sm:$0xff] }
 0x4a6   :  { %v3008_v59 = vpop.eup %3007  ;;  %v1923_v49 = vmul.f32 0.5, %v3006_v39  ;;  %3011 = vtanh.f32 %v1919_v63  ;;  %v8183_v63 = vld [vmem:[%s9575_s2 + $0x1b8] sm:$0xff]  ;;  %v8197_v39 = vld [vmem:[%s9575_s2 + $0x188] sm:$0xff] }
 0x4a7   :  { %v1924_v19 = vmul.f32 0.5, %v3008_v59  ;;  %v2023_v28 = vmul.f32 0.5, %v2019_v16  ;;  %v2024_v31 = vmul.f32 0.5, %v2020_v58  ;;  %v8203_v16 = vld [vmem:[%s9575_s2 + $0x190] sm:$0xff]  ;;  %v8209_v58 = vld [vmem:[%s9575_s2 + $0x198] sm:$0xff]  ;;  %v8219_v59 = vld [vmem:[%s9575_s2 + $0x160] sm:$0xff] }
 0x4a8   :  { %v1926_v26 = vadd.f32 0.5, %v1923_v49  ;;  %v8225_v49 = vld [vmem:[%s9575_s2 + $0x168] sm:$0xff] }
 0x4a9   :  { %v1927_v27 = vadd.f32 0.5, %v1924_v19  ;;  %3013 = vtanh.f32 %v2023_v28  ;;  %v8231_v19 = vld [vmem:[%s9575_s2 + $0x170] sm:$0xff]  ;;  %v8237_v28 = vld [vmem:[%s9575_s2 + $0x178] sm:$0xff] }
 0x4aa   :  { %v3010_v13 = vpop.eup %3009  ;;  %3015 = vtanh.f32 %v2024_v31  ;;  %v8243_v31 = vld [vmem:[%s9575_s2 + $0x140] sm:$0xff] }
 0x4ab   :  { %v1930_v24 = vmul.f32 %v1927_v27, %v7887_v11  ;;  %v1931_v8 = vmul.f32 %v3010_v13, %v1926_v26  ;;  %v1996_v6 = vpop.f32.mrf.mxu2  ;;  %v2016_v9 = vpop.f32.mrf.mxu3  ;;  %v8249_v26 = vld [vmem:[%s9575_s2 + $0x148] sm:$0xff]  ;;  %v8255_v27 = vld [vmem:[%s9575_s2 + $0x150] sm:$0xff]  ;;  %v8261_v13 = vld [vmem:[%s9575_s2 + $0x158] sm:$0xff] }
 0x4ac   :  { %v2021_v10 = vadd.f32 %v1996_v6, %v212_v46  ;;  %v2022_v18 = vadd.f32 %v2016_v9, %v253_v25  ;;  %v3012_v23 = vpop.eup %3011  ;;  %v8273_v25 = vld [vmem:[%s9575_s2 + $0x128] sm:$0xff]  ;;  %v8285_v46 = vld [vmem:[%s9575_s2 + $0x138] sm:$0xff]  ;;  %v8303_v6 = vld [vmem:[%s9575_s2 + $0x110] sm:$0xff] }
 0x4ad   :  { %v8107_v7 = vadd.f32 %v1931_v8, %v1930_v24  ;;  %v1925_v35 = vmul.f32 0.5, %v3012_v23  ;;  %v8291_v24 = vld [vmem:[%s9575_s2 + $0x100] sm:$0xff]  ;;  %v8297_v8 = vld [vmem:[%s9575_s2 + $0x108] sm:$0xff]  ;;  %v8309_v9 = vld [vmem:[%s9575_s2 + $0x118] sm:$0xff] }
 0x4ae   :  { %v2025_v32 = vmul.f32 0.5, %v2021_v10  ;;  %3017 = vtanh.f32 %v2022_v18  ;;  %v8315_v10 = vld [vmem:[%s9575_s2 + $0xe0] sm:$0xff]  ;;  %v8321_v18 = vld [vmem:[%s9575_s2 + $0xe8] sm:$0xff]  ;;  %v8327_v23 = vld [vmem:[%s9575_s2 + $0xf0] sm:$0xff] }
 0x4af   :  { %v3014_v40 = vpop.eup %3013  ;;  %3019 = vtanh.f32 %v8107_v7  ;;  %v1928_v44 = vadd.f32 0.5, %v1925_v35  ;;  %v8351_v35 = vld [vmem:[%s9575_s2 + $0xd0] sm:$0xff] }
 0x4b0   :  { %v3016_v34 = vpop.eup %3015  ;;  %v2029_v36 = vmul.f32 0.5, %v3014_v40  ;;  %3021 = vtanh.f32 %v2025_v32  ;;  %v8333_v32 = vld [vmem:[%s9575_s2 + $0xf8] sm:$0xff]  ;;  %v8339_v40 = vld [vmem:[%s9575_s2 + $0xc0] sm:$0xff]  ;;  %11145 = vst [vmem:[#allocation183_spill] sm:$0xff] %v8351_v35 }
 0x4b1   :  { %v2030_v37 = vmul.f32 0.5, %v3016_v34  ;;  %11142 = vst [vmem:[#allocation180_spill] sm:$0xff] %v8333_v32  ;;  %v8345_v34 = vld [vmem:[%s9575_s2 + $0xc8] sm:$0xff] }
 0x4b2   :  { %v2032_v38 = vadd.f32 0.5, %v2029_v36  ;;  %11143 = vst [vmem:[#allocation181_spill] sm:$0xff] %v8339_v40  ;;  %v8357_v36 = vld [vmem:[%s9575_s2 + $0xd8] sm:$0xff] }
 0x4b3   :  { %v2033_v11 = vadd.f32 0.5, %v2030_v37  ;;  %11144 = vst [vmem:[#allocation182_spill] sm:$0xff] %v8345_v34  ;;  %v8363_v37 = vld [vmem:[%s9575_s2 + $0xa0] sm:$0xff] }
 0x4b4   :  { %v3018_v29 = vpop.eup %3017  ;;  %11146 = vst [vmem:[#allocation114_spill] sm:$0xff] %v8357_v36 }
 0x4b5   :  { %v3020_v45 = vpop.eup %3019  ;;  %v2036_v47 = vmul.f32 %v2033_v11, %v7921_v41  ;;  %v2037_v48 = vmul.f32 %v3018_v29, %v2032_v38  ;;  %v8123_v41 = vld [vmem:[%s9575_s2 + $0x1e8] sm:$0xff]  ;;  %11147 = vst [vmem:[#allocation100_spill] sm:$0xff] %v8363_v37  ;;  %v8375_v11 = vld [vmem:[%s9575_s2 + $0xb0] sm:$0xff]  ;;  %v8381_v29 = vld [vmem:[%s9575_s2 + $0xb8] sm:$0xff] }
 0x4b6   :  { %v1934_v50 = vmul.f32 %v3020_v45, %v1928_v44  ;;  %v3022_v53 = vpop.eup %3021  ;;  %v8369_v38 = vld [vmem:[%s9575_s2 + $0xa8] sm:$0xff]  ;;  %11149 = vst [vmem:[#allocation151_spill] sm:$0xff] %v8375_v11  ;;  %v8387_v44 = vld [vmem:[%s9575_s2 + $0x80] sm:$0xff] }
 0x4b7   :  { %v8111_v52 = vadd.f32 %v2037_v48, %v2036_v47  ;;  %v2031_v54 = vmul.f32 0.5, %v3022_v53  ;;  %11148 = vst [vmem:[#allocation118_spill] sm:$0xff] %v8369_v38  ;;  %v8393_v45 = vld [vmem:[%s9575_s2 + $0x88] sm:$0xff]  ;;  %v8399_v47 = vld [vmem:[%s9575_s2 + $0x90] sm:$0xff]  ;;  %v8405_v48 = vld [vmem:[%s9575_s2 + $0x98] sm:$0xff] }
 0x4b8   :  { %2057 = vmatmul.f32.vlgmr.msrb.gmra.mxu0 %v1934_v50  ;;  %2077 = vmatmul.f32.vlgmr.msrb.gmra.mxu1 %v1934_v50  ;;  %11150 = vst [vmem:[#allocation139_spill] sm:$0xff] %v8381_v29  ;;  %v8417_v53 = vld [vmem:[%s9575_s2 + $0x68] sm:$0xff] }
 0x4b9   :  { %3023 = vtanh.f32 %v8111_v52  ;;  %2097 = vmatmul.f32.vlgmr.msra.gmra.mxu2 %v1934_v50  ;;  %2117 = vmatmul.f32.vlgmr.msrb.gmra.mxu3 %v1934_v50  ;;  %v2034_v4 = vadd.f32 0.5, %v2031_v54  ;;  %11151 = vst [vmem:[#allocation120_spill] sm:$0xff] %v8387_v44  ;;  %v8411_v50 = vld [vmem:[%s9575_s2 + $0x60] sm:$0xff]  ;;  %v8423_v54 = vld [vmem:[%s9575_s2 + $0x70] sm:$0xff] }
 0x4ba   :  { %2227 = vmatpush.msrb.mxu0 %v8117_v56  ;;  %2247 = vmatpush.msrb.mxu1 %v8123_v41  ;;  %11152 = vst [vmem:[#allocation137_spill] sm:$0xff] %v8393_v45 }
 0x4bb   :  { %2267 = vmatpush.msra.mxu2 %v8129_v22  ;;  %2287 = vmatpush.msrb.mxu3 %v8135_v3  ;;  %11153 = vst [vmem:[#allocation160_spill] sm:$0xff] %v8399_v47 }
 0x4bc   :  { %2228 = vmatpush.msrb.mxu0 %v8141_v21  ;;  %2248 = vmatpush.msrb.mxu1 %v8147_v33  ;;  %11154 = vst [vmem:[#allocation89_spill] sm:$0xff] %v8405_v48 }
 0x4bd   :  { %2268 = vmatpush.msra.mxu2 %v8153_v51  ;;  %2288 = vmatpush.msrb.mxu3 %v8159_v12  ;;  %11155 = vst [vmem:[#allocation79_spill] sm:$0xff] %v8411_v50 }
 0x4be   :  { %2229 = vmatpush.msrb.mxu0 %v8165_v1  ;;  %2249 = vmatpush.msrb.mxu1 %v8171_v0  ;;  %11156 = vst [vmem:[#allocation98_spill] sm:$0xff] %v8417_v53 }
 0x4bf   :  { %v3024_v5 = vpop.eup %3023  ;;  %2269 = vmatpush.msra.mxu2 %v8177_v2  ;;  %2289 = vmatpush.msrb.mxu3 %v8183_v63  ;;  %11157 = vst [vmem:[#allocation132_spill] sm:$0xff] %v8423_v54 }
 0x4c0   :  { %v8186_v14 = vmul.f32 %v3024_v5, %v2034_v4  ;;  %2230 = vmatpush.msrb.mxu0 %v8191_v57  ;;  %2250 = vmatpush.msrb.mxu1 %v8197_v39  ;;  %v8429_v4 = vld [vmem:[%s9575_s2 + $0x78] sm:$0xff]  ;;  %v8435_v5 = vld [vmem:[%s9575_s2 + $0x40] sm:$0xff] }
 0x4c1   :  { %2270 = vmatpush.msra.mxu2 %v8203_v16  ;;  %2290 = vmatpush.msrb.mxu3 %v8209_v58  ;;  %11158 = vst [vmem:[#allocation3_spill] sm:$0xff] %v8429_v4 }
 0x4c2   :  { %2137 = vmatmul.f32.vlgmr.msra.gmra.mxu0 %v8186_v14  ;;  %2157 = vmatmul.f32.vlgmr.msra.gmra.mxu1 %v8186_v14  ;;  %11159 = vst [vmem:[#allocation6_spill] sm:$0xff] %v8435_v5 }
 0x4c3   :  { %2177 = vmatmul.f32.vlgmr.msrb.gmra.mxu2 %v8186_v14  ;;  %2197 = vmatmul.f32.vlgmr.msra.gmra.mxu3 %v8186_v14 }
 0x4c4   :  { %2231 = vmatpush.msrb.mxu0 %v8219_v59  ;;  %2251 = vmatpush.msrb.mxu1 %v8225_v49 }
 0x4c5   :  { %2271 = vmatpush.msra.mxu2 %v8231_v19  ;;  %2291 = vmatpush.msrb.mxu3 %v8237_v28 }
 0x4c6   :  { %2232 = vmatpush.msrb.mxu0 %v8243_v31  ;;  %2252 = vmatpush.msrb.mxu1 %v8249_v26 }
 0x4c7   :  { %2272 = vmatpush.msra.mxu2 %v8255_v27  ;;  %2292 = vmatpush.msrb.mxu3 %v8261_v13 }
 0x4c8   :  { %2233 = vmatpush.msrb.mxu0 %v8267_v60  ;;  %2253 = vmatpush.msrb.mxu1 %v8273_v25 }
 0x4c9   :  { %2273 = vmatpush.msra.mxu2 %v8279_v43  ;;  %2293 = vmatpush.msrb.mxu3 %v8285_v46 }
 0x4ca   :  { %2234 = vmatpush.msrb.mxu0 %v8291_v24  ;;  %2254 = vmatpush.msrb.mxu1 %v8297_v8 }
 0x4cb   :  { %2274 = vmatpush.msra.mxu2 %v8303_v6  ;;  %2294 = vmatpush.msrb.mxu3 %v8309_v9 }
 0x4cc   :  { %2235 = vmatpush.msrb.mxu0 %v8315_v10  ;;  %2255 = vmatpush.msrb.mxu1 %v8321_v18 }
 0x4cd   :  { %2275 = vmatpush.msra.mxu2 %v8327_v23  ;;  %2295 = vmatpush.msrb.mxu3 %v8333_v32 }
 0x4ce   :  { %2236 = vmatpush.msrb.mxu0 %v8339_v40  ;;  %2256 = vmatpush.msrb.mxu1 %v8345_v34 }
 0x4cf   :  { %2276 = vmatpush.msra.mxu2 %v8351_v35  ;;  %2296 = vmatpush.msrb.mxu3 %v8357_v36 }
 0x4d0   :  { %2237 = vmatpush.msrb.mxu0 %v8363_v37  ;;  %2257 = vmatpush.msrb.mxu1 %v8369_v38 }
 0x4d1   :  { %2277 = vmatpush.msra.mxu2 %v8375_v11  ;;  %2297 = vmatpush.msrb.mxu3 %v8381_v29 }
 0x4d2   :  { %2238 = vmatpush.msrb.mxu0 %v8387_v44  ;;  %2258 = vmatpush.msrb.mxu1 %v8393_v45 }
 0x4d3   :  { %2278 = vmatpush.msra.mxu2 %v8399_v47  ;;  %2298 = vmatpush.msrb.mxu3 %v8405_v48 }
 0x4d4   :  { %2239 = vmatpush.msrb.mxu0 %v8411_v50  ;;  %2259 = vmatpush.msrb.mxu1 %v8417_v53  ;;  %v8441_v53 = vld [vmem:[%s9575_s2 + $0x48] sm:$0xff] }
 0x4d5   :  { %2279 = vmatpush.msra.mxu2 %v8423_v54  ;;  %2299 = vmatpush.msrb.mxu3 %v8429_v4  ;;  %11160 = vst [vmem:[#allocation12_spill] sm:$0xff] %v8441_v53  ;;  %v8447_v54 = vld [vmem:[%s9575_s2 + $0x50] sm:$0xff]  ;;  %v8453_v4 = vld [vmem:[%s9575_s2 + $0x58] sm:$0xff] }
 0x4d6   :  { %2240 = vmatpush.msrb.mxu0 %v8435_v5  ;;  %2260 = vmatpush.msrb.mxu1 %v8441_v53  ;;  %11161 = vst [vmem:[#allocation7_spill] sm:$0xff] %v8447_v54  ;;  %v8459_v5 = vld [vmem:[%s9575_s2 + $0x20] sm:$0xff]  ;;  %v8465_v53 = vld [vmem:[%s9575_s2 + $0x28] sm:$0xff] }
 0x4d7   :  { %2280 = vmatpush.msra.mxu2 %v8447_v54  ;;  %11162 = vst [vmem:[#allocation4_spill] sm:$0xff] %v8453_v4  ;;  %2300 = vmatpush.msrb.mxu3 %v8453_v4  ;;  %v8471_v54 = vld [vmem:[%s9575_s2 + $0x30] sm:$0xff]  ;;  %v8477_v4 = vld [vmem:[%s9575_s2 + $0x38] sm:$0xff] }
 0x4d8   :  { %11163 = vst [vmem:[#allocation8_spill] sm:$0xff] %v8459_v5  ;;  %2241 = vmatpush.msrb.mxu0 %v8459_v5  ;;  %2261 = vmatpush.msrb.mxu1 %v8465_v53  ;;  %v8483_v5 = vld [vmem:[%s9575_s2] sm:$0xff] }
 0x4d9   :  { %11164 = vst [vmem:[#allocation13_spill] sm:$0xff] %v8465_v53  ;;  %2281 = vmatpush.msra.mxu2 %v8471_v54  ;;  %2301 = vmatpush.msrb.mxu3 %v8477_v4  ;;  %v8489_v53 = vld [vmem:[%s9575_s2 + $0x8] sm:$0xff] }
 0x4da   :  { %11165 = vst [vmem:[#allocation9_spill] sm:$0xff] %v8471_v54  ;;  %2242 = vmatpush.msrb.mxu0 %v8483_v5  ;;  %2262 = vmatpush.msrb.mxu1 %v8489_v53  ;;  %v8495_v54 = vld [vmem:[%s9575_s2 + $0x10] sm:$0xff] }
 0x4db   :  { %11166 = vst [vmem:[#allocation93_spill] sm:$0xff] %v8477_v4  ;;  %2282 = vmatpush.msra.mxu2 %v8495_v54  ;;  %v8501_v4 = vld [vmem:[%s9575_s2 + $0x18] sm:$0xff]  ;;  %2243 = vmatmul.f32.vlgmr.msrb.gmra.mxu0 %v8186_v14 }
 0x4dc   :  { %11167 = vst [vmem:[#allocation5_spill] sm:$0xff] %v8483_v5  ;;  %2302 = vmatpush.msrb.mxu3 %v8501_v4  ;;  %2263 = vmatmul.f32.vlgmr.msrb.gmra.mxu1 %v8186_v14 }
 0x4dd   :  { %11168 = vst [vmem:[#allocation10_spill] sm:$0xff] %v8489_v53  ;;  %2283 = vmatmul.f32.vlgmr.msra.gmra.mxu2 %v8186_v14  ;;  %2303 = vmatmul.f32.vlgmr.msrb.gmra.mxu3 %v8186_v14  ;;  %v8511_v53 = vld [vmem:[%s9576_s5 + $0x1e0] sm:$0xff]  ;;  %v8529_v14 = vld [vmem:[%s9576_s5 + $0x1f8] sm:$0xff] }
 0x4de   :  { %11169 = vst [vmem:[#allocation14_spill] sm:$0xff] %v8495_v54  ;;  %2329 = vmatpush.msra.mxu0 %v8511_v53  ;;  %v8517_v54 = vld [vmem:[%s9576_s5 + $0x1e8] sm:$0xff]  ;;  %2389 = vmatpush.msra.mxu3 %v8529_v14 }
 0x4df   :  { %11170 = vst [vmem:[#allocation11_spill] sm:$0xff] %v8501_v4  ;;  %2349 = vmatpush.msra.mxu1 %v8517_v54  ;;  %v8523_v4 = vld [vmem:[%s9576_s5 + $0x1f0] sm:$0xff] }
 0x4e0   :  { %11171 = vst [vmem:[#allocation15_spill] sm:$0xff] %v8511_v53  ;;  %2369 = vmatpush.msrb.mxu2 %v8523_v4  ;;  %v8535_v53 = vld [vmem:[%s9576_s5 + $0x1c0] sm:$0xff] }
 0x4e1   :  { %11172 = vst [vmem:[#allocation16_spill] sm:$0xff] %v8517_v54  ;;  %2330 = vmatpush.msra.mxu0 %v8535_v53  ;;  %v8541_v54 = vld [vmem:[%s9576_s5 + $0x1c8] sm:$0xff] }
 0x4e2   :  { %11173 = vst [vmem:[#allocation17_spill] sm:$0xff] %v8523_v4  ;;  %2350 = vmatpush.msra.mxu1 %v8541_v54  ;;  %v8547_v4 = vld [vmem:[%s9576_s5 + $0x1d0] sm:$0xff] }
 0x4e3   :  { %11174 = vst [vmem:[#allocation18_spill] sm:$0xff] %v8529_v14  ;;  %2370 = vmatpush.msrb.mxu2 %v8547_v4  ;;  %v8553_v14 = vld [vmem:[%s9576_s5 + $0x1d8] sm:$0xff] }
 0x4e4   :  { %11175 = vst [vmem:[#allocation19_spill] sm:$0xff] %v8535_v53  ;;  %2390 = vmatpush.msra.mxu3 %v8553_v14  ;;  %v8559_v53 = vld [vmem:[%s9576_s5 + $0x1a0] sm:$0xff] }
 0x4e5   :  { %11176 = vst [vmem:[#allocation20_spill] sm:$0xff] %v8541_v54  ;;  %2331 = vmatpush.msra.mxu0 %v8559_v53  ;;  %v8565_v54 = vld [vmem:[%s9576_s5 + $0x1a8] sm:$0xff] }
 0x4e6   :  { %11177 = vst [vmem:[#allocation21_spill] sm:$0xff] %v8547_v4  ;;  %2351 = vmatpush.msra.mxu1 %v8565_v54  ;;  %v8571_v4 = vld [vmem:[%s9576_s5 + $0x1b0] sm:$0xff] }
 0x4e7   :  { %11178 = vst [vmem:[#allocation22_spill] sm:$0xff] %v8553_v14  ;;  %2371 = vmatpush.msrb.mxu2 %v8571_v4  ;;  %v8577_v14 = vld [vmem:[%s9576_s5 + $0x1b8] sm:$0xff] }
 0x4e8   :  { %11179 = vst [vmem:[#allocation23_spill] sm:$0xff] %v8559_v53  ;;  %2391 = vmatpush.msra.mxu3 %v8577_v14  ;;  %v8583_v53 = vld [vmem:[%s9576_s5 + $0x180] sm:$0xff] }
 0x4e9   :  { %11180 = vst [vmem:[#allocation24_spill] sm:$0xff] %v8565_v54  ;;  %2332 = vmatpush.msra.mxu0 %v8583_v53  ;;  %v8589_v54 = vld [vmem:[%s9576_s5 + $0x188] sm:$0xff] }
 0x4ea   :  { %11181 = vst [vmem:[#allocation25_spill] sm:$0xff] %v8571_v4  ;;  %2352 = vmatpush.msra.mxu1 %v8589_v54  ;;  %v8595_v4 = vld [vmem:[%s9576_s5 + $0x190] sm:$0xff] }
 0x4eb   :  { %11182 = vst [vmem:[#allocation26_spill] sm:$0xff] %v8577_v14  ;;  %2372 = vmatpush.msrb.mxu2 %v8595_v4  ;;  %v8601_v14 = vld [vmem:[%s9576_s5 + $0x198] sm:$0xff] }
 0x4ec   :  { %11183 = vst [vmem:[#allocation27_spill] sm:$0xff] %v8583_v53  ;;  %2392 = vmatpush.msra.mxu3 %v8601_v14  ;;  %v8607_v53 = vld [vmem:[%s9576_s5 + $0x160] sm:$0xff] }
 0x4ed   :  { %11184 = vst [vmem:[#allocation28_spill] sm:$0xff] %v8589_v54  ;;  %2333 = vmatpush.msra.mxu0 %v8607_v53  ;;  %v8613_v54 = vld [vmem:[%s9576_s5 + $0x168] sm:$0xff] }
 0x4ee   :  { %11185 = vst [vmem:[#allocation29_spill] sm:$0xff] %v8595_v4  ;;  %2353 = vmatpush.msra.mxu1 %v8613_v54  ;;  %v8619_v4 = vld [vmem:[%s9576_s5 + $0x170] sm:$0xff] }
 0x4ef   :  { %11186 = vst [vmem:[#allocation30_spill] sm:$0xff] %v8601_v14  ;;  %2373 = vmatpush.msrb.mxu2 %v8619_v4  ;;  %v8625_v14 = vld [vmem:[%s9576_s5 + $0x178] sm:$0xff] }
 0x4f0   :  { %11187 = vst [vmem:[#allocation31_spill] sm:$0xff] %v8607_v53  ;;  %2393 = vmatpush.msra.mxu3 %v8625_v14  ;;  %v8631_v53 = vld [vmem:[%s9576_s5 + $0x140] sm:$0xff] }
 0x4f1   :  { %11188 = vst [vmem:[#allocation32_spill] sm:$0xff] %v8613_v54  ;;  %2334 = vmatpush.msra.mxu0 %v8631_v53  ;;  %v8637_v54 = vld [vmem:[%s9576_s5 + $0x148] sm:$0xff] }
 0x4f2   :  { %11189 = vst [vmem:[#allocation33_spill] sm:$0xff] %v8619_v4  ;;  %2354 = vmatpush.msra.mxu1 %v8637_v54  ;;  %v8643_v4 = vld [vmem:[%s9576_s5 + $0x150] sm:$0xff] }
 0x4f3   :  { %11190 = vst [vmem:[#allocation34_spill] sm:$0xff] %v8625_v14  ;;  %2374 = vmatpush.msrb.mxu2 %v8643_v4  ;;  %v8649_v14 = vld [vmem:[%s9576_s5 + $0x158] sm:$0xff] }
 0x4f4   :  { %11191 = vst [vmem:[#allocation35_spill] sm:$0xff] %v8631_v53  ;;  %2394 = vmatpush.msra.mxu3 %v8649_v14  ;;  %v8655_v53 = vld [vmem:[%s9576_s5 + $0x120] sm:$0xff] }
 0x4f5   :  { %11192 = vst [vmem:[#allocation36_spill] sm:$0xff] %v8637_v54  ;;  %2335 = vmatpush.msra.mxu0 %v8655_v53  ;;  %v8661_v54 = vld [vmem:[%s9576_s5 + $0x128] sm:$0xff] }
 0x4f6   :  { %11193 = vst [vmem:[#allocation37_spill] sm:$0xff] %v8643_v4  ;;  %2355 = vmatpush.msra.mxu1 %v8661_v54  ;;  %v8667_v4 = vld [vmem:[%s9576_s5 + $0x130] sm:$0xff] }
 0x4f7   :  { %11194 = vst [vmem:[#allocation38_spill] sm:$0xff] %v8649_v14  ;;  %2375 = vmatpush.msrb.mxu2 %v8667_v4  ;;  %v8673_v14 = vld [vmem:[%s9576_s5 + $0x138] sm:$0xff] }
 0x4f8   :  { %11195 = vst [vmem:[#allocation39_spill] sm:$0xff] %v8655_v53  ;;  %2395 = vmatpush.msra.mxu3 %v8673_v14  ;;  %v8679_v53 = vld [vmem:[%s9576_s5 + $0x100] sm:$0xff] }
 0x4f9   :  { %11196 = vst [vmem:[#allocation40_spill] sm:$0xff] %v8661_v54  ;;  %2336 = vmatpush.msra.mxu0 %v8679_v53  ;;  %v8685_v54 = vld [vmem:[%s9576_s5 + $0x108] sm:$0xff] }
 0x4fa   :  { %11197 = vst [vmem:[#allocation41_spill] sm:$0xff] %v8667_v4  ;;  %2356 = vmatpush.msra.mxu1 %v8685_v54  ;;  %v8691_v4 = vld [vmem:[%s9576_s5 + $0x110] sm:$0xff] }
 0x4fb   :  { %11198 = vst [vmem:[#allocation42_spill] sm:$0xff] %v8673_v14  ;;  %2376 = vmatpush.msrb.mxu2 %v8691_v4  ;;  %v8697_v14 = vld [vmem:[%s9576_s5 + $0x118] sm:$0xff] }
 0x4fc   :  { %11199 = vst [vmem:[#allocation43_spill] sm:$0xff] %v8679_v53  ;;  %2396 = vmatpush.msra.mxu3 %v8697_v14  ;;  %v8703_v53 = vld [vmem:[%s9576_s5 + $0xe0] sm:$0xff] }
 0x4fd   :  { %11200 = vst [vmem:[#allocation44_spill] sm:$0xff] %v8685_v54  ;;  %2337 = vmatpush.msra.mxu0 %v8703_v53  ;;  %v8709_v54 = vld [vmem:[%s9576_s5 + $0xe8] sm:$0xff] }
 0x4fe   :  { %11201 = vst [vmem:[#allocation45_spill] sm:$0xff] %v8691_v4  ;;  %2357 = vmatpush.msra.mxu1 %v8709_v54  ;;  %v8715_v4 = vld [vmem:[%s9576_s5 + $0xf0] sm:$0xff] }
 0x4ff   :  { %11202 = vst [vmem:[#allocation46_spill] sm:$0xff] %v8697_v14  ;;  %2377 = vmatpush.msrb.mxu2 %v8715_v4  ;;  %v8721_v14 = vld [vmem:[%s9576_s5 + $0xf8] sm:$0xff] }
 0x500   :  { %11203 = vst [vmem:[#allocation47_spill] sm:$0xff] %v8703_v53  ;;  %2397 = vmatpush.msra.mxu3 %v8721_v14  ;;  %v8727_v53 = vld [vmem:[%s9576_s5 + $0xc0] sm:$0xff] }
 0x501   :  { %11204 = vst [vmem:[#allocation48_spill] sm:$0xff] %v8709_v54  ;;  %2338 = vmatpush.msra.mxu0 %v8727_v53  ;;  %v8733_v54 = vld [vmem:[%s9576_s5 + $0xc8] sm:$0xff] }
 0x502   :  { %11205 = vst [vmem:[#allocation49_spill] sm:$0xff] %v8715_v4  ;;  %2358 = vmatpush.msra.mxu1 %v8733_v54  ;;  %v8739_v4 = vld [vmem:[%s9576_s5 + $0xd0] sm:$0xff] }
 0x503   :  { %11206 = vst [vmem:[#allocation50_spill] sm:$0xff] %v8721_v14  ;;  %2378 = vmatpush.msrb.mxu2 %v8739_v4  ;;  %v8745_v14 = vld [vmem:[%s9576_s5 + $0xd8] sm:$0xff] }
 0x504   :  { %11207 = vst [vmem:[#allocation51_spill] sm:$0xff] %v8727_v53  ;;  %2398 = vmatpush.msra.mxu3 %v8745_v14  ;;  %v8751_v53 = vld [vmem:[%s9576_s5 + $0xa0] sm:$0xff] }
 0x505   :  { %11208 = vst [vmem:[#allocation52_spill] sm:$0xff] %v8733_v54  ;;  %2339 = vmatpush.msra.mxu0 %v8751_v53  ;;  %v8757_v54 = vld [vmem:[%s9576_s5 + $0xa8] sm:$0xff] }
 0x506   :  { %11209 = vst [vmem:[#allocation53_spill] sm:$0xff] %v8739_v4  ;;  %2359 = vmatpush.msra.mxu1 %v8757_v54  ;;  %v8763_v4 = vld [vmem:[%s9576_s5 + $0xb0] sm:$0xff] }
 0x507   :  { %11210 = vst [vmem:[#allocation54_spill] sm:$0xff] %v8745_v14  ;;  %2379 = vmatpush.msrb.mxu2 %v8763_v4  ;;  %v8769_v14 = vld [vmem:[%s9576_s5 + $0xb8] sm:$0xff] }
 0x508   :  { %11211 = vst [vmem:[#allocation56_spill] sm:$0xff] %v8751_v53  ;;  %2399 = vmatpush.msra.mxu3 %v8769_v14  ;;  %v8775_v53 = vld [vmem:[%s9576_s5 + $0x80] sm:$0xff] }
 0x509   :  { %11212 = vst [vmem:[#allocation57_spill] sm:$0xff] %v8757_v54  ;;  %2340 = vmatpush.msra.mxu0 %v8775_v53  ;;  %v8781_v54 = vld [vmem:[%s9576_s5 + $0x88] sm:$0xff] }
 0x50a   :  { %11213 = vst [vmem:[#allocation58_spill] sm:$0xff] %v8763_v4  ;;  %2360 = vmatpush.msra.mxu1 %v8781_v54  ;;  %v8787_v4 = vld [vmem:[%s9576_s5 + $0x90] sm:$0xff] }
 0x50b   :  { %11214 = vst [vmem:[#allocation60_spill] sm:$0xff] %v8769_v14  ;;  %2380 = vmatpush.msrb.mxu2 %v8787_v4  ;;  %v8793_v14 = vld [vmem:[%s9576_s5 + $0x98] sm:$0xff] }
 0x50c   :  { %11215 = vst [vmem:[#allocation61_spill] sm:$0xff] %v8775_v53  ;;  %2400 = vmatpush.msra.mxu3 %v8793_v14  ;;  %v8799_v53 = vld [vmem:[%s9576_s5 + $0x60] sm:$0xff] }
 0x50d   :  { %11216 = vst [vmem:[#allocation62_spill] sm:$0xff] %v8781_v54  ;;  %2341 = vmatpush.msra.mxu0 %v8799_v53  ;;  %v8805_v54 = vld [vmem:[%s9576_s5 + $0x68] sm:$0xff] }
 0x50e   :  { %11217 = vst [vmem:[#allocation63_spill] sm:$0xff] %v8787_v4  ;;  %2361 = vmatpush.msra.mxu1 %v8805_v54  ;;  %v8811_v4 = vld [vmem:[%s9576_s5 + $0x70] sm:$0xff] }
 0x50f   :  { %11218 = vst [vmem:[#allocation65_spill] sm:$0xff] %v8793_v14  ;;  %2381 = vmatpush.msrb.mxu2 %v8811_v4  ;;  %v8817_v14 = vld [vmem:[%s9576_s5 + $0x78] sm:$0xff] }
 0x510   :  { %11219 = vst [vmem:[#allocation66_spill] sm:$0xff] %v8799_v53  ;;  %2401 = vmatpush.msra.mxu3 %v8817_v14  ;;  %v8823_v53 = vld [vmem:[%s9576_s5 + $0x40] sm:$0xff] }
 0x511   :  { %11220 = vst [vmem:[#allocation67_spill] sm:$0xff] %v8805_v54  ;;  %2342 = vmatpush.msra.mxu0 %v8823_v53  ;;  %v8829_v54 = vld [vmem:[%s9576_s5 + $0x48] sm:$0xff] }
 0x512   :  { %11221 = vst [vmem:[#allocation68_spill] sm:$0xff] %v8811_v4  ;;  %2362 = vmatpush.msra.mxu1 %v8829_v54  ;;  %v8835_v4 = vld [vmem:[%s9576_s5 + $0x50] sm:$0xff] }
 0x513   :  { %11222 = vst [vmem:[#allocation69_spill] sm:$0xff] %v8817_v14  ;;  %2382 = vmatpush.msrb.mxu2 %v8835_v4  ;;  %v8841_v14 = vld [vmem:[%s9576_s5 + $0x58] sm:$0xff] }
 0x514   :  { %11223 = vst [vmem:[#allocation70_spill] sm:$0xff] %v8823_v53  ;;  %2402 = vmatpush.msra.mxu3 %v8841_v14  ;;  %v8847_v53 = vld [vmem:[%s9576_s5 + $0x20] sm:$0xff] }
 0x515   :  { %11224 = vst [vmem:[#allocation71_spill] sm:$0xff] %v8829_v54  ;;  %2343 = vmatpush.msra.mxu0 %v8847_v53  ;;  %v8853_v54 = vld [vmem:[%s9576_s5 + $0x28] sm:$0xff] }
 0x516   :  { %11225 = vst [vmem:[#allocation72_spill] sm:$0xff] %v8835_v4  ;;  %2363 = vmatpush.msra.mxu1 %v8853_v54  ;;  %v8859_v4 = vld [vmem:[%s9576_s5 + $0x30] sm:$0xff] }
 0x517   :  { %11226 = vst [vmem:[#allocation73_spill] sm:$0xff] %v8841_v14  ;;  %2383 = vmatpush.msrb.mxu2 %v8859_v4  ;;  %v8865_v14 = vld [vmem:[%s9576_s5 + $0x38] sm:$0xff] }
 0x518   :  { %11227 = vst [vmem:[#allocation76_spill] sm:$0xff] %v8847_v53  ;;  %2403 = vmatpush.msra.mxu3 %v8865_v14  ;;  %v8871_v53 = vld [vmem:[%s9576_s5] sm:$0xff] }
 0x519   :  { %11228 = vst [vmem:[#allocation77_spill] sm:$0xff] %v8853_v54  ;;  %2344 = vmatpush.msra.mxu0 %v8871_v53  ;;  %v8877_v54 = vld [vmem:[%s9576_s5 + $0x8] sm:$0xff] }
 0x51a   :  { %11229 = vst [vmem:[#allocation78_spill] sm:$0xff] %v8859_v4  ;;  %2364 = vmatpush.msra.mxu1 %v8877_v54  ;;  %v8883_v4 = vld [vmem:[%s9576_s5 + $0x10] sm:$0xff] }
 0x51b   :  { %11230 = vst [vmem:[#allocation80_spill] sm:$0xff] %v8865_v14  ;;  %2384 = vmatpush.msrb.mxu2 %v8883_v4  ;;  %v8889_v14 = vld [vmem:[%s9576_s5 + $0x18] sm:$0xff] }
 0x51c   :  { %11231 = vst [vmem:[#allocation81_spill] sm:$0xff] %v8871_v53  ;;  %2404 = vmatpush.msra.mxu3 %v8889_v14  ;;  %v8895_v53 = vld [vmem:[%s9577_s4 + $0x1e0] sm:$0xff] }
 0x51d   :  { %11232 = vst [vmem:[#allocation82_spill] sm:$0xff] %v8877_v54  ;;  %2409 = vmatpush.msrb.mxu0 %v8895_v53  ;;  %v8901_v54 = vld [vmem:[%s9577_s4 + $0x1e8] sm:$0xff] }
 0x51e   :  { %11233 = vst [vmem:[#allocation83_spill] sm:$0xff] %v8883_v4  ;;  %2429 = vmatpush.msrb.mxu1 %v8901_v54  ;;  %v8907_v4 = vld [vmem:[%s9577_s4 + $0x1f0] sm:$0xff] }
 0x51f   :  { %11234 = vst [vmem:[#allocation84_spill] sm:$0xff] %v8889_v14  ;;  %2449 = vmatpush.msra.mxu2 %v8907_v4  ;;  %v8913_v14 = vld [vmem:[%s9577_s4 + $0x1f8] sm:$0xff] }
 0x520   :  { %11235 = vst [vmem:[#allocation85_spill] sm:$0xff] %v8895_v53  ;;  %2469 = vmatpush.msrb.mxu3 %v8913_v14  ;;  %v8919_v53 = vld [vmem:[%s9577_s4 + $0x1c0] sm:$0xff] }
 0x521   :  { %11236 = vst [vmem:[#allocation86_spill] sm:$0xff] %v8901_v54  ;;  %2410 = vmatpush.msrb.mxu0 %v8919_v53  ;;  %v8925_v54 = vld [vmem:[%s9577_s4 + $0x1c8] sm:$0xff] }
 0x522   :  { %11237 = vst [vmem:[#allocation87_spill] sm:$0xff] %v8907_v4  ;;  %2430 = vmatpush.msrb.mxu1 %v8925_v54  ;;  %v8931_v4 = vld [vmem:[%s9577_s4 + $0x1d0] sm:$0xff] }
 0x523   :  { %11238 = vst [vmem:[#allocation88_spill] sm:$0xff] %v8913_v14  ;;  %2450 = vmatpush.msra.mxu2 %v8931_v4  ;;  %v8937_v14 = vld [vmem:[%s9577_s4 + $0x1d8] sm:$0xff] }
 0x524   :  { %11239 = vst [vmem:[#allocation90_spill] sm:$0xff] %v8919_v53  ;;  %2470 = vmatpush.msrb.mxu3 %v8937_v14  ;;  %v8943_v53 = vld [vmem:[%s9577_s4 + $0x1a0] sm:$0xff] }
 0x525   :  { %11240 = vst [vmem:[#allocation91_spill] sm:$0xff] %v8925_v54  ;;  %2411 = vmatpush.msrb.mxu0 %v8943_v53  ;;  %v8949_v54 = vld [vmem:[%s9577_s4 + $0x1a8] sm:$0xff] }
 0x526   :  { %11241 = vst [vmem:[#allocation92_spill] sm:$0xff] %v8931_v4  ;;  %2431 = vmatpush.msrb.mxu1 %v8949_v54  ;;  %v8955_v4 = vld [vmem:[%s9577_s4 + $0x1b0] sm:$0xff] }
 0x527   :  { %11242 = vst [vmem:[#allocation94_spill] sm:$0xff] %v8937_v14  ;;  %2451 = vmatpush.msra.mxu2 %v8955_v4  ;;  %v8961_v14 = vld [vmem:[%s9577_s4 + $0x1b8] sm:$0xff] }
 0x528   :  { %11243 = vst [vmem:[#allocation95_spill] sm:$0xff] %v8943_v53  ;;  %2471 = vmatpush.msrb.mxu3 %v8961_v14  ;;  %v8967_v53 = vld [vmem:[%s9577_s4 + $0x180] sm:$0xff] }
 0x529   :  { %11244 = vst [vmem:[#allocation96_spill] sm:$0xff] %v8949_v54  ;;  %2412 = vmatpush.msrb.mxu0 %v8967_v53  ;;  %v8973_v54 = vld [vmem:[%s9577_s4 + $0x188] sm:$0xff] }
 0x52a   :  { %11245 = vst [vmem:[#allocation97_spill] sm:$0xff] %v8955_v4  ;;  %2432 = vmatpush.msrb.mxu1 %v8973_v54  ;;  %v8979_v4 = vld [vmem:[%s9577_s4 + $0x190] sm:$0xff] }
 0x52b   :  { %11246 = vst [vmem:[#allocation99_spill] sm:$0xff] %v8961_v14  ;;  %2452 = vmatpush.msra.mxu2 %v8979_v4  ;;  %v8985_v14 = vld [vmem:[%s9577_s4 + $0x198] sm:$0xff] }
 0x52c   :  { %11247 = vst [vmem:[#allocation101_spill] sm:$0xff] %v8967_v53  ;;  %2472 = vmatpush.msrb.mxu3 %v8985_v14  ;;  %v8991_v53 = vld [vmem:[%s9577_s4 + $0x160] sm:$0xff] }
 0x52d   :  { %11248 = vst [vmem:[#allocation102_spill] sm:$0xff] %v8973_v54  ;;  %2413 = vmatpush.msrb.mxu0 %v8991_v53  ;;  %v8997_v54 = vld [vmem:[%s9577_s4 + $0x168] sm:$0xff] }
 0x52e   :  { %11249 = vst [vmem:[#allocation103_spill] sm:$0xff] %v8979_v4  ;;  %2433 = vmatpush.msrb.mxu1 %v8997_v54  ;;  %v9003_v4 = vld [vmem:[%s9577_s4 + $0x170] sm:$0xff] }
 0x52f   :  { %11250 = vst [vmem:[#allocation104_spill] sm:$0xff] %v8985_v14  ;;  %2453 = vmatpush.msra.mxu2 %v9003_v4  ;;  %v9009_v14 = vld [vmem:[%s9577_s4 + $0x178] sm:$0xff] }
 0x530   :  { %11251 = vst [vmem:[#allocation105_spill] sm:$0xff] %v8991_v53  ;;  %2473 = vmatpush.msrb.mxu3 %v9009_v14  ;;  %v9015_v53 = vld [vmem:[%s9577_s4 + $0x140] sm:$0xff] }
 0x531   :  { %11252 = vst [vmem:[#allocation106_spill] sm:$0xff] %v8997_v54  ;;  %2414 = vmatpush.msrb.mxu0 %v9015_v53  ;;  %v9021_v54 = vld [vmem:[%s9577_s4 + $0x148] sm:$0xff] }
 0x532   :  { %11253 = vst [vmem:[#allocation107_spill] sm:$0xff] %v9003_v4  ;;  %2434 = vmatpush.msrb.mxu1 %v9021_v54  ;;  %v9027_v4 = vld [vmem:[%s9577_s4 + $0x150] sm:$0xff] }
 0x533   :  { %11254 = vst [vmem:[#allocation108_spill] sm:$0xff] %v9009_v14  ;;  %2454 = vmatpush.msra.mxu2 %v9027_v4  ;;  %v9033_v14 = vld [vmem:[%s9577_s4 + $0x158] sm:$0xff] }
 0x534   :  { %11255 = vst [vmem:[#allocation109_spill] sm:$0xff] %v9015_v53  ;;  %2474 = vmatpush.msrb.mxu3 %v9033_v14  ;;  %v9039_v53 = vld [vmem:[%s9577_s4 + $0x120] sm:$0xff] }
 0x535   :  { %11256 = vst [vmem:[#allocation110_spill] sm:$0xff] %v9021_v54  ;;  %2415 = vmatpush.msrb.mxu0 %v9039_v53  ;;  %v9045_v54 = vld [vmem:[%s9577_s4 + $0x128] sm:$0xff]  ;;  %v2078_v5 = vpop.f32.mrf.mxu1 }
 0x536   :  { %11257 = vst [vmem:[#allocation111_spill] sm:$0xff] %v9027_v4  ;;  %2435 = vmatpush.msrb.mxu1 %v9045_v54  ;;  %v9051_v4 = vld [vmem:[%s9577_s4 + $0x130] sm:$0xff] }
 0x537   :  { %11258 = vst [vmem:[#allocation113_spill] sm:$0xff] %v9033_v14  ;;  %2455 = vmatpush.msra.mxu2 %v9051_v4  ;;  %v9057_v14 = vld [vmem:[%s9577_s4 + $0x138] sm:$0xff] }
 0x538   :  { %11259 = vst [vmem:[#allocation115_spill] sm:$0xff] %v9039_v53  ;;  %2475 = vmatpush.msrb.mxu3 %v9057_v14  ;;  %v9063_v53 = vld [vmem:[%s9577_s4 + $0x100] sm:$0xff] }
 0x539   :  { %11260 = vst [vmem:[#allocation116_spill] sm:$0xff] %v9045_v54  ;;  %2416 = vmatpush.msrb.mxu0 %v9063_v53  ;;  %v9069_v54 = vld [vmem:[%s9577_s4 + $0x108] sm:$0xff] }
 0x53a   :  { %11261 = vst [vmem:[#allocation117_spill] sm:$0xff] %v9051_v4  ;;  %2436 = vmatpush.msrb.mxu1 %v9069_v54  ;;  %v9075_v4 = vld [vmem:[%s9577_s4 + $0x110] sm:$0xff] }
 0x53b   :  { %11262 = vst [vmem:[#allocation119_spill] sm:$0xff] %v9057_v14  ;;  %2456 = vmatpush.msra.mxu2 %v9075_v4  ;;  %v9081_v14 = vld [vmem:[%s9577_s4 + $0x118] sm:$0xff] }
 0x53c   :  { %11263 = vst [vmem:[#allocation121_spill] sm:$0xff] %v9063_v53  ;;  %2476 = vmatpush.msrb.mxu3 %v9081_v14  ;;  %v9087_v53 = vld [vmem:[%s9577_s4 + $0xe0] sm:$0xff]  ;;  %v2098_v50 = vpop.f32.mrf.mxu2  ;;  %v2118_v48 = vpop.f32.mrf.mxu3 }
 0x53d   :  { %11264 = vst [vmem:[#allocation122_spill] sm:$0xff] %v9069_v54  ;;  %2417 = vmatpush.msrb.mxu0 %v9087_v53  ;;  %v9093_v54 = vld [vmem:[%s9577_s4 + $0xe8] sm:$0xff] }
 0x53e   :  { %11265 = vst [vmem:[#allocation123_spill] sm:$0xff] %v9075_v4  ;;  %2437 = vmatpush.msrb.mxu1 %v9093_v54  ;;  %v9099_v4 = vld [vmem:[%s9577_s4 + $0xf0] sm:$0xff] }
 0x53f   :  { %11266 = vst [vmem:[#allocation124_spill] sm:$0xff] %v9081_v14  ;;  %2457 = vmatpush.msra.mxu2 %v9099_v4  ;;  %v9105_v14 = vld [vmem:[%s9577_s4 + $0xf8] sm:$0xff] }
 0x540   :  { %11267 = vst [vmem:[#allocation125_spill] sm:$0xff] %v9087_v53  ;;  %2477 = vmatpush.msrb.mxu3 %v9105_v14  ;;  %v9111_v53 = vld [vmem:[%s9577_s4 + $0xc0] sm:$0xff] }
 0x541   :  { %11268 = vst [vmem:[#allocation126_spill] sm:$0xff] %v9093_v54  ;;  %2418 = vmatpush.msrb.mxu0 %v9111_v53  ;;  %v9117_v54 = vld [vmem:[%s9577_s4 + $0xc8] sm:$0xff] }
 0x542   :  { %11269 = vst [vmem:[#allocation127_spill] sm:$0xff] %v9099_v4  ;;  %2438 = vmatpush.msrb.mxu1 %v9117_v54  ;;  %v9123_v4 = vld [vmem:[%s9577_s4 + $0xd0] sm:$0xff] }
 0x543   :  { %11270 = vst [vmem:[#allocation128_spill] sm:$0xff] %v9105_v14  ;;  %2458 = vmatpush.msra.mxu2 %v9123_v4  ;;  %v9129_v14 = vld [vmem:[%s9577_s4 + $0xd8] sm:$0xff] }
 0x544   :  { %11271 = vst [vmem:[#allocation129_spill] sm:$0xff] %v9111_v53  ;;  %2478 = vmatpush.msrb.mxu3 %v9129_v14  ;;  %v9135_v53 = vld [vmem:[%s9577_s4 + $0xa0] sm:$0xff] }
 0x545   :  { %11272 = vst [vmem:[#allocation130_spill] sm:$0xff] %v9117_v54  ;;  %2419 = vmatpush.msrb.mxu0 %v9135_v53  ;;  %v9141_v54 = vld [vmem:[%s9577_s4 + $0xa8] sm:$0xff] }
 0x546   :  { %11273 = vst [vmem:[#allocation131_spill] sm:$0xff] %v9123_v4  ;;  %2439 = vmatpush.msrb.mxu1 %v9141_v54  ;;  %v9147_v4 = vld [vmem:[%s9577_s4 + $0xb0] sm:$0xff]  ;;  %v2178_v37 = vpop.f32.mrf.mxu2  ;;  %v2198_v36 = vpop.f32.mrf.mxu3 }
 0x547   :  { %11274 = vst [vmem:[#allocation133_spill] sm:$0xff] %v9129_v14  ;;  %2459 = vmatpush.msra.mxu2 %v9147_v4  ;;  %v9153_v14 = vld [vmem:[%s9577_s4 + $0xb8] sm:$0xff]  ;;  %v2179_v35 = vadd.f32 %v2178_v37, %v2098_v50 }
 0x548   :  { %11275 = vst [vmem:[#allocation134_spill] sm:$0xff] %v9135_v53  ;;  %2479 = vmatpush.msrb.mxu3 %v9153_v14  ;;  %v9159_v53 = vld [vmem:[%s9577_s4 + $0x80] sm:$0xff] }
 0x549   :  { %11276 = vst [vmem:[#allocation135_spill] sm:$0xff] %v9141_v54  ;;  %2420 = vmatpush.msrb.mxu0 %v9159_v53  ;;  %v9165_v54 = vld [vmem:[%s9577_s4 + $0x88] sm:$0xff]  ;;  %v2203_v34 = vadd.f32 %v2179_v35, %v5305_v61 }
 0x54a   :  { %11277 = vst [vmem:[#allocation136_spill] sm:$0xff] %v9147_v4  ;;  %2440 = vmatpush.msrb.mxu1 %v9165_v54  ;;  %v9171_v4 = vld [vmem:[%s9577_s4 + $0x90] sm:$0xff] }
 0x54b   :  { %11278 = vst [vmem:[#allocation138_spill] sm:$0xff] %v9153_v14  ;;  %2460 = vmatpush.msra.mxu2 %v9171_v4  ;;  %v9177_v14 = vld [vmem:[%s9577_s4 + $0x98] sm:$0xff]  ;;  %v2207_v32 = vmul.f32 0.5, %v2203_v34  ;;  %v11299_v34 = vld [vmem:[#allocation55_spill] sm:$0xff] }
 0x54c   :  { %11279 = vst [vmem:[#allocation141_spill] sm:$0xff] %v9159_v53  ;;  %2480 = vmatpush.msrb.mxu3 %v9177_v14  ;;  %v9183_v53 = vld [vmem:[%s9577_s4 + $0x60] sm:$0xff] }
 0x54d   :  { %11280 = vst [vmem:[#allocation142_spill] sm:$0xff] %v9165_v54  ;;  %2421 = vmatpush.msrb.mxu0 %v9183_v53  ;;  %v9189_v54 = vld [vmem:[%s9577_s4 + $0x68] sm:$0xff] }
 0x54e   :  { %11281 = vst [vmem:[#allocation143_spill] sm:$0xff] %v9171_v4  ;;  %2441 = vmatpush.msrb.mxu1 %v9189_v54  ;;  %v9195_v4 = vld [vmem:[%s9577_s4 + $0x70] sm:$0xff] }
 0x54f   :  { %11282 = vst [vmem:[#allocation144_spill] sm:$0xff] %v9177_v14  ;;  %2461 = vmatpush.msra.mxu2 %v9195_v4  ;;  %v9201_v14 = vld [vmem:[%s9577_s4 + $0x78] sm:$0xff] }
 0x550   :  { %11283 = vst [vmem:[#allocation145_spill] sm:$0xff] %v9183_v53  ;;  %2481 = vmatpush.msrb.mxu3 %v9201_v14  ;;  %v9207_v53 = vld [vmem:[%s9577_s4 + $0x40] sm:$0xff] }
 0x551   :  { %11284 = vst [vmem:[#allocation146_spill] sm:$0xff] %v9189_v54  ;;  %2422 = vmatpush.msrb.mxu0 %v9207_v53  ;;  %v9213_v54 = vld [vmem:[%s9577_s4 + $0x48] sm:$0xff] }
 0x552   :  { %11285 = vst [vmem:[#allocation147_spill] sm:$0xff] %v9195_v4  ;;  %2442 = vmatpush.msrb.mxu1 %v9213_v54  ;;  %v9219_v4 = vld [vmem:[%s9577_s4 + $0x50] sm:$0xff] }
 0x553   :  { %11286 = vst [vmem:[#allocation148_spill] sm:$0xff] %v9201_v14  ;;  %2462 = vmatpush.msra.mxu2 %v9219_v4  ;;  %v9225_v14 = vld [vmem:[%s9577_s4 + $0x58] sm:$0xff] }
 0x554   :  { %11287 = vst [vmem:[#allocation149_spill] sm:$0xff] %v9207_v53  ;;  %2482 = vmatpush.msrb.mxu3 %v9225_v14  ;;  %v9231_v53 = vld [vmem:[%s9577_s4 + $0x20] sm:$0xff] }
 0x555   :  { %11288 = vst [vmem:[#allocation150_spill] sm:$0xff] %v9213_v54  ;;  %2423 = vmatpush.msrb.mxu0 %v9231_v53  ;;  %v9237_v54 = vld [vmem:[%s9577_s4 + $0x28] sm:$0xff] }
 0x556   :  { %11289 = vst [vmem:[#allocation152_spill] sm:$0xff] %v9219_v4  ;;  %2443 = vmatpush.msrb.mxu1 %v9237_v54  ;;  %v9243_v4 = vld [vmem:[%s9577_s4 + $0x30] sm:$0xff] }
 0x557   :  { %11290 = vst [vmem:[#allocation153_spill] sm:$0xff] %v9225_v14  ;;  %2463 = vmatpush.msra.mxu2 %v9243_v4  ;;  %v9249_v14 = vld [vmem:[%s9577_s4 + $0x38] sm:$0xff] }
 0x558   :  { %11291 = vst [vmem:[#allocation154_spill] sm:$0xff] %v9231_v53  ;;  %2483 = vmatpush.msrb.mxu3 %v9249_v14  ;;  %v9255_v53 = vld [vmem:[%s9577_s4] sm:$0xff] }
 0x559   :  { %11292 = vst [vmem:[#allocation156_spill] sm:$0xff] %v9237_v54  ;;  %2424 = vmatpush.msrb.mxu0 %v9255_v53  ;;  %v9261_v54 = vld [vmem:[%s9577_s4 + $0x8] sm:$0xff] }
 0x55a   :  { %11293 = vst [vmem:[#allocation158_spill] sm:$0xff] %v9243_v4  ;;  %2444 = vmatpush.msrb.mxu1 %v9261_v54  ;;  %v9267_v4 = vld [vmem:[%s9577_s4 + $0x10] sm:$0xff] }
 0x55b   :  { %11294 = vst [vmem:[#allocation64_spill] sm:$0xff] %v9249_v14  ;;  %2464 = vmatpush.msra.mxu2 %v9267_v4  ;;  %v9273_v14 = vld [vmem:[%s9577_s4 + $0x18] sm:$0xff] }
 0x55c   :  { %11295 = vst [vmem:[#allocation59_spill] sm:$0xff] %v9255_v53  ;;  %2484 = vmatpush.msrb.mxu3 %v9273_v14  ;;  %v2058_v53 = vpop.f32.mrf.mxu0 }
 0x55d   :  { %11296 = vst [vmem:[#allocation75_spill] sm:$0xff] %v9261_v54  ;;  %v2158_v54 = vpop.f32.mrf.mxu1 }
 0x55e   :  { %11297 = vst [vmem:[#allocation112_spill] sm:$0xff] %v9267_v4  ;;  %v2159_v44 = vadd.f32 %v2158_v54, %v2078_v5 }
 0x55f   :  { %11298 = vst [vmem:[#allocation167_spill] sm:$0xff] %v9273_v14  ;;  %v2199_v14 = vadd.f32 %v2198_v36, %v2118_v48  ;;  %v11300_v36 = vld [vmem:[#allocation157_spill] sm:$0xff] }
 0x560   :  { %v2202_v11 = vadd.f32 %v2159_v44, %v5301_v20  ;;  %v174_v48 = vadd.f32 %v11300_v36, %v5087_v17 }
 0x561   :  { %v2204_v40 = vadd.f32 %v2199_v14, %v5307_v62 }
 0x562   :  { %v2206_v38 = vmul.f32 0.5, %v2202_v11 }
 0x564   :  { %v2138_v47 = vpop.f32.mrf.mxu0 }
 0x565   :  { %v2139_v45 = vadd.f32 %v2138_v47, %v2058_v53 }
 0x567   :  { %v2201_v29 = vadd.f32 %v2139_v45, %v5299_v55 }
 0x569   :  { %v2205_v4 = vmul.f32 0.5, %v2201_v29 }
 0x56b   :  { %3025 = vtanh.f32 %v2205_v4 }
 0x56c   :  { %3027 = vtanh.f32 %v2206_v38  ;;  %v2244_v50 = vpop.f32.mrf.mxu0 }
 0x56d   :  { %3029 = vtanh.f32 %v2204_v40  ;;  %v133_v40 = vadd.f32 %v11299_v34, %v5084_v15  ;;  %v2304_v34 = vpop.f32.mrf.mxu3 }
 0x56e   :  { %3031 = vtanh.f32 %v2207_v32  ;;  %v2264_v32 = vpop.f32.mrf.mxu1 }
 0x56f   :  { %v2307_v14 = vadd.f32 %v2244_v50, %v133_v40 }
 0x571   :  { %v3026_v47 = vpop.eup %3025 }
 0x572   :  { %v3028_v53 = vpop.eup %3027  ;;  %v2211_v54 = vmul.f32 0.5, %v3026_v47  ;;  %v2308_v47 = vadd.f32 %v2264_v32, %v174_v48 }
 0x573   :  { %v2212_v45 = vmul.f32 0.5, %v3028_v53  ;;  %v3030_v11 = vpop.eup %3029 }
 0x574   :  { %v2214_v44 = vadd.f32 0.5, %v2211_v54  ;;  %v3032_v38 = vpop.eup %3031 }
 0x575   :  { %v2215_v29 = vadd.f32 0.5, %v2212_v45  ;;  %v2213_v35 = vmul.f32 0.5, %v3032_v38  ;;  %v2312_v45 = vmul.f32 0.5, %v2308_v47  ;;  %v2284_v38 = vpop.f32.mrf.mxu2  ;;  %v11328_v47 = vld [vmem:[#allocation5_spill] sm:$0xff] }
 0x576   :  { %v2219_v5 = vmul.f32 %v3030_v11, %v2214_v44 }
 0x577   :  { %v2218_v4 = vmul.f32 %v2215_v29, %v8107_v7  ;;  %v2216_v53 = vadd.f32 0.5, %v2213_v35  ;;  %v2311_v7 = vmul.f32 0.5, %v2307_v14  ;;  %v11301_v29 = vld [vmem:[#allocation161_spill] sm:$0xff] }
 0x578   :  { %v256_v11 = vadd.f32 %v11301_v29, %v5114_v30  ;;  %v11327_v14 = vld [vmem:[#allocation93_spill] sm:$0xff] }
 0x579   :  { %v9281_v37 = vadd.f32 %v2219_v5, %v2218_v4  ;;  %v11302_v4 = vld [vmem:[#allocation165_spill] sm:$0xff] }
 0x57a   :  { %v215_v5 = vadd.f32 %v11302_v4, %v5149_v42  ;;  %v2310_v35 = vadd.f32 %v2304_v34, %v256_v11  ;;  %v11334_v29 = vld [vmem:[#allocation17_spill] sm:$0xff]  ;;  %v11335_v11 = vld [vmem:[#allocation18_spill] sm:$0xff]  ;;  %v11336_v4 = vld [vmem:[#allocation19_spill] sm:$0xff] }
 0x57b   :  { %3033 = vtanh.f32 %v9281_v37  ;;  %v11339_v34 = vld [vmem:[#allocation22_spill] sm:$0xff] }
 0x57c   :  { %3035 = vtanh.f32 %v2311_v7  ;;  %v2309_v40 = vadd.f32 %v2284_v38, %v215_v5  ;;  %v11331_v7 = vld [vmem:[#allocation11_spill] sm:$0xff]  ;;  %v11337_v5 = vld [vmem:[#allocation20_spill] sm:$0xff]  ;;  %v11338_v38 = vld [vmem:[#allocation21_spill] sm:$0xff] }
 0x57d   :  { %3037 = vtanh.f32 %v2312_v45  ;;  %v11332_v45 = vld [vmem:[#allocation15_spill] sm:$0xff] }
 0x57e   :  { %v2313_v36 = vmul.f32 0.5, %v2309_v40  ;;  %3039 = vtanh.f32 %v2310_v35  ;;  %v11340_v40 = vld [vmem:[#allocation23_spill] sm:$0xff]  ;;  %v11341_v35 = vld [vmem:[#allocation24_spill] sm:$0xff] }
 0x580   :  { %3041 = vtanh.f32 %v2313_v36  ;;  %v11342_v36 = vld [vmem:[#allocation25_spill] sm:$0xff] }
 0x581   :  { %v3034_v54 = vpop.eup %3033 }
 0x582   :  { %v2222_v44 = vmul.f32 %v3034_v54, %v2216_v53  ;;  %v3036_v48 = vpop.eup %3035  ;;  %v11329_v53 = vld [vmem:[#allocation10_spill] sm:$0xff] }
 0x583   :  { %v3038_v50 = vpop.eup %3037  ;;  %v2317_v32 = vmul.f32 0.5, %v3036_v48  ;;  %v11330_v54 = vld [vmem:[#allocation14_spill] sm:$0xff] }
 0x584   :  { %2345 = vmatmul.f32.vlgmr.msra.gmra.mxu0 %v2222_v44  ;;  %2365 = vmatmul.f32.vlgmr.msra.gmra.mxu1 %v2222_v44  ;;  %v11343_v48 = vld [vmem:[#allocation26_spill] sm:$0xff] }
 0x585   :  { %2385 = vmatmul.f32.vlgmr.msrb.gmra.mxu2 %v2222_v44  ;;  %2405 = vmatmul.f32.vlgmr.msra.gmra.mxu3 %v2222_v44  ;;  %v11333_v44 = vld [vmem:[#allocation16_spill] sm:$0xff] }
 0x586   :  { %2515 = vmatpush.msra.mxu0 %v8117_v56  ;;  %2535 = vmatpush.msra.mxu1 %v8123_v41  ;;  %v2318_v56 = vmul.f32 0.5, %v3038_v50  ;;  %v2320_v41 = vadd.f32 0.5, %v2317_v32  ;;  %v11344_v50 = vld [vmem:[#allocation27_spill] sm:$0xff]  ;;  %v11345_v32 = vld [vmem:[#allocation28_spill] sm:$0xff] }
 0x587   :  { %2555 = vmatpush.msrb.mxu2 %v8129_v22  ;;  %2575 = vmatpush.msra.mxu3 %v8135_v3  ;;  %v3040_v3 = vpop.eup %3039 }
 0x588   :  { %2516 = vmatpush.msra.mxu0 %v8141_v21  ;;  %2536 = vmatpush.msra.mxu1 %v8147_v33  ;;  %v2321_v22 = vadd.f32 0.5, %v2318_v56  ;;  %v2325_v33 = vmul.f32 %v3040_v3, %v2320_v41  ;;  %v11346_v56 = vld [vmem:[#allocation29_spill] sm:$0xff]  ;;  %v11347_v41 = vld [vmem:[#allocation30_spill] sm:$0xff]  ;;  %v11349_v3 = vld [vmem:[#allocation32_spill] sm:$0xff] }
 0x589   :  { %2556 = vmatpush.msrb.mxu2 %v8153_v51  ;;  %2576 = vmatpush.msra.mxu3 %v8159_v12  ;;  %v3042_v51 = vpop.eup %3041 }
 0x58a   :  { %2517 = vmatpush.msra.mxu0 %v8165_v1  ;;  %2537 = vmatpush.msra.mxu1 %v8171_v0  ;;  %v2324_v21 = vmul.f32 %v2321_v22, %v8111_v52  ;;  %v2319_v52 = vmul.f32 0.5, %v3042_v51  ;;  %v11303_v1 = vld [vmem:[#allocation180_spill] sm:$0xff]  ;;  %v11348_v22 = vld [vmem:[#allocation31_spill] sm:$0xff] }
 0x58b   :  { %2557 = vmatpush.msrb.mxu2 %v8177_v2  ;;  %2577 = vmatpush.msra.mxu3 %v8183_v63  ;;  %v11304_v2 = vld [vmem:[#allocation181_spill] sm:$0xff]  ;;  %v11305_v63 = vld [vmem:[#allocation182_spill] sm:$0xff]  ;;  %v11352_v51 = vld [vmem:[#allocation35_spill] sm:$0xff] }
 0x58c   :  { %2518 = vmatpush.msra.mxu0 %v8191_v57  ;;  %2538 = vmatpush.msra.mxu1 %v8197_v39  ;;  %v9315_v12 = vadd.f32 %v2325_v33, %v2324_v21  ;;  %v2322_v0 = vadd.f32 0.5, %v2319_v52  ;;  %v11306_v39 = vld [vmem:[#allocation183_spill] sm:$0xff]  ;;  %v11350_v21 = vld [vmem:[#allocation33_spill] sm:$0xff]  ;;  %v11351_v33 = vld [vmem:[#allocation34_spill] sm:$0xff] }
 0x58d   :  { %2558 = vmatpush.msrb.mxu2 %v8203_v16  ;;  %2578 = vmatpush.msra.mxu3 %v8209_v58  ;;  %v11307_v16 = vld [vmem:[#allocation114_spill] sm:$0xff]  ;;  %v11353_v52 = vld [vmem:[#allocation36_spill] sm:$0xff] }
 0x58e   :  { %2519 = vmatpush.msra.mxu0 %v8219_v59  ;;  %2539 = vmatpush.msra.mxu1 %v8225_v49  ;;  %3043 = vtanh.f32 %v9315_v12  ;;  %v11308_v59 = vld [vmem:[#allocation100_spill] sm:$0xff]  ;;  %v11309_v49 = vld [vmem:[#allocation118_spill] sm:$0xff] }
 0x58f   :  { %2559 = vmatpush.msrb.mxu2 %v8231_v19  ;;  %2579 = vmatpush.msra.mxu3 %v8237_v28  ;;  %v11310_v19 = vld [vmem:[#allocation151_spill] sm:$0xff] }
 0x590   :  { %2520 = vmatpush.msra.mxu0 %v8243_v31  ;;  %2540 = vmatpush.msra.mxu1 %v8249_v26  ;;  %v11311_v28 = vld [vmem:[#allocation139_spill] sm:$0xff]  ;;  %v11312_v31 = vld [vmem:[#allocation120_spill] sm:$0xff]  ;;  %v11313_v26 = vld [vmem:[#allocation137_spill] sm:$0xff] }
 0x591   :  { %2560 = vmatpush.msrb.mxu2 %v8255_v27  ;;  %2580 = vmatpush.msra.mxu3 %v8261_v13  ;;  %v11314_v27 = vld [vmem:[#allocation160_spill] sm:$0xff]  ;;  %v11315_v13 = vld [vmem:[#allocation89_spill] sm:$0xff] }
 0x592   :  { %2521 = vmatpush.msra.mxu0 %v8267_v60  ;;  %2541 = vmatpush.msra.mxu1 %v8273_v25  ;;  %v11316_v60 = vld [vmem:[#allocation79_spill] sm:$0xff]  ;;  %v11317_v25 = vld [vmem:[#allocation98_spill] sm:$0xff] }
 0x593   :  { %2561 = vmatpush.msrb.mxu2 %v8279_v43  ;;  %2581 = vmatpush.msra.mxu3 %v8285_v46  ;;  %v11318_v43 = vld [vmem:[#allocation132_spill] sm:$0xff]  ;;  %v11319_v46 = vld [vmem:[#allocation3_spill] sm:$0xff] }
 0x594   :  { %2522 = vmatpush.msra.mxu0 %v8291_v24  ;;  %2542 = vmatpush.msra.mxu1 %v8297_v8  ;;  %v3044_v57 = vpop.eup %3043  ;;  %v11320_v24 = vld [vmem:[#allocation6_spill] sm:$0xff]  ;;  %v11321_v8 = vld [vmem:[#allocation12_spill] sm:$0xff] }
 0x595   :  { %2562 = vmatpush.msrb.mxu2 %v8303_v6  ;;  %2582 = vmatpush.msra.mxu3 %v8309_v9  ;;  %v2328_v58 = vmul.f32 %v3044_v57, %v2322_v0  ;;  %v11322_v6 = vld [vmem:[#allocation7_spill] sm:$0xff]  ;;  %v11323_v9 = vld [vmem:[#allocation4_spill] sm:$0xff]  ;;  %v11355_v0 = vld [vmem:[#allocation38_spill] sm:$0xff] }
 0x596   :  { %2523 = vmatpush.msra.mxu0 %v8315_v10  ;;  %2543 = vmatpush.msra.mxu1 %v8321_v18  ;;  %v11324_v10 = vld [vmem:[#allocation8_spill] sm:$0xff]  ;;  %v11325_v18 = vld [vmem:[#allocation13_spill] sm:$0xff] }
 0x597   :  { %2563 = vmatpush.msrb.mxu2 %v8327_v23  ;;  %2583 = vmatpush.msra.mxu3 %v11303_v1  ;;  %v11326_v23 = vld [vmem:[#allocation9_spill] sm:$0xff] }
 0x598   :  { %2524 = vmatpush.msra.mxu0 %v11304_v2  ;;  %2544 = vmatpush.msra.mxu1 %v11305_v63  ;;  %v11354_v1 = vld [vmem:[#allocation37_spill] sm:$0xff]  ;;  %v11356_v2 = vld [vmem:[#allocation39_spill] sm:$0xff]  ;;  %v11357_v63 = vld [vmem:[#allocation40_spill] sm:$0xff] }
 0x599   :  { %2564 = vmatpush.msrb.mxu2 %v11306_v39  ;;  %2584 = vmatpush.msra.mxu3 %v11307_v16  ;;  %v11358_v57 = vld [vmem:[#allocation41_spill] sm:$0xff]  ;;  %v11359_v39 = vld [vmem:[#allocation42_spill] sm:$0xff]  ;;  %v11360_v16 = vld [vmem:[#allocation43_spill] sm:$0xff] }
 0x59a   :  { %2525 = vmatpush.msra.mxu0 %v11308_v59  ;;  %2545 = vmatpush.msra.mxu1 %v11309_v49  ;;  %v11362_v59 = vld [vmem:[#allocation45_spill] sm:$0xff]  ;;  %v11363_v49 = vld [vmem:[#allocation46_spill] sm:$0xff] }
 0x59b   :  { %2565 = vmatpush.msrb.mxu2 %v11310_v19  ;;  %2585 = vmatpush.msra.mxu3 %v11311_v28  ;;  %v11364_v19 = vld [vmem:[#allocation47_spill] sm:$0xff]  ;;  %v11365_v28 = vld [vmem:[#allocation48_spill] sm:$0xff] }
 0x59c   :  { %2425 = vmatmul.f32.vlgmr.msrb.gmra.mxu0 %v2328_v58  ;;  %2445 = vmatmul.f32.vlgmr.msrb.gmra.mxu1 %v2328_v58 }
 0x59d   :  { %2465 = vmatmul.f32.vlgmr.msra.gmra.mxu2 %v2328_v58  ;;  %2485 = vmatmul.f32.vlgmr.msrb.gmra.mxu3 %v2328_v58 }
 0x59e   :  { %2526 = vmatpush.msra.mxu0 %v11312_v31  ;;  %2546 = vmatpush.msra.mxu1 %v11313_v26  ;;  %v11366_v31 = vld [vmem:[#allocation49_spill] sm:$0xff]  ;;  %v11367_v26 = vld [vmem:[#allocation50_spill] sm:$0xff] }
 0x59f   :  { %2566 = vmatpush.msrb.mxu2 %v11314_v27  ;;  %2586 = vmatpush.msra.mxu3 %v11315_v13  ;;  %v11368_v27 = vld [vmem:[#allocation51_spill] sm:$0xff]  ;;  %v11369_v13 = vld [vmem:[#allocation52_spill] sm:$0xff] }
 0x5a0   :  { %2527 = vmatpush.msra.mxu0 %v11316_v60  ;;  %2547 = vmatpush.msra.mxu1 %v11317_v25  ;;  %v11370_v60 = vld [vmem:[#allocation53_spill] sm:$0xff]  ;;  %v11371_v25 = vld [vmem:[#allocation54_spill] sm:$0xff] }
 0x5a1   :  { %2567 = vmatpush.msrb.mxu2 %v11318_v43  ;;  %2587 = vmatpush.msra.mxu3 %v11319_v46  ;;  %v11372_v43 = vld [vmem:[#allocation56_spill] sm:$0xff]  ;;  %v11373_v46 = vld [vmem:[#allocation57_spill] sm:$0xff] }
 0x5a2   :  { %2528 = vmatpush.msra.mxu0 %v11320_v24  ;;  %2548 = vmatpush.msra.mxu1 %v11321_v8  ;;  %v11374_v24 = vld [vmem:[#allocation58_spill] sm:$0xff]  ;;  %v11375_v8 = vld [vmem:[#allocation60_spill] sm:$0xff] }
 0x5a3   :  { %2568 = vmatpush.msrb.mxu2 %v11322_v6  ;;  %2588 = vmatpush.msra.mxu3 %v11323_v9  ;;  %v11376_v6 = vld [vmem:[#allocation61_spill] sm:$0xff]  ;;  %v11377_v9 = vld [vmem:[#allocation62_spill] sm:$0xff] }
 0x5a4   :  { %2529 = vmatpush.msra.mxu0 %v11324_v10  ;;  %2549 = vmatpush.msra.mxu1 %v11325_v18  ;;  %v11378_v10 = vld [vmem:[#allocation63_spill] sm:$0xff]  ;;  %v11379_v18 = vld [vmem:[#allocation65_spill] sm:$0xff] }
 0x5a5   :  { %2569 = vmatpush.msrb.mxu2 %v11326_v23  ;;  %2589 = vmatpush.msra.mxu3 %v11327_v14  ;;  %v11380_v23 = vld [vmem:[#allocation66_spill] sm:$0xff]  ;;  %v11381_v14 = vld [vmem:[#allocation67_spill] sm:$0xff] }
 0x5a6   :  { %2530 = vmatpush.msra.mxu0 %v11328_v47  ;;  %2550 = vmatpush.msra.mxu1 %v11329_v53  ;;  %v11382_v47 = vld [vmem:[#allocation68_spill] sm:$0xff]  ;;  %v11383_v53 = vld [vmem:[#allocation69_spill] sm:$0xff] }
 0x5a7   :  { %2570 = vmatpush.msrb.mxu2 %v11330_v54  ;;  %2590 = vmatpush.msra.mxu3 %v11331_v7  ;;  %v11384_v54 = vld [vmem:[#allocation70_spill] sm:$0xff]  ;;  %v11385_v7 = vld [vmem:[#allocation71_spill] sm:$0xff] }
 0x5a8   :  { %2531 = vmatmul.f32.vlgmr.msra.gmra.mxu0 %v2328_v58  ;;  %2551 = vmatmul.f32.vlgmr.msra.gmra.mxu1 %v2328_v58 }
 0x5a9   :  { %2571 = vmatmul.f32.vlgmr.msrb.gmra.mxu2 %v2328_v58  ;;  %2591 = vmatmul.f32.vlgmr.msra.gmra.mxu3 %v2328_v58  ;;  %v11361_v58 = vld [vmem:[#allocation44_spill] sm:$0xff] }
 0x5aa   :  { %2617 = vmatpush.msrb.mxu0 %v11332_v45  ;;  %2637 = vmatpush.msrb.mxu1 %v11333_v44  ;;  %v11386_v45 = vld [vmem:[#allocation72_spill] sm:$0xff]  ;;  %v11387_v44 = vld [vmem:[#allocation73_spill] sm:$0xff] }
 0x5ab   :  { %2657 = vmatpush.msra.mxu2 %v11334_v29  ;;  %2677 = vmatpush.msrb.mxu3 %v11335_v11  ;;  %v11388_v29 = vld [vmem:[#allocation76_spill] sm:$0xff]  ;;  %v11389_v11 = vld [vmem:[#allocation77_spill] sm:$0xff] }
 0x5ac   :  { %2618 = vmatpush.msrb.mxu0 %v11336_v4  ;;  %2638 = vmatpush.msrb.mxu1 %v11337_v5  ;;  %v11390_v4 = vld [vmem:[#allocation78_spill] sm:$0xff]  ;;  %v11391_v5 = vld [vmem:[#allocation80_spill] sm:$0xff] }
 0x5ad   :  { %2658 = vmatpush.msra.mxu2 %v11338_v38  ;;  %2678 = vmatpush.msrb.mxu3 %v11339_v34  ;;  %v11392_v38 = vld [vmem:[#allocation81_spill] sm:$0xff]  ;;  %v11393_v34 = vld [vmem:[#allocation82_spill] sm:$0xff] }
 0x5ae   :  { %2619 = vmatpush.msrb.mxu0 %v11340_v40  ;;  %2639 = vmatpush.msrb.mxu1 %v11341_v35  ;;  %v11394_v40 = vld [vmem:[#allocation83_spill] sm:$0xff]  ;;  %v11395_v35 = vld [vmem:[#allocation84_spill] sm:$0xff] }
 0x5af   :  { %2659 = vmatpush.msra.mxu2 %v11342_v36  ;;  %2679 = vmatpush.msrb.mxu3 %v11343_v48  ;;  %v11396_v36 = vld [vmem:[#allocation85_spill] sm:$0xff]  ;;  %v11397_v48 = vld [vmem:[#allocation86_spill] sm:$0xff] }
 0x5b0   :  { %2620 = vmatpush.msrb.mxu0 %v11344_v50  ;;  %2640 = vmatpush.msrb.mxu1 %v11345_v32  ;;  %v11398_v50 = vld [vmem:[#allocation87_spill] sm:$0xff]  ;;  %v11399_v32 = vld [vmem:[#allocation88_spill] sm:$0xff] }
 0x5b1   :  { %2660 = vmatpush.msra.mxu2 %v11346_v56  ;;  %2680 = vmatpush.msrb.mxu3 %v11347_v41  ;;  %v11400_v56 = vld [vmem:[#allocation90_spill] sm:$0xff]  ;;  %v11401_v41 = vld [vmem:[#allocation91_spill] sm:$0xff] }
 0x5b2   :  { %2621 = vmatpush.msrb.mxu0 %v11348_v22  ;;  %2641 = vmatpush.msrb.mxu1 %v11349_v3  ;;  %v11402_v22 = vld [vmem:[#allocation92_spill] sm:$0xff]  ;;  %v11403_v3 = vld [vmem:[#allocation94_spill] sm:$0xff] }
 0x5b3   :  { %2661 = vmatpush.msra.mxu2 %v11350_v21  ;;  %2681 = vmatpush.msrb.mxu3 %v11351_v33  ;;  %v11404_v21 = vld [vmem:[#allocation95_spill] sm:$0xff]  ;;  %v11405_v33 = vld [vmem:[#allocation96_spill] sm:$0xff] }
 0x5b4   :  { %2622 = vmatpush.msrb.mxu0 %v11352_v51  ;;  %2642 = vmatpush.msrb.mxu1 %v11353_v52  ;;  %v11406_v51 = vld [vmem:[#allocation97_spill] sm:$0xff]  ;;  %v11407_v52 = vld [vmem:[#allocation99_spill] sm:$0xff] }
 0x5b5   :  { %2662 = vmatpush.msra.mxu2 %v11354_v1  ;;  %2682 = vmatpush.msrb.mxu3 %v11355_v0  ;;  %v11408_v1 = vld [vmem:[#allocation101_spill] sm:$0xff]  ;;  %v11409_v0 = vld [vmem:[#allocation102_spill] sm:$0xff] }
 0x5b6   :  { %2623 = vmatpush.msrb.mxu0 %v11356_v2  ;;  %2643 = vmatpush.msrb.mxu1 %v11357_v63  ;;  %v11410_v2 = vld [vmem:[#allocation103_spill] sm:$0xff]  ;;  %v11411_v63 = vld [vmem:[#allocation104_spill] sm:$0xff] }
 0x5b7   :  { %2663 = vmatpush.msra.mxu2 %v11358_v57  ;;  %2683 = vmatpush.msrb.mxu3 %v11359_v39  ;;  %v11412_v57 = vld [vmem:[#allocation105_spill] sm:$0xff]  ;;  %v11413_v39 = vld [vmem:[#allocation106_spill] sm:$0xff] }
 0x5b8   :  { %2624 = vmatpush.msrb.mxu0 %v11360_v16  ;;  %2644 = vmatpush.msrb.mxu1 %v11361_v58  ;;  %v11414_v16 = vld [vmem:[#allocation107_spill] sm:$0xff]  ;;  %v11415_v58 = vld [vmem:[#allocation108_spill] sm:$0xff] }
 0x5b9   :  { %2664 = vmatpush.msra.mxu2 %v11362_v59  ;;  %2684 = vmatpush.msrb.mxu3 %v11363_v49  ;;  %v11416_v59 = vld [vmem:[#allocation109_spill] sm:$0xff]  ;;  %v11417_v49 = vld [vmem:[#allocation110_spill] sm:$0xff] }
 0x5ba   :  { %2625 = vmatpush.msrb.mxu0 %v11364_v19  ;;  %2645 = vmatpush.msrb.mxu1 %v11365_v28  ;;  %v11418_v19 = vld [vmem:[#allocation111_spill] sm:$0xff]  ;;  %v11419_v28 = vld [vmem:[#allocation113_spill] sm:$0xff] }
 0x5bb   :  { %2665 = vmatpush.msra.mxu2 %v11366_v31  ;;  %2685 = vmatpush.msrb.mxu3 %v11367_v26  ;;  %v11420_v31 = vld [vmem:[#allocation115_spill] sm:$0xff]  ;;  %v11421_v26 = vld [vmem:[#allocation116_spill] sm:$0xff] }
 0x5bc   :  { %2626 = vmatpush.msrb.mxu0 %v11368_v27  ;;  %2646 = vmatpush.msrb.mxu1 %v11369_v13  ;;  %v11422_v27 = vld [vmem:[#allocation117_spill] sm:$0xff]  ;;  %v11423_v13 = vld [vmem:[#allocation119_spill] sm:$0xff] }
 0x5bd   :  { %2666 = vmatpush.msra.mxu2 %v11370_v60  ;;  %2686 = vmatpush.msrb.mxu3 %v11371_v25  ;;  %v11424_v60 = vld [vmem:[#allocation121_spill] sm:$0xff]  ;;  %v11425_v25 = vld [vmem:[#allocation122_spill] sm:$0xff] }
 0x5be   :  { %2627 = vmatpush.msrb.mxu0 %v11372_v43  ;;  %2647 = vmatpush.msrb.mxu1 %v11373_v46  ;;  %v11426_v43 = vld [vmem:[#allocation123_spill] sm:$0xff]  ;;  %v11427_v46 = vld [vmem:[#allocation124_spill] sm:$0xff] }
 0x5bf   :  { %2667 = vmatpush.msra.mxu2 %v11374_v24  ;;  %2687 = vmatpush.msrb.mxu3 %v11375_v8  ;;  %v11428_v24 = vld [vmem:[#allocation125_spill] sm:$0xff]  ;;  %v11429_v8 = vld [vmem:[#allocation126_spill] sm:$0xff] }
 0x5c0   :  { %2628 = vmatpush.msrb.mxu0 %v11376_v6  ;;  %2648 = vmatpush.msrb.mxu1 %v11377_v9  ;;  %v11430_v6 = vld [vmem:[#allocation127_spill] sm:$0xff]  ;;  %v11431_v9 = vld [vmem:[#allocation128_spill] sm:$0xff] }
 0x5c1   :  { %2668 = vmatpush.msra.mxu2 %v11378_v10  ;;  %2688 = vmatpush.msrb.mxu3 %v11379_v18  ;;  %v11432_v10 = vld [vmem:[#allocation129_spill] sm:$0xff]  ;;  %v11433_v18 = vld [vmem:[#allocation130_spill] sm:$0xff] }
 0x5c2   :  { %2629 = vmatpush.msrb.mxu0 %v11380_v23  ;;  %2649 = vmatpush.msrb.mxu1 %v11381_v14  ;;  %v11434_v23 = vld [vmem:[#allocation131_spill] sm:$0xff]  ;;  %v11435_v14 = vld [vmem:[#allocation133_spill] sm:$0xff] }
 0x5c3   :  { %2669 = vmatpush.msra.mxu2 %v11382_v47  ;;  %2689 = vmatpush.msrb.mxu3 %v11383_v53  ;;  %v11436_v47 = vld [vmem:[#allocation134_spill] sm:$0xff]  ;;  %v11437_v53 = vld [vmem:[#allocation135_spill] sm:$0xff] }
 0x5c4   :  { %2630 = vmatpush.msrb.mxu0 %v11384_v54  ;;  %2650 = vmatpush.msrb.mxu1 %v11385_v7  ;;  %v11438_v54 = vld [vmem:[#allocation136_spill] sm:$0xff]  ;;  %v11439_v7 = vld [vmem:[#allocation138_spill] sm:$0xff] }
 0x5c5   :  { %2670 = vmatpush.msra.mxu2 %v11386_v45  ;;  %2690 = vmatpush.msrb.mxu3 %v11387_v44  ;;  %v11440_v45 = vld [vmem:[#allocation141_spill] sm:$0xff]  ;;  %v11441_v44 = vld [vmem:[#allocation142_spill] sm:$0xff] }
 0x5c6   :  { %2631 = vmatpush.msrb.mxu0 %v11388_v29  ;;  %2651 = vmatpush.msrb.mxu1 %v11389_v11  ;;  %v11442_v29 = vld [vmem:[#allocation143_spill] sm:$0xff]  ;;  %v11443_v11 = vld [vmem:[#allocation144_spill] sm:$0xff] }
 0x5c7   :  { %2671 = vmatpush.msra.mxu2 %v11390_v4  ;;  %2691 = vmatpush.msrb.mxu3 %v11391_v5  ;;  %v11444_v4 = vld [vmem:[#allocation145_spill] sm:$0xff]  ;;  %v11445_v5 = vld [vmem:[#allocation146_spill] sm:$0xff] }
 0x5c8   :  { %2632 = vmatpush.msrb.mxu0 %v11392_v38  ;;  %2652 = vmatpush.msrb.mxu1 %v11393_v34  ;;  %v11446_v38 = vld [vmem:[#allocation147_spill] sm:$0xff]  ;;  %v11447_v34 = vld [vmem:[#allocation148_spill] sm:$0xff] }
 0x5c9   :  { %2672 = vmatpush.msra.mxu2 %v11394_v40  ;;  %2692 = vmatpush.msrb.mxu3 %v11395_v35  ;;  %v11448_v40 = vld [vmem:[#allocation149_spill] sm:$0xff]  ;;  %v11449_v35 = vld [vmem:[#allocation150_spill] sm:$0xff] }
 0x5ca   :  { %2697 = vmatpush.msra.mxu0 %v11396_v36  ;;  %2717 = vmatpush.msra.mxu1 %v11397_v48  ;;  %v11450_v36 = vld [vmem:[#allocation152_spill] sm:$0xff]  ;;  %v11451_v48 = vld [vmem:[#allocation153_spill] sm:$0xff] }
 0x5cb   :  { %2737 = vmatpush.msrb.mxu2 %v11398_v50  ;;  %2757 = vmatpush.msra.mxu3 %v11399_v32  ;;  %v11452_v50 = vld [vmem:[#allocation154_spill] sm:$0xff]  ;;  %v11453_v32 = vld [vmem:[#allocation156_spill] sm:$0xff] }
 0x5cc   :  { %2698 = vmatpush.msra.mxu0 %v11400_v56  ;;  %2718 = vmatpush.msra.mxu1 %v11401_v41  ;;  %v11454_v56 = vld [vmem:[#allocation158_spill] sm:$0xff]  ;;  %v11455_v41 = vld [vmem:[#allocation64_spill] sm:$0xff] }
 0x5cd   :  { %2738 = vmatpush.msrb.mxu2 %v11402_v22  ;;  %2758 = vmatpush.msra.mxu3 %v11403_v3  ;;  %v11456_v22 = vld [vmem:[#allocation59_spill] sm:$0xff] }
 0x5ce   :  { %2699 = vmatpush.msra.mxu0 %v11404_v21  ;;  %2719 = vmatpush.msra.mxu1 %v11405_v33  ;;  %v11457_v3 = vld [vmem:[#allocation75_spill] sm:$0xff]  ;;  %v11458_v21 = vld [vmem:[#allocation112_spill] sm:$0xff] }
 0x5cf   :  { %2739 = vmatpush.msrb.mxu2 %v11406_v51  ;;  %2759 = vmatpush.msra.mxu3 %v11407_v52  ;;  %v11459_v33 = vld [vmem:[#allocation167_spill] sm:$0xff] }
 0x5d0   :  { %2700 = vmatpush.msra.mxu0 %v11408_v1  ;;  %2720 = vmatpush.msra.mxu1 %v11409_v0 }
 0x5d1   :  { %2740 = vmatpush.msrb.mxu2 %v11410_v2  ;;  %2760 = vmatpush.msra.mxu3 %v11411_v63 }
 0x5d2   :  { %2701 = vmatpush.msra.mxu0 %v11412_v57  ;;  %2721 = vmatpush.msra.mxu1 %v11413_v39 }
 0x5d3   :  { %2741 = vmatpush.msrb.mxu2 %v11414_v16  ;;  %2761 = vmatpush.msra.mxu3 %v11415_v58 }
 0x5d4   :  { %2702 = vmatpush.msra.mxu0 %v11416_v59  ;;  %2722 = vmatpush.msra.mxu1 %v11417_v49 }
 0x5d5   :  { %2742 = vmatpush.msrb.mxu2 %v11418_v19  ;;  %2762 = vmatpush.msra.mxu3 %v11419_v28 }
 0x5d6   :  { %2703 = vmatpush.msra.mxu0 %v11420_v31  ;;  %2723 = vmatpush.msra.mxu1 %v11421_v26 }
 0x5d7   :  { %2743 = vmatpush.msrb.mxu2 %v11422_v27  ;;  %2763 = vmatpush.msra.mxu3 %v11423_v13 }
 0x5d8   :  { %2704 = vmatpush.msra.mxu0 %v11424_v60  ;;  %2724 = vmatpush.msra.mxu1 %v11425_v25  ;;  %v11460_v60 = vld [vmem:[#allocation74_spill] sm:$0xff] }
 0x5d9   :  { %2744 = vmatpush.msrb.mxu2 %v11426_v43  ;;  %2764 = vmatpush.msra.mxu3 %v11427_v46  ;;  %v136_v25 = vadd.f32 %v11460_v60, %v5084_v15  ;;  %v11461_v43 = vld [vmem:[#allocation162_spill] sm:$0xff]  ;;  %v2804_v60 = vld [vmem:[%s9581_s7 + $0x28] sm:$0xff] }
 0x5da   :  { %2705 = vmatpush.msra.mxu0 %v11428_v24  ;;  %2725 = vmatpush.msra.mxu1 %v11429_v8  ;;  %v177_v46 = vadd.f32 %v11461_v43, %v5087_v17 }
 0x5db   :  { %2745 = vmatpush.msrb.mxu2 %v11430_v6  ;;  %2765 = vmatpush.msra.mxu3 %v11431_v9 }
 0x5dc   :  { %2706 = vmatpush.msra.mxu0 %v11432_v10  ;;  %2726 = vmatpush.msra.mxu1 %v11433_v18 }
 0x5dd   :  { %2746 = vmatpush.msrb.mxu2 %v11434_v23  ;;  %2766 = vmatpush.msra.mxu3 %v11435_v14 }
 0x5de   :  { %2707 = vmatpush.msra.mxu0 %v11436_v47  ;;  %2727 = vmatpush.msra.mxu1 %v11437_v53 }
 0x5df   :  { %2747 = vmatpush.msrb.mxu2 %v11438_v54  ;;  %2767 = vmatpush.msra.mxu3 %v11439_v7 }
 0x5e0   :  { %2708 = vmatpush.msra.mxu0 %v11440_v45  ;;  %2728 = vmatpush.msra.mxu1 %v11441_v44  ;;  %v11462_v44 = vld [vmem:[#allocation164_spill] sm:$0xff] }
 0x5e1   :  { %2748 = vmatpush.msrb.mxu2 %v11442_v29  ;;  %2768 = vmatpush.msra.mxu3 %v11443_v11  ;;  %v259_v17 = vadd.f32 %v11462_v44, %v5114_v30  ;;  %v11463_v29 = vld [vmem:[#allocation166_spill] sm:$0xff] }
 0x5e2   :  { %2709 = vmatpush.msra.mxu0 %v11444_v4  ;;  %2729 = vmatpush.msra.mxu1 %v11445_v5  ;;  %v218_v11 = vadd.f32 %v11463_v29, %v5149_v42 }
 0x5e3   :  { %2749 = vmatpush.msrb.mxu2 %v11446_v38  ;;  %2769 = vmatpush.msra.mxu3 %v11447_v34 }
 0x5e4   :  { %2710 = vmatpush.msra.mxu0 %v11448_v40  ;;  %2730 = vmatpush.msra.mxu1 %v11449_v35 }
 0x5e5   :  { %2750 = vmatpush.msrb.mxu2 %v11450_v36  ;;  %2770 = vmatpush.msra.mxu3 %v11451_v48 }
 0x5e6   :  { %2711 = vmatpush.msra.mxu0 %v11452_v50  ;;  %2731 = vmatpush.msra.mxu1 %v11453_v32 }
 0x5e7   :  { %2751 = vmatpush.msrb.mxu2 %v11454_v56  ;;  %2771 = vmatpush.msra.mxu3 %v11455_v41 }
 0x5e8   :  { %2712 = vmatpush.msra.mxu0 %v11456_v22  ;;  %2732 = vmatpush.msra.mxu1 %v11457_v3 }
 0x5e9   :  { %2752 = vmatpush.msrb.mxu2 %v11458_v21  ;;  %2772 = vmatpush.msra.mxu3 %v11459_v33 }
 0x601   :  { %v2346_v51 = vpop.f32.mrf.mxu0  ;;  %v2366_v52 = vpop.f32.mrf.mxu1 }
 0x608   :  { %v2386_v1 = vpop.f32.mrf.mxu2  ;;  %v2406_v0 = vpop.f32.mrf.mxu3 }
 0x619   :  { %v2426_v2 = vpop.f32.mrf.mxu0  ;;  %v2446_v63 = vpop.f32.mrf.mxu1 }
 0x61a   :  { %v2427_v57 = vadd.f32 %v2426_v2, %v2346_v51  ;;  %v2447_v39 = vadd.f32 %v2446_v63, %v2366_v52 }
 0x61c   :  { %v2489_v16 = vadd.f32 %v2427_v57, %v5299_v55  ;;  %v2490_v58 = vadd.f32 %v2447_v39, %v5301_v20 }
 0x61e   :  { %v2493_v59 = vmul.f32 0.5, %v2489_v16  ;;  %v2494_v49 = vmul.f32 0.5, %v2490_v58  ;;  %v2813_v58 = vld [vmem:[%s9581_s7 + $0x70] sm:$0xff] }
 0x620   :  { %3045 = vtanh.f32 %v2493_v59  ;;  %v2466_v19 = vpop.f32.mrf.mxu2  ;;  %v2486_v28 = vpop.f32.mrf.mxu3  ;;  %v2812_v59 = vld [vmem:[%s9581_s7 + $0x68] sm:$0xff] }
 0x621   :  { %3047 = vtanh.f32 %v2494_v49  ;;  %v2467_v31 = vadd.f32 %v2466_v19, %v2386_v1  ;;  %v2487_v26 = vadd.f32 %v2486_v28, %v2406_v0  ;;  %v2811_v49 = vld [vmem:[%s9581_s7 + $0x60] sm:$0xff]  ;;  %v2810_v19 = vld [vmem:[%s9581_s7 + $0x58] sm:$0xff]  ;;  %v2809_v28 = vld [vmem:[%s9581_s7 + $0x50] sm:$0xff] }
 0x623   :  { %v2491_v27 = vadd.f32 %v2467_v31, %v5305_v61  ;;  %v2492_v13 = vadd.f32 %v2487_v26, %v5307_v62  ;;  %v2808_v31 = vld [vmem:[%s9581_s7 + $0x48] sm:$0xff]  ;;  %v2807_v26 = vld [vmem:[%s9581_s7 + $0x40] sm:$0xff] }
 0x625   :  { %v2495_v24 = vmul.f32 0.5, %v2491_v27  ;;  %3049 = vtanh.f32 %v2492_v13  ;;  %v2532_v8 = vpop.f32.mrf.mxu0  ;;  %v2552_v6 = vpop.f32.mrf.mxu1  ;;  %v2806_v27 = vld [vmem:[%s9581_s7 + $0x38] sm:$0xff]  ;;  %v2805_v13 = vld [vmem:[%s9581_s7 + $0x30] sm:$0xff] }
 0x626   :  { %v3046_v9 = vpop.eup %3045  ;;  %v2595_v10 = vadd.f32 %v2532_v8, %v136_v25  ;;  %v2596_v18 = vadd.f32 %v2552_v6, %v177_v46  ;;  %v2803_v46 = vld [vmem:[%s9581_s7 + $0x20] sm:$0xff]  ;;  %v2801_v8 = vld [vmem:[%s9581_s7 + $0x10] sm:$0xff]  ;;  %v2800_v6 = vld [vmem:[%s9581_s7 + $0x8] sm:$0xff] }
 0x627   :  { %v3048_v23 = vpop.eup %3047  ;;  %v2499_v14 = vmul.f32 0.5, %v3046_v9  ;;  %3051 = vtanh.f32 %v2495_v24  ;;  %v2802_v24 = vld [vmem:[%s9581_s7 + $0x18] sm:$0xff]  ;;  %v2799_v9 = vld [vmem:[%s9581_s7] sm:$0xff] }
 0x628   :  { %v2500_v47 = vmul.f32 0.5, %v3048_v23  ;;  %v2599_v53 = vmul.f32 0.5, %v2595_v10  ;;  %v2600_v54 = vmul.f32 0.5, %v2596_v18 }
 0x629   :  { %v2502_v7 = vadd.f32 0.5, %v2499_v14 }
 0x62a   :  { %v2503_v45 = vadd.f32 0.5, %v2500_v47  ;;  %3053 = vtanh.f32 %v2599_v53  ;;  %v2840_v47 = vld [vmem:[%s9582_s9 + $0x8] sm:$0xff]  ;;  %v2839_v53 = vld [vmem:[%s9582_s9] sm:$0xff] }
 0x62b   :  { %v3050_v15 = vpop.eup %3049  ;;  %3055 = vtanh.f32 %v2600_v54 }
 0x62c   :  { %v2506_v4 = vmul.f32 %v2503_v45, %v9281_v37  ;;  %v2507_v5 = vmul.f32 %v3050_v15, %v2502_v7  ;;  %v2572_v38 = vpop.f32.mrf.mxu2  ;;  %v2592_v34 = vpop.f32.mrf.mxu3 }
 0x62d   :  { %v2597_v40 = vadd.f32 %v2572_v38, %v218_v11  ;;  %v2598_v35 = vadd.f32 %v2592_v34, %v259_v17  ;;  %v3052_v36 = vpop.eup %3051 }
 0x62e   :  { %v9501_v48 = vadd.f32 %v2507_v5, %v2506_v4  ;;  %v2501_v56 = vmul.f32 0.5, %v3052_v36 }
 0x62f   :  { %v2601_v50 = vmul.f32 0.5, %v2597_v40  ;;  %3057 = vtanh.f32 %v2598_v35 }
 0x630   :  { %v3054_v32 = vpop.eup %3053  ;;  %3059 = vtanh.f32 %v9501_v48  ;;  %v2504_v21 = vadd.f32 0.5, %v2501_v56 }
 0x631   :  { %v3056_v30 = vpop.eup %3055  ;;  %v2605_v41 = vmul.f32 0.5, %v3054_v32  ;;  %3061 = vtanh.f32 %v2601_v50 }
 0x632   :  { %v2606_v42 = vmul.f32 0.5, %v3056_v30 }
 0x633   :  { %v2608_v22 = vadd.f32 0.5, %v2605_v41 }
 0x634   :  { %v2609_v37 = vadd.f32 0.5, %v2606_v42 }
 0x635   :  { %v3058_v3 = vpop.eup %3057 }
 0x636   :  { %v3060_v33 = vpop.eup %3059  ;;  %v2612_v51 = vmul.f32 %v2609_v37, %v9315_v12  ;;  %v2613_v52 = vmul.f32 %v3058_v3, %v2608_v22  ;;  %v2814_v12 = vld [vmem:[%s9581_s7 + $0x78] sm:$0xff] }
 0x637   :  { %v2510_v1 = vmul.f32 %v3060_v33, %v2504_v21  ;;  %v3062_v0 = vpop.eup %3061  ;;  %v2913_v21 = vld [vmem:[%s9580_s8] ss:$0 sm:$0xff] }
 0x638   :  { %v2614_v2 = vadd.f32 %v2613_v52, %v2612_v51  ;;  %v2607_v63 = vmul.f32 0.5, %v3062_v0 }
 0x639   :  { %2633 = vmatmul.f32.vlgmr.msrb.gmra.mxu0 %v2510_v1  ;;  %2653 = vmatmul.f32.vlgmr.msrb.gmra.mxu1 %v2510_v1 }
 0x63a   :  { %3063 = vtanh.f32 %v2614_v2  ;;  %2673 = vmatmul.f32.vlgmr.msra.gmra.mxu2 %v2510_v1  ;;  %2693 = vmatmul.f32.vlgmr.msrb.gmra.mxu3 %v2510_v1  ;;  %v2610_v57 = vadd.f32 0.5, %v2607_v63 }
 0x63b   :  { %2819 = vmatpush.msrb.mxu0 %v2814_v12  ;;  %2863 = vmatpush.msrb.mxu1 %v2840_v47 }
 0x63d   :  { %2820 = vmatpush.msrb.mxu0 %v2813_v58  ;;  %2864 = vmatpush.msrb.mxu1 %v2839_v53 }
 0x63f   :  { %2821 = vmatpush.msrb.mxu0 %v2812_v59 }
 0x640   :  { %v3064_v39 = vpop.eup %3063 }
 0x641   :  { %v2616_v16 = vmul.f32 %v3064_v39, %v2610_v57  ;;  %2822 = vmatpush.msrb.mxu0 %v2811_v49 }
 0x643   :  { %2713 = vmatmul.f32.vlgmr.msra.gmra.mxu0 %v2616_v16  ;;  %2733 = vmatmul.f32.vlgmr.msra.gmra.mxu1 %v2616_v16 }
 0x644   :  { %2753 = vmatmul.f32.vlgmr.msrb.gmra.mxu2 %v2616_v16  ;;  %2773 = vmatmul.f32.vlgmr.msra.gmra.mxu3 %v2616_v16 }
 0x645   :  { %2823 = vmatpush.msrb.mxu0 %v2810_v19 }
 0x647   :  { %2824 = vmatpush.msrb.mxu0 %v2809_v28 }
 0x649   :  { %2825 = vmatpush.msrb.mxu0 %v2808_v31 }
 0x64b   :  { %2826 = vmatpush.msrb.mxu0 %v2807_v26 }
 0x64d   :  { %2827 = vmatpush.msrb.mxu0 %v2806_v27 }
 0x64f   :  { %2828 = vmatpush.msrb.mxu0 %v2805_v13 }
 0x651   :  { %2829 = vmatpush.msrb.mxu0 %v2804_v60 }
 0x653   :  { %2830 = vmatpush.msrb.mxu0 %v2803_v46 }
 0x655   :  { %2831 = vmatpush.msrb.mxu0 %v2802_v24 }
 0x657   :  { %2832 = vmatpush.msrb.mxu0 %v2801_v8 }
 0x659   :  { %2833 = vmatpush.msrb.mxu0 %v2800_v6 }
 0x65b   :  { %2834 = vmatpush.msrb.mxu0 %v2799_v9 }
 0x6b6   :  { %v2634_v25 = vpop.f32.mrf.mxu0  ;;  %v2654_v43 = vpop.f32.mrf.mxu1 }
 0x6bd   :  { %v2674_v10 = vpop.f32.mrf.mxu2  ;;  %v2694_v18 = vpop.f32.mrf.mxu3 }
 0x6c0   :  { %v2714_v23 = vpop.f32.mrf.mxu0  ;;  %v2734_v14 = vpop.f32.mrf.mxu1 }
 0x6c1   :  { %v2715_v54 = vadd.f32 %v2714_v23, %v2634_v25  ;;  %v2735_v7 = vadd.f32 %v2734_v14, %v2654_v43 }
 0x6c3   :  { %v2777_v45 = vadd.f32 %v2715_v54, %v5299_v55  ;;  %v2778_v15 = vadd.f32 %v2735_v7, %v5301_v20 }
 0x6c5   :  { %v2781_v44 = vmul.f32 0.5, %v2777_v45  ;;  %v2782_v17 = vmul.f32 0.5, %v2778_v15 }
 0x6c7   :  { %3065 = vtanh.f32 %v2781_v44  ;;  %v2754_v29 = vpop.f32.mrf.mxu2  ;;  %v2774_v11 = vpop.f32.mrf.mxu3 }
 0x6c8   :  { %3067 = vtanh.f32 %v2782_v17  ;;  %v2755_v4 = vadd.f32 %v2754_v29, %v2674_v10  ;;  %v2775_v5 = vadd.f32 %v2774_v11, %v2694_v18 }
 0x6ca   :  { %v2779_v38 = vadd.f32 %v2755_v4, %v5305_v61  ;;  %v2780_v34 = vadd.f32 %v2775_v5, %v5307_v62 }
 0x6cc   :  { %v2783_v40 = vmul.f32 0.5, %v2779_v38  ;;  %3069 = vtanh.f32 %v2780_v34 }
 0x6cd   :  { %v3066_v35 = vpop.eup %3065 }
 0x6ce   :  { %v3068_v36 = vpop.eup %3067  ;;  %v2787_v55 = vmul.f32 0.5, %v3066_v35  ;;  %3071 = vtanh.f32 %v2783_v40 }
 0x6cf   :  { %v2788_v50 = vmul.f32 0.5, %v3068_v36 }
 0x6d0   :  { %v2790_v20 = vadd.f32 0.5, %v2787_v55 }
 0x6d1   :  { %v2791_v32 = vadd.f32 0.5, %v2788_v50 }
 0x6d2   :  { %v3070_v30 = vpop.eup %3069 }
 0x6d3   :  { %v2794_v56 = vmul.f32 %v2791_v32, %v9501_v48  ;;  %v2795_v41 = vmul.f32 %v3070_v30, %v2790_v20  ;;  %v2914_v48 = vld [vmem:[%s9583_s10] ss:$0 sm:$0xff] }
 0x6d4   :  { %v3072_v42 = vpop.eup %3071 }
 0x6d5   :  { %v2796_v22 = vadd.f32 %v2795_v41, %v2794_v56  ;;  %v2789_v37 = vmul.f32 0.5, %v3072_v42 }
 0x6d7   :  { %3073 = vtanh.f32 %v2796_v22  ;;  %v2792_v61 = vadd.f32 0.5, %v2789_v37 }
 0x6dd   :  { %v3074_v3 = vpop.eup %3073 }
 0x6de   :  { %v2798_v62 = vmul.f32 %v3074_v3, %v2792_v61 }
 0x6e0   :  { %2835 = vmatmul.f32.vlgmr.msrb.gmra.mxu0 %v2798_v62 }
 0x75d   :  { %v2836_v33 = vpop.f32.mrf.mxu0 }
 0x75e   :  { %v2837_v51 = vadd.f32 %v2913_v21, %v2836_v33 }
 0x760   :  { %2907 = vmatmul.msk.f32.vlgmr.msrb.gmra.mxu1 %vm2845_vm1, %v2837_v51 }
 0x7dd   :  { %v2866_v52 = vpop.f32.mrf.mxu1 }
 0x7de   :  { %v2867_v1 = vadd.f32 %v2914_v48, %v2866_v52 }
 0x7e0   :  { %2870 = vst.msk [vmem:[%s9584_s11] sm:$0xff] %vm2869_vm2, %v2867_v1 }

</bundles_post_ra>
